<compile_context>
chip_gen: v7x
topology: tpu7x:2x2x1
jax: 0.10.0
libtpu: 0.0.40
codegen_flags: <defaults>
</compile_context>

<pallas_src>
import numpy as np
import jax
import jax.numpy as jnp
from jax.experimental import pallas as pl
from jax.experimental.pallas import tpu as pltpu  # noqa: F401  (TPU backend)

# --- model hyper-parameters (the `param` object of the torch module) ---
SEQ_LEN   = 8    # param.seq_len   (T)
N_EVENT   = 4    # param.n_event   (E)
N_STATE   = 4    # param.n_state   (N, number of graph nodes)
NODE_DIM  = 8    # param.node_dim  (F)
GRAPH_DIM = 8    # param.graph_dim (G)
FC_HIDDEN = 512  # fc1 hidden size (fixed in Evonet_TSC)


# ---------------------------------------------------------------------------
# Single fused kernel: recurrence + classifier head + attention softmax
# ---------------------------------------------------------------------------
def _evonet_tsc_kernel(
    state_col_ref, state_row_ref, event_ref, init_node_ref,
    blk_ref, avg_ref, expand_ref, place_rows_ref, place_time_ref,
    w_hin_ref, b_hin_ref, w_hout_ref, b_hout_ref,
    se_in_ref, se_out_ref, so_in_ref, so_out_ref,
    wa_f_ref, wa_g_ref,
    nWg_ref, nWf_ref, nbW_ref, nV_ref, nbV_ref,
    gWh_ref, gWe_ref, gbW_ref, gV_ref, gbV_ref,
    w1_ref, b1_ref, w2_ref, b2_ref,
    out_ref, score_ref):

    T = state_col_ref.shape[0]
    BN, Fdim = init_node_ref.shape          # B*N, node feature dim
    B = event_ref.shape[1]
    G = wa_g_ref.shape[0]

    f32 = jnp.float32
    sig = jax.nn.sigmoid

    def mm(x, w):
        return jnp.dot(x, w, preferred_element_type=f32)

    # Small shared constants/weights, hoisted once (a handful of vregs).
    blk = blk_ref[...]            # (BN, BN) block-diagonal batch mask
    avg = avg_ref[...]            # (B, BN)  per-batch mean over nodes
    expand = expand_ref[...]      # (BN, B)  per-batch row broadcast
    w_hin, b_hin = w_hin_ref[...], b_hin_ref[...]
    w_hout, b_hout = w_hout_ref[...], b_hout_ref[...]
    se_in, se_out = se_in_ref[...], se_out_ref[...]
    so_in, so_out = so_in_ref[...], so_out_ref[...]
    wa_f, wa_g = wa_f_ref[...], wa_g_ref[...]

    # Recurrent carries (torch: emb = LSTM "memory" output, mem = "hidden").
    node_emb = init_node_ref[...]             # (BN, F)
    node_mem = init_node_ref[...]             # (BN, F)
    graph_emb = jnp.zeros((B, G), f32)
    graph_mem = jnp.zeros((B, G), f32)

    # Batch-major accumulators, written to HBM once at the end.
    patterns = jnp.zeros((B * (T - 1), G), f32)   # row b*(T-1)+t = graph emb
    attn = jnp.zeros((B, T - 1), f32)             # attention logits

    for t in range(T - 1):                        # statically unrolled
        send_col = state_col_ref[t]               # (BN, 1)
        send_row = state_row_ref[t]               # (1, BN)
        recv_col = state_col_ref[t + 1]
        recv_row = state_row_ref[t + 1]
        event = event_ref[t + 1]                  # (B, E)

        # -------- MessagePassing (block-diagonal over flattened batch*node) --------
        Min = send_col * recv_row * blk           # (BN, BN)
        Mout = recv_col * send_row * blk
        Hin = jnp.tanh(mm(mm(Min, node_emb), w_hin) + b_hin)     # (BN, F)
        Hout = jnp.tanh(mm(mm(Mout, node_emb), w_hout) + b_hout)
        # interleave-max == cat([Hin, Hout], -1).reshape(.., F, 2).max(-1)
        H = jnp.maximum(mm(Hin, se_in) + mm(Hout, se_out),
                        mm(Hin, so_in) + mm(Hout, so_out))       # (BN, F)

        # -------- TemporalModeling --------
        mean_H = mm(avg, H)                                      # (B, F)
        cur_a = mm(mean_H, wa_f) + mm(graph_emb, wa_g)           # (B, 1)
        g3 = mm(expand, cur_a * graph_emb)                       # (BN, G)

        # node LSTM: input = [g3 | H], hidden = node_emb, memory = node_mem
        in_i = mm(g3, nWg_ref[0]) + mm(H, nWf_ref[0]) + nbW_ref[0]
        in_f = mm(g3, nWg_ref[1]) + mm(H, nWf_ref[1]) + nbW_ref[1]
        in_o = mm(g3, nWg_ref[2]) + mm(H, nWf_ref[2]) + nbW_ref[2]
        I_n = sig(in_i + mm(node_emb, nV_ref[0]) + nbV_ref[0])
        F_n = sig(in_f + mm(node_emb, nV_ref[1]) + nbV_ref[1])
        O_n = sig(in_o + mm(node_emb, nV_ref[2]) + nbV_ref[2])
        # C gate reuses the Wi/Vi weights with sigmoid (as in torch Lstm_unit)
        C_n = sig(in_i + mm(F_n * node_emb, nV_ref[0]) + nbV_ref[0])
        Ct_n = F_n * node_mem + I_n * C_n
        node_emb = Ct_n                          # Lstm_unit returns (memory, hidden)
        node_mem = O_n * jnp.tanh(Ct_n)

        h_ = cur_a * mm(avg, node_emb)                            # (B, F)

        # graph LSTM: input = [h_ | event], hidden = graph_emb, memory = graph_mem
        gin_i = mm(h_, gWh_ref[0]) + mm(event, gWe_ref[0]) + gbW_ref[0]
        gin_f = mm(h_, gWh_ref[1]) + mm(event, gWe_ref[1]) + gbW_ref[1]
        gin_o = mm(h_, gWh_ref[2]) + mm(event, gWe_ref[2]) + gbW_ref[2]
        I_g = sig(gin_i + mm(graph_emb, gV_ref[0]) + gbV_ref[0])
        F_g = sig(gin_f + mm(graph_emb, gV_ref[1]) + gbV_ref[1])
        O_g = sig(gin_o + mm(graph_emb, gV_ref[2]) + gbV_ref[2])
        C_g = sig(gin_i + mm(F_g * graph_emb, gV_ref[0]) + gbV_ref[0])
        Ct_g = F_g * graph_mem + I_g * C_g
        graph_emb = Ct_g
        graph_mem = O_g * jnp.tanh(Ct_g)

        # scatter this step's outputs into the batch-major accumulators
        # (constant one-hot placement matmul / broadcast -- no per-step stores)
        patterns = patterns + mm(place_rows_ref[t], graph_emb)    # (B*(T-1), G)
        attn = attn + cur_a * place_time_ref[t]                   # (B, T-1)

    # -------- fused classifier head (fc1 -> relu -> fc2 -> relu) --------
    h1 = jnp.maximum(mm(patterns, w1_ref[...]) + b1_ref[...], 0.0)
    out_ref[...] = jnp.maximum(mm(h1, w2_ref[...]) + b2_ref[...], 0.0)

    # -------- attention softmax over the time axis --------
    m = jnp.max(attn, axis=-1, keepdims=True)
    e = jnp.exp(attn - m)
    score_ref[...] = e / jnp.sum(e, axis=-1, keepdims=True)


# ---------------------------------------------------------------------------
# Wrapper (= Evonet_TSC.forward)
# ---------------------------------------------------------------------------
def evonet_tsc_forward(params, a, y, p):
    # a: (B, T, N) state sequence, y: (B, T, E) event sequence,
    # p: (N, F) initial node embedding (broadcast like torch.ones(...) * p)
    B, T, N = a.shape
    F, G, E = NODE_DIM, GRAPH_DIM, N_EVENT
    BN = B * N
    a = a.astype(jnp.float32)
    y = y.astype(jnp.float32)

    # time-major, batch*node-flattened state sequence (two layouts so the
    # per-step outer products are pure broadcast multiplies in the kernel)
    state_tm = jnp.transpose(a, (1, 0, 2)).reshape(T, BN)     # (T, B*N)
    state_col = state_tm.reshape(T, BN, 1)
    state_row = state_tm.reshape(T, 1, BN)
    event_seq = jnp.transpose(y, (1, 0, 2))                   # (T, B, E)
    init_node = jnp.tile(p.astype(jnp.float32), (B, 1))       # (B*N, F)

    # constant matrices folding the torch batched matmuls / means / broadcasts
    # / transposes into plain 2-D matmuls inside the kernel
    blk = np.zeros((BN, BN), np.float32)       # block-diagonal batch mask
    avg = np.zeros((B, BN), np.float32)        # per-batch mean over nodes
    expand = np.zeros((BN, B), np.float32)     # per-batch row broadcast
    for b in range(B):
        blk[b * N:(b + 1) * N, b * N:(b + 1) * N] = 1.0
        avg[b, b * N:(b + 1) * N] = 1.0 / N
        expand[b * N:(b + 1) * N, b] = 1.0
    place_rows = np.zeros((T - 1, B * (T - 1), B), np.float32)  # patterns rows
    place_time = np.zeros((T - 1, 1, T - 1), np.float32)        # attn lanes
    for t in range(T - 1):
        for b in range(B):
            place_rows[t, b * (T - 1) + t, b] = 1.0
        place_time[t, 0, t] = 1.0

    inputs = (
        state_col, state_row, event_seq, init_node,
        jnp.asarray(blk), jnp.asarray(avg), jnp.asarray(expand),
        jnp.asarray(place_rows), jnp.asarray(place_time),
        params['w_hin'], params['b_hin'], params['w_hout'], params['b_hout'],
        params['se_in'], params['se_out'], params['so_in'], params['so_out'],
        params['wa_f'], params['wa_g'],
        params['nWg'], params['nWf'], params['nbW'], params['nV'], params['nbV'],
        params['gWh'], params['gWe'], params['gbW'], params['gV'], params['gbV'],
        params['w1'], params['b1'], params['w2'], params['b2'],
    )

    out_logits, attention_score = pl.pallas_call(
        _evonet_tsc_kernel,
        out_shape=(jax.ShapeDtypeStruct((B * (T - 1), E), jnp.float32),
                   jax.ShapeDtypeStruct((B, T - 1), jnp.float32)),
    )(*inputs)

    return out_logits, attention_score


# ---------------------------------------------------------------------------
# Deterministic synthetic parameters (shapes follow the torch __init__)
# ---------------------------------------------------------------------------
def init_params(key):
    F, G, E = NODE_DIM, GRAPH_DIM, N_EVENT

    def nrm(k, shape, scale=0.1):
        return jax.random.normal(k, shape, jnp.float32) * scale

    ks = iter(jax.random.split(key, 32))
    p = {}
    # Evonet.Hin / Hout (Linear(F, F))
    p['w_hin'] = nrm(next(ks), (F, F));  p['b_hin'] = nrm(next(ks), (1, F), 0.01)
    p['w_hout'] = nrm(next(ks), (F, F)); p['b_hout'] = nrm(next(ks), (1, F), 0.01)
    # Evonet.A (Linear(F+G, 1, bias=False)) split into [mean_H | prev_graph] parts
    p['wa_f'] = nrm(next(ks), (F, 1));   p['wa_g'] = nrm(next(ks), (G, 1))
    # node_lstm = Lstm_unit(F+G, F, F): gates stacked (i, f, o);
    # input weights split into g_-part (G) and H-part (F).
    # (Wc/Vc of Lstm_unit are never used in forward, so they are omitted.)
    p['nWg'] = nrm(next(ks), (3, G, F)); p['nWf'] = nrm(next(ks), (3, F, F))
    p['nbW'] = nrm(next(ks), (3, 1, F), 0.01)
    p['nV'] = nrm(next(ks), (3, F, F));  p['nbV'] = nrm(next(ks), (3, 1, F), 0.01)
    # graph_lstm = Lstm_unit(F+E, G, G): input split into h_-part (F) and event-part (E)
    p['gWh'] = nrm(next(ks), (3, F, G)); p['gWe'] = nrm(next(ks), (3, E, G))
    p['gbW'] = nrm(next(ks), (3, 1, G), 0.01)
    p['gV'] = nrm(next(ks), (3, G, G));  p['gbV'] = nrm(next(ks), (3, 1, G), 0.01)
    # Evonet_TSC head: fc1 (G -> 512), fc2 (512 -> E), stored (in, out)
    p['w1'] = nrm(next(ks), (G, FC_HIDDEN)); p['b1'] = nrm(next(ks), (1, FC_HIDDEN), 0.01)
    p['w2'] = nrm(next(ks), (FC_HIDDEN, E)); p['b2'] = nrm(next(ks), (1, E), 0.01)

    # Constant one-hot selectors implementing the interleave-max
    # (cat([Hin,Hout],-1).reshape(...,F,2).max(-1)) via matmuls.
    se_in = np.zeros((F, F), np.float32); se_out = np.zeros((F, F), np.float32)
    so_in = np.zeros((F, F), np.float32); so_out = np.zeros((F, F), np.float32)
    for f in range(F):
        e_idx, o_idx = 2 * f, 2 * f + 1
        if e_idx < F:
            se_in[e_idx, f] = 1.0
        else:
            se_out[e_idx - F, f] = 1.0
        if o_idx < F:
            so_in[o_idx, f] = 1.0
        else:
            so_out[o_idx - F, f] = 1.0
    p['se_in'] = jnp.asarray(se_in);  p['se_out'] = jnp.asarray(se_out)
    p['so_in'] = jnp.asarray(so_in);  p['so_out'] = jnp.asarray(so_out)
    return p


if __name__ == "__main__":
    key = jax.random.PRNGKey(0)
    kp, ka, ky, kpn = jax.random.split(key, 4)
    params = init_params(kp)

    B = 2
    a = jax.random.normal(ka, (B, SEQ_LEN, N_STATE), jnp.float32)        # state sequence
    y = jax.random.normal(ky, (B, SEQ_LEN, N_EVENT), jnp.float32)        # event sequence
    p0 = jax.random.normal(kpn, (N_STATE, NODE_DIM), jnp.float32) * 0.1  # init node emb

    out_logits, attention_score = jax.jit(evonet_tsc_forward)(params, a, y, p0)
    jax.block_until_ready((out_logits, attention_score))

    assert out_logits.shape == (B * (SEQ_LEN - 1), N_EVENT)
    assert attention_score.shape == (B, SEQ_LEN - 1)
    print("KERNEL_OK")
</pallas_src>

<mosaic_0001>
module attributes {stable_mosaic.version = 11 : i64} {
  func.func @_evonet_tsc_kernel(%arg0: memref<8x8x1xf32, #tpu.memory_space<vmem>>, %arg1: memref<8x1x8xf32, #tpu.memory_space<vmem>>, %arg2: memref<8x2x4xf32, #tpu.memory_space<vmem>>, %arg3: memref<8x8xf32, #tpu.memory_space<vmem>>, %arg4: memref<8x8xf32, #tpu.memory_space<vmem>>, %arg5: memref<2x8xf32, #tpu.memory_space<vmem>>, %arg6: memref<8x2xf32, #tpu.memory_space<vmem>>, %arg7: memref<7x14x2xf32, #tpu.memory_space<vmem>>, %arg8: memref<7x1x7xf32, #tpu.memory_space<vmem>>, %arg9: memref<8x8xf32, #tpu.memory_space<vmem>>, %arg10: memref<1x8xf32, #tpu.memory_space<vmem>>, %arg11: memref<8x8xf32, #tpu.memory_space<vmem>>, %arg12: memref<1x8xf32, #tpu.memory_space<vmem>>, %arg13: memref<8x8xf32, #tpu.memory_space<vmem>>, %arg14: memref<8x8xf32, #tpu.memory_space<vmem>>, %arg15: memref<8x8xf32, #tpu.memory_space<vmem>>, %arg16: memref<8x8xf32, #tpu.memory_space<vmem>>, %arg17: memref<8x1xf32, #tpu.memory_space<vmem>>, %arg18: memref<8x1xf32, #tpu.memory_space<vmem>>, %arg19: memref<3x8x8xf32, #tpu.memory_space<vmem>>, %arg20: memref<3x8x8xf32, #tpu.memory_space<vmem>>, %arg21: memref<3x1x8xf32, #tpu.memory_space<vmem>>, %arg22: memref<3x8x8xf32, #tpu.memory_space<vmem>>, %arg23: memref<3x1x8xf32, #tpu.memory_space<vmem>>, %arg24: memref<3x8x8xf32, #tpu.memory_space<vmem>>, %arg25: memref<3x4x8xf32, #tpu.memory_space<vmem>>, %arg26: memref<3x1x8xf32, #tpu.memory_space<vmem>>, %arg27: memref<3x8x8xf32, #tpu.memory_space<vmem>>, %arg28: memref<3x1x8xf32, #tpu.memory_space<vmem>>, %arg29: memref<8x512xf32, #tpu.memory_space<vmem>>, %arg30: memref<1x512xf32, #tpu.memory_space<vmem>>, %arg31: memref<512x4xf32, #tpu.memory_space<vmem>>, %arg32: memref<1x4xf32, #tpu.memory_space<vmem>>, %arg33: memref<14x4xf32, #tpu.memory_space<vmem>>, %arg34: memref<2x7xf32, #tpu.memory_space<vmem>>) attributes {dimension_semantics = [], scalar_prefetch = 0 : i64, scratch_operands = 0 : i64, tpu.core_type = #tpu.core_type<tc>} {
    %c0 = arith.constant 0 : index
    %c0_0 = arith.constant 0 : index
    %0 = vector.load %arg4[%c0, %c0_0] : memref<8x8xf32, #tpu.memory_space<vmem>>, vector<8x8xf32>
    %c0_1 = arith.constant 0 : index
    %c0_2 = arith.constant 0 : index
    %1 = vector.load %arg5[%c0_1, %c0_2] : memref<2x8xf32, #tpu.memory_space<vmem>>, vector<2x8xf32>
    %c0_3 = arith.constant 0 : index
    %c0_4 = arith.constant 0 : index
    %2 = vector.load %arg6[%c0_3, %c0_4] : memref<8x2xf32, #tpu.memory_space<vmem>>, vector<8x2xf32>
    %c0_5 = arith.constant 0 : index
    %c0_6 = arith.constant 0 : index
    %3 = vector.load %arg9[%c0_5, %c0_6] : memref<8x8xf32, #tpu.memory_space<vmem>>, vector<8x8xf32>
    %c0_7 = arith.constant 0 : index
    %c0_8 = arith.constant 0 : index
    %4 = vector.load %arg10[%c0_7, %c0_8] : memref<1x8xf32, #tpu.memory_space<vmem>>, vector<1x8xf32>
    %c0_9 = arith.constant 0 : index
    %c0_10 = arith.constant 0 : index
    %5 = vector.load %arg11[%c0_9, %c0_10] : memref<8x8xf32, #tpu.memory_space<vmem>>, vector<8x8xf32>
    %c0_11 = arith.constant 0 : index
    %c0_12 = arith.constant 0 : index
    %6 = vector.load %arg12[%c0_11, %c0_12] : memref<1x8xf32, #tpu.memory_space<vmem>>, vector<1x8xf32>
    %c0_13 = arith.constant 0 : index
    %c0_14 = arith.constant 0 : index
    %7 = vector.load %arg13[%c0_13, %c0_14] : memref<8x8xf32, #tpu.memory_space<vmem>>, vector<8x8xf32>
    %c0_15 = arith.constant 0 : index
    %c0_16 = arith.constant 0 : index
    %8 = vector.load %arg14[%c0_15, %c0_16] : memref<8x8xf32, #tpu.memory_space<vmem>>, vector<8x8xf32>
    %c0_17 = arith.constant 0 : index
    %c0_18 = arith.constant 0 : index
    %9 = vector.load %arg15[%c0_17, %c0_18] : memref<8x8xf32, #tpu.memory_space<vmem>>, vector<8x8xf32>
    %c0_19 = arith.constant 0 : index
    %c0_20 = arith.constant 0 : index
    %10 = vector.load %arg16[%c0_19, %c0_20] : memref<8x8xf32, #tpu.memory_space<vmem>>, vector<8x8xf32>
    %c0_21 = arith.constant 0 : index
    %c0_22 = arith.constant 0 : index
    %11 = vector.load %arg17[%c0_21, %c0_22] : memref<8x1xf32, #tpu.memory_space<vmem>>, vector<8x1xf32>
    %c0_23 = arith.constant 0 : index
    %c0_24 = arith.constant 0 : index
    %12 = vector.load %arg18[%c0_23, %c0_24] : memref<8x1xf32, #tpu.memory_space<vmem>>, vector<8x1xf32>
    %c0_25 = arith.constant 0 : index
    %c0_26 = arith.constant 0 : index
    %13 = vector.load %arg3[%c0_25, %c0_26] : memref<8x8xf32, #tpu.memory_space<vmem>>, vector<8x8xf32>
    %c0_27 = arith.constant 0 : index
    %c0_28 = arith.constant 0 : index
    %14 = vector.load %arg3[%c0_27, %c0_28] : memref<8x8xf32, #tpu.memory_space<vmem>>, vector<8x8xf32>
    %cst = arith.constant 0.000000e+00 : f32
    %15 = vector.broadcast %cst : f32 to vector<2x8xf32>
    %cst_29 = arith.constant 0.000000e+00 : f32
    %16 = vector.broadcast %cst_29 : f32 to vector<2x8xf32>
    %cst_30 = arith.constant 0.000000e+00 : f32
    %17 = vector.broadcast %cst_30 : f32 to vector<14x8xf32>
    %cst_31 = arith.constant 0.000000e+00 : f32
    %18 = vector.broadcast %cst_31 : f32 to vector<2x7xf32>
    %c0_32 = arith.constant 0 : index
    %c0_33 = arith.constant 0 : index
    %c0_34 = arith.constant 0 : index
    %19 = vector.load %arg0[%c0_32, %c0_33, %c0_34] : memref<8x8x1xf32, #tpu.memory_space<vmem>>, vector<1x8x1xf32>
    %20 = vector.shape_cast %19 : vector<1x8x1xf32> to vector<8x1xf32>
    %c0_35 = arith.constant 0 : index
    %c0_36 = arith.constant 0 : index
    %c0_37 = arith.constant 0 : index
    %21 = vector.load %arg1[%c0_35, %c0_36, %c0_37] : memref<8x1x8xf32, #tpu.memory_space<vmem>>, vector<1x1x8xf32>
    %22 = vector.shape_cast %21 : vector<1x1x8xf32> to vector<1x8xf32>
    %c1 = arith.constant 1 : index
    %c0_38 = arith.constant 0 : index
    %c0_39 = arith.constant 0 : index
    %23 = vector.load %arg0[%c1, %c0_38, %c0_39] : memref<8x8x1xf32, #tpu.memory_space<vmem>>, vector<1x8x1xf32>
    %24 = vector.shape_cast %23 : vector<1x8x1xf32> to vector<8x1xf32>
    %c1_40 = arith.constant 1 : index
    %c0_41 = arith.constant 0 : index
    %c0_42 = arith.constant 0 : index
    %25 = vector.load %arg1[%c1_40, %c0_41, %c0_42] : memref<8x1x8xf32, #tpu.memory_space<vmem>>, vector<1x1x8xf32>
    %26 = vector.shape_cast %25 : vector<1x1x8xf32> to vector<1x8xf32>
    %c1_43 = arith.constant 1 : index
    %c0_44 = arith.constant 0 : index
    %c0_45 = arith.constant 0 : index
    %27 = vector.load %arg2[%c1_43, %c0_44, %c0_45] : memref<8x2x4xf32, #tpu.memory_space<vmem>>, vector<1x2x4xf32>
    %28 = vector.shape_cast %27 : vector<1x2x4xf32> to vector<2x4xf32>
    %29 = vector.broadcast %20 : vector<8x1xf32> to vector<8x8xf32>
    %30 = vector.broadcast %26 : vector<1x8xf32> to vector<8x8xf32>
    %31 = arith.mulf %29, %30 : vector<8x8xf32>
    %32 = arith.mulf %31, %0 : vector<8x8xf32>
    %33 = vector.broadcast %24 : vector<8x1xf32> to vector<8x8xf32>
    %34 = vector.broadcast %22 : vector<1x8xf32> to vector<8x8xf32>
    %35 = arith.mulf %33, %34 : vector<8x8xf32>
    %36 = arith.mulf %35, %0 : vector<8x8xf32>
    %cst_46 = arith.constant dense<0.000000e+00> : vector<8x8xf32>
    %37 = tpu.matmul %32, %13, %cst_46 {dimension_numbers = #tpu.dot_dimension_numbers<[1], [0], [0], [1], [0, 0, 1, 1], [], []>} : vector<8x8xf32>, vector<8x8xf32>, vector<8x8xf32> -> vector<8x8xf32>
    %cst_47 = arith.constant dense<0.000000e+00> : vector<8x8xf32>
    %38 = tpu.matmul %37, %3, %cst_47 {dimension_numbers = #tpu.dot_dimension_numbers<[1], [0], [0], [1], [0, 0, 1, 1], [], []>} : vector<8x8xf32>, vector<8x8xf32>, vector<8x8xf32> -> vector<8x8xf32>
    %39 = vector.broadcast %4 : vector<1x8xf32> to vector<8x8xf32>
    %40 = arith.addf %38, %39 : vector<8x8xf32>
    %41 = math.tanh %40 : vector<8x8xf32>
    %cst_48 = arith.constant dense<0.000000e+00> : vector<8x8xf32>
    %42 = tpu.matmul %36, %13, %cst_48 {dimension_numbers = #tpu.dot_dimension_numbers<[1], [0], [0], [1], [0, 0, 1, 1], [], []>} : vector<8x8xf32>, vector<8x8xf32>, vector<8x8xf32> -> vector<8x8xf32>
    %cst_49 = arith.constant dense<0.000000e+00> : vector<8x8xf32>
    %43 = tpu.matmul %42, %5, %cst_49 {dimension_numbers = #tpu.dot_dimension_numbers<[1], [0], [0], [1], [0, 0, 1, 1], [], []>} : vector<8x8xf32>, vector<8x8xf32>, vector<8x8xf32> -> vector<8x8xf32>
    %44 = vector.broadcast %6 : vector<1x8xf32> to vector<8x8xf32>
    %45 = arith.addf %43, %44 : vector<8x8xf32>
    %46 = math.tanh %45 : vector<8x8xf32>
    %cst_50 = arith.constant dense<0.000000e+00> : vector<8x8xf32>
    %47 = tpu.matmul %41, %7, %cst_50 {dimension_numbers = #tpu.dot_dimension_numbers<[1], [0], [0], [1], [0, 0, 1, 1], [], []>} : vector<8x8xf32>, vector<8x8xf32>, vector<8x8xf32> -> vector<8x8xf32>
    %cst_51 = arith.constant dense<0.000000e+00> : vector<8x8xf32>
    %48 = tpu.matmul %46, %8, %cst_51 {dimension_numbers = #tpu.dot_dimension_numbers<[1], [0], [0], [1], [0, 0, 1, 1], [], []>} : vector<8x8xf32>, vector<8x8xf32>, vector<8x8xf32> -> vector<8x8xf32>
    %49 = arith.addf %47, %48 : vector<8x8xf32>
    %cst_52 = arith.constant dense<0.000000e+00> : vector<8x8xf32>
    %50 = tpu.matmul %41, %9, %cst_52 {dimension_numbers = #tpu.dot_dimension_numbers<[1], [0], [0], [1], [0, 0, 1, 1], [], []>} : vector<8x8xf32>, vector<8x8xf32>, vector<8x8xf32> -> vector<8x8xf32>
    %cst_53 = arith.constant dense<0.000000e+00> : vector<8x8xf32>
    %51 = tpu.matmul %46, %10, %cst_53 {dimension_numbers = #tpu.dot_dimension_numbers<[1], [0], [0], [1], [0, 0, 1, 1], [], []>} : vector<8x8xf32>, vector<8x8xf32>, vector<8x8xf32> -> vector<8x8xf32>
    %52 = arith.addf %50, %51 : vector<8x8xf32>
    %53 = arith.maximumf %49, %52 : vector<8x8xf32>
    %cst_54 = arith.constant dense<0.000000e+00> : vector<2x8xf32>
    %54 = tpu.matmul %1, %53, %cst_54 {dimension_numbers = #tpu.dot_dimension_numbers<[1], [0], [0], [1], [0, 0, 1, 1], [], []>} : vector<2x8xf32>, vector<8x8xf32>, vector<2x8xf32> -> vector<2x8xf32>
    %cst_55 = arith.constant dense<0.000000e+00> : vector<2x1xf32>
    %55 = tpu.matmul %54, %11, %cst_55 {dimension_numbers = #tpu.dot_dimension_numbers<[1], [0], [0], [1], [0, 0, 1, 1], [], []>} : vector<2x8xf32>, vector<8x1xf32>, vector<2x1xf32> -> vector<2x1xf32>
    %cst_56 = arith.constant dense<0.000000e+00> : vector<2x1xf32>
    %56 = tpu.matmul %15, %12, %cst_56 {dimension_numbers = #tpu.dot_dimension_numbers<[1], [0], [0], [1], [0, 0, 1, 1], [], []>} : vector<2x8xf32>, vector<8x1xf32>, vector<2x1xf32> -> vector<2x1xf32>
    %57 = arith.addf %55, %56 : vector<2x1xf32>
    %58 = vector.broadcast %57 : vector<2x1xf32> to vector<2x8xf32>
    %59 = arith.mulf %58, %15 : vector<2x8xf32>
    %cst_57 = arith.constant dense<0.000000e+00> : vector<8x8xf32>
    %60 = tpu.matmul %2, %59, %cst_57 {dimension_numbers = #tpu.dot_dimension_numbers<[1], [0], [0], [1], [0, 0, 1, 1], [], []>} : vector<8x2xf32>, vector<2x8xf32>, vector<8x8xf32> -> vector<8x8xf32>
    %c0_58 = arith.constant 0 : index
    %c0_59 = arith.constant 0 : index
    %c0_60 = arith.constant 0 : index
    %61 = vector.load %arg19[%c0_58, %c0_59, %c0_60] : memref<3x8x8xf32, #tpu.memory_space<vmem>>, vector<1x8x8xf32>
    %62 = vector.shape_cast %61 : vector<1x8x8xf32> to vector<8x8xf32>
    %cst_61 = arith.constant dense<0.000000e+00> : vector<8x8xf32>
    %63 = tpu.matmul %60, %62, %cst_61 {dimension_numbers = #tpu.dot_dimension_numbers<[1], [0], [0], [1], [0, 0, 1, 1], [], []>} : vector<8x8xf32>, vector<8x8xf32>, vector<8x8xf32> -> vector<8x8xf32>
    %c0_62 = arith.constant 0 : index
    %c0_63 = arith.constant 0 : index
    %c0_64 = arith.constant 0 : index
    %64 = vector.load %arg20[%c0_62, %c0_63, %c0_64] : memref<3x8x8xf32, #tpu.memory_space<vmem>>, vector<1x8x8xf32>
    %65 = vector.shape_cast %64 : vector<1x8x8xf32> to vector<8x8xf32>
    %cst_65 = arith.constant dense<0.000000e+00> : vector<8x8xf32>
    %66 = tpu.matmul %53, %65, %cst_65 {dimension_numbers = #tpu.dot_dimension_numbers<[1], [0], [0], [1], [0, 0, 1, 1], [], []>} : vector<8x8xf32>, vector<8x8xf32>, vector<8x8xf32> -> vector<8x8xf32>
    %67 = arith.addf %63, %66 : vector<8x8xf32>
    %c0_66 = arith.constant 0 : index
    %c0_67 = arith.constant 0 : index
    %c0_68 = arith.constant 0 : index
    %68 = vector.load %arg21[%c0_66, %c0_67, %c0_68] : memref<3x1x8xf32, #tpu.memory_space<vmem>>, vector<1x1x8xf32>
    %69 = vector.shape_cast %68 : vector<1x1x8xf32> to vector<1x8xf32>
    %70 = vector.broadcast %69 : vector<1x8xf32> to vector<8x8xf32>
    %71 = arith.addf %67, %70 : vector<8x8xf32>
    %c1_69 = arith.constant 1 : index
    %c0_70 = arith.constant 0 : index
    %c0_71 = arith.constant 0 : index
    %72 = vector.load %arg19[%c1_69, %c0_70, %c0_71] : memref<3x8x8xf32, #tpu.memory_space<vmem>>, vector<1x8x8xf32>
    %73 = vector.shape_cast %72 : vector<1x8x8xf32> to vector<8x8xf32>
    %cst_72 = arith.constant dense<0.000000e+00> : vector<8x8xf32>
    %74 = tpu.matmul %60, %73, %cst_72 {dimension_numbers = #tpu.dot_dimension_numbers<[1], [0], [0], [1], [0, 0, 1, 1], [], []>} : vector<8x8xf32>, vector<8x8xf32>, vector<8x8xf32> -> vector<8x8xf32>
    %c1_73 = arith.constant 1 : index
    %c0_74 = arith.constant 0 : index
    %c0_75 = arith.constant 0 : index
    %75 = vector.load %arg20[%c1_73, %c0_74, %c0_75] : memref<3x8x8xf32, #tpu.memory_space<vmem>>, vector<1x8x8xf32>
    %76 = vector.shape_cast %75 : vector<1x8x8xf32> to vector<8x8xf32>
    %cst_76 = arith.constant dense<0.000000e+00> : vector<8x8xf32>
    %77 = tpu.matmul %53, %76, %cst_76 {dimension_numbers = #tpu.dot_dimension_numbers<[1], [0], [0], [1], [0, 0, 1, 1], [], []>} : vector<8x8xf32>, vector<8x8xf32>, vector<8x8xf32> -> vector<8x8xf32>
    %78 = arith.addf %74, %77 : vector<8x8xf32>
    %c1_77 = arith.constant 1 : index
    %c0_78 = arith.constant 0 : index
    %c0_79 = arith.constant 0 : index
    %79 = vector.load %arg21[%c1_77, %c0_78, %c0_79] : memref<3x1x8xf32, #tpu.memory_space<vmem>>, vector<1x1x8xf32>
    %80 = vector.shape_cast %79 : vector<1x1x8xf32> to vector<1x8xf32>
    %81 = vector.broadcast %80 : vector<1x8xf32> to vector<8x8xf32>
    %82 = arith.addf %78, %81 : vector<8x8xf32>
    %c2 = arith.constant 2 : index
    %c0_80 = arith.constant 0 : index
    %c0_81 = arith.constant 0 : index
    %83 = vector.load %arg19[%c2, %c0_80, %c0_81] : memref<3x8x8xf32, #tpu.memory_space<vmem>>, vector<1x8x8xf32>
    %84 = vector.shape_cast %83 : vector<1x8x8xf32> to vector<8x8xf32>
    %cst_82 = arith.constant dense<0.000000e+00> : vector<8x8xf32>
    %85 = tpu.matmul %60, %84, %cst_82 {dimension_numbers = #tpu.dot_dimension_numbers<[1], [0], [0], [1], [0, 0, 1, 1], [], []>} : vector<8x8xf32>, vector<8x8xf32>, vector<8x8xf32> -> vector<8x8xf32>
    %c2_83 = arith.constant 2 : index
    %c0_84 = arith.constant 0 : index
    %c0_85 = arith.constant 0 : index
    %86 = vector.load %arg20[%c2_83, %c0_84, %c0_85] : memref<3x8x8xf32, #tpu.memory_space<vmem>>, vector<1x8x8xf32>
    %87 = vector.shape_cast %86 : vector<1x8x8xf32> to vector<8x8xf32>
    %cst_86 = arith.constant dense<0.000000e+00> : vector<8x8xf32>
    %88 = tpu.matmul %53, %87, %cst_86 {dimension_numbers = #tpu.dot_dimension_numbers<[1], [0], [0], [1], [0, 0, 1, 1], [], []>} : vector<8x8xf32>, vector<8x8xf32>, vector<8x8xf32> -> vector<8x8xf32>
    %89 = arith.addf %85, %88 : vector<8x8xf32>
    %c2_87 = arith.constant 2 : index
    %c0_88 = arith.constant 0 : index
    %c0_89 = arith.constant 0 : index
    %90 = vector.load %arg21[%c2_87, %c0_88, %c0_89] : memref<3x1x8xf32, #tpu.memory_space<vmem>>, vector<1x1x8xf32>
    %91 = vector.shape_cast %90 : vector<1x1x8xf32> to vector<1x8xf32>
    %92 = vector.broadcast %91 : vector<1x8xf32> to vector<8x8xf32>
    %93 = arith.addf %89, %92 : vector<8x8xf32>
    %c0_90 = arith.constant 0 : index
    %c0_91 = arith.constant 0 : index
    %c0_92 = arith.constant 0 : index
    %94 = vector.load %arg22[%c0_90, %c0_91, %c0_92] : memref<3x8x8xf32, #tpu.memory_space<vmem>>, vector<1x8x8xf32>
    %95 = vector.shape_cast %94 : vector<1x8x8xf32> to vector<8x8xf32>
    %cst_93 = arith.constant dense<0.000000e+00> : vector<8x8xf32>
    %96 = tpu.matmul %13, %95, %cst_93 {dimension_numbers = #tpu.dot_dimension_numbers<[1], [0], [0], [1], [0, 0, 1, 1], [], []>} : vector<8x8xf32>, vector<8x8xf32>, vector<8x8xf32> -> vector<8x8xf32>
    %97 = arith.addf %71, %96 : vector<8x8xf32>
    %c0_94 = arith.constant 0 : index
    %c0_95 = arith.constant 0 : index
    %c0_96 = arith.constant 0 : index
    %98 = vector.load %arg23[%c0_94, %c0_95, %c0_96] : memref<3x1x8xf32, #tpu.memory_space<vmem>>, vector<1x1x8xf32>
    %99 = vector.shape_cast %98 : vector<1x1x8xf32> to vector<1x8xf32>
    %100 = vector.broadcast %99 : vector<1x8xf32> to vector<8x8xf32>
    %101 = arith.addf %97, %100 : vector<8x8xf32>
    %102 = arith.negf %101 : vector<8x8xf32>
    %103 = math.exp %102 : vector<8x8xf32>
    %cst_97 = arith.constant 1.000000e+00 : f32
    %104 = vector.broadcast %cst_97 : f32 to vector<8x8xf32>
    %105 = arith.addf %104, %103 : vector<8x8xf32>
    %106 = arith.divf %104, %105 : vector<8x8xf32>
    %c1_98 = arith.constant 1 : index
    %c0_99 = arith.constant 0 : index
    %c0_100 = arith.constant 0 : index
    %107 = vector.load %arg22[%c1_98, %c0_99, %c0_100] : memref<3x8x8xf32, #tpu.memory_space<vmem>>, vector<1x8x8xf32>
    %108 = vector.shape_cast %107 : vector<1x8x8xf32> to vector<8x8xf32>
    %cst_101 = arith.constant dense<0.000000e+00> : vector<8x8xf32>
    %109 = tpu.matmul %13, %108, %cst_101 {dimension_numbers = #tpu.dot_dimension_numbers<[1], [0], [0], [1], [0, 0, 1, 1], [], []>} : vector<8x8xf32>, vector<8x8xf32>, vector<8x8xf32> -> vector<8x8xf32>
    %110 = arith.addf %82, %109 : vector<8x8xf32>
    %c1_102 = arith.constant 1 : index
    %c0_103 = arith.constant 0 : index
    %c0_104 = arith.constant 0 : index
    %111 = vector.load %arg23[%c1_102, %c0_103, %c0_104] : memref<3x1x8xf32, #tpu.memory_space<vmem>>, vector<1x1x8xf32>
    %112 = vector.shape_cast %111 : vector<1x1x8xf32> to vector<1x8xf32>
    %113 = vector.broadcast %112 : vector<1x8xf32> to vector<8x8xf32>
    %114 = arith.addf %110, %113 : vector<8x8xf32>
    %115 = arith.negf %114 : vector<8x8xf32>
    %116 = math.exp %115 : vector<8x8xf32>
    %cst_105 = arith.constant 1.000000e+00 : f32
    %117 = vector.broadcast %cst_105 : f32 to vector<8x8xf32>
    %118 = arith.addf %117, %116 : vector<8x8xf32>
    %119 = arith.divf %117, %118 : vector<8x8xf32>
    %c2_106 = arith.constant 2 : index
    %c0_107 = arith.constant 0 : index
    %c0_108 = arith.constant 0 : index
    %120 = vector.load %arg22[%c2_106, %c0_107, %c0_108] : memref<3x8x8xf32, #tpu.memory_space<vmem>>, vector<1x8x8xf32>
    %121 = vector.shape_cast %120 : vector<1x8x8xf32> to vector<8x8xf32>
    %cst_109 = arith.constant dense<0.000000e+00> : vector<8x8xf32>
    %122 = tpu.matmul %13, %121, %cst_109 {dimension_numbers = #tpu.dot_dimension_numbers<[1], [0], [0], [1], [0, 0, 1, 1], [], []>} : vector<8x8xf32>, vector<8x8xf32>, vector<8x8xf32> -> vector<8x8xf32>
    %123 = arith.addf %93, %122 : vector<8x8xf32>
    %c2_110 = arith.constant 2 : index
    %c0_111 = arith.constant 0 : index
    %c0_112 = arith.constant 0 : index
    %124 = vector.load %arg23[%c2_110, %c0_111, %c0_112] : memref<3x1x8xf32, #tpu.memory_space<vmem>>, vector<1x1x8xf32>
    %125 = vector.shape_cast %124 : vector<1x1x8xf32> to vector<1x8xf32>
    %126 = vector.broadcast %125 : vector<1x8xf32> to vector<8x8xf32>
    %127 = arith.addf %123, %126 : vector<8x8xf32>
    %128 = arith.negf %127 : vector<8x8xf32>
    %129 = math.exp %128 : vector<8x8xf32>
    %cst_113 = arith.constant 1.000000e+00 : f32
    %130 = vector.broadcast %cst_113 : f32 to vector<8x8xf32>
    %131 = arith.addf %130, %129 : vector<8x8xf32>
    %132 = arith.divf %130, %131 : vector<8x8xf32>
    %133 = arith.mulf %119, %13 : vector<8x8xf32>
    %c0_114 = arith.constant 0 : index
    %c0_115 = arith.constant 0 : index
    %c0_116 = arith.constant 0 : index
    %134 = vector.load %arg22[%c0_114, %c0_115, %c0_116] : memref<3x8x8xf32, #tpu.memory_space<vmem>>, vector<1x8x8xf32>
    %135 = vector.shape_cast %134 : vector<1x8x8xf32> to vector<8x8xf32>
    %cst_117 = arith.constant dense<0.000000e+00> : vector<8x8xf32>
    %136 = tpu.matmul %133, %135, %cst_117 {dimension_numbers = #tpu.dot_dimension_numbers<[1], [0], [0], [1], [0, 0, 1, 1], [], []>} : vector<8x8xf32>, vector<8x8xf32>, vector<8x8xf32> -> vector<8x8xf32>
    %137 = arith.addf %71, %136 : vector<8x8xf32>
    %c0_118 = arith.constant 0 : index
    %c0_119 = arith.constant 0 : index
    %c0_120 = arith.constant 0 : index
    %138 = vector.load %arg23[%c0_118, %c0_119, %c0_120] : memref<3x1x8xf32, #tpu.memory_space<vmem>>, vector<1x1x8xf32>
    %139 = vector.shape_cast %138 : vector<1x1x8xf32> to vector<1x8xf32>
    %140 = vector.broadcast %139 : vector<1x8xf32> to vector<8x8xf32>
    %141 = arith.addf %137, %140 : vector<8x8xf32>
    %142 = arith.negf %141 : vector<8x8xf32>
    %143 = math.exp %142 : vector<8x8xf32>
    %cst_121 = arith.constant 1.000000e+00 : f32
    %144 = vector.broadcast %cst_121 : f32 to vector<8x8xf32>
    %145 = arith.addf %144, %143 : vector<8x8xf32>
    %146 = arith.divf %144, %145 : vector<8x8xf32>
    %147 = arith.mulf %119, %14 : vector<8x8xf32>
    %148 = arith.mulf %106, %146 : vector<8x8xf32>
    %149 = arith.addf %147, %148 : vector<8x8xf32>
    %150 = math.tanh %149 : vector<8x8xf32>
    %151 = arith.mulf %132, %150 : vector<8x8xf32>
    %cst_122 = arith.constant dense<0.000000e+00> : vector<2x8xf32>
    %152 = tpu.matmul %1, %149, %cst_122 {dimension_numbers = #tpu.dot_dimension_numbers<[1], [0], [0], [1], [0, 0, 1, 1], [], []>} : vector<2x8xf32>, vector<8x8xf32>, vector<2x8xf32> -> vector<2x8xf32>
    %153 = vector.broadcast %57 : vector<2x1xf32> to vector<2x8xf32>
    %154 = arith.mulf %153, %152 : vector<2x8xf32>
    %c0_123 = arith.constant 0 : index
    %c0_124 = arith.constant 0 : index
    %c0_125 = arith.constant 0 : index
    %155 = vector.load %arg24[%c0_123, %c0_124, %c0_125] : memref<3x8x8xf32, #tpu.memory_space<vmem>>, vector<1x8x8xf32>
    %156 = vector.shape_cast %155 : vector<1x8x8xf32> to vector<8x8xf32>
    %cst_126 = arith.constant dense<0.000000e+00> : vector<2x8xf32>
    %157 = tpu.matmul %154, %156, %cst_126 {dimension_numbers = #tpu.dot_dimension_numbers<[1], [0], [0], [1], [0, 0, 1, 1], [], []>} : vector<2x8xf32>, vector<8x8xf32>, vector<2x8xf32> -> vector<2x8xf32>
    %c0_127 = arith.constant 0 : index
    %c0_128 = arith.constant 0 : index
    %c0_129 = arith.constant 0 : index
    %158 = vector.load %arg25[%c0_127, %c0_128, %c0_129] : memref<3x4x8xf32, #tpu.memory_space<vmem>>, vector<1x4x8xf32>
    %159 = vector.shape_cast %158 : vector<1x4x8xf32> to vector<4x8xf32>
    %cst_130 = arith.constant dense<0.000000e+00> : vector<2x8xf32>
    %160 = tpu.matmul %28, %159, %cst_130 {dimension_numbers = #tpu.dot_dimension_numbers<[1], [0], [0], [1], [0, 0, 1, 1], [], []>} : vector<2x4xf32>, vector<4x8xf32>, vector<2x8xf32> -> vector<2x8xf32>
    %161 = arith.addf %157, %160 : vector<2x8xf32>
    %c0_131 = arith.constant 0 : index
    %c0_132 = arith.constant 0 : index
    %c0_133 = arith.constant 0 : index
    %162 = vector.load %arg26[%c0_131, %c0_132, %c0_133] : memref<3x1x8xf32, #tpu.memory_space<vmem>>, vector<1x1x8xf32>
    %163 = vector.shape_cast %162 : vector<1x1x8xf32> to vector<1x8xf32>
    %164 = vector.broadcast %163 : vector<1x8xf32> to vector<2x8xf32>
    %165 = arith.addf %161, %164 : vector<2x8xf32>
    %c1_134 = arith.constant 1 : index
    %c0_135 = arith.constant 0 : index
    %c0_136 = arith.constant 0 : index
    %166 = vector.load %arg24[%c1_134, %c0_135, %c0_136] : memref<3x8x8xf32, #tpu.memory_space<vmem>>, vector<1x8x8xf32>
    %167 = vector.shape_cast %166 : vector<1x8x8xf32> to vector<8x8xf32>
    %cst_137 = arith.constant dense<0.000000e+00> : vector<2x8xf32>
    %168 = tpu.matmul %154, %167, %cst_137 {dimension_numbers = #tpu.dot_dimension_numbers<[1], [0], [0], [1], [0, 0, 1, 1], [], []>} : vector<2x8xf32>, vector<8x8xf32>, vector<2x8xf32> -> vector<2x8xf32>
    %c1_138 = arith.constant 1 : index
    %c0_139 = arith.constant 0 : index
    %c0_140 = arith.constant 0 : index
    %169 = vector.load %arg25[%c1_138, %c0_139, %c0_140] : memref<3x4x8xf32, #tpu.memory_space<vmem>>, vector<1x4x8xf32>
    %170 = vector.shape_cast %169 : vector<1x4x8xf32> to vector<4x8xf32>
    %cst_141 = arith.constant dense<0.000000e+00> : vector<2x8xf32>
    %171 = tpu.matmul %28, %170, %cst_141 {dimension_numbers = #tpu.dot_dimension_numbers<[1], [0], [0], [1], [0, 0, 1, 1], [], []>} : vector<2x4xf32>, vector<4x8xf32>, vector<2x8xf32> -> vector<2x8xf32>
    %172 = arith.addf %168, %171 : vector<2x8xf32>
    %c1_142 = arith.constant 1 : index
    %c0_143 = arith.constant 0 : index
    %c0_144 = arith.constant 0 : index
    %173 = vector.load %arg26[%c1_142, %c0_143, %c0_144] : memref<3x1x8xf32, #tpu.memory_space<vmem>>, vector<1x1x8xf32>
    %174 = vector.shape_cast %173 : vector<1x1x8xf32> to vector<1x8xf32>
    %175 = vector.broadcast %174 : vector<1x8xf32> to vector<2x8xf32>
    %176 = arith.addf %172, %175 : vector<2x8xf32>
    %c2_145 = arith.constant 2 : index
    %c0_146 = arith.constant 0 : index
    %c0_147 = arith.constant 0 : index
    %177 = vector.load %arg24[%c2_145, %c0_146, %c0_147] : memref<3x8x8xf32, #tpu.memory_space<vmem>>, vector<1x8x8xf32>
    %178 = vector.shape_cast %177 : vector<1x8x8xf32> to vector<8x8xf32>
    %cst_148 = arith.constant dense<0.000000e+00> : vector<2x8xf32>
    %179 = tpu.matmul %154, %178, %cst_148 {dimension_numbers = #tpu.dot_dimension_numbers<[1], [0], [0], [1], [0, 0, 1, 1], [], []>} : vector<2x8xf32>, vector<8x8xf32>, vector<2x8xf32> -> vector<2x8xf32>
    %c2_149 = arith.constant 2 : index
    %c0_150 = arith.constant 0 : index
    %c0_151 = arith.constant 0 : index
    %180 = vector.load %arg25[%c2_149, %c0_150, %c0_151] : memref<3x4x8xf32, #tpu.memory_space<vmem>>, vector<1x4x8xf32>
    %181 = vector.shape_cast %180 : vector<1x4x8xf32> to vector<4x8xf32>
    %cst_152 = arith.constant dense<0.000000e+00> : vector<2x8xf32>
    %182 = tpu.matmul %28, %181, %cst_152 {dimension_numbers = #tpu.dot_dimension_numbers<[1], [0], [0], [1], [0, 0, 1, 1], [], []>} : vector<2x4xf32>, vector<4x8xf32>, vector<2x8xf32> -> vector<2x8xf32>
    %183 = arith.addf %179, %182 : vector<2x8xf32>
    %c2_153 = arith.constant 2 : index
    %c0_154 = arith.constant 0 : index
    %c0_155 = arith.constant 0 : index
    %184 = vector.load %arg26[%c2_153, %c0_154, %c0_155] : memref<3x1x8xf32, #tpu.memory_space<vmem>>, vector<1x1x8xf32>
    %185 = vector.shape_cast %184 : vector<1x1x8xf32> to vector<1x8xf32>
    %186 = vector.broadcast %185 : vector<1x8xf32> to vector<2x8xf32>
    %187 = arith.addf %183, %186 : vector<2x8xf32>
    %c0_156 = arith.constant 0 : index
    %c0_157 = arith.constant 0 : index
    %c0_158 = arith.constant 0 : index
    %188 = vector.load %arg27[%c0_156, %c0_157, %c0_158] : memref<3x8x8xf32, #tpu.memory_space<vmem>>, vector<1x8x8xf32>
    %189 = vector.shape_cast %188 : vector<1x8x8xf32> to vector<8x8xf32>
    %cst_159 = arith.constant dense<0.000000e+00> : vector<2x8xf32>
    %190 = tpu.matmul %15, %189, %cst_159 {dimension_numbers = #tpu.dot_dimension_numbers<[1], [0], [0], [1], [0, 0, 1, 1], [], []>} : vector<2x8xf32>, vector<8x8xf32>, vector<2x8xf32> -> vector<2x8xf32>
    %191 = arith.addf %165, %190 : vector<2x8xf32>
    %c0_160 = arith.constant 0 : index
    %c0_161 = arith.constant 0 : index
    %c0_162 = arith.constant 0 : index
    %192 = vector.load %arg28[%c0_160, %c0_161, %c0_162] : memref<3x1x8xf32, #tpu.memory_space<vmem>>, vector<1x1x8xf32>
    %193 = vector.shape_cast %192 : vector<1x1x8xf32> to vector<1x8xf32>
    %194 = vector.broadcast %193 : vector<1x8xf32> to vector<2x8xf32>
    %195 = arith.addf %191, %194 : vector<2x8xf32>
    %196 = arith.negf %195 : vector<2x8xf32>
    %197 = math.exp %196 : vector<2x8xf32>
    %cst_163 = arith.constant 1.000000e+00 : f32
    %198 = vector.broadcast %cst_163 : f32 to vector<2x8xf32>
    %199 = arith.addf %198, %197 : vector<2x8xf32>
    %200 = arith.divf %198, %199 : vector<2x8xf32>
    %c1_164 = arith.constant 1 : index
    %c0_165 = arith.constant 0 : index
    %c0_166 = arith.constant 0 : index
    %201 = vector.load %arg27[%c1_164, %c0_165, %c0_166] : memref<3x8x8xf32, #tpu.memory_space<vmem>>, vector<1x8x8xf32>
    %202 = vector.shape_cast %201 : vector<1x8x8xf32> to vector<8x8xf32>
    %cst_167 = arith.constant dense<0.000000e+00> : vector<2x8xf32>
    %203 = tpu.matmul %15, %202, %cst_167 {dimension_numbers = #tpu.dot_dimension_numbers<[1], [0], [0], [1], [0, 0, 1, 1], [], []>} : vector<2x8xf32>, vector<8x8xf32>, vector<2x8xf32> -> vector<2x8xf32>
    %204 = arith.addf %176, %203 : vector<2x8xf32>
    %c1_168 = arith.constant 1 : index
    %c0_169 = arith.constant 0 : index
    %c0_170 = arith.constant 0 : index
    %205 = vector.load %arg28[%c1_168, %c0_169, %c0_170] : memref<3x1x8xf32, #tpu.memory_space<vmem>>, vector<1x1x8xf32>
    %206 = vector.shape_cast %205 : vector<1x1x8xf32> to vector<1x8xf32>
    %207 = vector.broadcast %206 : vector<1x8xf32> to vector<2x8xf32>
    %208 = arith.addf %204, %207 : vector<2x8xf32>
    %209 = arith.negf %208 : vector<2x8xf32>
    %210 = math.exp %209 : vector<2x8xf32>
    %cst_171 = arith.constant 1.000000e+00 : f32
    %211 = vector.broadcast %cst_171 : f32 to vector<2x8xf32>
    %212 = arith.addf %211, %210 : vector<2x8xf32>
    %213 = arith.divf %211, %212 : vector<2x8xf32>
    %c2_172 = arith.constant 2 : index
    %c0_173 = arith.constant 0 : index
    %c0_174 = arith.constant 0 : index
    %214 = vector.load %arg27[%c2_172, %c0_173, %c0_174] : memref<3x8x8xf32, #tpu.memory_space<vmem>>, vector<1x8x8xf32>
    %215 = vector.shape_cast %214 : vector<1x8x8xf32> to vector<8x8xf32>
    %cst_175 = arith.constant dense<0.000000e+00> : vector<2x8xf32>
    %216 = tpu.matmul %15, %215, %cst_175 {dimension_numbers = #tpu.dot_dimension_numbers<[1], [0], [0], [1], [0, 0, 1, 1], [], []>} : vector<2x8xf32>, vector<8x8xf32>, vector<2x8xf32> -> vector<2x8xf32>
    %217 = arith.addf %187, %216 : vector<2x8xf32>
    %c2_176 = arith.constant 2 : index
    %c0_177 = arith.constant 0 : index
    %c0_178 = arith.constant 0 : index
    %218 = vector.load %arg28[%c2_176, %c0_177, %c0_178] : memref<3x1x8xf32, #tpu.memory_space<vmem>>, vector<1x1x8xf32>
    %219 = vector.shape_cast %218 : vector<1x1x8xf32> to vector<1x8xf32>
    %220 = vector.broadcast %219 : vector<1x8xf32> to vector<2x8xf32>
    %221 = arith.addf %217, %220 : vector<2x8xf32>
    %222 = arith.negf %221 : vector<2x8xf32>
    %223 = math.exp %222 : vector<2x8xf32>
    %cst_179 = arith.constant 1.000000e+00 : f32
    %224 = vector.broadcast %cst_179 : f32 to vector<2x8xf32>
    %225 = arith.addf %224, %223 : vector<2x8xf32>
    %226 = arith.divf %224, %225 : vector<2x8xf32>
    %227 = arith.mulf %213, %15 : vector<2x8xf32>
    %c0_180 = arith.constant 0 : index
    %c0_181 = arith.constant 0 : index
    %c0_182 = arith.constant 0 : index
    %228 = vector.load %arg27[%c0_180, %c0_181, %c0_182] : memref<3x8x8xf32, #tpu.memory_space<vmem>>, vector<1x8x8xf32>
    %229 = vector.shape_cast %228 : vector<1x8x8xf32> to vector<8x8xf32>
    %cst_183 = arith.constant dense<0.000000e+00> : vector<2x8xf32>
    %230 = tpu.matmul %227, %229, %cst_183 {dimension_numbers = #tpu.dot_dimension_numbers<[1], [0], [0], [1], [0, 0, 1, 1], [], []>} : vector<2x8xf32>, vector<8x8xf32>, vector<2x8xf32> -> vector<2x8xf32>
    %231 = arith.addf %165, %230 : vector<2x8xf32>
    %c0_184 = arith.constant 0 : index
    %c0_185 = arith.constant 0 : index
    %c0_186 = arith.constant 0 : index
    %232 = vector.load %arg28[%c0_184, %c0_185, %c0_186] : memref<3x1x8xf32, #tpu.memory_space<vmem>>, vector<1x1x8xf32>
    %233 = vector.shape_cast %232 : vector<1x1x8xf32> to vector<1x8xf32>
    %234 = vector.broadcast %233 : vector<1x8xf32> to vector<2x8xf32>
    %235 = arith.addf %231, %234 : vector<2x8xf32>
    %236 = arith.negf %235 : vector<2x8xf32>
    %237 = math.exp %236 : vector<2x8xf32>
    %cst_187 = arith.constant 1.000000e+00 : f32
    %238 = vector.broadcast %cst_187 : f32 to vector<2x8xf32>
    %239 = arith.addf %238, %237 : vector<2x8xf32>
    %240 = arith.divf %238, %239 : vector<2x8xf32>
    %241 = arith.mulf %213, %16 : vector<2x8xf32>
    %242 = arith.mulf %200, %240 : vector<2x8xf32>
    %243 = arith.addf %241, %242 : vector<2x8xf32>
    %244 = math.tanh %243 : vector<2x8xf32>
    %245 = arith.mulf %226, %244 : vector<2x8xf32>
    %c0_188 = arith.constant 0 : index
    %c0_189 = arith.constant 0 : index
    %c0_190 = arith.constant 0 : index
    %246 = vector.load %arg7[%c0_188, %c0_189, %c0_190] : memref<7x14x2xf32, #tpu.memory_space<vmem>>, vector<1x14x2xf32>
    %247 = vector.shape_cast %246 : vector<1x14x2xf32> to vector<14x2xf32>
    %cst_191 = arith.constant dense<0.000000e+00> : vector<14x8xf32>
    %248 = tpu.matmul %247, %243, %cst_191 {dimension_numbers = #tpu.dot_dimension_numbers<[1], [0], [0], [1], [0, 0, 1, 1], [], []>} : vector<14x2xf32>, vector<2x8xf32>, vector<14x8xf32> -> vector<14x8xf32>
    %249 = arith.addf %17, %248 : vector<14x8xf32>
    %c0_192 = arith.constant 0 : index
    %c0_193 = arith.constant 0 : index
    %c0_194 = arith.constant 0 : index
    %250 = vector.load %arg8[%c0_192, %c0_193, %c0_194] : memref<7x1x7xf32, #tpu.memory_space<vmem>>, vector<1x1x7xf32>
    %251 = vector.shape_cast %250 : vector<1x1x7xf32> to vector<1x7xf32>
    %252 = vector.broadcast %57 : vector<2x1xf32> to vector<2x7xf32>
    %253 = vector.broadcast %251 : vector<1x7xf32> to vector<2x7xf32>
    %254 = arith.mulf %252, %253 : vector<2x7xf32>
    %255 = arith.addf %18, %254 : vector<2x7xf32>
    %c1_195 = arith.constant 1 : index
    %c0_196 = arith.constant 0 : index
    %c0_197 = arith.constant 0 : index
    %256 = vector.load %arg0[%c1_195, %c0_196, %c0_197] : memref<8x8x1xf32, #tpu.memory_space<vmem>>, vector<1x8x1xf32>
    %257 = vector.shape_cast %256 : vector<1x8x1xf32> to vector<8x1xf32>
    %c1_198 = arith.constant 1 : index
    %c0_199 = arith.constant 0 : index
    %c0_200 = arith.constant 0 : index
    %258 = vector.load %arg1[%c1_198, %c0_199, %c0_200] : memref<8x1x8xf32, #tpu.memory_space<vmem>>, vector<1x1x8xf32>
    %259 = vector.shape_cast %258 : vector<1x1x8xf32> to vector<1x8xf32>
    %c2_201 = arith.constant 2 : index
    %c0_202 = arith.constant 0 : index
    %c0_203 = arith.constant 0 : index
    %260 = vector.load %arg0[%c2_201, %c0_202, %c0_203] : memref<8x8x1xf32, #tpu.memory_space<vmem>>, vector<1x8x1xf32>
    %261 = vector.shape_cast %260 : vector<1x8x1xf32> to vector<8x1xf32>
    %c2_204 = arith.constant 2 : index
    %c0_205 = arith.constant 0 : index
    %c0_206 = arith.constant 0 : index
    %262 = vector.load %arg1[%c2_204, %c0_205, %c0_206] : memref<8x1x8xf32, #tpu.memory_space<vmem>>, vector<1x1x8xf32>
    %263 = vector.shape_cast %262 : vector<1x1x8xf32> to vector<1x8xf32>
    %c2_207 = arith.constant 2 : index
    %c0_208 = arith.constant 0 : index
    %c0_209 = arith.constant 0 : index
    %264 = vector.load %arg2[%c2_207, %c0_208, %c0_209] : memref<8x2x4xf32, #tpu.memory_space<vmem>>, vector<1x2x4xf32>
    %265 = vector.shape_cast %264 : vector<1x2x4xf32> to vector<2x4xf32>
    %266 = vector.broadcast %257 : vector<8x1xf32> to vector<8x8xf32>
    %267 = vector.broadcast %263 : vector<1x8xf32> to vector<8x8xf32>
    %268 = arith.mulf %266, %267 : vector<8x8xf32>
    %269 = arith.mulf %268, %0 : vector<8x8xf32>
    %270 = vector.broadcast %261 : vector<8x1xf32> to vector<8x8xf32>
    %271 = vector.broadcast %259 : vector<1x8xf32> to vector<8x8xf32>
    %272 = arith.mulf %270, %271 : vector<8x8xf32>
    %273 = arith.mulf %272, %0 : vector<8x8xf32>
    %cst_210 = arith.constant dense<0.000000e+00> : vector<8x8xf32>
    %274 = tpu.matmul %269, %149, %cst_210 {dimension_numbers = #tpu.dot_dimension_numbers<[1], [0], [0], [1], [0, 0, 1, 1], [], []>} : vector<8x8xf32>, vector<8x8xf32>, vector<8x8xf32> -> vector<8x8xf32>
    %cst_211 = arith.constant dense<0.000000e+00> : vector<8x8xf32>
    %275 = tpu.matmul %274, %3, %cst_211 {dimension_numbers = #tpu.dot_dimension_numbers<[1], [0], [0], [1], [0, 0, 1, 1], [], []>} : vector<8x8xf32>, vector<8x8xf32>, vector<8x8xf32> -> vector<8x8xf32>
    %276 = vector.broadcast %4 : vector<1x8xf32> to vector<8x8xf32>
    %277 = arith.addf %275, %276 : vector<8x8xf32>
    %278 = math.tanh %277 : vector<8x8xf32>
    %cst_212 = arith.constant dense<0.000000e+00> : vector<8x8xf32>
    %279 = tpu.matmul %273, %149, %cst_212 {dimension_numbers = #tpu.dot_dimension_numbers<[1], [0], [0], [1], [0, 0, 1, 1], [], []>} : vector<8x8xf32>, vector<8x8xf32>, vector<8x8xf32> -> vector<8x8xf32>
    %cst_213 = arith.constant dense<0.000000e+00> : vector<8x8xf32>
    %280 = tpu.matmul %279, %5, %cst_213 {dimension_numbers = #tpu.dot_dimension_numbers<[1], [0], [0], [1], [0, 0, 1, 1], [], []>} : vector<8x8xf32>, vector<8x8xf32>, vector<8x8xf32> -> vector<8x8xf32>
    %281 = vector.broadcast %6 : vector<1x8xf32> to vector<8x8xf32>
    %282 = arith.addf %280, %281 : vector<8x8xf32>
    %283 = math.tanh %282 : vector<8x8xf32>
    %cst_214 = arith.constant dense<0.000000e+00> : vector<8x8xf32>
    %284 = tpu.matmul %278, %7, %cst_214 {dimension_numbers = #tpu.dot_dimension_numbers<[1], [0], [0], [1], [0, 0, 1, 1], [], []>} : vector<8x8xf32>, vector<8x8xf32>, vector<8x8xf32> -> vector<8x8xf32>
    %cst_215 = arith.constant dense<0.000000e+00> : vector<8x8xf32>
    %285 = tpu.matmul %283, %8, %cst_215 {dimension_numbers = #tpu.dot_dimension_numbers<[1], [0], [0], [1], [0, 0, 1, 1], [], []>} : vector<8x8xf32>, vector<8x8xf32>, vector<8x8xf32> -> vector<8x8xf32>
    %286 = arith.addf %284, %285 : vector<8x8xf32>
    %cst_216 = arith.constant dense<0.000000e+00> : vector<8x8xf32>
    %287 = tpu.matmul %278, %9, %cst_216 {dimension_numbers = #tpu.dot_dimension_numbers<[1], [0], [0], [1], [0, 0, 1, 1], [], []>} : vector<8x8xf32>, vector<8x8xf32>, vector<8x8xf32> -> vector<8x8xf32>
    %cst_217 = arith.constant dense<0.000000e+00> : vector<8x8xf32>
    %288 = tpu.matmul %283, %10, %cst_217 {dimension_numbers = #tpu.dot_dimension_numbers<[1], [0], [0], [1], [0, 0, 1, 1], [], []>} : vector<8x8xf32>, vector<8x8xf32>, vector<8x8xf32> -> vector<8x8xf32>
    %289 = arith.addf %287, %288 : vector<8x8xf32>
    %290 = arith.maximumf %286, %289 : vector<8x8xf32>
    %cst_218 = arith.constant dense<0.000000e+00> : vector<2x8xf32>
    %291 = tpu.matmul %1, %290, %cst_218 {dimension_numbers = #tpu.dot_dimension_numbers<[1], [0], [0], [1], [0, 0, 1, 1], [], []>} : vector<2x8xf32>, vector<8x8xf32>, vector<2x8xf32> -> vector<2x8xf32>
    %cst_219 = arith.constant dense<0.000000e+00> : vector<2x1xf32>
    %292 = tpu.matmul %291, %11, %cst_219 {dimension_numbers = #tpu.dot_dimension_numbers<[1], [0], [0], [1], [0, 0, 1, 1], [], []>} : vector<2x8xf32>, vector<8x1xf32>, vector<2x1xf32> -> vector<2x1xf32>
    %cst_220 = arith.constant dense<0.000000e+00> : vector<2x1xf32>
    %293 = tpu.matmul %243, %12, %cst_220 {dimension_numbers = #tpu.dot_dimension_numbers<[1], [0], [0], [1], [0, 0, 1, 1], [], []>} : vector<2x8xf32>, vector<8x1xf32>, vector<2x1xf32> -> vector<2x1xf32>
    %294 = arith.addf %292, %293 : vector<2x1xf32>
    %295 = vector.broadcast %294 : vector<2x1xf32> to vector<2x8xf32>
    %296 = arith.mulf %295, %243 : vector<2x8xf32>
    %cst_221 = arith.constant dense<0.000000e+00> : vector<8x8xf32>
    %297 = tpu.matmul %2, %296, %cst_221 {dimension_numbers = #tpu.dot_dimension_numbers<[1], [0], [0], [1], [0, 0, 1, 1], [], []>} : vector<8x2xf32>, vector<2x8xf32>, vector<8x8xf32> -> vector<8x8xf32>
    %c0_222 = arith.constant 0 : index
    %c0_223 = arith.constant 0 : index
    %c0_224 = arith.constant 0 : index
    %298 = vector.load %arg19[%c0_222, %c0_223, %c0_224] : memref<3x8x8xf32, #tpu.memory_space<vmem>>, vector<1x8x8xf32>
    %299 = vector.shape_cast %298 : vector<1x8x8xf32> to vector<8x8xf32>
    %cst_225 = arith.constant dense<0.000000e+00> : vector<8x8xf32>
    %300 = tpu.matmul %297, %299, %cst_225 {dimension_numbers = #tpu.dot_dimension_numbers<[1], [0], [0], [1], [0, 0, 1, 1], [], []>} : vector<8x8xf32>, vector<8x8xf32>, vector<8x8xf32> -> vector<8x8xf32>
    %c0_226 = arith.constant 0 : index
    %c0_227 = arith.constant 0 : index
    %c0_228 = arith.constant 0 : index
    %301 = vector.load %arg20[%c0_226, %c0_227, %c0_228] : memref<3x8x8xf32, #tpu.memory_space<vmem>>, vector<1x8x8xf32>
    %302 = vector.shape_cast %301 : vector<1x8x8xf32> to vector<8x8xf32>
    %cst_229 = arith.constant dense<0.000000e+00> : vector<8x8xf32>
    %303 = tpu.matmul %290, %302, %cst_229 {dimension_numbers = #tpu.dot_dimension_numbers<[1], [0], [0], [1], [0, 0, 1, 1], [], []>} : vector<8x8xf32>, vector<8x8xf32>, vector<8x8xf32> -> vector<8x8xf32>
    %304 = arith.addf %300, %303 : vector<8x8xf32>
    %c0_230 = arith.constant 0 : index
    %c0_231 = arith.constant 0 : index
    %c0_232 = arith.constant 0 : index
    %305 = vector.load %arg21[%c0_230, %c0_231, %c0_232] : memref<3x1x8xf32, #tpu.memory_space<vmem>>, vector<1x1x8xf32>
    %306 = vector.shape_cast %305 : vector<1x1x8xf32> to vector<1x8xf32>
    %307 = vector.broadcast %306 : vector<1x8xf32> to vector<8x8xf32>
    %308 = arith.addf %304, %307 : vector<8x8xf32>
    %c1_233 = arith.constant 1 : index
    %c0_234 = arith.constant 0 : index
    %c0_235 = arith.constant 0 : index
    %309 = vector.load %arg19[%c1_233, %c0_234, %c0_235] : memref<3x8x8xf32, #tpu.memory_space<vmem>>, vector<1x8x8xf32>
    %310 = vector.shape_cast %309 : vector<1x8x8xf32> to vector<8x8xf32>
    %cst_236 = arith.constant dense<0.000000e+00> : vector<8x8xf32>
    %311 = tpu.matmul %297, %310, %cst_236 {dimension_numbers = #tpu.dot_dimension_numbers<[1], [0], [0], [1], [0, 0, 1, 1], [], []>} : vector<8x8xf32>, vector<8x8xf32>, vector<8x8xf32> -> vector<8x8xf32>
    %c1_237 = arith.constant 1 : index
    %c0_238 = arith.constant 0 : index
    %c0_239 = arith.constant 0 : index
    %312 = vector.load %arg20[%c1_237, %c0_238, %c0_239] : memref<3x8x8xf32, #tpu.memory_space<vmem>>, vector<1x8x8xf32>
    %313 = vector.shape_cast %312 : vector<1x8x8xf32> to vector<8x8xf32>
    %cst_240 = arith.constant dense<0.000000e+00> : vector<8x8xf32>
    %314 = tpu.matmul %290, %313, %cst_240 {dimension_numbers = #tpu.dot_dimension_numbers<[1], [0], [0], [1], [0, 0, 1, 1], [], []>} : vector<8x8xf32>, vector<8x8xf32>, vector<8x8xf32> -> vector<8x8xf32>
    %315 = arith.addf %311, %314 : vector<8x8xf32>
    %c1_241 = arith.constant 1 : index
    %c0_242 = arith.constant 0 : index
    %c0_243 = arith.constant 0 : index
    %316 = vector.load %arg21[%c1_241, %c0_242, %c0_243] : memref<3x1x8xf32, #tpu.memory_space<vmem>>, vector<1x1x8xf32>
    %317 = vector.shape_cast %316 : vector<1x1x8xf32> to vector<1x8xf32>
    %318 = vector.broadcast %317 : vector<1x8xf32> to vector<8x8xf32>
    %319 = arith.addf %315, %318 : vector<8x8xf32>
    %c2_244 = arith.constant 2 : index
    %c0_245 = arith.constant 0 : index
    %c0_246 = arith.constant 0 : index
    %320 = vector.load %arg19[%c2_244, %c0_245, %c0_246] : memref<3x8x8xf32, #tpu.memory_space<vmem>>, vector<1x8x8xf32>
    %321 = vector.shape_cast %320 : vector<1x8x8xf32> to vector<8x8xf32>
    %cst_247 = arith.constant dense<0.000000e+00> : vector<8x8xf32>
    %322 = tpu.matmul %297, %321, %cst_247 {dimension_numbers = #tpu.dot_dimension_numbers<[1], [0], [0], [1], [0, 0, 1, 1], [], []>} : vector<8x8xf32>, vector<8x8xf32>, vector<8x8xf32> -> vector<8x8xf32>
    %c2_248 = arith.constant 2 : index
    %c0_249 = arith.constant 0 : index
    %c0_250 = arith.constant 0 : index
    %323 = vector.load %arg20[%c2_248, %c0_249, %c0_250] : memref<3x8x8xf32, #tpu.memory_space<vmem>>, vector<1x8x8xf32>
    %324 = vector.shape_cast %323 : vector<1x8x8xf32> to vector<8x8xf32>
    %cst_251 = arith.constant dense<0.000000e+00> : vector<8x8xf32>
    %325 = tpu.matmul %290, %324, %cst_251 {dimension_numbers = #tpu.dot_dimension_numbers<[1], [0], [0], [1], [0, 0, 1, 1], [], []>} : vector<8x8xf32>, vector<8x8xf32>, vector<8x8xf32> -> vector<8x8xf32>
    %326 = arith.addf %322, %325 : vector<8x8xf32>
    %c2_252 = arith.constant 2 : index
    %c0_253 = arith.constant 0 : index
    %c0_254 = arith.constant 0 : index
    %327 = vector.load %arg21[%c2_252, %c0_253, %c0_254] : memref<3x1x8xf32, #tpu.memory_space<vmem>>, vector<1x1x8xf32>
    %328 = vector.shape_cast %327 : vector<1x1x8xf32> to vector<1x8xf32>
    %329 = vector.broadcast %328 : vector<1x8xf32> to vector<8x8xf32>
    %330 = arith.addf %326, %329 : vector<8x8xf32>
    %c0_255 = arith.constant 0 : index
    %c0_256 = arith.constant 0 : index
    %c0_257 = arith.constant 0 : index
    %331 = vector.load %arg22[%c0_255, %c0_256, %c0_257] : memref<3x8x8xf32, #tpu.memory_space<vmem>>, vector<1x8x8xf32>
    %332 = vector.shape_cast %331 : vector<1x8x8xf32> to vector<8x8xf32>
    %cst_258 = arith.constant dense<0.000000e+00> : vector<8x8xf32>
    %333 = tpu.matmul %149, %332, %cst_258 {dimension_numbers = #tpu.dot_dimension_numbers<[1], [0], [0], [1], [0, 0, 1, 1], [], []>} : vector<8x8xf32>, vector<8x8xf32>, vector<8x8xf32> -> vector<8x8xf32>
    %334 = arith.addf %308, %333 : vector<8x8xf32>
    %c0_259 = arith.constant 0 : index
    %c0_260 = arith.constant 0 : index
    %c0_261 = arith.constant 0 : index
    %335 = vector.load %arg23[%c0_259, %c0_260, %c0_261] : memref<3x1x8xf32, #tpu.memory_space<vmem>>, vector<1x1x8xf32>
    %336 = vector.shape_cast %335 : vector<1x1x8xf32> to vector<1x8xf32>
    %337 = vector.broadcast %336 : vector<1x8xf32> to vector<8x8xf32>
    %338 = arith.addf %334, %337 : vector<8x8xf32>
    %339 = arith.negf %338 : vector<8x8xf32>
    %340 = math.exp %339 : vector<8x8xf32>
    %cst_262 = arith.constant 1.000000e+00 : f32
    %341 = vector.broadcast %cst_262 : f32 to vector<8x8xf32>
    %342 = arith.addf %341, %340 : vector<8x8xf32>
    %343 = arith.divf %341, %342 : vector<8x8xf32>
    %c1_263 = arith.constant 1 : index
    %c0_264 = arith.constant 0 : index
    %c0_265 = arith.constant 0 : index
    %344 = vector.load %arg22[%c1_263, %c0_264, %c0_265] : memref<3x8x8xf32, #tpu.memory_space<vmem>>, vector<1x8x8xf32>
    %345 = vector.shape_cast %344 : vector<1x8x8xf32> to vector<8x8xf32>
    %cst_266 = arith.constant dense<0.000000e+00> : vector<8x8xf32>
    %346 = tpu.matmul %149, %345, %cst_266 {dimension_numbers = #tpu.dot_dimension_numbers<[1], [0], [0], [1], [0, 0, 1, 1], [], []>} : vector<8x8xf32>, vector<8x8xf32>, vector<8x8xf32> -> vector<8x8xf32>
    %347 = arith.addf %319, %346 : vector<8x8xf32>
    %c1_267 = arith.constant 1 : index
    %c0_268 = arith.constant 0 : index
    %c0_269 = arith.constant 0 : index
    %348 = vector.load %arg23[%c1_267, %c0_268, %c0_269] : memref<3x1x8xf32, #tpu.memory_space<vmem>>, vector<1x1x8xf32>
    %349 = vector.shape_cast %348 : vector<1x1x8xf32> to vector<1x8xf32>
    %350 = vector.broadcast %349 : vector<1x8xf32> to vector<8x8xf32>
    %351 = arith.addf %347, %350 : vector<8x8xf32>
    %352 = arith.negf %351 : vector<8x8xf32>
    %353 = math.exp %352 : vector<8x8xf32>
    %cst_270 = arith.constant 1.000000e+00 : f32
    %354 = vector.broadcast %cst_270 : f32 to vector<8x8xf32>
    %355 = arith.addf %354, %353 : vector<8x8xf32>
    %356 = arith.divf %354, %355 : vector<8x8xf32>
    %c2_271 = arith.constant 2 : index
    %c0_272 = arith.constant 0 : index
    %c0_273 = arith.constant 0 : index
    %357 = vector.load %arg22[%c2_271, %c0_272, %c0_273] : memref<3x8x8xf32, #tpu.memory_space<vmem>>, vector<1x8x8xf32>
    %358 = vector.shape_cast %357 : vector<1x8x8xf32> to vector<8x8xf32>
    %cst_274 = arith.constant dense<0.000000e+00> : vector<8x8xf32>
    %359 = tpu.matmul %149, %358, %cst_274 {dimension_numbers = #tpu.dot_dimension_numbers<[1], [0], [0], [1], [0, 0, 1, 1], [], []>} : vector<8x8xf32>, vector<8x8xf32>, vector<8x8xf32> -> vector<8x8xf32>
    %360 = arith.addf %330, %359 : vector<8x8xf32>
    %c2_275 = arith.constant 2 : index
    %c0_276 = arith.constant 0 : index
    %c0_277 = arith.constant 0 : index
    %361 = vector.load %arg23[%c2_275, %c0_276, %c0_277] : memref<3x1x8xf32, #tpu.memory_space<vmem>>, vector<1x1x8xf32>
    %362 = vector.shape_cast %361 : vector<1x1x8xf32> to vector<1x8xf32>
    %363 = vector.broadcast %362 : vector<1x8xf32> to vector<8x8xf32>
    %364 = arith.addf %360, %363 : vector<8x8xf32>
    %365 = arith.negf %364 : vector<8x8xf32>
    %366 = math.exp %365 : vector<8x8xf32>
    %cst_278 = arith.constant 1.000000e+00 : f32
    %367 = vector.broadcast %cst_278 : f32 to vector<8x8xf32>
    %368 = arith.addf %367, %366 : vector<8x8xf32>
    %369 = arith.divf %367, %368 : vector<8x8xf32>
    %370 = arith.mulf %356, %149 : vector<8x8xf32>
    %c0_279 = arith.constant 0 : index
    %c0_280 = arith.constant 0 : index
    %c0_281 = arith.constant 0 : index
    %371 = vector.load %arg22[%c0_279, %c0_280, %c0_281] : memref<3x8x8xf32, #tpu.memory_space<vmem>>, vector<1x8x8xf32>
    %372 = vector.shape_cast %371 : vector<1x8x8xf32> to vector<8x8xf32>
    %cst_282 = arith.constant dense<0.000000e+00> : vector<8x8xf32>
    %373 = tpu.matmul %370, %372, %cst_282 {dimension_numbers = #tpu.dot_dimension_numbers<[1], [0], [0], [1], [0, 0, 1, 1], [], []>} : vector<8x8xf32>, vector<8x8xf32>, vector<8x8xf32> -> vector<8x8xf32>
    %374 = arith.addf %308, %373 : vector<8x8xf32>
    %c0_283 = arith.constant 0 : index
    %c0_284 = arith.constant 0 : index
    %c0_285 = arith.constant 0 : index
    %375 = vector.load %arg23[%c0_283, %c0_284, %c0_285] : memref<3x1x8xf32, #tpu.memory_space<vmem>>, vector<1x1x8xf32>
    %376 = vector.shape_cast %375 : vector<1x1x8xf32> to vector<1x8xf32>
    %377 = vector.broadcast %376 : vector<1x8xf32> to vector<8x8xf32>
    %378 = arith.addf %374, %377 : vector<8x8xf32>
    %379 = arith.negf %378 : vector<8x8xf32>
    %380 = math.exp %379 : vector<8x8xf32>
    %cst_286 = arith.constant 1.000000e+00 : f32
    %381 = vector.broadcast %cst_286 : f32 to vector<8x8xf32>
    %382 = arith.addf %381, %380 : vector<8x8xf32>
    %383 = arith.divf %381, %382 : vector<8x8xf32>
    %384 = arith.mulf %356, %151 : vector<8x8xf32>
    %385 = arith.mulf %343, %383 : vector<8x8xf32>
    %386 = arith.addf %384, %385 : vector<8x8xf32>
    %387 = math.tanh %386 : vector<8x8xf32>
    %388 = arith.mulf %369, %387 : vector<8x8xf32>
    %cst_287 = arith.constant dense<0.000000e+00> : vector<2x8xf32>
    %389 = tpu.matmul %1, %386, %cst_287 {dimension_numbers = #tpu.dot_dimension_numbers<[1], [0], [0], [1], [0, 0, 1, 1], [], []>} : vector<2x8xf32>, vector<8x8xf32>, vector<2x8xf32> -> vector<2x8xf32>
    %390 = vector.broadcast %294 : vector<2x1xf32> to vector<2x8xf32>
    %391 = arith.mulf %390, %389 : vector<2x8xf32>
    %c0_288 = arith.constant 0 : index
    %c0_289 = arith.constant 0 : index
    %c0_290 = arith.constant 0 : index
    %392 = vector.load %arg24[%c0_288, %c0_289, %c0_290] : memref<3x8x8xf32, #tpu.memory_space<vmem>>, vector<1x8x8xf32>
    %393 = vector.shape_cast %392 : vector<1x8x8xf32> to vector<8x8xf32>
    %cst_291 = arith.constant dense<0.000000e+00> : vector<2x8xf32>
    %394 = tpu.matmul %391, %393, %cst_291 {dimension_numbers = #tpu.dot_dimension_numbers<[1], [0], [0], [1], [0, 0, 1, 1], [], []>} : vector<2x8xf32>, vector<8x8xf32>, vector<2x8xf32> -> vector<2x8xf32>
    %c0_292 = arith.constant 0 : index
    %c0_293 = arith.constant 0 : index
    %c0_294 = arith.constant 0 : index
    %395 = vector.load %arg25[%c0_292, %c0_293, %c0_294] : memref<3x4x8xf32, #tpu.memory_space<vmem>>, vector<1x4x8xf32>
    %396 = vector.shape_cast %395 : vector<1x4x8xf32> to vector<4x8xf32>
    %cst_295 = arith.constant dense<0.000000e+00> : vector<2x8xf32>
    %397 = tpu.matmul %265, %396, %cst_295 {dimension_numbers = #tpu.dot_dimension_numbers<[1], [0], [0], [1], [0, 0, 1, 1], [], []>} : vector<2x4xf32>, vector<4x8xf32>, vector<2x8xf32> -> vector<2x8xf32>
    %398 = arith.addf %394, %397 : vector<2x8xf32>
    %c0_296 = arith.constant 0 : index
    %c0_297 = arith.constant 0 : index
    %c0_298 = arith.constant 0 : index
    %399 = vector.load %arg26[%c0_296, %c0_297, %c0_298] : memref<3x1x8xf32, #tpu.memory_space<vmem>>, vector<1x1x8xf32>
    %400 = vector.shape_cast %399 : vector<1x1x8xf32> to vector<1x8xf32>
    %401 = vector.broadcast %400 : vector<1x8xf32> to vector<2x8xf32>
    %402 = arith.addf %398, %401 : vector<2x8xf32>
    %c1_299 = arith.constant 1 : index
    %c0_300 = arith.constant 0 : index
    %c0_301 = arith.constant 0 : index
    %403 = vector.load %arg24[%c1_299, %c0_300, %c0_301] : memref<3x8x8xf32, #tpu.memory_space<vmem>>, vector<1x8x8xf32>
    %404 = vector.shape_cast %403 : vector<1x8x8xf32> to vector<8x8xf32>
    %cst_302 = arith.constant dense<0.000000e+00> : vector<2x8xf32>
    %405 = tpu.matmul %391, %404, %cst_302 {dimension_numbers = #tpu.dot_dimension_numbers<[1], [0], [0], [1], [0, 0, 1, 1], [], []>} : vector<2x8xf32>, vector<8x8xf32>, vector<2x8xf32> -> vector<2x8xf32>
    %c1_303 = arith.constant 1 : index
    %c0_304 = arith.constant 0 : index
    %c0_305 = arith.constant 0 : index
    %406 = vector.load %arg25[%c1_303, %c0_304, %c0_305] : memref<3x4x8xf32, #tpu.memory_space<vmem>>, vector<1x4x8xf32>
    %407 = vector.shape_cast %406 : vector<1x4x8xf32> to vector<4x8xf32>
    %cst_306 = arith.constant dense<0.000000e+00> : vector<2x8xf32>
    %408 = tpu.matmul %265, %407, %cst_306 {dimension_numbers = #tpu.dot_dimension_numbers<[1], [0], [0], [1], [0, 0, 1, 1], [], []>} : vector<2x4xf32>, vector<4x8xf32>, vector<2x8xf32> -> vector<2x8xf32>
    %409 = arith.addf %405, %408 : vector<2x8xf32>
    %c1_307 = arith.constant 1 : index
    %c0_308 = arith.constant 0 : index
    %c0_309 = arith.constant 0 : index
    %410 = vector.load %arg26[%c1_307, %c0_308, %c0_309] : memref<3x1x8xf32, #tpu.memory_space<vmem>>, vector<1x1x8xf32>
    %411 = vector.shape_cast %410 : vector<1x1x8xf32> to vector<1x8xf32>
    %412 = vector.broadcast %411 : vector<1x8xf32> to vector<2x8xf32>
    %413 = arith.addf %409, %412 : vector<2x8xf32>
    %c2_310 = arith.constant 2 : index
    %c0_311 = arith.constant 0 : index
    %c0_312 = arith.constant 0 : index
    %414 = vector.load %arg24[%c2_310, %c0_311, %c0_312] : memref<3x8x8xf32, #tpu.memory_space<vmem>>, vector<1x8x8xf32>
    %415 = vector.shape_cast %414 : vector<1x8x8xf32> to vector<8x8xf32>
    %cst_313 = arith.constant dense<0.000000e+00> : vector<2x8xf32>
    %416 = tpu.matmul %391, %415, %cst_313 {dimension_numbers = #tpu.dot_dimension_numbers<[1], [0], [0], [1], [0, 0, 1, 1], [], []>} : vector<2x8xf32>, vector<8x8xf32>, vector<2x8xf32> -> vector<2x8xf32>
    %c2_314 = arith.constant 2 : index
    %c0_315 = arith.constant 0 : index
    %c0_316 = arith.constant 0 : index
    %417 = vector.load %arg25[%c2_314, %c0_315, %c0_316] : memref<3x4x8xf32, #tpu.memory_space<vmem>>, vector<1x4x8xf32>
    %418 = vector.shape_cast %417 : vector<1x4x8xf32> to vector<4x8xf32>
    %cst_317 = arith.constant dense<0.000000e+00> : vector<2x8xf32>
    %419 = tpu.matmul %265, %418, %cst_317 {dimension_numbers = #tpu.dot_dimension_numbers<[1], [0], [0], [1], [0, 0, 1, 1], [], []>} : vector<2x4xf32>, vector<4x8xf32>, vector<2x8xf32> -> vector<2x8xf32>
    %420 = arith.addf %416, %419 : vector<2x8xf32>
    %c2_318 = arith.constant 2 : index
    %c0_319 = arith.constant 0 : index
    %c0_320 = arith.constant 0 : index
    %421 = vector.load %arg26[%c2_318, %c0_319, %c0_320] : memref<3x1x8xf32, #tpu.memory_space<vmem>>, vector<1x1x8xf32>
    %422 = vector.shape_cast %421 : vector<1x1x8xf32> to vector<1x8xf32>
    %423 = vector.broadcast %422 : vector<1x8xf32> to vector<2x8xf32>
    %424 = arith.addf %420, %423 : vector<2x8xf32>
    %c0_321 = arith.constant 0 : index
    %c0_322 = arith.constant 0 : index
    %c0_323 = arith.constant 0 : index
    %425 = vector.load %arg27[%c0_321, %c0_322, %c0_323] : memref<3x8x8xf32, #tpu.memory_space<vmem>>, vector<1x8x8xf32>
    %426 = vector.shape_cast %425 : vector<1x8x8xf32> to vector<8x8xf32>
    %cst_324 = arith.constant dense<0.000000e+00> : vector<2x8xf32>
    %427 = tpu.matmul %243, %426, %cst_324 {dimension_numbers = #tpu.dot_dimension_numbers<[1], [0], [0], [1], [0, 0, 1, 1], [], []>} : vector<2x8xf32>, vector<8x8xf32>, vector<2x8xf32> -> vector<2x8xf32>
    %428 = arith.addf %402, %427 : vector<2x8xf32>
    %c0_325 = arith.constant 0 : index
    %c0_326 = arith.constant 0 : index
    %c0_327 = arith.constant 0 : index
    %429 = vector.load %arg28[%c0_325, %c0_326, %c0_327] : memref<3x1x8xf32, #tpu.memory_space<vmem>>, vector<1x1x8xf32>
    %430 = vector.shape_cast %429 : vector<1x1x8xf32> to vector<1x8xf32>
    %431 = vector.broadcast %430 : vector<1x8xf32> to vector<2x8xf32>
    %432 = arith.addf %428, %431 : vector<2x8xf32>
    %433 = arith.negf %432 : vector<2x8xf32>
    %434 = math.exp %433 : vector<2x8xf32>
    %cst_328 = arith.constant 1.000000e+00 : f32
    %435 = vector.broadcast %cst_328 : f32 to vector<2x8xf32>
    %436 = arith.addf %435, %434 : vector<2x8xf32>
    %437 = arith.divf %435, %436 : vector<2x8xf32>
    %c1_329 = arith.constant 1 : index
    %c0_330 = arith.constant 0 : index
    %c0_331 = arith.constant 0 : index
    %438 = vector.load %arg27[%c1_329, %c0_330, %c0_331] : memref<3x8x8xf32, #tpu.memory_space<vmem>>, vector<1x8x8xf32>
    %439 = vector.shape_cast %438 : vector<1x8x8xf32> to vector<8x8xf32>
    %cst_332 = arith.constant dense<0.000000e+00> : vector<2x8xf32>
    %440 = tpu.matmul %243, %439, %cst_332 {dimension_numbers = #tpu.dot_dimension_numbers<[1], [0], [0], [1], [0, 0, 1, 1], [], []>} : vector<2x8xf32>, vector<8x8xf32>, vector<2x8xf32> -> vector<2x8xf32>
    %441 = arith.addf %413, %440 : vector<2x8xf32>
    %c1_333 = arith.constant 1 : index
    %c0_334 = arith.constant 0 : index
    %c0_335 = arith.constant 0 : index
    %442 = vector.load %arg28[%c1_333, %c0_334, %c0_335] : memref<3x1x8xf32, #tpu.memory_space<vmem>>, vector<1x1x8xf32>
    %443 = vector.shape_cast %442 : vector<1x1x8xf32> to vector<1x8xf32>
    %444 = vector.broadcast %443 : vector<1x8xf32> to vector<2x8xf32>
    %445 = arith.addf %441, %444 : vector<2x8xf32>
    %446 = arith.negf %445 : vector<2x8xf32>
    %447 = math.exp %446 : vector<2x8xf32>
    %cst_336 = arith.constant 1.000000e+00 : f32
    %448 = vector.broadcast %cst_336 : f32 to vector<2x8xf32>
    %449 = arith.addf %448, %447 : vector<2x8xf32>
    %450 = arith.divf %448, %449 : vector<2x8xf32>
    %c2_337 = arith.constant 2 : index
    %c0_338 = arith.constant 0 : index
    %c0_339 = arith.constant 0 : index
    %451 = vector.load %arg27[%c2_337, %c0_338, %c0_339] : memref<3x8x8xf32, #tpu.memory_space<vmem>>, vector<1x8x8xf32>
    %452 = vector.shape_cast %451 : vector<1x8x8xf32> to vector<8x8xf32>
    %cst_340 = arith.constant dense<0.000000e+00> : vector<2x8xf32>
    %453 = tpu.matmul %243, %452, %cst_340 {dimension_numbers = #tpu.dot_dimension_numbers<[1], [0], [0], [1], [0, 0, 1, 1], [], []>} : vector<2x8xf32>, vector<8x8xf32>, vector<2x8xf32> -> vector<2x8xf32>
    %454 = arith.addf %424, %453 : vector<2x8xf32>
    %c2_341 = arith.constant 2 : index
    %c0_342 = arith.constant 0 : index
    %c0_343 = arith.constant 0 : index
    %455 = vector.load %arg28[%c2_341, %c0_342, %c0_343] : memref<3x1x8xf32, #tpu.memory_space<vmem>>, vector<1x1x8xf32>
    %456 = vector.shape_cast %455 : vector<1x1x8xf32> to vector<1x8xf32>
    %457 = vector.broadcast %456 : vector<1x8xf32> to vector<2x8xf32>
    %458 = arith.addf %454, %457 : vector<2x8xf32>
    %459 = arith.negf %458 : vector<2x8xf32>
    %460 = math.exp %459 : vector<2x8xf32>
    %cst_344 = arith.constant 1.000000e+00 : f32
    %461 = vector.broadcast %cst_344 : f32 to vector<2x8xf32>
    %462 = arith.addf %461, %460 : vector<2x8xf32>
    %463 = arith.divf %461, %462 : vector<2x8xf32>
    %464 = arith.mulf %450, %243 : vector<2x8xf32>
    %c0_345 = arith.constant 0 : index
    %c0_346 = arith.constant 0 : index
    %c0_347 = arith.constant 0 : index
    %465 = vector.load %arg27[%c0_345, %c0_346, %c0_347] : memref<3x8x8xf32, #tpu.memory_space<vmem>>, vector<1x8x8xf32>
    %466 = vector.shape_cast %465 : vector<1x8x8xf32> to vector<8x8xf32>
    %cst_348 = arith.constant dense<0.000000e+00> : vector<2x8xf32>
    %467 = tpu.matmul %464, %466, %cst_348 {dimension_numbers = #tpu.dot_dimension_numbers<[1], [0], [0], [1], [0, 0, 1, 1], [], []>} : vector<2x8xf32>, vector<8x8xf32>, vector<2x8xf32> -> vector<2x8xf32>
    %468 = arith.addf %402, %467 : vector<2x8xf32>
    %c0_349 = arith.constant 0 : index
    %c0_350 = arith.constant 0 : index
    %c0_351 = arith.constant 0 : index
    %469 = vector.load %arg28[%c0_349, %c0_350, %c0_351] : memref<3x1x8xf32, #tpu.memory_space<vmem>>, vector<1x1x8xf32>
    %470 = vector.shape_cast %469 : vector<1x1x8xf32> to vector<1x8xf32>
    %471 = vector.broadcast %470 : vector<1x8xf32> to vector<2x8xf32>
    %472 = arith.addf %468, %471 : vector<2x8xf32>
    %473 = arith.negf %472 : vector<2x8xf32>
    %474 = math.exp %473 : vector<2x8xf32>
    %cst_352 = arith.constant 1.000000e+00 : f32
    %475 = vector.broadcast %cst_352 : f32 to vector<2x8xf32>
    %476 = arith.addf %475, %474 : vector<2x8xf32>
    %477 = arith.divf %475, %476 : vector<2x8xf32>
    %478 = arith.mulf %450, %245 : vector<2x8xf32>
    %479 = arith.mulf %437, %477 : vector<2x8xf32>
    %480 = arith.addf %478, %479 : vector<2x8xf32>
    %481 = math.tanh %480 : vector<2x8xf32>
    %482 = arith.mulf %463, %481 : vector<2x8xf32>
    %c1_353 = arith.constant 1 : index
    %c0_354 = arith.constant 0 : index
    %c0_355 = arith.constant 0 : index
    %483 = vector.load %arg7[%c1_353, %c0_354, %c0_355] : memref<7x14x2xf32, #tpu.memory_space<vmem>>, vector<1x14x2xf32>
    %484 = vector.shape_cast %483 : vector<1x14x2xf32> to vector<14x2xf32>
    %cst_356 = arith.constant dense<0.000000e+00> : vector<14x8xf32>
    %485 = tpu.matmul %484, %480, %cst_356 {dimension_numbers = #tpu.dot_dimension_numbers<[1], [0], [0], [1], [0, 0, 1, 1], [], []>} : vector<14x2xf32>, vector<2x8xf32>, vector<14x8xf32> -> vector<14x8xf32>
    %486 = arith.addf %249, %485 : vector<14x8xf32>
    %c1_357 = arith.constant 1 : index
    %c0_358 = arith.constant 0 : index
    %c0_359 = arith.constant 0 : index
    %487 = vector.load %arg8[%c1_357, %c0_358, %c0_359] : memref<7x1x7xf32, #tpu.memory_space<vmem>>, vector<1x1x7xf32>
    %488 = vector.shape_cast %487 : vector<1x1x7xf32> to vector<1x7xf32>
    %489 = vector.broadcast %294 : vector<2x1xf32> to vector<2x7xf32>
    %490 = vector.broadcast %488 : vector<1x7xf32> to vector<2x7xf32>
    %491 = arith.mulf %489, %490 : vector<2x7xf32>
    %492 = arith.addf %255, %491 : vector<2x7xf32>
    %c2_360 = arith.constant 2 : index
    %c0_361 = arith.constant 0 : index
    %c0_362 = arith.constant 0 : index
    %493 = vector.load %arg0[%c2_360, %c0_361, %c0_362] : memref<8x8x1xf32, #tpu.memory_space<vmem>>, vector<1x8x1xf32>
    %494 = vector.shape_cast %493 : vector<1x8x1xf32> to vector<8x1xf32>
    %c2_363 = arith.constant 2 : index
    %c0_364 = arith.constant 0 : index
    %c0_365 = arith.constant 0 : index
    %495 = vector.load %arg1[%c2_363, %c0_364, %c0_365] : memref<8x1x8xf32, #tpu.memory_space<vmem>>, vector<1x1x8xf32>
    %496 = vector.shape_cast %495 : vector<1x1x8xf32> to vector<1x8xf32>
    %c3 = arith.constant 3 : index
    %c0_366 = arith.constant 0 : index
    %c0_367 = arith.constant 0 : index
    %497 = vector.load %arg0[%c3, %c0_366, %c0_367] : memref<8x8x1xf32, #tpu.memory_space<vmem>>, vector<1x8x1xf32>
    %498 = vector.shape_cast %497 : vector<1x8x1xf32> to vector<8x1xf32>
    %c3_368 = arith.constant 3 : index
    %c0_369 = arith.constant 0 : index
    %c0_370 = arith.constant 0 : index
    %499 = vector.load %arg1[%c3_368, %c0_369, %c0_370] : memref<8x1x8xf32, #tpu.memory_space<vmem>>, vector<1x1x8xf32>
    %500 = vector.shape_cast %499 : vector<1x1x8xf32> to vector<1x8xf32>
    %c3_371 = arith.constant 3 : index
    %c0_372 = arith.constant 0 : index
    %c0_373 = arith.constant 0 : index
    %501 = vector.load %arg2[%c3_371, %c0_372, %c0_373] : memref<8x2x4xf32, #tpu.memory_space<vmem>>, vector<1x2x4xf32>
    %502 = vector.shape_cast %501 : vector<1x2x4xf32> to vector<2x4xf32>
    %503 = vector.broadcast %494 : vector<8x1xf32> to vector<8x8xf32>
    %504 = vector.broadcast %500 : vector<1x8xf32> to vector<8x8xf32>
    %505 = arith.mulf %503, %504 : vector<8x8xf32>
    %506 = arith.mulf %505, %0 : vector<8x8xf32>
    %507 = vector.broadcast %498 : vector<8x1xf32> to vector<8x8xf32>
    %508 = vector.broadcast %496 : vector<1x8xf32> to vector<8x8xf32>
    %509 = arith.mulf %507, %508 : vector<8x8xf32>
    %510 = arith.mulf %509, %0 : vector<8x8xf32>
    %cst_374 = arith.constant dense<0.000000e+00> : vector<8x8xf32>
    %511 = tpu.matmul %506, %386, %cst_374 {dimension_numbers = #tpu.dot_dimension_numbers<[1], [0], [0], [1], [0, 0, 1, 1], [], []>} : vector<8x8xf32>, vector<8x8xf32>, vector<8x8xf32> -> vector<8x8xf32>
    %cst_375 = arith.constant dense<0.000000e+00> : vector<8x8xf32>
    %512 = tpu.matmul %511, %3, %cst_375 {dimension_numbers = #tpu.dot_dimension_numbers<[1], [0], [0], [1], [0, 0, 1, 1], [], []>} : vector<8x8xf32>, vector<8x8xf32>, vector<8x8xf32> -> vector<8x8xf32>
    %513 = vector.broadcast %4 : vector<1x8xf32> to vector<8x8xf32>
    %514 = arith.addf %512, %513 : vector<8x8xf32>
    %515 = math.tanh %514 : vector<8x8xf32>
    %cst_376 = arith.constant dense<0.000000e+00> : vector<8x8xf32>
    %516 = tpu.matmul %510, %386, %cst_376 {dimension_numbers = #tpu.dot_dimension_numbers<[1], [0], [0], [1], [0, 0, 1, 1], [], []>} : vector<8x8xf32>, vector<8x8xf32>, vector<8x8xf32> -> vector<8x8xf32>
    %cst_377 = arith.constant dense<0.000000e+00> : vector<8x8xf32>
    %517 = tpu.matmul %516, %5, %cst_377 {dimension_numbers = #tpu.dot_dimension_numbers<[1], [0], [0], [1], [0, 0, 1, 1], [], []>} : vector<8x8xf32>, vector<8x8xf32>, vector<8x8xf32> -> vector<8x8xf32>
    %518 = vector.broadcast %6 : vector<1x8xf32> to vector<8x8xf32>
    %519 = arith.addf %517, %518 : vector<8x8xf32>
    %520 = math.tanh %519 : vector<8x8xf32>
    %cst_378 = arith.constant dense<0.000000e+00> : vector<8x8xf32>
    %521 = tpu.matmul %515, %7, %cst_378 {dimension_numbers = #tpu.dot_dimension_numbers<[1], [0], [0], [1], [0, 0, 1, 1], [], []>} : vector<8x8xf32>, vector<8x8xf32>, vector<8x8xf32> -> vector<8x8xf32>
    %cst_379 = arith.constant dense<0.000000e+00> : vector<8x8xf32>
    %522 = tpu.matmul %520, %8, %cst_379 {dimension_numbers = #tpu.dot_dimension_numbers<[1], [0], [0], [1], [0, 0, 1, 1], [], []>} : vector<8x8xf32>, vector<8x8xf32>, vector<8x8xf32> -> vector<8x8xf32>
    %523 = arith.addf %521, %522 : vector<8x8xf32>
    %cst_380 = arith.constant dense<0.000000e+00> : vector<8x8xf32>
    %524 = tpu.matmul %515, %9, %cst_380 {dimension_numbers = #tpu.dot_dimension_numbers<[1], [0], [0], [1], [0, 0, 1, 1], [], []>} : vector<8x8xf32>, vector<8x8xf32>, vector<8x8xf32> -> vector<8x8xf32>
    %cst_381 = arith.constant dense<0.000000e+00> : vector<8x8xf32>
    %525 = tpu.matmul %520, %10, %cst_381 {dimension_numbers = #tpu.dot_dimension_numbers<[1], [0], [0], [1], [0, 0, 1, 1], [], []>} : vector<8x8xf32>, vector<8x8xf32>, vector<8x8xf32> -> vector<8x8xf32>
    %526 = arith.addf %524, %525 : vector<8x8xf32>
    %527 = arith.maximumf %523, %526 : vector<8x8xf32>
    %cst_382 = arith.constant dense<0.000000e+00> : vector<2x8xf32>
    %528 = tpu.matmul %1, %527, %cst_382 {dimension_numbers = #tpu.dot_dimension_numbers<[1], [0], [0], [1], [0, 0, 1, 1], [], []>} : vector<2x8xf32>, vector<8x8xf32>, vector<2x8xf32> -> vector<2x8xf32>
    %cst_383 = arith.constant dense<0.000000e+00> : vector<2x1xf32>
    %529 = tpu.matmul %528, %11, %cst_383 {dimension_numbers = #tpu.dot_dimension_numbers<[1], [0], [0], [1], [0, 0, 1, 1], [], []>} : vector<2x8xf32>, vector<8x1xf32>, vector<2x1xf32> -> vector<2x1xf32>
    %cst_384 = arith.constant dense<0.000000e+00> : vector<2x1xf32>
    %530 = tpu.matmul %480, %12, %cst_384 {dimension_numbers = #tpu.dot_dimension_numbers<[1], [0], [0], [1], [0, 0, 1, 1], [], []>} : vector<2x8xf32>, vector<8x1xf32>, vector<2x1xf32> -> vector<2x1xf32>
    %531 = arith.addf %529, %530 : vector<2x1xf32>
    %532 = vector.broadcast %531 : vector<2x1xf32> to vector<2x8xf32>
    %533 = arith.mulf %532, %480 : vector<2x8xf32>
    %cst_385 = arith.constant dense<0.000000e+00> : vector<8x8xf32>
    %534 = tpu.matmul %2, %533, %cst_385 {dimension_numbers = #tpu.dot_dimension_numbers<[1], [0], [0], [1], [0, 0, 1, 1], [], []>} : vector<8x2xf32>, vector<2x8xf32>, vector<8x8xf32> -> vector<8x8xf32>
    %c0_386 = arith.constant 0 : index
    %c0_387 = arith.constant 0 : index
    %c0_388 = arith.constant 0 : index
    %535 = vector.load %arg19[%c0_386, %c0_387, %c0_388] : memref<3x8x8xf32, #tpu.memory_space<vmem>>, vector<1x8x8xf32>
    %536 = vector.shape_cast %535 : vector<1x8x8xf32> to vector<8x8xf32>
    %cst_389 = arith.constant dense<0.000000e+00> : vector<8x8xf32>
    %537 = tpu.matmul %534, %536, %cst_389 {dimension_numbers = #tpu.dot_dimension_numbers<[1], [0], [0], [1], [0, 0, 1, 1], [], []>} : vector<8x8xf32>, vector<8x8xf32>, vector<8x8xf32> -> vector<8x8xf32>
    %c0_390 = arith.constant 0 : index
    %c0_391 = arith.constant 0 : index
    %c0_392 = arith.constant 0 : index
    %538 = vector.load %arg20[%c0_390, %c0_391, %c0_392] : memref<3x8x8xf32, #tpu.memory_space<vmem>>, vector<1x8x8xf32>
    %539 = vector.shape_cast %538 : vector<1x8x8xf32> to vector<8x8xf32>
    %cst_393 = arith.constant dense<0.000000e+00> : vector<8x8xf32>
    %540 = tpu.matmul %527, %539, %cst_393 {dimension_numbers = #tpu.dot_dimension_numbers<[1], [0], [0], [1], [0, 0, 1, 1], [], []>} : vector<8x8xf32>, vector<8x8xf32>, vector<8x8xf32> -> vector<8x8xf32>
    %541 = arith.addf %537, %540 : vector<8x8xf32>
    %c0_394 = arith.constant 0 : index
    %c0_395 = arith.constant 0 : index
    %c0_396 = arith.constant 0 : index
    %542 = vector.load %arg21[%c0_394, %c0_395, %c0_396] : memref<3x1x8xf32, #tpu.memory_space<vmem>>, vector<1x1x8xf32>
    %543 = vector.shape_cast %542 : vector<1x1x8xf32> to vector<1x8xf32>
    %544 = vector.broadcast %543 : vector<1x8xf32> to vector<8x8xf32>
    %545 = arith.addf %541, %544 : vector<8x8xf32>
    %c1_397 = arith.constant 1 : index
    %c0_398 = arith.constant 0 : index
    %c0_399 = arith.constant 0 : index
    %546 = vector.load %arg19[%c1_397, %c0_398, %c0_399] : memref<3x8x8xf32, #tpu.memory_space<vmem>>, vector<1x8x8xf32>
    %547 = vector.shape_cast %546 : vector<1x8x8xf32> to vector<8x8xf32>
    %cst_400 = arith.constant dense<0.000000e+00> : vector<8x8xf32>
    %548 = tpu.matmul %534, %547, %cst_400 {dimension_numbers = #tpu.dot_dimension_numbers<[1], [0], [0], [1], [0, 0, 1, 1], [], []>} : vector<8x8xf32>, vector<8x8xf32>, vector<8x8xf32> -> vector<8x8xf32>
    %c1_401 = arith.constant 1 : index
    %c0_402 = arith.constant 0 : index
    %c0_403 = arith.constant 0 : index
    %549 = vector.load %arg20[%c1_401, %c0_402, %c0_403] : memref<3x8x8xf32, #tpu.memory_space<vmem>>, vector<1x8x8xf32>
    %550 = vector.shape_cast %549 : vector<1x8x8xf32> to vector<8x8xf32>
    %cst_404 = arith.constant dense<0.000000e+00> : vector<8x8xf32>
    %551 = tpu.matmul %527, %550, %cst_404 {dimension_numbers = #tpu.dot_dimension_numbers<[1], [0], [0], [1], [0, 0, 1, 1], [], []>} : vector<8x8xf32>, vector<8x8xf32>, vector<8x8xf32> -> vector<8x8xf32>
    %552 = arith.addf %548, %551 : vector<8x8xf32>
    %c1_405 = arith.constant 1 : index
    %c0_406 = arith.constant 0 : index
    %c0_407 = arith.constant 0 : index
    %553 = vector.load %arg21[%c1_405, %c0_406, %c0_407] : memref<3x1x8xf32, #tpu.memory_space<vmem>>, vector<1x1x8xf32>
    %554 = vector.shape_cast %553 : vector<1x1x8xf32> to vector<1x8xf32>
    %555 = vector.broadcast %554 : vector<1x8xf32> to vector<8x8xf32>
    %556 = arith.addf %552, %555 : vector<8x8xf32>
    %c2_408 = arith.constant 2 : index
    %c0_409 = arith.constant 0 : index
    %c0_410 = arith.constant 0 : index
    %557 = vector.load %arg19[%c2_408, %c0_409, %c0_410] : memref<3x8x8xf32, #tpu.memory_space<vmem>>, vector<1x8x8xf32>
    %558 = vector.shape_cast %557 : vector<1x8x8xf32> to vector<8x8xf32>
    %cst_411 = arith.constant dense<0.000000e+00> : vector<8x8xf32>
    %559 = tpu.matmul %534, %558, %cst_411 {dimension_numbers = #tpu.dot_dimension_numbers<[1], [0], [0], [1], [0, 0, 1, 1], [], []>} : vector<8x8xf32>, vector<8x8xf32>, vector<8x8xf32> -> vector<8x8xf32>
    %c2_412 = arith.constant 2 : index
    %c0_413 = arith.constant 0 : index
    %c0_414 = arith.constant 0 : index
    %560 = vector.load %arg20[%c2_412, %c0_413, %c0_414] : memref<3x8x8xf32, #tpu.memory_space<vmem>>, vector<1x8x8xf32>
    %561 = vector.shape_cast %560 : vector<1x8x8xf32> to vector<8x8xf32>
    %cst_415 = arith.constant dense<0.000000e+00> : vector<8x8xf32>
    %562 = tpu.matmul %527, %561, %cst_415 {dimension_numbers = #tpu.dot_dimension_numbers<[1], [0], [0], [1], [0, 0, 1, 1], [], []>} : vector<8x8xf32>, vector<8x8xf32>, vector<8x8xf32> -> vector<8x8xf32>
    %563 = arith.addf %559, %562 : vector<8x8xf32>
    %c2_416 = arith.constant 2 : index
    %c0_417 = arith.constant 0 : index
    %c0_418 = arith.constant 0 : index
    %564 = vector.load %arg21[%c2_416, %c0_417, %c0_418] : memref<3x1x8xf32, #tpu.memory_space<vmem>>, vector<1x1x8xf32>
    %565 = vector.shape_cast %564 : vector<1x1x8xf32> to vector<1x8xf32>
    %566 = vector.broadcast %565 : vector<1x8xf32> to vector<8x8xf32>
    %567 = arith.addf %563, %566 : vector<8x8xf32>
    %c0_419 = arith.constant 0 : index
    %c0_420 = arith.constant 0 : index
    %c0_421 = arith.constant 0 : index
    %568 = vector.load %arg22[%c0_419, %c0_420, %c0_421] : memref<3x8x8xf32, #tpu.memory_space<vmem>>, vector<1x8x8xf32>
    %569 = vector.shape_cast %568 : vector<1x8x8xf32> to vector<8x8xf32>
    %cst_422 = arith.constant dense<0.000000e+00> : vector<8x8xf32>
    %570 = tpu.matmul %386, %569, %cst_422 {dimension_numbers = #tpu.dot_dimension_numbers<[1], [0], [0], [1], [0, 0, 1, 1], [], []>} : vector<8x8xf32>, vector<8x8xf32>, vector<8x8xf32> -> vector<8x8xf32>
    %571 = arith.addf %545, %570 : vector<8x8xf32>
    %c0_423 = arith.constant 0 : index
    %c0_424 = arith.constant 0 : index
    %c0_425 = arith.constant 0 : index
    %572 = vector.load %arg23[%c0_423, %c0_424, %c0_425] : memref<3x1x8xf32, #tpu.memory_space<vmem>>, vector<1x1x8xf32>
    %573 = vector.shape_cast %572 : vector<1x1x8xf32> to vector<1x8xf32>
    %574 = vector.broadcast %573 : vector<1x8xf32> to vector<8x8xf32>
    %575 = arith.addf %571, %574 : vector<8x8xf32>
    %576 = arith.negf %575 : vector<8x8xf32>
    %577 = math.exp %576 : vector<8x8xf32>
    %cst_426 = arith.constant 1.000000e+00 : f32
    %578 = vector.broadcast %cst_426 : f32 to vector<8x8xf32>
    %579 = arith.addf %578, %577 : vector<8x8xf32>
    %580 = arith.divf %578, %579 : vector<8x8xf32>
    %c1_427 = arith.constant 1 : index
    %c0_428 = arith.constant 0 : index
    %c0_429 = arith.constant 0 : index
    %581 = vector.load %arg22[%c1_427, %c0_428, %c0_429] : memref<3x8x8xf32, #tpu.memory_space<vmem>>, vector<1x8x8xf32>
    %582 = vector.shape_cast %581 : vector<1x8x8xf32> to vector<8x8xf32>
    %cst_430 = arith.constant dense<0.000000e+00> : vector<8x8xf32>
    %583 = tpu.matmul %386, %582, %cst_430 {dimension_numbers = #tpu.dot_dimension_numbers<[1], [0], [0], [1], [0, 0, 1, 1], [], []>} : vector<8x8xf32>, vector<8x8xf32>, vector<8x8xf32> -> vector<8x8xf32>
    %584 = arith.addf %556, %583 : vector<8x8xf32>
    %c1_431 = arith.constant 1 : index
    %c0_432 = arith.constant 0 : index
    %c0_433 = arith.constant 0 : index
    %585 = vector.load %arg23[%c1_431, %c0_432, %c0_433] : memref<3x1x8xf32, #tpu.memory_space<vmem>>, vector<1x1x8xf32>
    %586 = vector.shape_cast %585 : vector<1x1x8xf32> to vector<1x8xf32>
    %587 = vector.broadcast %586 : vector<1x8xf32> to vector<8x8xf32>
    %588 = arith.addf %584, %587 : vector<8x8xf32>
    %589 = arith.negf %588 : vector<8x8xf32>
    %590 = math.exp %589 : vector<8x8xf32>
    %cst_434 = arith.constant 1.000000e+00 : f32
    %591 = vector.broadcast %cst_434 : f32 to vector<8x8xf32>
    %592 = arith.addf %591, %590 : vector<8x8xf32>
    %593 = arith.divf %591, %592 : vector<8x8xf32>
    %c2_435 = arith.constant 2 : index
    %c0_436 = arith.constant 0 : index
    %c0_437 = arith.constant 0 : index
    %594 = vector.load %arg22[%c2_435, %c0_436, %c0_437] : memref<3x8x8xf32, #tpu.memory_space<vmem>>, vector<1x8x8xf32>
    %595 = vector.shape_cast %594 : vector<1x8x8xf32> to vector<8x8xf32>
    %cst_438 = arith.constant dense<0.000000e+00> : vector<8x8xf32>
    %596 = tpu.matmul %386, %595, %cst_438 {dimension_numbers = #tpu.dot_dimension_numbers<[1], [0], [0], [1], [0, 0, 1, 1], [], []>} : vector<8x8xf32>, vector<8x8xf32>, vector<8x8xf32> -> vector<8x8xf32>
    %597 = arith.addf %567, %596 : vector<8x8xf32>
    %c2_439 = arith.constant 2 : index
    %c0_440 = arith.constant 0 : index
    %c0_441 = arith.constant 0 : index
    %598 = vector.load %arg23[%c2_439, %c0_440, %c0_441] : memref<3x1x8xf32, #tpu.memory_space<vmem>>, vector<1x1x8xf32>
    %599 = vector.shape_cast %598 : vector<1x1x8xf32> to vector<1x8xf32>
    %600 = vector.broadcast %599 : vector<1x8xf32> to vector<8x8xf32>
    %601 = arith.addf %597, %600 : vector<8x8xf32>
    %602 = arith.negf %601 : vector<8x8xf32>
    %603 = math.exp %602 : vector<8x8xf32>
    %cst_442 = arith.constant 1.000000e+00 : f32
    %604 = vector.broadcast %cst_442 : f32 to vector<8x8xf32>
    %605 = arith.addf %604, %603 : vector<8x8xf32>
    %606 = arith.divf %604, %605 : vector<8x8xf32>
    %607 = arith.mulf %593, %386 : vector<8x8xf32>
    %c0_443 = arith.constant 0 : index
    %c0_444 = arith.constant 0 : index
    %c0_445 = arith.constant 0 : index
    %608 = vector.load %arg22[%c0_443, %c0_444, %c0_445] : memref<3x8x8xf32, #tpu.memory_space<vmem>>, vector<1x8x8xf32>
    %609 = vector.shape_cast %608 : vector<1x8x8xf32> to vector<8x8xf32>
    %cst_446 = arith.constant dense<0.000000e+00> : vector<8x8xf32>
    %610 = tpu.matmul %607, %609, %cst_446 {dimension_numbers = #tpu.dot_dimension_numbers<[1], [0], [0], [1], [0, 0, 1, 1], [], []>} : vector<8x8xf32>, vector<8x8xf32>, vector<8x8xf32> -> vector<8x8xf32>
    %611 = arith.addf %545, %610 : vector<8x8xf32>
    %c0_447 = arith.constant 0 : index
    %c0_448 = arith.constant 0 : index
    %c0_449 = arith.constant 0 : index
    %612 = vector.load %arg23[%c0_447, %c0_448, %c0_449] : memref<3x1x8xf32, #tpu.memory_space<vmem>>, vector<1x1x8xf32>
    %613 = vector.shape_cast %612 : vector<1x1x8xf32> to vector<1x8xf32>
    %614 = vector.broadcast %613 : vector<1x8xf32> to vector<8x8xf32>
    %615 = arith.addf %611, %614 : vector<8x8xf32>
    %616 = arith.negf %615 : vector<8x8xf32>
    %617 = math.exp %616 : vector<8x8xf32>
    %cst_450 = arith.constant 1.000000e+00 : f32
    %618 = vector.broadcast %cst_450 : f32 to vector<8x8xf32>
    %619 = arith.addf %618, %617 : vector<8x8xf32>
    %620 = arith.divf %618, %619 : vector<8x8xf32>
    %621 = arith.mulf %593, %388 : vector<8x8xf32>
    %622 = arith.mulf %580, %620 : vector<8x8xf32>
    %623 = arith.addf %621, %622 : vector<8x8xf32>
    %624 = math.tanh %623 : vector<8x8xf32>
    %625 = arith.mulf %606, %624 : vector<8x8xf32>
    %cst_451 = arith.constant dense<0.000000e+00> : vector<2x8xf32>
    %626 = tpu.matmul %1, %623, %cst_451 {dimension_numbers = #tpu.dot_dimension_numbers<[1], [0], [0], [1], [0, 0, 1, 1], [], []>} : vector<2x8xf32>, vector<8x8xf32>, vector<2x8xf32> -> vector<2x8xf32>
    %627 = vector.broadcast %531 : vector<2x1xf32> to vector<2x8xf32>
    %628 = arith.mulf %627, %626 : vector<2x8xf32>
    %c0_452 = arith.constant 0 : index
    %c0_453 = arith.constant 0 : index
    %c0_454 = arith.constant 0 : index
    %629 = vector.load %arg24[%c0_452, %c0_453, %c0_454] : memref<3x8x8xf32, #tpu.memory_space<vmem>>, vector<1x8x8xf32>
    %630 = vector.shape_cast %629 : vector<1x8x8xf32> to vector<8x8xf32>
    %cst_455 = arith.constant dense<0.000000e+00> : vector<2x8xf32>
    %631 = tpu.matmul %628, %630, %cst_455 {dimension_numbers = #tpu.dot_dimension_numbers<[1], [0], [0], [1], [0, 0, 1, 1], [], []>} : vector<2x8xf32>, vector<8x8xf32>, vector<2x8xf32> -> vector<2x8xf32>
    %c0_456 = arith.constant 0 : index
    %c0_457 = arith.constant 0 : index
    %c0_458 = arith.constant 0 : index
    %632 = vector.load %arg25[%c0_456, %c0_457, %c0_458] : memref<3x4x8xf32, #tpu.memory_space<vmem>>, vector<1x4x8xf32>
    %633 = vector.shape_cast %632 : vector<1x4x8xf32> to vector<4x8xf32>
    %cst_459 = arith.constant dense<0.000000e+00> : vector<2x8xf32>
    %634 = tpu.matmul %502, %633, %cst_459 {dimension_numbers = #tpu.dot_dimension_numbers<[1], [0], [0], [1], [0, 0, 1, 1], [], []>} : vector<2x4xf32>, vector<4x8xf32>, vector<2x8xf32> -> vector<2x8xf32>
    %635 = arith.addf %631, %634 : vector<2x8xf32>
    %c0_460 = arith.constant 0 : index
    %c0_461 = arith.constant 0 : index
    %c0_462 = arith.constant 0 : index
    %636 = vector.load %arg26[%c0_460, %c0_461, %c0_462] : memref<3x1x8xf32, #tpu.memory_space<vmem>>, vector<1x1x8xf32>
    %637 = vector.shape_cast %636 : vector<1x1x8xf32> to vector<1x8xf32>
    %638 = vector.broadcast %637 : vector<1x8xf32> to vector<2x8xf32>
    %639 = arith.addf %635, %638 : vector<2x8xf32>
    %c1_463 = arith.constant 1 : index
    %c0_464 = arith.constant 0 : index
    %c0_465 = arith.constant 0 : index
    %640 = vector.load %arg24[%c1_463, %c0_464, %c0_465] : memref<3x8x8xf32, #tpu.memory_space<vmem>>, vector<1x8x8xf32>
    %641 = vector.shape_cast %640 : vector<1x8x8xf32> to vector<8x8xf32>
    %cst_466 = arith.constant dense<0.000000e+00> : vector<2x8xf32>
    %642 = tpu.matmul %628, %641, %cst_466 {dimension_numbers = #tpu.dot_dimension_numbers<[1], [0], [0], [1], [0, 0, 1, 1], [], []>} : vector<2x8xf32>, vector<8x8xf32>, vector<2x8xf32> -> vector<2x8xf32>
    %c1_467 = arith.constant 1 : index
    %c0_468 = arith.constant 0 : index
    %c0_469 = arith.constant 0 : index
    %643 = vector.load %arg25[%c1_467, %c0_468, %c0_469] : memref<3x4x8xf32, #tpu.memory_space<vmem>>, vector<1x4x8xf32>
    %644 = vector.shape_cast %643 : vector<1x4x8xf32> to vector<4x8xf32>
    %cst_470 = arith.constant dense<0.000000e+00> : vector<2x8xf32>
    %645 = tpu.matmul %502, %644, %cst_470 {dimension_numbers = #tpu.dot_dimension_numbers<[1], [0], [0], [1], [0, 0, 1, 1], [], []>} : vector<2x4xf32>, vector<4x8xf32>, vector<2x8xf32> -> vector<2x8xf32>
    %646 = arith.addf %642, %645 : vector<2x8xf32>
    %c1_471 = arith.constant 1 : index
    %c0_472 = arith.constant 0 : index
    %c0_473 = arith.constant 0 : index
    %647 = vector.load %arg26[%c1_471, %c0_472, %c0_473] : memref<3x1x8xf32, #tpu.memory_space<vmem>>, vector<1x1x8xf32>
    %648 = vector.shape_cast %647 : vector<1x1x8xf32> to vector<1x8xf32>
    %649 = vector.broadcast %648 : vector<1x8xf32> to vector<2x8xf32>
    %650 = arith.addf %646, %649 : vector<2x8xf32>
    %c2_474 = arith.constant 2 : index
    %c0_475 = arith.constant 0 : index
    %c0_476 = arith.constant 0 : index
    %651 = vector.load %arg24[%c2_474, %c0_475, %c0_476] : memref<3x8x8xf32, #tpu.memory_space<vmem>>, vector<1x8x8xf32>
    %652 = vector.shape_cast %651 : vector<1x8x8xf32> to vector<8x8xf32>
    %cst_477 = arith.constant dense<0.000000e+00> : vector<2x8xf32>
    %653 = tpu.matmul %628, %652, %cst_477 {dimension_numbers = #tpu.dot_dimension_numbers<[1], [0], [0], [1], [0, 0, 1, 1], [], []>} : vector<2x8xf32>, vector<8x8xf32>, vector<2x8xf32> -> vector<2x8xf32>
    %c2_478 = arith.constant 2 : index
    %c0_479 = arith.constant 0 : index
    %c0_480 = arith.constant 0 : index
    %654 = vector.load %arg25[%c2_478, %c0_479, %c0_480] : memref<3x4x8xf32, #tpu.memory_space<vmem>>, vector<1x4x8xf32>
    %655 = vector.shape_cast %654 : vector<1x4x8xf32> to vector<4x8xf32>
    %cst_481 = arith.constant dense<0.000000e+00> : vector<2x8xf32>
    %656 = tpu.matmul %502, %655, %cst_481 {dimension_numbers = #tpu.dot_dimension_numbers<[1], [0], [0], [1], [0, 0, 1, 1], [], []>} : vector<2x4xf32>, vector<4x8xf32>, vector<2x8xf32> -> vector<2x8xf32>
    %657 = arith.addf %653, %656 : vector<2x8xf32>
    %c2_482 = arith.constant 2 : index
    %c0_483 = arith.constant 0 : index
    %c0_484 = arith.constant 0 : index
    %658 = vector.load %arg26[%c2_482, %c0_483, %c0_484] : memref<3x1x8xf32, #tpu.memory_space<vmem>>, vector<1x1x8xf32>
    %659 = vector.shape_cast %658 : vector<1x1x8xf32> to vector<1x8xf32>
    %660 = vector.broadcast %659 : vector<1x8xf32> to vector<2x8xf32>
    %661 = arith.addf %657, %660 : vector<2x8xf32>
    %c0_485 = arith.constant 0 : index
    %c0_486 = arith.constant 0 : index
    %c0_487 = arith.constant 0 : index
    %662 = vector.load %arg27[%c0_485, %c0_486, %c0_487] : memref<3x8x8xf32, #tpu.memory_space<vmem>>, vector<1x8x8xf32>
    %663 = vector.shape_cast %662 : vector<1x8x8xf32> to vector<8x8xf32>
    %cst_488 = arith.constant dense<0.000000e+00> : vector<2x8xf32>
    %664 = tpu.matmul %480, %663, %cst_488 {dimension_numbers = #tpu.dot_dimension_numbers<[1], [0], [0], [1], [0, 0, 1, 1], [], []>} : vector<2x8xf32>, vector<8x8xf32>, vector<2x8xf32> -> vector<2x8xf32>
    %665 = arith.addf %639, %664 : vector<2x8xf32>
    %c0_489 = arith.constant 0 : index
    %c0_490 = arith.constant 0 : index
    %c0_491 = arith.constant 0 : index
    %666 = vector.load %arg28[%c0_489, %c0_490, %c0_491] : memref<3x1x8xf32, #tpu.memory_space<vmem>>, vector<1x1x8xf32>
    %667 = vector.shape_cast %666 : vector<1x1x8xf32> to vector<1x8xf32>
    %668 = vector.broadcast %667 : vector<1x8xf32> to vector<2x8xf32>
    %669 = arith.addf %665, %668 : vector<2x8xf32>
    %670 = arith.negf %669 : vector<2x8xf32>
    %671 = math.exp %670 : vector<2x8xf32>
    %cst_492 = arith.constant 1.000000e+00 : f32
    %672 = vector.broadcast %cst_492 : f32 to vector<2x8xf32>
    %673 = arith.addf %672, %671 : vector<2x8xf32>
    %674 = arith.divf %672, %673 : vector<2x8xf32>
    %c1_493 = arith.constant 1 : index
    %c0_494 = arith.constant 0 : index
    %c0_495 = arith.constant 0 : index
    %675 = vector.load %arg27[%c1_493, %c0_494, %c0_495] : memref<3x8x8xf32, #tpu.memory_space<vmem>>, vector<1x8x8xf32>
    %676 = vector.shape_cast %675 : vector<1x8x8xf32> to vector<8x8xf32>
    %cst_496 = arith.constant dense<0.000000e+00> : vector<2x8xf32>
    %677 = tpu.matmul %480, %676, %cst_496 {dimension_numbers = #tpu.dot_dimension_numbers<[1], [0], [0], [1], [0, 0, 1, 1], [], []>} : vector<2x8xf32>, vector<8x8xf32>, vector<2x8xf32> -> vector<2x8xf32>
    %678 = arith.addf %650, %677 : vector<2x8xf32>
    %c1_497 = arith.constant 1 : index
    %c0_498 = arith.constant 0 : index
    %c0_499 = arith.constant 0 : index
    %679 = vector.load %arg28[%c1_497, %c0_498, %c0_499] : memref<3x1x8xf32, #tpu.memory_space<vmem>>, vector<1x1x8xf32>
    %680 = vector.shape_cast %679 : vector<1x1x8xf32> to vector<1x8xf32>
    %681 = vector.broadcast %680 : vector<1x8xf32> to vector<2x8xf32>
    %682 = arith.addf %678, %681 : vector<2x8xf32>
    %683 = arith.negf %682 : vector<2x8xf32>
    %684 = math.exp %683 : vector<2x8xf32>
    %cst_500 = arith.constant 1.000000e+00 : f32
    %685 = vector.broadcast %cst_500 : f32 to vector<2x8xf32>
    %686 = arith.addf %685, %684 : vector<2x8xf32>
    %687 = arith.divf %685, %686 : vector<2x8xf32>
    %c2_501 = arith.constant 2 : index
    %c0_502 = arith.constant 0 : index
    %c0_503 = arith.constant 0 : index
    %688 = vector.load %arg27[%c2_501, %c0_502, %c0_503] : memref<3x8x8xf32, #tpu.memory_space<vmem>>, vector<1x8x8xf32>
    %689 = vector.shape_cast %688 : vector<1x8x8xf32> to vector<8x8xf32>
    %cst_504 = arith.constant dense<0.000000e+00> : vector<2x8xf32>
    %690 = tpu.matmul %480, %689, %cst_504 {dimension_numbers = #tpu.dot_dimension_numbers<[1], [0], [0], [1], [0, 0, 1, 1], [], []>} : vector<2x8xf32>, vector<8x8xf32>, vector<2x8xf32> -> vector<2x8xf32>
    %691 = arith.addf %661, %690 : vector<2x8xf32>
    %c2_505 = arith.constant 2 : index
    %c0_506 = arith.constant 0 : index
    %c0_507 = arith.constant 0 : index
    %692 = vector.load %arg28[%c2_505, %c0_506, %c0_507] : memref<3x1x8xf32, #tpu.memory_space<vmem>>, vector<1x1x8xf32>
    %693 = vector.shape_cast %692 : vector<1x1x8xf32> to vector<1x8xf32>
    %694 = vector.broadcast %693 : vector<1x8xf32> to vector<2x8xf32>
    %695 = arith.addf %691, %694 : vector<2x8xf32>
    %696 = arith.negf %695 : vector<2x8xf32>
    %697 = math.exp %696 : vector<2x8xf32>
    %cst_508 = arith.constant 1.000000e+00 : f32
    %698 = vector.broadcast %cst_508 : f32 to vector<2x8xf32>
    %699 = arith.addf %698, %697 : vector<2x8xf32>
    %700 = arith.divf %698, %699 : vector<2x8xf32>
    %701 = arith.mulf %687, %480 : vector<2x8xf32>
    %c0_509 = arith.constant 0 : index
    %c0_510 = arith.constant 0 : index
    %c0_511 = arith.constant 0 : index
    %702 = vector.load %arg27[%c0_509, %c0_510, %c0_511] : memref<3x8x8xf32, #tpu.memory_space<vmem>>, vector<1x8x8xf32>
    %703 = vector.shape_cast %702 : vector<1x8x8xf32> to vector<8x8xf32>
    %cst_512 = arith.constant dense<0.000000e+00> : vector<2x8xf32>
    %704 = tpu.matmul %701, %703, %cst_512 {dimension_numbers = #tpu.dot_dimension_numbers<[1], [0], [0], [1], [0, 0, 1, 1], [], []>} : vector<2x8xf32>, vector<8x8xf32>, vector<2x8xf32> -> vector<2x8xf32>
    %705 = arith.addf %639, %704 : vector<2x8xf32>
    %c0_513 = arith.constant 0 : index
    %c0_514 = arith.constant 0 : index
    %c0_515 = arith.constant 0 : index
    %706 = vector.load %arg28[%c0_513, %c0_514, %c0_515] : memref<3x1x8xf32, #tpu.memory_space<vmem>>, vector<1x1x8xf32>
    %707 = vector.shape_cast %706 : vector<1x1x8xf32> to vector<1x8xf32>
    %708 = vector.broadcast %707 : vector<1x8xf32> to vector<2x8xf32>
    %709 = arith.addf %705, %708 : vector<2x8xf32>
    %710 = arith.negf %709 : vector<2x8xf32>
    %711 = math.exp %710 : vector<2x8xf32>
    %cst_516 = arith.constant 1.000000e+00 : f32
    %712 = vector.broadcast %cst_516 : f32 to vector<2x8xf32>
    %713 = arith.addf %712, %711 : vector<2x8xf32>
    %714 = arith.divf %712, %713 : vector<2x8xf32>
    %715 = arith.mulf %687, %482 : vector<2x8xf32>
    %716 = arith.mulf %674, %714 : vector<2x8xf32>
    %717 = arith.addf %715, %716 : vector<2x8xf32>
    %718 = math.tanh %717 : vector<2x8xf32>
    %719 = arith.mulf %700, %718 : vector<2x8xf32>
    %c2_517 = arith.constant 2 : index
    %c0_518 = arith.constant 0 : index
    %c0_519 = arith.constant 0 : index
    %720 = vector.load %arg7[%c2_517, %c0_518, %c0_519] : memref<7x14x2xf32, #tpu.memory_space<vmem>>, vector<1x14x2xf32>
    %721 = vector.shape_cast %720 : vector<1x14x2xf32> to vector<14x2xf32>
    %cst_520 = arith.constant dense<0.000000e+00> : vector<14x8xf32>
    %722 = tpu.matmul %721, %717, %cst_520 {dimension_numbers = #tpu.dot_dimension_numbers<[1], [0], [0], [1], [0, 0, 1, 1], [], []>} : vector<14x2xf32>, vector<2x8xf32>, vector<14x8xf32> -> vector<14x8xf32>
    %723 = arith.addf %486, %722 : vector<14x8xf32>
    %c2_521 = arith.constant 2 : index
    %c0_522 = arith.constant 0 : index
    %c0_523 = arith.constant 0 : index
    %724 = vector.load %arg8[%c2_521, %c0_522, %c0_523] : memref<7x1x7xf32, #tpu.memory_space<vmem>>, vector<1x1x7xf32>
    %725 = vector.shape_cast %724 : vector<1x1x7xf32> to vector<1x7xf32>
    %726 = vector.broadcast %531 : vector<2x1xf32> to vector<2x7xf32>
    %727 = vector.broadcast %725 : vector<1x7xf32> to vector<2x7xf32>
    %728 = arith.mulf %726, %727 : vector<2x7xf32>
    %729 = arith.addf %492, %728 : vector<2x7xf32>
    %c3_524 = arith.constant 3 : index
    %c0_525 = arith.constant 0 : index
    %c0_526 = arith.constant 0 : index
    %730 = vector.load %arg0[%c3_524, %c0_525, %c0_526] : memref<8x8x1xf32, #tpu.memory_space<vmem>>, vector<1x8x1xf32>
    %731 = vector.shape_cast %730 : vector<1x8x1xf32> to vector<8x1xf32>
    %c3_527 = arith.constant 3 : index
    %c0_528 = arith.constant 0 : index
    %c0_529 = arith.constant 0 : index
    %732 = vector.load %arg1[%c3_527, %c0_528, %c0_529] : memref<8x1x8xf32, #tpu.memory_space<vmem>>, vector<1x1x8xf32>
    %733 = vector.shape_cast %732 : vector<1x1x8xf32> to vector<1x8xf32>
    %c4 = arith.constant 4 : index
    %c0_530 = arith.constant 0 : index
    %c0_531 = arith.constant 0 : index
    %734 = vector.load %arg0[%c4, %c0_530, %c0_531] : memref<8x8x1xf32, #tpu.memory_space<vmem>>, vector<1x8x1xf32>
    %735 = vector.shape_cast %734 : vector<1x8x1xf32> to vector<8x1xf32>
    %c4_532 = arith.constant 4 : index
    %c0_533 = arith.constant 0 : index
    %c0_534 = arith.constant 0 : index
    %736 = vector.load %arg1[%c4_532, %c0_533, %c0_534] : memref<8x1x8xf32, #tpu.memory_space<vmem>>, vector<1x1x8xf32>
    %737 = vector.shape_cast %736 : vector<1x1x8xf32> to vector<1x8xf32>
    %c4_535 = arith.constant 4 : index
    %c0_536 = arith.constant 0 : index
    %c0_537 = arith.constant 0 : index
    %738 = vector.load %arg2[%c4_535, %c0_536, %c0_537] : memref<8x2x4xf32, #tpu.memory_space<vmem>>, vector<1x2x4xf32>
    %739 = vector.shape_cast %738 : vector<1x2x4xf32> to vector<2x4xf32>
    %740 = vector.broadcast %731 : vector<8x1xf32> to vector<8x8xf32>
    %741 = vector.broadcast %737 : vector<1x8xf32> to vector<8x8xf32>
    %742 = arith.mulf %740, %741 : vector<8x8xf32>
    %743 = arith.mulf %742, %0 : vector<8x8xf32>
    %744 = vector.broadcast %735 : vector<8x1xf32> to vector<8x8xf32>
    %745 = vector.broadcast %733 : vector<1x8xf32> to vector<8x8xf32>
    %746 = arith.mulf %744, %745 : vector<8x8xf32>
    %747 = arith.mulf %746, %0 : vector<8x8xf32>
    %cst_538 = arith.constant dense<0.000000e+00> : vector<8x8xf32>
    %748 = tpu.matmul %743, %623, %cst_538 {dimension_numbers = #tpu.dot_dimension_numbers<[1], [0], [0], [1], [0, 0, 1, 1], [], []>} : vector<8x8xf32>, vector<8x8xf32>, vector<8x8xf32> -> vector<8x8xf32>
    %cst_539 = arith.constant dense<0.000000e+00> : vector<8x8xf32>
    %749 = tpu.matmul %748, %3, %cst_539 {dimension_numbers = #tpu.dot_dimension_numbers<[1], [0], [0], [1], [0, 0, 1, 1], [], []>} : vector<8x8xf32>, vector<8x8xf32>, vector<8x8xf32> -> vector<8x8xf32>
    %750 = vector.broadcast %4 : vector<1x8xf32> to vector<8x8xf32>
    %751 = arith.addf %749, %750 : vector<8x8xf32>
    %752 = math.tanh %751 : vector<8x8xf32>
    %cst_540 = arith.constant dense<0.000000e+00> : vector<8x8xf32>
    %753 = tpu.matmul %747, %623, %cst_540 {dimension_numbers = #tpu.dot_dimension_numbers<[1], [0], [0], [1], [0, 0, 1, 1], [], []>} : vector<8x8xf32>, vector<8x8xf32>, vector<8x8xf32> -> vector<8x8xf32>
    %cst_541 = arith.constant dense<0.000000e+00> : vector<8x8xf32>
    %754 = tpu.matmul %753, %5, %cst_541 {dimension_numbers = #tpu.dot_dimension_numbers<[1], [0], [0], [1], [0, 0, 1, 1], [], []>} : vector<8x8xf32>, vector<8x8xf32>, vector<8x8xf32> -> vector<8x8xf32>
    %755 = vector.broadcast %6 : vector<1x8xf32> to vector<8x8xf32>
    %756 = arith.addf %754, %755 : vector<8x8xf32>
    %757 = math.tanh %756 : vector<8x8xf32>
    %cst_542 = arith.constant dense<0.000000e+00> : vector<8x8xf32>
    %758 = tpu.matmul %752, %7, %cst_542 {dimension_numbers = #tpu.dot_dimension_numbers<[1], [0], [0], [1], [0, 0, 1, 1], [], []>} : vector<8x8xf32>, vector<8x8xf32>, vector<8x8xf32> -> vector<8x8xf32>
    %cst_543 = arith.constant dense<0.000000e+00> : vector<8x8xf32>
    %759 = tpu.matmul %757, %8, %cst_543 {dimension_numbers = #tpu.dot_dimension_numbers<[1], [0], [0], [1], [0, 0, 1, 1], [], []>} : vector<8x8xf32>, vector<8x8xf32>, vector<8x8xf32> -> vector<8x8xf32>
    %760 = arith.addf %758, %759 : vector<8x8xf32>
    %cst_544 = arith.constant dense<0.000000e+00> : vector<8x8xf32>
    %761 = tpu.matmul %752, %9, %cst_544 {dimension_numbers = #tpu.dot_dimension_numbers<[1], [0], [0], [1], [0, 0, 1, 1], [], []>} : vector<8x8xf32>, vector<8x8xf32>, vector<8x8xf32> -> vector<8x8xf32>
    %cst_545 = arith.constant dense<0.000000e+00> : vector<8x8xf32>
    %762 = tpu.matmul %757, %10, %cst_545 {dimension_numbers = #tpu.dot_dimension_numbers<[1], [0], [0], [1], [0, 0, 1, 1], [], []>} : vector<8x8xf32>, vector<8x8xf32>, vector<8x8xf32> -> vector<8x8xf32>
    %763 = arith.addf %761, %762 : vector<8x8xf32>
    %764 = arith.maximumf %760, %763 : vector<8x8xf32>
    %cst_546 = arith.constant dense<0.000000e+00> : vector<2x8xf32>
    %765 = tpu.matmul %1, %764, %cst_546 {dimension_numbers = #tpu.dot_dimension_numbers<[1], [0], [0], [1], [0, 0, 1, 1], [], []>} : vector<2x8xf32>, vector<8x8xf32>, vector<2x8xf32> -> vector<2x8xf32>
    %cst_547 = arith.constant dense<0.000000e+00> : vector<2x1xf32>
    %766 = tpu.matmul %765, %11, %cst_547 {dimension_numbers = #tpu.dot_dimension_numbers<[1], [0], [0], [1], [0, 0, 1, 1], [], []>} : vector<2x8xf32>, vector<8x1xf32>, vector<2x1xf32> -> vector<2x1xf32>
    %cst_548 = arith.constant dense<0.000000e+00> : vector<2x1xf32>
    %767 = tpu.matmul %717, %12, %cst_548 {dimension_numbers = #tpu.dot_dimension_numbers<[1], [0], [0], [1], [0, 0, 1, 1], [], []>} : vector<2x8xf32>, vector<8x1xf32>, vector<2x1xf32> -> vector<2x1xf32>
    %768 = arith.addf %766, %767 : vector<2x1xf32>
    %769 = vector.broadcast %768 : vector<2x1xf32> to vector<2x8xf32>
    %770 = arith.mulf %769, %717 : vector<2x8xf32>
    %cst_549 = arith.constant dense<0.000000e+00> : vector<8x8xf32>
    %771 = tpu.matmul %2, %770, %cst_549 {dimension_numbers = #tpu.dot_dimension_numbers<[1], [0], [0], [1], [0, 0, 1, 1], [], []>} : vector<8x2xf32>, vector<2x8xf32>, vector<8x8xf32> -> vector<8x8xf32>
    %c0_550 = arith.constant 0 : index
    %c0_551 = arith.constant 0 : index
    %c0_552 = arith.constant 0 : index
    %772 = vector.load %arg19[%c0_550, %c0_551, %c0_552] : memref<3x8x8xf32, #tpu.memory_space<vmem>>, vector<1x8x8xf32>
    %773 = vector.shape_cast %772 : vector<1x8x8xf32> to vector<8x8xf32>
    %cst_553 = arith.constant dense<0.000000e+00> : vector<8x8xf32>
    %774 = tpu.matmul %771, %773, %cst_553 {dimension_numbers = #tpu.dot_dimension_numbers<[1], [0], [0], [1], [0, 0, 1, 1], [], []>} : vector<8x8xf32>, vector<8x8xf32>, vector<8x8xf32> -> vector<8x8xf32>
    %c0_554 = arith.constant 0 : index
    %c0_555 = arith.constant 0 : index
    %c0_556 = arith.constant 0 : index
    %775 = vector.load %arg20[%c0_554, %c0_555, %c0_556] : memref<3x8x8xf32, #tpu.memory_space<vmem>>, vector<1x8x8xf32>
    %776 = vector.shape_cast %775 : vector<1x8x8xf32> to vector<8x8xf32>
    %cst_557 = arith.constant dense<0.000000e+00> : vector<8x8xf32>
    %777 = tpu.matmul %764, %776, %cst_557 {dimension_numbers = #tpu.dot_dimension_numbers<[1], [0], [0], [1], [0, 0, 1, 1], [], []>} : vector<8x8xf32>, vector<8x8xf32>, vector<8x8xf32> -> vector<8x8xf32>
    %778 = arith.addf %774, %777 : vector<8x8xf32>
    %c0_558 = arith.constant 0 : index
    %c0_559 = arith.constant 0 : index
    %c0_560 = arith.constant 0 : index
    %779 = vector.load %arg21[%c0_558, %c0_559, %c0_560] : memref<3x1x8xf32, #tpu.memory_space<vmem>>, vector<1x1x8xf32>
    %780 = vector.shape_cast %779 : vector<1x1x8xf32> to vector<1x8xf32>
    %781 = vector.broadcast %780 : vector<1x8xf32> to vector<8x8xf32>
    %782 = arith.addf %778, %781 : vector<8x8xf32>
    %c1_561 = arith.constant 1 : index
    %c0_562 = arith.constant 0 : index
    %c0_563 = arith.constant 0 : index
    %783 = vector.load %arg19[%c1_561, %c0_562, %c0_563] : memref<3x8x8xf32, #tpu.memory_space<vmem>>, vector<1x8x8xf32>
    %784 = vector.shape_cast %783 : vector<1x8x8xf32> to vector<8x8xf32>
    %cst_564 = arith.constant dense<0.000000e+00> : vector<8x8xf32>
    %785 = tpu.matmul %771, %784, %cst_564 {dimension_numbers = #tpu.dot_dimension_numbers<[1], [0], [0], [1], [0, 0, 1, 1], [], []>} : vector<8x8xf32>, vector<8x8xf32>, vector<8x8xf32> -> vector<8x8xf32>
    %c1_565 = arith.constant 1 : index
    %c0_566 = arith.constant 0 : index
    %c0_567 = arith.constant 0 : index
    %786 = vector.load %arg20[%c1_565, %c0_566, %c0_567] : memref<3x8x8xf32, #tpu.memory_space<vmem>>, vector<1x8x8xf32>
    %787 = vector.shape_cast %786 : vector<1x8x8xf32> to vector<8x8xf32>
    %cst_568 = arith.constant dense<0.000000e+00> : vector<8x8xf32>
    %788 = tpu.matmul %764, %787, %cst_568 {dimension_numbers = #tpu.dot_dimension_numbers<[1], [0], [0], [1], [0, 0, 1, 1], [], []>} : vector<8x8xf32>, vector<8x8xf32>, vector<8x8xf32> -> vector<8x8xf32>
    %789 = arith.addf %785, %788 : vector<8x8xf32>
    %c1_569 = arith.constant 1 : index
    %c0_570 = arith.constant 0 : index
    %c0_571 = arith.constant 0 : index
    %790 = vector.load %arg21[%c1_569, %c0_570, %c0_571] : memref<3x1x8xf32, #tpu.memory_space<vmem>>, vector<1x1x8xf32>
    %791 = vector.shape_cast %790 : vector<1x1x8xf32> to vector<1x8xf32>
    %792 = vector.broadcast %791 : vector<1x8xf32> to vector<8x8xf32>
    %793 = arith.addf %789, %792 : vector<8x8xf32>
    %c2_572 = arith.constant 2 : index
    %c0_573 = arith.constant 0 : index
    %c0_574 = arith.constant 0 : index
    %794 = vector.load %arg19[%c2_572, %c0_573, %c0_574] : memref<3x8x8xf32, #tpu.memory_space<vmem>>, vector<1x8x8xf32>
    %795 = vector.shape_cast %794 : vector<1x8x8xf32> to vector<8x8xf32>
    %cst_575 = arith.constant dense<0.000000e+00> : vector<8x8xf32>
    %796 = tpu.matmul %771, %795, %cst_575 {dimension_numbers = #tpu.dot_dimension_numbers<[1], [0], [0], [1], [0, 0, 1, 1], [], []>} : vector<8x8xf32>, vector<8x8xf32>, vector<8x8xf32> -> vector<8x8xf32>
    %c2_576 = arith.constant 2 : index
    %c0_577 = arith.constant 0 : index
    %c0_578 = arith.constant 0 : index
    %797 = vector.load %arg20[%c2_576, %c0_577, %c0_578] : memref<3x8x8xf32, #tpu.memory_space<vmem>>, vector<1x8x8xf32>
    %798 = vector.shape_cast %797 : vector<1x8x8xf32> to vector<8x8xf32>
    %cst_579 = arith.constant dense<0.000000e+00> : vector<8x8xf32>
    %799 = tpu.matmul %764, %798, %cst_579 {dimension_numbers = #tpu.dot_dimension_numbers<[1], [0], [0], [1], [0, 0, 1, 1], [], []>} : vector<8x8xf32>, vector<8x8xf32>, vector<8x8xf32> -> vector<8x8xf32>
    %800 = arith.addf %796, %799 : vector<8x8xf32>
    %c2_580 = arith.constant 2 : index
    %c0_581 = arith.constant 0 : index
    %c0_582 = arith.constant 0 : index
    %801 = vector.load %arg21[%c2_580, %c0_581, %c0_582] : memref<3x1x8xf32, #tpu.memory_space<vmem>>, vector<1x1x8xf32>
    %802 = vector.shape_cast %801 : vector<1x1x8xf32> to vector<1x8xf32>
    %803 = vector.broadcast %802 : vector<1x8xf32> to vector<8x8xf32>
    %804 = arith.addf %800, %803 : vector<8x8xf32>
    %c0_583 = arith.constant 0 : index
    %c0_584 = arith.constant 0 : index
    %c0_585 = arith.constant 0 : index
    %805 = vector.load %arg22[%c0_583, %c0_584, %c0_585] : memref<3x8x8xf32, #tpu.memory_space<vmem>>, vector<1x8x8xf32>
    %806 = vector.shape_cast %805 : vector<1x8x8xf32> to vector<8x8xf32>
    %cst_586 = arith.constant dense<0.000000e+00> : vector<8x8xf32>
    %807 = tpu.matmul %623, %806, %cst_586 {dimension_numbers = #tpu.dot_dimension_numbers<[1], [0], [0], [1], [0, 0, 1, 1], [], []>} : vector<8x8xf32>, vector<8x8xf32>, vector<8x8xf32> -> vector<8x8xf32>
    %808 = arith.addf %782, %807 : vector<8x8xf32>
    %c0_587 = arith.constant 0 : index
    %c0_588 = arith.constant 0 : index
    %c0_589 = arith.constant 0 : index
    %809 = vector.load %arg23[%c0_587, %c0_588, %c0_589] : memref<3x1x8xf32, #tpu.memory_space<vmem>>, vector<1x1x8xf32>
    %810 = vector.shape_cast %809 : vector<1x1x8xf32> to vector<1x8xf32>
    %811 = vector.broadcast %810 : vector<1x8xf32> to vector<8x8xf32>
    %812 = arith.addf %808, %811 : vector<8x8xf32>
    %813 = arith.negf %812 : vector<8x8xf32>
    %814 = math.exp %813 : vector<8x8xf32>
    %cst_590 = arith.constant 1.000000e+00 : f32
    %815 = vector.broadcast %cst_590 : f32 to vector<8x8xf32>
    %816 = arith.addf %815, %814 : vector<8x8xf32>
    %817 = arith.divf %815, %816 : vector<8x8xf32>
    %c1_591 = arith.constant 1 : index
    %c0_592 = arith.constant 0 : index
    %c0_593 = arith.constant 0 : index
    %818 = vector.load %arg22[%c1_591, %c0_592, %c0_593] : memref<3x8x8xf32, #tpu.memory_space<vmem>>, vector<1x8x8xf32>
    %819 = vector.shape_cast %818 : vector<1x8x8xf32> to vector<8x8xf32>
    %cst_594 = arith.constant dense<0.000000e+00> : vector<8x8xf32>
    %820 = tpu.matmul %623, %819, %cst_594 {dimension_numbers = #tpu.dot_dimension_numbers<[1], [0], [0], [1], [0, 0, 1, 1], [], []>} : vector<8x8xf32>, vector<8x8xf32>, vector<8x8xf32> -> vector<8x8xf32>
    %821 = arith.addf %793, %820 : vector<8x8xf32>
    %c1_595 = arith.constant 1 : index
    %c0_596 = arith.constant 0 : index
    %c0_597 = arith.constant 0 : index
    %822 = vector.load %arg23[%c1_595, %c0_596, %c0_597] : memref<3x1x8xf32, #tpu.memory_space<vmem>>, vector<1x1x8xf32>
    %823 = vector.shape_cast %822 : vector<1x1x8xf32> to vector<1x8xf32>
    %824 = vector.broadcast %823 : vector<1x8xf32> to vector<8x8xf32>
    %825 = arith.addf %821, %824 : vector<8x8xf32>
    %826 = arith.negf %825 : vector<8x8xf32>
    %827 = math.exp %826 : vector<8x8xf32>
    %cst_598 = arith.constant 1.000000e+00 : f32
    %828 = vector.broadcast %cst_598 : f32 to vector<8x8xf32>
    %829 = arith.addf %828, %827 : vector<8x8xf32>
    %830 = arith.divf %828, %829 : vector<8x8xf32>
    %c2_599 = arith.constant 2 : index
    %c0_600 = arith.constant 0 : index
    %c0_601 = arith.constant 0 : index
    %831 = vector.load %arg22[%c2_599, %c0_600, %c0_601] : memref<3x8x8xf32, #tpu.memory_space<vmem>>, vector<1x8x8xf32>
    %832 = vector.shape_cast %831 : vector<1x8x8xf32> to vector<8x8xf32>
    %cst_602 = arith.constant dense<0.000000e+00> : vector<8x8xf32>
    %833 = tpu.matmul %623, %832, %cst_602 {dimension_numbers = #tpu.dot_dimension_numbers<[1], [0], [0], [1], [0, 0, 1, 1], [], []>} : vector<8x8xf32>, vector<8x8xf32>, vector<8x8xf32> -> vector<8x8xf32>
    %834 = arith.addf %804, %833 : vector<8x8xf32>
    %c2_603 = arith.constant 2 : index
    %c0_604 = arith.constant 0 : index
    %c0_605 = arith.constant 0 : index
    %835 = vector.load %arg23[%c2_603, %c0_604, %c0_605] : memref<3x1x8xf32, #tpu.memory_space<vmem>>, vector<1x1x8xf32>
    %836 = vector.shape_cast %835 : vector<1x1x8xf32> to vector<1x8xf32>
    %837 = vector.broadcast %836 : vector<1x8xf32> to vector<8x8xf32>
    %838 = arith.addf %834, %837 : vector<8x8xf32>
    %839 = arith.negf %838 : vector<8x8xf32>
    %840 = math.exp %839 : vector<8x8xf32>
    %cst_606 = arith.constant 1.000000e+00 : f32
    %841 = vector.broadcast %cst_606 : f32 to vector<8x8xf32>
    %842 = arith.addf %841, %840 : vector<8x8xf32>
    %843 = arith.divf %841, %842 : vector<8x8xf32>
    %844 = arith.mulf %830, %623 : vector<8x8xf32>
    %c0_607 = arith.constant 0 : index
    %c0_608 = arith.constant 0 : index
    %c0_609 = arith.constant 0 : index
    %845 = vector.load %arg22[%c0_607, %c0_608, %c0_609] : memref<3x8x8xf32, #tpu.memory_space<vmem>>, vector<1x8x8xf32>
    %846 = vector.shape_cast %845 : vector<1x8x8xf32> to vector<8x8xf32>
    %cst_610 = arith.constant dense<0.000000e+00> : vector<8x8xf32>
    %847 = tpu.matmul %844, %846, %cst_610 {dimension_numbers = #tpu.dot_dimension_numbers<[1], [0], [0], [1], [0, 0, 1, 1], [], []>} : vector<8x8xf32>, vector<8x8xf32>, vector<8x8xf32> -> vector<8x8xf32>
    %848 = arith.addf %782, %847 : vector<8x8xf32>
    %c0_611 = arith.constant 0 : index
    %c0_612 = arith.constant 0 : index
    %c0_613 = arith.constant 0 : index
    %849 = vector.load %arg23[%c0_611, %c0_612, %c0_613] : memref<3x1x8xf32, #tpu.memory_space<vmem>>, vector<1x1x8xf32>
    %850 = vector.shape_cast %849 : vector<1x1x8xf32> to vector<1x8xf32>
    %851 = vector.broadcast %850 : vector<1x8xf32> to vector<8x8xf32>
    %852 = arith.addf %848, %851 : vector<8x8xf32>
    %853 = arith.negf %852 : vector<8x8xf32>
    %854 = math.exp %853 : vector<8x8xf32>
    %cst_614 = arith.constant 1.000000e+00 : f32
    %855 = vector.broadcast %cst_614 : f32 to vector<8x8xf32>
    %856 = arith.addf %855, %854 : vector<8x8xf32>
    %857 = arith.divf %855, %856 : vector<8x8xf32>
    %858 = arith.mulf %830, %625 : vector<8x8xf32>
    %859 = arith.mulf %817, %857 : vector<8x8xf32>
    %860 = arith.addf %858, %859 : vector<8x8xf32>
    %861 = math.tanh %860 : vector<8x8xf32>
    %862 = arith.mulf %843, %861 : vector<8x8xf32>
    %cst_615 = arith.constant dense<0.000000e+00> : vector<2x8xf32>
    %863 = tpu.matmul %1, %860, %cst_615 {dimension_numbers = #tpu.dot_dimension_numbers<[1], [0], [0], [1], [0, 0, 1, 1], [], []>} : vector<2x8xf32>, vector<8x8xf32>, vector<2x8xf32> -> vector<2x8xf32>
    %864 = vector.broadcast %768 : vector<2x1xf32> to vector<2x8xf32>
    %865 = arith.mulf %864, %863 : vector<2x8xf32>
    %c0_616 = arith.constant 0 : index
    %c0_617 = arith.constant 0 : index
    %c0_618 = arith.constant 0 : index
    %866 = vector.load %arg24[%c0_616, %c0_617, %c0_618] : memref<3x8x8xf32, #tpu.memory_space<vmem>>, vector<1x8x8xf32>
    %867 = vector.shape_cast %866 : vector<1x8x8xf32> to vector<8x8xf32>
    %cst_619 = arith.constant dense<0.000000e+00> : vector<2x8xf32>
    %868 = tpu.matmul %865, %867, %cst_619 {dimension_numbers = #tpu.dot_dimension_numbers<[1], [0], [0], [1], [0, 0, 1, 1], [], []>} : vector<2x8xf32>, vector<8x8xf32>, vector<2x8xf32> -> vector<2x8xf32>
    %c0_620 = arith.constant 0 : index
    %c0_621 = arith.constant 0 : index
    %c0_622 = arith.constant 0 : index
    %869 = vector.load %arg25[%c0_620, %c0_621, %c0_622] : memref<3x4x8xf32, #tpu.memory_space<vmem>>, vector<1x4x8xf32>
    %870 = vector.shape_cast %869 : vector<1x4x8xf32> to vector<4x8xf32>
    %cst_623 = arith.constant dense<0.000000e+00> : vector<2x8xf32>
    %871 = tpu.matmul %739, %870, %cst_623 {dimension_numbers = #tpu.dot_dimension_numbers<[1], [0], [0], [1], [0, 0, 1, 1], [], []>} : vector<2x4xf32>, vector<4x8xf32>, vector<2x8xf32> -> vector<2x8xf32>
    %872 = arith.addf %868, %871 : vector<2x8xf32>
    %c0_624 = arith.constant 0 : index
    %c0_625 = arith.constant 0 : index
    %c0_626 = arith.constant 0 : index
    %873 = vector.load %arg26[%c0_624, %c0_625, %c0_626] : memref<3x1x8xf32, #tpu.memory_space<vmem>>, vector<1x1x8xf32>
    %874 = vector.shape_cast %873 : vector<1x1x8xf32> to vector<1x8xf32>
    %875 = vector.broadcast %874 : vector<1x8xf32> to vector<2x8xf32>
    %876 = arith.addf %872, %875 : vector<2x8xf32>
    %c1_627 = arith.constant 1 : index
    %c0_628 = arith.constant 0 : index
    %c0_629 = arith.constant 0 : index
    %877 = vector.load %arg24[%c1_627, %c0_628, %c0_629] : memref<3x8x8xf32, #tpu.memory_space<vmem>>, vector<1x8x8xf32>
    %878 = vector.shape_cast %877 : vector<1x8x8xf32> to vector<8x8xf32>
    %cst_630 = arith.constant dense<0.000000e+00> : vector<2x8xf32>
    %879 = tpu.matmul %865, %878, %cst_630 {dimension_numbers = #tpu.dot_dimension_numbers<[1], [0], [0], [1], [0, 0, 1, 1], [], []>} : vector<2x8xf32>, vector<8x8xf32>, vector<2x8xf32> -> vector<2x8xf32>
    %c1_631 = arith.constant 1 : index
    %c0_632 = arith.constant 0 : index
    %c0_633 = arith.constant 0 : index
    %880 = vector.load %arg25[%c1_631, %c0_632, %c0_633] : memref<3x4x8xf32, #tpu.memory_space<vmem>>, vector<1x4x8xf32>
    %881 = vector.shape_cast %880 : vector<1x4x8xf32> to vector<4x8xf32>
    %cst_634 = arith.constant dense<0.000000e+00> : vector<2x8xf32>
    %882 = tpu.matmul %739, %881, %cst_634 {dimension_numbers = #tpu.dot_dimension_numbers<[1], [0], [0], [1], [0, 0, 1, 1], [], []>} : vector<2x4xf32>, vector<4x8xf32>, vector<2x8xf32> -> vector<2x8xf32>
    %883 = arith.addf %879, %882 : vector<2x8xf32>
    %c1_635 = arith.constant 1 : index
    %c0_636 = arith.constant 0 : index
    %c0_637 = arith.constant 0 : index
    %884 = vector.load %arg26[%c1_635, %c0_636, %c0_637] : memref<3x1x8xf32, #tpu.memory_space<vmem>>, vector<1x1x8xf32>
    %885 = vector.shape_cast %884 : vector<1x1x8xf32> to vector<1x8xf32>
    %886 = vector.broadcast %885 : vector<1x8xf32> to vector<2x8xf32>
    %887 = arith.addf %883, %886 : vector<2x8xf32>
    %c2_638 = arith.constant 2 : index
    %c0_639 = arith.constant 0 : index
    %c0_640 = arith.constant 0 : index
    %888 = vector.load %arg24[%c2_638, %c0_639, %c0_640] : memref<3x8x8xf32, #tpu.memory_space<vmem>>, vector<1x8x8xf32>
    %889 = vector.shape_cast %888 : vector<1x8x8xf32> to vector<8x8xf32>
    %cst_641 = arith.constant dense<0.000000e+00> : vector<2x8xf32>
    %890 = tpu.matmul %865, %889, %cst_641 {dimension_numbers = #tpu.dot_dimension_numbers<[1], [0], [0], [1], [0, 0, 1, 1], [], []>} : vector<2x8xf32>, vector<8x8xf32>, vector<2x8xf32> -> vector<2x8xf32>
    %c2_642 = arith.constant 2 : index
    %c0_643 = arith.constant 0 : index
    %c0_644 = arith.constant 0 : index
    %891 = vector.load %arg25[%c2_642, %c0_643, %c0_644] : memref<3x4x8xf32, #tpu.memory_space<vmem>>, vector<1x4x8xf32>
    %892 = vector.shape_cast %891 : vector<1x4x8xf32> to vector<4x8xf32>
    %cst_645 = arith.constant dense<0.000000e+00> : vector<2x8xf32>
    %893 = tpu.matmul %739, %892, %cst_645 {dimension_numbers = #tpu.dot_dimension_numbers<[1], [0], [0], [1], [0, 0, 1, 1], [], []>} : vector<2x4xf32>, vector<4x8xf32>, vector<2x8xf32> -> vector<2x8xf32>
    %894 = arith.addf %890, %893 : vector<2x8xf32>
    %c2_646 = arith.constant 2 : index
    %c0_647 = arith.constant 0 : index
    %c0_648 = arith.constant 0 : index
    %895 = vector.load %arg26[%c2_646, %c0_647, %c0_648] : memref<3x1x8xf32, #tpu.memory_space<vmem>>, vector<1x1x8xf32>
    %896 = vector.shape_cast %895 : vector<1x1x8xf32> to vector<1x8xf32>
    %897 = vector.broadcast %896 : vector<1x8xf32> to vector<2x8xf32>
    %898 = arith.addf %894, %897 : vector<2x8xf32>
    %c0_649 = arith.constant 0 : index
    %c0_650 = arith.constant 0 : index
    %c0_651 = arith.constant 0 : index
    %899 = vector.load %arg27[%c0_649, %c0_650, %c0_651] : memref<3x8x8xf32, #tpu.memory_space<vmem>>, vector<1x8x8xf32>
    %900 = vector.shape_cast %899 : vector<1x8x8xf32> to vector<8x8xf32>
    %cst_652 = arith.constant dense<0.000000e+00> : vector<2x8xf32>
    %901 = tpu.matmul %717, %900, %cst_652 {dimension_numbers = #tpu.dot_dimension_numbers<[1], [0], [0], [1], [0, 0, 1, 1], [], []>} : vector<2x8xf32>, vector<8x8xf32>, vector<2x8xf32> -> vector<2x8xf32>
    %902 = arith.addf %876, %901 : vector<2x8xf32>
    %c0_653 = arith.constant 0 : index
    %c0_654 = arith.constant 0 : index
    %c0_655 = arith.constant 0 : index
    %903 = vector.load %arg28[%c0_653, %c0_654, %c0_655] : memref<3x1x8xf32, #tpu.memory_space<vmem>>, vector<1x1x8xf32>
    %904 = vector.shape_cast %903 : vector<1x1x8xf32> to vector<1x8xf32>
    %905 = vector.broadcast %904 : vector<1x8xf32> to vector<2x8xf32>
    %906 = arith.addf %902, %905 : vector<2x8xf32>
    %907 = arith.negf %906 : vector<2x8xf32>
    %908 = math.exp %907 : vector<2x8xf32>
    %cst_656 = arith.constant 1.000000e+00 : f32
    %909 = vector.broadcast %cst_656 : f32 to vector<2x8xf32>
    %910 = arith.addf %909, %908 : vector<2x8xf32>
    %911 = arith.divf %909, %910 : vector<2x8xf32>
    %c1_657 = arith.constant 1 : index
    %c0_658 = arith.constant 0 : index
    %c0_659 = arith.constant 0 : index
    %912 = vector.load %arg27[%c1_657, %c0_658, %c0_659] : memref<3x8x8xf32, #tpu.memory_space<vmem>>, vector<1x8x8xf32>
    %913 = vector.shape_cast %912 : vector<1x8x8xf32> to vector<8x8xf32>
    %cst_660 = arith.constant dense<0.000000e+00> : vector<2x8xf32>
    %914 = tpu.matmul %717, %913, %cst_660 {dimension_numbers = #tpu.dot_dimension_numbers<[1], [0], [0], [1], [0, 0, 1, 1], [], []>} : vector<2x8xf32>, vector<8x8xf32>, vector<2x8xf32> -> vector<2x8xf32>
    %915 = arith.addf %887, %914 : vector<2x8xf32>
    %c1_661 = arith.constant 1 : index
    %c0_662 = arith.constant 0 : index
    %c0_663 = arith.constant 0 : index
    %916 = vector.load %arg28[%c1_661, %c0_662, %c0_663] : memref<3x1x8xf32, #tpu.memory_space<vmem>>, vector<1x1x8xf32>
    %917 = vector.shape_cast %916 : vector<1x1x8xf32> to vector<1x8xf32>
    %918 = vector.broadcast %917 : vector<1x8xf32> to vector<2x8xf32>
    %919 = arith.addf %915, %918 : vector<2x8xf32>
    %920 = arith.negf %919 : vector<2x8xf32>
    %921 = math.exp %920 : vector<2x8xf32>
    %cst_664 = arith.constant 1.000000e+00 : f32
    %922 = vector.broadcast %cst_664 : f32 to vector<2x8xf32>
    %923 = arith.addf %922, %921 : vector<2x8xf32>
    %924 = arith.divf %922, %923 : vector<2x8xf32>
    %c2_665 = arith.constant 2 : index
    %c0_666 = arith.constant 0 : index
    %c0_667 = arith.constant 0 : index
    %925 = vector.load %arg27[%c2_665, %c0_666, %c0_667] : memref<3x8x8xf32, #tpu.memory_space<vmem>>, vector<1x8x8xf32>
    %926 = vector.shape_cast %925 : vector<1x8x8xf32> to vector<8x8xf32>
    %cst_668 = arith.constant dense<0.000000e+00> : vector<2x8xf32>
    %927 = tpu.matmul %717, %926, %cst_668 {dimension_numbers = #tpu.dot_dimension_numbers<[1], [0], [0], [1], [0, 0, 1, 1], [], []>} : vector<2x8xf32>, vector<8x8xf32>, vector<2x8xf32> -> vector<2x8xf32>
    %928 = arith.addf %898, %927 : vector<2x8xf32>
    %c2_669 = arith.constant 2 : index
    %c0_670 = arith.constant 0 : index
    %c0_671 = arith.constant 0 : index
    %929 = vector.load %arg28[%c2_669, %c0_670, %c0_671] : memref<3x1x8xf32, #tpu.memory_space<vmem>>, vector<1x1x8xf32>
    %930 = vector.shape_cast %929 : vector<1x1x8xf32> to vector<1x8xf32>
    %931 = vector.broadcast %930 : vector<1x8xf32> to vector<2x8xf32>
    %932 = arith.addf %928, %931 : vector<2x8xf32>
    %933 = arith.negf %932 : vector<2x8xf32>
    %934 = math.exp %933 : vector<2x8xf32>
    %cst_672 = arith.constant 1.000000e+00 : f32
    %935 = vector.broadcast %cst_672 : f32 to vector<2x8xf32>
    %936 = arith.addf %935, %934 : vector<2x8xf32>
    %937 = arith.divf %935, %936 : vector<2x8xf32>
    %938 = arith.mulf %924, %717 : vector<2x8xf32>
    %c0_673 = arith.constant 0 : index
    %c0_674 = arith.constant 0 : index
    %c0_675 = arith.constant 0 : index
    %939 = vector.load %arg27[%c0_673, %c0_674, %c0_675] : memref<3x8x8xf32, #tpu.memory_space<vmem>>, vector<1x8x8xf32>
    %940 = vector.shape_cast %939 : vector<1x8x8xf32> to vector<8x8xf32>
    %cst_676 = arith.constant dense<0.000000e+00> : vector<2x8xf32>
    %941 = tpu.matmul %938, %940, %cst_676 {dimension_numbers = #tpu.dot_dimension_numbers<[1], [0], [0], [1], [0, 0, 1, 1], [], []>} : vector<2x8xf32>, vector<8x8xf32>, vector<2x8xf32> -> vector<2x8xf32>
    %942 = arith.addf %876, %941 : vector<2x8xf32>
    %c0_677 = arith.constant 0 : index
    %c0_678 = arith.constant 0 : index
    %c0_679 = arith.constant 0 : index
    %943 = vector.load %arg28[%c0_677, %c0_678, %c0_679] : memref<3x1x8xf32, #tpu.memory_space<vmem>>, vector<1x1x8xf32>
    %944 = vector.shape_cast %943 : vector<1x1x8xf32> to vector<1x8xf32>
    %945 = vector.broadcast %944 : vector<1x8xf32> to vector<2x8xf32>
    %946 = arith.addf %942, %945 : vector<2x8xf32>
    %947 = arith.negf %946 : vector<2x8xf32>
    %948 = math.exp %947 : vector<2x8xf32>
    %cst_680 = arith.constant 1.000000e+00 : f32
    %949 = vector.broadcast %cst_680 : f32 to vector<2x8xf32>
    %950 = arith.addf %949, %948 : vector<2x8xf32>
    %951 = arith.divf %949, %950 : vector<2x8xf32>
    %952 = arith.mulf %924, %719 : vector<2x8xf32>
    %953 = arith.mulf %911, %951 : vector<2x8xf32>
    %954 = arith.addf %952, %953 : vector<2x8xf32>
    %955 = math.tanh %954 : vector<2x8xf32>
    %956 = arith.mulf %937, %955 : vector<2x8xf32>
    %c3_681 = arith.constant 3 : index
    %c0_682 = arith.constant 0 : index
    %c0_683 = arith.constant 0 : index
    %957 = vector.load %arg7[%c3_681, %c0_682, %c0_683] : memref<7x14x2xf32, #tpu.memory_space<vmem>>, vector<1x14x2xf32>
    %958 = vector.shape_cast %957 : vector<1x14x2xf32> to vector<14x2xf32>
    %cst_684 = arith.constant dense<0.000000e+00> : vector<14x8xf32>
    %959 = tpu.matmul %958, %954, %cst_684 {dimension_numbers = #tpu.dot_dimension_numbers<[1], [0], [0], [1], [0, 0, 1, 1], [], []>} : vector<14x2xf32>, vector<2x8xf32>, vector<14x8xf32> -> vector<14x8xf32>
    %960 = arith.addf %723, %959 : vector<14x8xf32>
    %c3_685 = arith.constant 3 : index
    %c0_686 = arith.constant 0 : index
    %c0_687 = arith.constant 0 : index
    %961 = vector.load %arg8[%c3_685, %c0_686, %c0_687] : memref<7x1x7xf32, #tpu.memory_space<vmem>>, vector<1x1x7xf32>
    %962 = vector.shape_cast %961 : vector<1x1x7xf32> to vector<1x7xf32>
    %963 = vector.broadcast %768 : vector<2x1xf32> to vector<2x7xf32>
    %964 = vector.broadcast %962 : vector<1x7xf32> to vector<2x7xf32>
    %965 = arith.mulf %963, %964 : vector<2x7xf32>
    %966 = arith.addf %729, %965 : vector<2x7xf32>
    %c4_688 = arith.constant 4 : index
    %c0_689 = arith.constant 0 : index
    %c0_690 = arith.constant 0 : index
    %967 = vector.load %arg0[%c4_688, %c0_689, %c0_690] : memref<8x8x1xf32, #tpu.memory_space<vmem>>, vector<1x8x1xf32>
    %968 = vector.shape_cast %967 : vector<1x8x1xf32> to vector<8x1xf32>
    %c4_691 = arith.constant 4 : index
    %c0_692 = arith.constant 0 : index
    %c0_693 = arith.constant 0 : index
    %969 = vector.load %arg1[%c4_691, %c0_692, %c0_693] : memref<8x1x8xf32, #tpu.memory_space<vmem>>, vector<1x1x8xf32>
    %970 = vector.shape_cast %969 : vector<1x1x8xf32> to vector<1x8xf32>
    %c5 = arith.constant 5 : index
    %c0_694 = arith.constant 0 : index
    %c0_695 = arith.constant 0 : index
    %971 = vector.load %arg0[%c5, %c0_694, %c0_695] : memref<8x8x1xf32, #tpu.memory_space<vmem>>, vector<1x8x1xf32>
    %972 = vector.shape_cast %971 : vector<1x8x1xf32> to vector<8x1xf32>
    %c5_696 = arith.constant 5 : index
    %c0_697 = arith.constant 0 : index
    %c0_698 = arith.constant 0 : index
    %973 = vector.load %arg1[%c5_696, %c0_697, %c0_698] : memref<8x1x8xf32, #tpu.memory_space<vmem>>, vector<1x1x8xf32>
    %974 = vector.shape_cast %973 : vector<1x1x8xf32> to vector<1x8xf32>
    %c5_699 = arith.constant 5 : index
    %c0_700 = arith.constant 0 : index
    %c0_701 = arith.constant 0 : index
    %975 = vector.load %arg2[%c5_699, %c0_700, %c0_701] : memref<8x2x4xf32, #tpu.memory_space<vmem>>, vector<1x2x4xf32>
    %976 = vector.shape_cast %975 : vector<1x2x4xf32> to vector<2x4xf32>
    %977 = vector.broadcast %968 : vector<8x1xf32> to vector<8x8xf32>
    %978 = vector.broadcast %974 : vector<1x8xf32> to vector<8x8xf32>
    %979 = arith.mulf %977, %978 : vector<8x8xf32>
    %980 = arith.mulf %979, %0 : vector<8x8xf32>
    %981 = vector.broadcast %972 : vector<8x1xf32> to vector<8x8xf32>
    %982 = vector.broadcast %970 : vector<1x8xf32> to vector<8x8xf32>
    %983 = arith.mulf %981, %982 : vector<8x8xf32>
    %984 = arith.mulf %983, %0 : vector<8x8xf32>
    %cst_702 = arith.constant dense<0.000000e+00> : vector<8x8xf32>
    %985 = tpu.matmul %980, %860, %cst_702 {dimension_numbers = #tpu.dot_dimension_numbers<[1], [0], [0], [1], [0, 0, 1, 1], [], []>} : vector<8x8xf32>, vector<8x8xf32>, vector<8x8xf32> -> vector<8x8xf32>
    %cst_703 = arith.constant dense<0.000000e+00> : vector<8x8xf32>
    %986 = tpu.matmul %985, %3, %cst_703 {dimension_numbers = #tpu.dot_dimension_numbers<[1], [0], [0], [1], [0, 0, 1, 1], [], []>} : vector<8x8xf32>, vector<8x8xf32>, vector<8x8xf32> -> vector<8x8xf32>
    %987 = vector.broadcast %4 : vector<1x8xf32> to vector<8x8xf32>
    %988 = arith.addf %986, %987 : vector<8x8xf32>
    %989 = math.tanh %988 : vector<8x8xf32>
    %cst_704 = arith.constant dense<0.000000e+00> : vector<8x8xf32>
    %990 = tpu.matmul %984, %860, %cst_704 {dimension_numbers = #tpu.dot_dimension_numbers<[1], [0], [0], [1], [0, 0, 1, 1], [], []>} : vector<8x8xf32>, vector<8x8xf32>, vector<8x8xf32> -> vector<8x8xf32>
    %cst_705 = arith.constant dense<0.000000e+00> : vector<8x8xf32>
    %991 = tpu.matmul %990, %5, %cst_705 {dimension_numbers = #tpu.dot_dimension_numbers<[1], [0], [0], [1], [0, 0, 1, 1], [], []>} : vector<8x8xf32>, vector<8x8xf32>, vector<8x8xf32> -> vector<8x8xf32>
    %992 = vector.broadcast %6 : vector<1x8xf32> to vector<8x8xf32>
    %993 = arith.addf %991, %992 : vector<8x8xf32>
    %994 = math.tanh %993 : vector<8x8xf32>
    %cst_706 = arith.constant dense<0.000000e+00> : vector<8x8xf32>
    %995 = tpu.matmul %989, %7, %cst_706 {dimension_numbers = #tpu.dot_dimension_numbers<[1], [0], [0], [1], [0, 0, 1, 1], [], []>} : vector<8x8xf32>, vector<8x8xf32>, vector<8x8xf32> -> vector<8x8xf32>
    %cst_707 = arith.constant dense<0.000000e+00> : vector<8x8xf32>
    %996 = tpu.matmul %994, %8, %cst_707 {dimension_numbers = #tpu.dot_dimension_numbers<[1], [0], [0], [1], [0, 0, 1, 1], [], []>} : vector<8x8xf32>, vector<8x8xf32>, vector<8x8xf32> -> vector<8x8xf32>
    %997 = arith.addf %995, %996 : vector<8x8xf32>
    %cst_708 = arith.constant dense<0.000000e+00> : vector<8x8xf32>
    %998 = tpu.matmul %989, %9, %cst_708 {dimension_numbers = #tpu.dot_dimension_numbers<[1], [0], [0], [1], [0, 0, 1, 1], [], []>} : vector<8x8xf32>, vector<8x8xf32>, vector<8x8xf32> -> vector<8x8xf32>
    %cst_709 = arith.constant dense<0.000000e+00> : vector<8x8xf32>
    %999 = tpu.matmul %994, %10, %cst_709 {dimension_numbers = #tpu.dot_dimension_numbers<[1], [0], [0], [1], [0, 0, 1, 1], [], []>} : vector<8x8xf32>, vector<8x8xf32>, vector<8x8xf32> -> vector<8x8xf32>
    %1000 = arith.addf %998, %999 : vector<8x8xf32>
    %1001 = arith.maximumf %997, %1000 : vector<8x8xf32>
    %cst_710 = arith.constant dense<0.000000e+00> : vector<2x8xf32>
    %1002 = tpu.matmul %1, %1001, %cst_710 {dimension_numbers = #tpu.dot_dimension_numbers<[1], [0], [0], [1], [0, 0, 1, 1], [], []>} : vector<2x8xf32>, vector<8x8xf32>, vector<2x8xf32> -> vector<2x8xf32>
    %cst_711 = arith.constant dense<0.000000e+00> : vector<2x1xf32>
    %1003 = tpu.matmul %1002, %11, %cst_711 {dimension_numbers = #tpu.dot_dimension_numbers<[1], [0], [0], [1], [0, 0, 1, 1], [], []>} : vector<2x8xf32>, vector<8x1xf32>, vector<2x1xf32> -> vector<2x1xf32>
    %cst_712 = arith.constant dense<0.000000e+00> : vector<2x1xf32>
    %1004 = tpu.matmul %954, %12, %cst_712 {dimension_numbers = #tpu.dot_dimension_numbers<[1], [0], [0], [1], [0, 0, 1, 1], [], []>} : vector<2x8xf32>, vector<8x1xf32>, vector<2x1xf32> -> vector<2x1xf32>
    %1005 = arith.addf %1003, %1004 : vector<2x1xf32>
    %1006 = vector.broadcast %1005 : vector<2x1xf32> to vector<2x8xf32>
    %1007 = arith.mulf %1006, %954 : vector<2x8xf32>
    %cst_713 = arith.constant dense<0.000000e+00> : vector<8x8xf32>
    %1008 = tpu.matmul %2, %1007, %cst_713 {dimension_numbers = #tpu.dot_dimension_numbers<[1], [0], [0], [1], [0, 0, 1, 1], [], []>} : vector<8x2xf32>, vector<2x8xf32>, vector<8x8xf32> -> vector<8x8xf32>
    %c0_714 = arith.constant 0 : index
    %c0_715 = arith.constant 0 : index
    %c0_716 = arith.constant 0 : index
    %1009 = vector.load %arg19[%c0_714, %c0_715, %c0_716] : memref<3x8x8xf32, #tpu.memory_space<vmem>>, vector<1x8x8xf32>
    %1010 = vector.shape_cast %1009 : vector<1x8x8xf32> to vector<8x8xf32>
    %cst_717 = arith.constant dense<0.000000e+00> : vector<8x8xf32>
    %1011 = tpu.matmul %1008, %1010, %cst_717 {dimension_numbers = #tpu.dot_dimension_numbers<[1], [0], [0], [1], [0, 0, 1, 1], [], []>} : vector<8x8xf32>, vector<8x8xf32>, vector<8x8xf32> -> vector<8x8xf32>
    %c0_718 = arith.constant 0 : index
    %c0_719 = arith.constant 0 : index
    %c0_720 = arith.constant 0 : index
    %1012 = vector.load %arg20[%c0_718, %c0_719, %c0_720] : memref<3x8x8xf32, #tpu.memory_space<vmem>>, vector<1x8x8xf32>
    %1013 = vector.shape_cast %1012 : vector<1x8x8xf32> to vector<8x8xf32>
    %cst_721 = arith.constant dense<0.000000e+00> : vector<8x8xf32>
    %1014 = tpu.matmul %1001, %1013, %cst_721 {dimension_numbers = #tpu.dot_dimension_numbers<[1], [0], [0], [1], [0, 0, 1, 1], [], []>} : vector<8x8xf32>, vector<8x8xf32>, vector<8x8xf32> -> vector<8x8xf32>
    %1015 = arith.addf %1011, %1014 : vector<8x8xf32>
    %c0_722 = arith.constant 0 : index
    %c0_723 = arith.constant 0 : index
    %c0_724 = arith.constant 0 : index
    %1016 = vector.load %arg21[%c0_722, %c0_723, %c0_724] : memref<3x1x8xf32, #tpu.memory_space<vmem>>, vector<1x1x8xf32>
    %1017 = vector.shape_cast %1016 : vector<1x1x8xf32> to vector<1x8xf32>
    %1018 = vector.broadcast %1017 : vector<1x8xf32> to vector<8x8xf32>
    %1019 = arith.addf %1015, %1018 : vector<8x8xf32>
    %c1_725 = arith.constant 1 : index
    %c0_726 = arith.constant 0 : index
    %c0_727 = arith.constant 0 : index
    %1020 = vector.load %arg19[%c1_725, %c0_726, %c0_727] : memref<3x8x8xf32, #tpu.memory_space<vmem>>, vector<1x8x8xf32>
    %1021 = vector.shape_cast %1020 : vector<1x8x8xf32> to vector<8x8xf32>
    %cst_728 = arith.constant dense<0.000000e+00> : vector<8x8xf32>
    %1022 = tpu.matmul %1008, %1021, %cst_728 {dimension_numbers = #tpu.dot_dimension_numbers<[1], [0], [0], [1], [0, 0, 1, 1], [], []>} : vector<8x8xf32>, vector<8x8xf32>, vector<8x8xf32> -> vector<8x8xf32>
    %c1_729 = arith.constant 1 : index
    %c0_730 = arith.constant 0 : index
    %c0_731 = arith.constant 0 : index
    %1023 = vector.load %arg20[%c1_729, %c0_730, %c0_731] : memref<3x8x8xf32, #tpu.memory_space<vmem>>, vector<1x8x8xf32>
    %1024 = vector.shape_cast %1023 : vector<1x8x8xf32> to vector<8x8xf32>
    %cst_732 = arith.constant dense<0.000000e+00> : vector<8x8xf32>
    %1025 = tpu.matmul %1001, %1024, %cst_732 {dimension_numbers = #tpu.dot_dimension_numbers<[1], [0], [0], [1], [0, 0, 1, 1], [], []>} : vector<8x8xf32>, vector<8x8xf32>, vector<8x8xf32> -> vector<8x8xf32>
    %1026 = arith.addf %1022, %1025 : vector<8x8xf32>
    %c1_733 = arith.constant 1 : index
    %c0_734 = arith.constant 0 : index
    %c0_735 = arith.constant 0 : index
    %1027 = vector.load %arg21[%c1_733, %c0_734, %c0_735] : memref<3x1x8xf32, #tpu.memory_space<vmem>>, vector<1x1x8xf32>
    %1028 = vector.shape_cast %1027 : vector<1x1x8xf32> to vector<1x8xf32>
    %1029 = vector.broadcast %1028 : vector<1x8xf32> to vector<8x8xf32>
    %1030 = arith.addf %1026, %1029 : vector<8x8xf32>
    %c2_736 = arith.constant 2 : index
    %c0_737 = arith.constant 0 : index
    %c0_738 = arith.constant 0 : index
    %1031 = vector.load %arg19[%c2_736, %c0_737, %c0_738] : memref<3x8x8xf32, #tpu.memory_space<vmem>>, vector<1x8x8xf32>
    %1032 = vector.shape_cast %1031 : vector<1x8x8xf32> to vector<8x8xf32>
    %cst_739 = arith.constant dense<0.000000e+00> : vector<8x8xf32>
    %1033 = tpu.matmul %1008, %1032, %cst_739 {dimension_numbers = #tpu.dot_dimension_numbers<[1], [0], [0], [1], [0, 0, 1, 1], [], []>} : vector<8x8xf32>, vector<8x8xf32>, vector<8x8xf32> -> vector<8x8xf32>
    %c2_740 = arith.constant 2 : index
    %c0_741 = arith.constant 0 : index
    %c0_742 = arith.constant 0 : index
    %1034 = vector.load %arg20[%c2_740, %c0_741, %c0_742] : memref<3x8x8xf32, #tpu.memory_space<vmem>>, vector<1x8x8xf32>
    %1035 = vector.shape_cast %1034 : vector<1x8x8xf32> to vector<8x8xf32>
    %cst_743 = arith.constant dense<0.000000e+00> : vector<8x8xf32>
    %1036 = tpu.matmul %1001, %1035, %cst_743 {dimension_numbers = #tpu.dot_dimension_numbers<[1], [0], [0], [1], [0, 0, 1, 1], [], []>} : vector<8x8xf32>, vector<8x8xf32>, vector<8x8xf32> -> vector<8x8xf32>
    %1037 = arith.addf %1033, %1036 : vector<8x8xf32>
    %c2_744 = arith.constant 2 : index
    %c0_745 = arith.constant 0 : index
    %c0_746 = arith.constant 0 : index
    %1038 = vector.load %arg21[%c2_744, %c0_745, %c0_746] : memref<3x1x8xf32, #tpu.memory_space<vmem>>, vector<1x1x8xf32>
    %1039 = vector.shape_cast %1038 : vector<1x1x8xf32> to vector<1x8xf32>
    %1040 = vector.broadcast %1039 : vector<1x8xf32> to vector<8x8xf32>
    %1041 = arith.addf %1037, %1040 : vector<8x8xf32>
    %c0_747 = arith.constant 0 : index
    %c0_748 = arith.constant 0 : index
    %c0_749 = arith.constant 0 : index
    %1042 = vector.load %arg22[%c0_747, %c0_748, %c0_749] : memref<3x8x8xf32, #tpu.memory_space<vmem>>, vector<1x8x8xf32>
    %1043 = vector.shape_cast %1042 : vector<1x8x8xf32> to vector<8x8xf32>
    %cst_750 = arith.constant dense<0.000000e+00> : vector<8x8xf32>
    %1044 = tpu.matmul %860, %1043, %cst_750 {dimension_numbers = #tpu.dot_dimension_numbers<[1], [0], [0], [1], [0, 0, 1, 1], [], []>} : vector<8x8xf32>, vector<8x8xf32>, vector<8x8xf32> -> vector<8x8xf32>
    %1045 = arith.addf %1019, %1044 : vector<8x8xf32>
    %c0_751 = arith.constant 0 : index
    %c0_752 = arith.constant 0 : index
    %c0_753 = arith.constant 0 : index
    %1046 = vector.load %arg23[%c0_751, %c0_752, %c0_753] : memref<3x1x8xf32, #tpu.memory_space<vmem>>, vector<1x1x8xf32>
    %1047 = vector.shape_cast %1046 : vector<1x1x8xf32> to vector<1x8xf32>
    %1048 = vector.broadcast %1047 : vector<1x8xf32> to vector<8x8xf32>
    %1049 = arith.addf %1045, %1048 : vector<8x8xf32>
    %1050 = arith.negf %1049 : vector<8x8xf32>
    %1051 = math.exp %1050 : vector<8x8xf32>
    %cst_754 = arith.constant 1.000000e+00 : f32
    %1052 = vector.broadcast %cst_754 : f32 to vector<8x8xf32>
    %1053 = arith.addf %1052, %1051 : vector<8x8xf32>
    %1054 = arith.divf %1052, %1053 : vector<8x8xf32>
    %c1_755 = arith.constant 1 : index
    %c0_756 = arith.constant 0 : index
    %c0_757 = arith.constant 0 : index
    %1055 = vector.load %arg22[%c1_755, %c0_756, %c0_757] : memref<3x8x8xf32, #tpu.memory_space<vmem>>, vector<1x8x8xf32>
    %1056 = vector.shape_cast %1055 : vector<1x8x8xf32> to vector<8x8xf32>
    %cst_758 = arith.constant dense<0.000000e+00> : vector<8x8xf32>
    %1057 = tpu.matmul %860, %1056, %cst_758 {dimension_numbers = #tpu.dot_dimension_numbers<[1], [0], [0], [1], [0, 0, 1, 1], [], []>} : vector<8x8xf32>, vector<8x8xf32>, vector<8x8xf32> -> vector<8x8xf32>
    %1058 = arith.addf %1030, %1057 : vector<8x8xf32>
    %c1_759 = arith.constant 1 : index
    %c0_760 = arith.constant 0 : index
    %c0_761 = arith.constant 0 : index
    %1059 = vector.load %arg23[%c1_759, %c0_760, %c0_761] : memref<3x1x8xf32, #tpu.memory_space<vmem>>, vector<1x1x8xf32>
    %1060 = vector.shape_cast %1059 : vector<1x1x8xf32> to vector<1x8xf32>
    %1061 = vector.broadcast %1060 : vector<1x8xf32> to vector<8x8xf32>
    %1062 = arith.addf %1058, %1061 : vector<8x8xf32>
    %1063 = arith.negf %1062 : vector<8x8xf32>
    %1064 = math.exp %1063 : vector<8x8xf32>
    %cst_762 = arith.constant 1.000000e+00 : f32
    %1065 = vector.broadcast %cst_762 : f32 to vector<8x8xf32>
    %1066 = arith.addf %1065, %1064 : vector<8x8xf32>
    %1067 = arith.divf %1065, %1066 : vector<8x8xf32>
    %c2_763 = arith.constant 2 : index
    %c0_764 = arith.constant 0 : index
    %c0_765 = arith.constant 0 : index
    %1068 = vector.load %arg22[%c2_763, %c0_764, %c0_765] : memref<3x8x8xf32, #tpu.memory_space<vmem>>, vector<1x8x8xf32>
    %1069 = vector.shape_cast %1068 : vector<1x8x8xf32> to vector<8x8xf32>
    %cst_766 = arith.constant dense<0.000000e+00> : vector<8x8xf32>
    %1070 = tpu.matmul %860, %1069, %cst_766 {dimension_numbers = #tpu.dot_dimension_numbers<[1], [0], [0], [1], [0, 0, 1, 1], [], []>} : vector<8x8xf32>, vector<8x8xf32>, vector<8x8xf32> -> vector<8x8xf32>
    %1071 = arith.addf %1041, %1070 : vector<8x8xf32>
    %c2_767 = arith.constant 2 : index
    %c0_768 = arith.constant 0 : index
    %c0_769 = arith.constant 0 : index
    %1072 = vector.load %arg23[%c2_767, %c0_768, %c0_769] : memref<3x1x8xf32, #tpu.memory_space<vmem>>, vector<1x1x8xf32>
    %1073 = vector.shape_cast %1072 : vector<1x1x8xf32> to vector<1x8xf32>
    %1074 = vector.broadcast %1073 : vector<1x8xf32> to vector<8x8xf32>
    %1075 = arith.addf %1071, %1074 : vector<8x8xf32>
    %1076 = arith.negf %1075 : vector<8x8xf32>
    %1077 = math.exp %1076 : vector<8x8xf32>
    %cst_770 = arith.constant 1.000000e+00 : f32
    %1078 = vector.broadcast %cst_770 : f32 to vector<8x8xf32>
    %1079 = arith.addf %1078, %1077 : vector<8x8xf32>
    %1080 = arith.divf %1078, %1079 : vector<8x8xf32>
    %1081 = arith.mulf %1067, %860 : vector<8x8xf32>
    %c0_771 = arith.constant 0 : index
    %c0_772 = arith.constant 0 : index
    %c0_773 = arith.constant 0 : index
    %1082 = vector.load %arg22[%c0_771, %c0_772, %c0_773] : memref<3x8x8xf32, #tpu.memory_space<vmem>>, vector<1x8x8xf32>
    %1083 = vector.shape_cast %1082 : vector<1x8x8xf32> to vector<8x8xf32>
    %cst_774 = arith.constant dense<0.000000e+00> : vector<8x8xf32>
    %1084 = tpu.matmul %1081, %1083, %cst_774 {dimension_numbers = #tpu.dot_dimension_numbers<[1], [0], [0], [1], [0, 0, 1, 1], [], []>} : vector<8x8xf32>, vector<8x8xf32>, vector<8x8xf32> -> vector<8x8xf32>
    %1085 = arith.addf %1019, %1084 : vector<8x8xf32>
    %c0_775 = arith.constant 0 : index
    %c0_776 = arith.constant 0 : index
    %c0_777 = arith.constant 0 : index
    %1086 = vector.load %arg23[%c0_775, %c0_776, %c0_777] : memref<3x1x8xf32, #tpu.memory_space<vmem>>, vector<1x1x8xf32>
    %1087 = vector.shape_cast %1086 : vector<1x1x8xf32> to vector<1x8xf32>
    %1088 = vector.broadcast %1087 : vector<1x8xf32> to vector<8x8xf32>
    %1089 = arith.addf %1085, %1088 : vector<8x8xf32>
    %1090 = arith.negf %1089 : vector<8x8xf32>
    %1091 = math.exp %1090 : vector<8x8xf32>
    %cst_778 = arith.constant 1.000000e+00 : f32
    %1092 = vector.broadcast %cst_778 : f32 to vector<8x8xf32>
    %1093 = arith.addf %1092, %1091 : vector<8x8xf32>
    %1094 = arith.divf %1092, %1093 : vector<8x8xf32>
    %1095 = arith.mulf %1067, %862 : vector<8x8xf32>
    %1096 = arith.mulf %1054, %1094 : vector<8x8xf32>
    %1097 = arith.addf %1095, %1096 : vector<8x8xf32>
    %1098 = math.tanh %1097 : vector<8x8xf32>
    %1099 = arith.mulf %1080, %1098 : vector<8x8xf32>
    %cst_779 = arith.constant dense<0.000000e+00> : vector<2x8xf32>
    %1100 = tpu.matmul %1, %1097, %cst_779 {dimension_numbers = #tpu.dot_dimension_numbers<[1], [0], [0], [1], [0, 0, 1, 1], [], []>} : vector<2x8xf32>, vector<8x8xf32>, vector<2x8xf32> -> vector<2x8xf32>
    %1101 = vector.broadcast %1005 : vector<2x1xf32> to vector<2x8xf32>
    %1102 = arith.mulf %1101, %1100 : vector<2x8xf32>
    %c0_780 = arith.constant 0 : index
    %c0_781 = arith.constant 0 : index
    %c0_782 = arith.constant 0 : index
    %1103 = vector.load %arg24[%c0_780, %c0_781, %c0_782] : memref<3x8x8xf32, #tpu.memory_space<vmem>>, vector<1x8x8xf32>
    %1104 = vector.shape_cast %1103 : vector<1x8x8xf32> to vector<8x8xf32>
    %cst_783 = arith.constant dense<0.000000e+00> : vector<2x8xf32>
    %1105 = tpu.matmul %1102, %1104, %cst_783 {dimension_numbers = #tpu.dot_dimension_numbers<[1], [0], [0], [1], [0, 0, 1, 1], [], []>} : vector<2x8xf32>, vector<8x8xf32>, vector<2x8xf32> -> vector<2x8xf32>
    %c0_784 = arith.constant 0 : index
    %c0_785 = arith.constant 0 : index
    %c0_786 = arith.constant 0 : index
    %1106 = vector.load %arg25[%c0_784, %c0_785, %c0_786] : memref<3x4x8xf32, #tpu.memory_space<vmem>>, vector<1x4x8xf32>
    %1107 = vector.shape_cast %1106 : vector<1x4x8xf32> to vector<4x8xf32>
    %cst_787 = arith.constant dense<0.000000e+00> : vector<2x8xf32>
    %1108 = tpu.matmul %976, %1107, %cst_787 {dimension_numbers = #tpu.dot_dimension_numbers<[1], [0], [0], [1], [0, 0, 1, 1], [], []>} : vector<2x4xf32>, vector<4x8xf32>, vector<2x8xf32> -> vector<2x8xf32>
    %1109 = arith.addf %1105, %1108 : vector<2x8xf32>
    %c0_788 = arith.constant 0 : index
    %c0_789 = arith.constant 0 : index
    %c0_790 = arith.constant 0 : index
    %1110 = vector.load %arg26[%c0_788, %c0_789, %c0_790] : memref<3x1x8xf32, #tpu.memory_space<vmem>>, vector<1x1x8xf32>
    %1111 = vector.shape_cast %1110 : vector<1x1x8xf32> to vector<1x8xf32>
    %1112 = vector.broadcast %1111 : vector<1x8xf32> to vector<2x8xf32>
    %1113 = arith.addf %1109, %1112 : vector<2x8xf32>
    %c1_791 = arith.constant 1 : index
    %c0_792 = arith.constant 0 : index
    %c0_793 = arith.constant 0 : index
    %1114 = vector.load %arg24[%c1_791, %c0_792, %c0_793] : memref<3x8x8xf32, #tpu.memory_space<vmem>>, vector<1x8x8xf32>
    %1115 = vector.shape_cast %1114 : vector<1x8x8xf32> to vector<8x8xf32>
    %cst_794 = arith.constant dense<0.000000e+00> : vector<2x8xf32>
    %1116 = tpu.matmul %1102, %1115, %cst_794 {dimension_numbers = #tpu.dot_dimension_numbers<[1], [0], [0], [1], [0, 0, 1, 1], [], []>} : vector<2x8xf32>, vector<8x8xf32>, vector<2x8xf32> -> vector<2x8xf32>
    %c1_795 = arith.constant 1 : index
    %c0_796 = arith.constant 0 : index
    %c0_797 = arith.constant 0 : index
    %1117 = vector.load %arg25[%c1_795, %c0_796, %c0_797] : memref<3x4x8xf32, #tpu.memory_space<vmem>>, vector<1x4x8xf32>
    %1118 = vector.shape_cast %1117 : vector<1x4x8xf32> to vector<4x8xf32>
    %cst_798 = arith.constant dense<0.000000e+00> : vector<2x8xf32>
    %1119 = tpu.matmul %976, %1118, %cst_798 {dimension_numbers = #tpu.dot_dimension_numbers<[1], [0], [0], [1], [0, 0, 1, 1], [], []>} : vector<2x4xf32>, vector<4x8xf32>, vector<2x8xf32> -> vector<2x8xf32>
    %1120 = arith.addf %1116, %1119 : vector<2x8xf32>
    %c1_799 = arith.constant 1 : index
    %c0_800 = arith.constant 0 : index
    %c0_801 = arith.constant 0 : index
    %1121 = vector.load %arg26[%c1_799, %c0_800, %c0_801] : memref<3x1x8xf32, #tpu.memory_space<vmem>>, vector<1x1x8xf32>
    %1122 = vector.shape_cast %1121 : vector<1x1x8xf32> to vector<1x8xf32>
    %1123 = vector.broadcast %1122 : vector<1x8xf32> to vector<2x8xf32>
    %1124 = arith.addf %1120, %1123 : vector<2x8xf32>
    %c2_802 = arith.constant 2 : index
    %c0_803 = arith.constant 0 : index
    %c0_804 = arith.constant 0 : index
    %1125 = vector.load %arg24[%c2_802, %c0_803, %c0_804] : memref<3x8x8xf32, #tpu.memory_space<vmem>>, vector<1x8x8xf32>
    %1126 = vector.shape_cast %1125 : vector<1x8x8xf32> to vector<8x8xf32>
    %cst_805 = arith.constant dense<0.000000e+00> : vector<2x8xf32>
    %1127 = tpu.matmul %1102, %1126, %cst_805 {dimension_numbers = #tpu.dot_dimension_numbers<[1], [0], [0], [1], [0, 0, 1, 1], [], []>} : vector<2x8xf32>, vector<8x8xf32>, vector<2x8xf32> -> vector<2x8xf32>
    %c2_806 = arith.constant 2 : index
    %c0_807 = arith.constant 0 : index
    %c0_808 = arith.constant 0 : index
    %1128 = vector.load %arg25[%c2_806, %c0_807, %c0_808] : memref<3x4x8xf32, #tpu.memory_space<vmem>>, vector<1x4x8xf32>
    %1129 = vector.shape_cast %1128 : vector<1x4x8xf32> to vector<4x8xf32>
    %cst_809 = arith.constant dense<0.000000e+00> : vector<2x8xf32>
    %1130 = tpu.matmul %976, %1129, %cst_809 {dimension_numbers = #tpu.dot_dimension_numbers<[1], [0], [0], [1], [0, 0, 1, 1], [], []>} : vector<2x4xf32>, vector<4x8xf32>, vector<2x8xf32> -> vector<2x8xf32>
    %1131 = arith.addf %1127, %1130 : vector<2x8xf32>
    %c2_810 = arith.constant 2 : index
    %c0_811 = arith.constant 0 : index
    %c0_812 = arith.constant 0 : index
    %1132 = vector.load %arg26[%c2_810, %c0_811, %c0_812] : memref<3x1x8xf32, #tpu.memory_space<vmem>>, vector<1x1x8xf32>
    %1133 = vector.shape_cast %1132 : vector<1x1x8xf32> to vector<1x8xf32>
    %1134 = vector.broadcast %1133 : vector<1x8xf32> to vector<2x8xf32>
    %1135 = arith.addf %1131, %1134 : vector<2x8xf32>
    %c0_813 = arith.constant 0 : index
    %c0_814 = arith.constant 0 : index
    %c0_815 = arith.constant 0 : index
    %1136 = vector.load %arg27[%c0_813, %c0_814, %c0_815] : memref<3x8x8xf32, #tpu.memory_space<vmem>>, vector<1x8x8xf32>
    %1137 = vector.shape_cast %1136 : vector<1x8x8xf32> to vector<8x8xf32>
    %cst_816 = arith.constant dense<0.000000e+00> : vector<2x8xf32>
    %1138 = tpu.matmul %954, %1137, %cst_816 {dimension_numbers = #tpu.dot_dimension_numbers<[1], [0], [0], [1], [0, 0, 1, 1], [], []>} : vector<2x8xf32>, vector<8x8xf32>, vector<2x8xf32> -> vector<2x8xf32>
    %1139 = arith.addf %1113, %1138 : vector<2x8xf32>
    %c0_817 = arith.constant 0 : index
    %c0_818 = arith.constant 0 : index
    %c0_819 = arith.constant 0 : index
    %1140 = vector.load %arg28[%c0_817, %c0_818, %c0_819] : memref<3x1x8xf32, #tpu.memory_space<vmem>>, vector<1x1x8xf32>
    %1141 = vector.shape_cast %1140 : vector<1x1x8xf32> to vector<1x8xf32>
    %1142 = vector.broadcast %1141 : vector<1x8xf32> to vector<2x8xf32>
    %1143 = arith.addf %1139, %1142 : vector<2x8xf32>
    %1144 = arith.negf %1143 : vector<2x8xf32>
    %1145 = math.exp %1144 : vector<2x8xf32>
    %cst_820 = arith.constant 1.000000e+00 : f32
    %1146 = vector.broadcast %cst_820 : f32 to vector<2x8xf32>
    %1147 = arith.addf %1146, %1145 : vector<2x8xf32>
    %1148 = arith.divf %1146, %1147 : vector<2x8xf32>
    %c1_821 = arith.constant 1 : index
    %c0_822 = arith.constant 0 : index
    %c0_823 = arith.constant 0 : index
    %1149 = vector.load %arg27[%c1_821, %c0_822, %c0_823] : memref<3x8x8xf32, #tpu.memory_space<vmem>>, vector<1x8x8xf32>
    %1150 = vector.shape_cast %1149 : vector<1x8x8xf32> to vector<8x8xf32>
    %cst_824 = arith.constant dense<0.000000e+00> : vector<2x8xf32>
    %1151 = tpu.matmul %954, %1150, %cst_824 {dimension_numbers = #tpu.dot_dimension_numbers<[1], [0], [0], [1], [0, 0, 1, 1], [], []>} : vector<2x8xf32>, vector<8x8xf32>, vector<2x8xf32> -> vector<2x8xf32>
    %1152 = arith.addf %1124, %1151 : vector<2x8xf32>
    %c1_825 = arith.constant 1 : index
    %c0_826 = arith.constant 0 : index
    %c0_827 = arith.constant 0 : index
    %1153 = vector.load %arg28[%c1_825, %c0_826, %c0_827] : memref<3x1x8xf32, #tpu.memory_space<vmem>>, vector<1x1x8xf32>
    %1154 = vector.shape_cast %1153 : vector<1x1x8xf32> to vector<1x8xf32>
    %1155 = vector.broadcast %1154 : vector<1x8xf32> to vector<2x8xf32>
    %1156 = arith.addf %1152, %1155 : vector<2x8xf32>
    %1157 = arith.negf %1156 : vector<2x8xf32>
    %1158 = math.exp %1157 : vector<2x8xf32>
    %cst_828 = arith.constant 1.000000e+00 : f32
    %1159 = vector.broadcast %cst_828 : f32 to vector<2x8xf32>
    %1160 = arith.addf %1159, %1158 : vector<2x8xf32>
    %1161 = arith.divf %1159, %1160 : vector<2x8xf32>
    %c2_829 = arith.constant 2 : index
    %c0_830 = arith.constant 0 : index
    %c0_831 = arith.constant 0 : index
    %1162 = vector.load %arg27[%c2_829, %c0_830, %c0_831] : memref<3x8x8xf32, #tpu.memory_space<vmem>>, vector<1x8x8xf32>
    %1163 = vector.shape_cast %1162 : vector<1x8x8xf32> to vector<8x8xf32>
    %cst_832 = arith.constant dense<0.000000e+00> : vector<2x8xf32>
    %1164 = tpu.matmul %954, %1163, %cst_832 {dimension_numbers = #tpu.dot_dimension_numbers<[1], [0], [0], [1], [0, 0, 1, 1], [], []>} : vector<2x8xf32>, vector<8x8xf32>, vector<2x8xf32> -> vector<2x8xf32>
    %1165 = arith.addf %1135, %1164 : vector<2x8xf32>
    %c2_833 = arith.constant 2 : index
    %c0_834 = arith.constant 0 : index
    %c0_835 = arith.constant 0 : index
    %1166 = vector.load %arg28[%c2_833, %c0_834, %c0_835] : memref<3x1x8xf32, #tpu.memory_space<vmem>>, vector<1x1x8xf32>
    %1167 = vector.shape_cast %1166 : vector<1x1x8xf32> to vector<1x8xf32>
    %1168 = vector.broadcast %1167 : vector<1x8xf32> to vector<2x8xf32>
    %1169 = arith.addf %1165, %1168 : vector<2x8xf32>
    %1170 = arith.negf %1169 : vector<2x8xf32>
    %1171 = math.exp %1170 : vector<2x8xf32>
    %cst_836 = arith.constant 1.000000e+00 : f32
    %1172 = vector.broadcast %cst_836 : f32 to vector<2x8xf32>
    %1173 = arith.addf %1172, %1171 : vector<2x8xf32>
    %1174 = arith.divf %1172, %1173 : vector<2x8xf32>
    %1175 = arith.mulf %1161, %954 : vector<2x8xf32>
    %c0_837 = arith.constant 0 : index
    %c0_838 = arith.constant 0 : index
    %c0_839 = arith.constant 0 : index
    %1176 = vector.load %arg27[%c0_837, %c0_838, %c0_839] : memref<3x8x8xf32, #tpu.memory_space<vmem>>, vector<1x8x8xf32>
    %1177 = vector.shape_cast %1176 : vector<1x8x8xf32> to vector<8x8xf32>
    %cst_840 = arith.constant dense<0.000000e+00> : vector<2x8xf32>
    %1178 = tpu.matmul %1175, %1177, %cst_840 {dimension_numbers = #tpu.dot_dimension_numbers<[1], [0], [0], [1], [0, 0, 1, 1], [], []>} : vector<2x8xf32>, vector<8x8xf32>, vector<2x8xf32> -> vector<2x8xf32>
    %1179 = arith.addf %1113, %1178 : vector<2x8xf32>
    %c0_841 = arith.constant 0 : index
    %c0_842 = arith.constant 0 : index
    %c0_843 = arith.constant 0 : index
    %1180 = vector.load %arg28[%c0_841, %c0_842, %c0_843] : memref<3x1x8xf32, #tpu.memory_space<vmem>>, vector<1x1x8xf32>
    %1181 = vector.shape_cast %1180 : vector<1x1x8xf32> to vector<1x8xf32>
    %1182 = vector.broadcast %1181 : vector<1x8xf32> to vector<2x8xf32>
    %1183 = arith.addf %1179, %1182 : vector<2x8xf32>
    %1184 = arith.negf %1183 : vector<2x8xf32>
    %1185 = math.exp %1184 : vector<2x8xf32>
    %cst_844 = arith.constant 1.000000e+00 : f32
    %1186 = vector.broadcast %cst_844 : f32 to vector<2x8xf32>
    %1187 = arith.addf %1186, %1185 : vector<2x8xf32>
    %1188 = arith.divf %1186, %1187 : vector<2x8xf32>
    %1189 = arith.mulf %1161, %956 : vector<2x8xf32>
    %1190 = arith.mulf %1148, %1188 : vector<2x8xf32>
    %1191 = arith.addf %1189, %1190 : vector<2x8xf32>
    %1192 = math.tanh %1191 : vector<2x8xf32>
    %1193 = arith.mulf %1174, %1192 : vector<2x8xf32>
    %c4_845 = arith.constant 4 : index
    %c0_846 = arith.constant 0 : index
    %c0_847 = arith.constant 0 : index
    %1194 = vector.load %arg7[%c4_845, %c0_846, %c0_847] : memref<7x14x2xf32, #tpu.memory_space<vmem>>, vector<1x14x2xf32>
    %1195 = vector.shape_cast %1194 : vector<1x14x2xf32> to vector<14x2xf32>
    %cst_848 = arith.constant dense<0.000000e+00> : vector<14x8xf32>
    %1196 = tpu.matmul %1195, %1191, %cst_848 {dimension_numbers = #tpu.dot_dimension_numbers<[1], [0], [0], [1], [0, 0, 1, 1], [], []>} : vector<14x2xf32>, vector<2x8xf32>, vector<14x8xf32> -> vector<14x8xf32>
    %1197 = arith.addf %960, %1196 : vector<14x8xf32>
    %c4_849 = arith.constant 4 : index
    %c0_850 = arith.constant 0 : index
    %c0_851 = arith.constant 0 : index
    %1198 = vector.load %arg8[%c4_849, %c0_850, %c0_851] : memref<7x1x7xf32, #tpu.memory_space<vmem>>, vector<1x1x7xf32>
    %1199 = vector.shape_cast %1198 : vector<1x1x7xf32> to vector<1x7xf32>
    %1200 = vector.broadcast %1005 : vector<2x1xf32> to vector<2x7xf32>
    %1201 = vector.broadcast %1199 : vector<1x7xf32> to vector<2x7xf32>
    %1202 = arith.mulf %1200, %1201 : vector<2x7xf32>
    %1203 = arith.addf %966, %1202 : vector<2x7xf32>
    %c5_852 = arith.constant 5 : index
    %c0_853 = arith.constant 0 : index
    %c0_854 = arith.constant 0 : index
    %1204 = vector.load %arg0[%c5_852, %c0_853, %c0_854] : memref<8x8x1xf32, #tpu.memory_space<vmem>>, vector<1x8x1xf32>
    %1205 = vector.shape_cast %1204 : vector<1x8x1xf32> to vector<8x1xf32>
    %c5_855 = arith.constant 5 : index
    %c0_856 = arith.constant 0 : index
    %c0_857 = arith.constant 0 : index
    %1206 = vector.load %arg1[%c5_855, %c0_856, %c0_857] : memref<8x1x8xf32, #tpu.memory_space<vmem>>, vector<1x1x8xf32>
    %1207 = vector.shape_cast %1206 : vector<1x1x8xf32> to vector<1x8xf32>
    %c6 = arith.constant 6 : index
    %c0_858 = arith.constant 0 : index
    %c0_859 = arith.constant 0 : index
    %1208 = vector.load %arg0[%c6, %c0_858, %c0_859] : memref<8x8x1xf32, #tpu.memory_space<vmem>>, vector<1x8x1xf32>
    %1209 = vector.shape_cast %1208 : vector<1x8x1xf32> to vector<8x1xf32>
    %c6_860 = arith.constant 6 : index
    %c0_861 = arith.constant 0 : index
    %c0_862 = arith.constant 0 : index
    %1210 = vector.load %arg1[%c6_860, %c0_861, %c0_862] : memref<8x1x8xf32, #tpu.memory_space<vmem>>, vector<1x1x8xf32>
    %1211 = vector.shape_cast %1210 : vector<1x1x8xf32> to vector<1x8xf32>
    %c6_863 = arith.constant 6 : index
    %c0_864 = arith.constant 0 : index
    %c0_865 = arith.constant 0 : index
    %1212 = vector.load %arg2[%c6_863, %c0_864, %c0_865] : memref<8x2x4xf32, #tpu.memory_space<vmem>>, vector<1x2x4xf32>
    %1213 = vector.shape_cast %1212 : vector<1x2x4xf32> to vector<2x4xf32>
    %1214 = vector.broadcast %1205 : vector<8x1xf32> to vector<8x8xf32>
    %1215 = vector.broadcast %1211 : vector<1x8xf32> to vector<8x8xf32>
    %1216 = arith.mulf %1214, %1215 : vector<8x8xf32>
    %1217 = arith.mulf %1216, %0 : vector<8x8xf32>
    %1218 = vector.broadcast %1209 : vector<8x1xf32> to vector<8x8xf32>
    %1219 = vector.broadcast %1207 : vector<1x8xf32> to vector<8x8xf32>
    %1220 = arith.mulf %1218, %1219 : vector<8x8xf32>
    %1221 = arith.mulf %1220, %0 : vector<8x8xf32>
    %cst_866 = arith.constant dense<0.000000e+00> : vector<8x8xf32>
    %1222 = tpu.matmul %1217, %1097, %cst_866 {dimension_numbers = #tpu.dot_dimension_numbers<[1], [0], [0], [1], [0, 0, 1, 1], [], []>} : vector<8x8xf32>, vector<8x8xf32>, vector<8x8xf32> -> vector<8x8xf32>
    %cst_867 = arith.constant dense<0.000000e+00> : vector<8x8xf32>
    %1223 = tpu.matmul %1222, %3, %cst_867 {dimension_numbers = #tpu.dot_dimension_numbers<[1], [0], [0], [1], [0, 0, 1, 1], [], []>} : vector<8x8xf32>, vector<8x8xf32>, vector<8x8xf32> -> vector<8x8xf32>
    %1224 = vector.broadcast %4 : vector<1x8xf32> to vector<8x8xf32>
    %1225 = arith.addf %1223, %1224 : vector<8x8xf32>
    %1226 = math.tanh %1225 : vector<8x8xf32>
    %cst_868 = arith.constant dense<0.000000e+00> : vector<8x8xf32>
    %1227 = tpu.matmul %1221, %1097, %cst_868 {dimension_numbers = #tpu.dot_dimension_numbers<[1], [0], [0], [1], [0, 0, 1, 1], [], []>} : vector<8x8xf32>, vector<8x8xf32>, vector<8x8xf32> -> vector<8x8xf32>
    %cst_869 = arith.constant dense<0.000000e+00> : vector<8x8xf32>
    %1228 = tpu.matmul %1227, %5, %cst_869 {dimension_numbers = #tpu.dot_dimension_numbers<[1], [0], [0], [1], [0, 0, 1, 1], [], []>} : vector<8x8xf32>, vector<8x8xf32>, vector<8x8xf32> -> vector<8x8xf32>
    %1229 = vector.broadcast %6 : vector<1x8xf32> to vector<8x8xf32>
    %1230 = arith.addf %1228, %1229 : vector<8x8xf32>
    %1231 = math.tanh %1230 : vector<8x8xf32>
    %cst_870 = arith.constant dense<0.000000e+00> : vector<8x8xf32>
    %1232 = tpu.matmul %1226, %7, %cst_870 {dimension_numbers = #tpu.dot_dimension_numbers<[1], [0], [0], [1], [0, 0, 1, 1], [], []>} : vector<8x8xf32>, vector<8x8xf32>, vector<8x8xf32> -> vector<8x8xf32>
    %cst_871 = arith.constant dense<0.000000e+00> : vector<8x8xf32>
    %1233 = tpu.matmul %1231, %8, %cst_871 {dimension_numbers = #tpu.dot_dimension_numbers<[1], [0], [0], [1], [0, 0, 1, 1], [], []>} : vector<8x8xf32>, vector<8x8xf32>, vector<8x8xf32> -> vector<8x8xf32>
    %1234 = arith.addf %1232, %1233 : vector<8x8xf32>
    %cst_872 = arith.constant dense<0.000000e+00> : vector<8x8xf32>
    %1235 = tpu.matmul %1226, %9, %cst_872 {dimension_numbers = #tpu.dot_dimension_numbers<[1], [0], [0], [1], [0, 0, 1, 1], [], []>} : vector<8x8xf32>, vector<8x8xf32>, vector<8x8xf32> -> vector<8x8xf32>
    %cst_873 = arith.constant dense<0.000000e+00> : vector<8x8xf32>
    %1236 = tpu.matmul %1231, %10, %cst_873 {dimension_numbers = #tpu.dot_dimension_numbers<[1], [0], [0], [1], [0, 0, 1, 1], [], []>} : vector<8x8xf32>, vector<8x8xf32>, vector<8x8xf32> -> vector<8x8xf32>
    %1237 = arith.addf %1235, %1236 : vector<8x8xf32>
    %1238 = arith.maximumf %1234, %1237 : vector<8x8xf32>
    %cst_874 = arith.constant dense<0.000000e+00> : vector<2x8xf32>
    %1239 = tpu.matmul %1, %1238, %cst_874 {dimension_numbers = #tpu.dot_dimension_numbers<[1], [0], [0], [1], [0, 0, 1, 1], [], []>} : vector<2x8xf32>, vector<8x8xf32>, vector<2x8xf32> -> vector<2x8xf32>
    %cst_875 = arith.constant dense<0.000000e+00> : vector<2x1xf32>
    %1240 = tpu.matmul %1239, %11, %cst_875 {dimension_numbers = #tpu.dot_dimension_numbers<[1], [0], [0], [1], [0, 0, 1, 1], [], []>} : vector<2x8xf32>, vector<8x1xf32>, vector<2x1xf32> -> vector<2x1xf32>
    %cst_876 = arith.constant dense<0.000000e+00> : vector<2x1xf32>
    %1241 = tpu.matmul %1191, %12, %cst_876 {dimension_numbers = #tpu.dot_dimension_numbers<[1], [0], [0], [1], [0, 0, 1, 1], [], []>} : vector<2x8xf32>, vector<8x1xf32>, vector<2x1xf32> -> vector<2x1xf32>
    %1242 = arith.addf %1240, %1241 : vector<2x1xf32>
    %1243 = vector.broadcast %1242 : vector<2x1xf32> to vector<2x8xf32>
    %1244 = arith.mulf %1243, %1191 : vector<2x8xf32>
    %cst_877 = arith.constant dense<0.000000e+00> : vector<8x8xf32>
    %1245 = tpu.matmul %2, %1244, %cst_877 {dimension_numbers = #tpu.dot_dimension_numbers<[1], [0], [0], [1], [0, 0, 1, 1], [], []>} : vector<8x2xf32>, vector<2x8xf32>, vector<8x8xf32> -> vector<8x8xf32>
    %c0_878 = arith.constant 0 : index
    %c0_879 = arith.constant 0 : index
    %c0_880 = arith.constant 0 : index
    %1246 = vector.load %arg19[%c0_878, %c0_879, %c0_880] : memref<3x8x8xf32, #tpu.memory_space<vmem>>, vector<1x8x8xf32>
    %1247 = vector.shape_cast %1246 : vector<1x8x8xf32> to vector<8x8xf32>
    %cst_881 = arith.constant dense<0.000000e+00> : vector<8x8xf32>
    %1248 = tpu.matmul %1245, %1247, %cst_881 {dimension_numbers = #tpu.dot_dimension_numbers<[1], [0], [0], [1], [0, 0, 1, 1], [], []>} : vector<8x8xf32>, vector<8x8xf32>, vector<8x8xf32> -> vector<8x8xf32>
    %c0_882 = arith.constant 0 : index
    %c0_883 = arith.constant 0 : index
    %c0_884 = arith.constant 0 : index
    %1249 = vector.load %arg20[%c0_882, %c0_883, %c0_884] : memref<3x8x8xf32, #tpu.memory_space<vmem>>, vector<1x8x8xf32>
    %1250 = vector.shape_cast %1249 : vector<1x8x8xf32> to vector<8x8xf32>
    %cst_885 = arith.constant dense<0.000000e+00> : vector<8x8xf32>
    %1251 = tpu.matmul %1238, %1250, %cst_885 {dimension_numbers = #tpu.dot_dimension_numbers<[1], [0], [0], [1], [0, 0, 1, 1], [], []>} : vector<8x8xf32>, vector<8x8xf32>, vector<8x8xf32> -> vector<8x8xf32>
    %1252 = arith.addf %1248, %1251 : vector<8x8xf32>
    %c0_886 = arith.constant 0 : index
    %c0_887 = arith.constant 0 : index
    %c0_888 = arith.constant 0 : index
    %1253 = vector.load %arg21[%c0_886, %c0_887, %c0_888] : memref<3x1x8xf32, #tpu.memory_space<vmem>>, vector<1x1x8xf32>
    %1254 = vector.shape_cast %1253 : vector<1x1x8xf32> to vector<1x8xf32>
    %1255 = vector.broadcast %1254 : vector<1x8xf32> to vector<8x8xf32>
    %1256 = arith.addf %1252, %1255 : vector<8x8xf32>
    %c1_889 = arith.constant 1 : index
    %c0_890 = arith.constant 0 : index
    %c0_891 = arith.constant 0 : index
    %1257 = vector.load %arg19[%c1_889, %c0_890, %c0_891] : memref<3x8x8xf32, #tpu.memory_space<vmem>>, vector<1x8x8xf32>
    %1258 = vector.shape_cast %1257 : vector<1x8x8xf32> to vector<8x8xf32>
    %cst_892 = arith.constant dense<0.000000e+00> : vector<8x8xf32>
    %1259 = tpu.matmul %1245, %1258, %cst_892 {dimension_numbers = #tpu.dot_dimension_numbers<[1], [0], [0], [1], [0, 0, 1, 1], [], []>} : vector<8x8xf32>, vector<8x8xf32>, vector<8x8xf32> -> vector<8x8xf32>
    %c1_893 = arith.constant 1 : index
    %c0_894 = arith.constant 0 : index
    %c0_895 = arith.constant 0 : index
    %1260 = vector.load %arg20[%c1_893, %c0_894, %c0_895] : memref<3x8x8xf32, #tpu.memory_space<vmem>>, vector<1x8x8xf32>
    %1261 = vector.shape_cast %1260 : vector<1x8x8xf32> to vector<8x8xf32>
    %cst_896 = arith.constant dense<0.000000e+00> : vector<8x8xf32>
    %1262 = tpu.matmul %1238, %1261, %cst_896 {dimension_numbers = #tpu.dot_dimension_numbers<[1], [0], [0], [1], [0, 0, 1, 1], [], []>} : vector<8x8xf32>, vector<8x8xf32>, vector<8x8xf32> -> vector<8x8xf32>
    %1263 = arith.addf %1259, %1262 : vector<8x8xf32>
    %c1_897 = arith.constant 1 : index
    %c0_898 = arith.constant 0 : index
    %c0_899 = arith.constant 0 : index
    %1264 = vector.load %arg21[%c1_897, %c0_898, %c0_899] : memref<3x1x8xf32, #tpu.memory_space<vmem>>, vector<1x1x8xf32>
    %1265 = vector.shape_cast %1264 : vector<1x1x8xf32> to vector<1x8xf32>
    %1266 = vector.broadcast %1265 : vector<1x8xf32> to vector<8x8xf32>
    %1267 = arith.addf %1263, %1266 : vector<8x8xf32>
    %c2_900 = arith.constant 2 : index
    %c0_901 = arith.constant 0 : index
    %c0_902 = arith.constant 0 : index
    %1268 = vector.load %arg19[%c2_900, %c0_901, %c0_902] : memref<3x8x8xf32, #tpu.memory_space<vmem>>, vector<1x8x8xf32>
    %1269 = vector.shape_cast %1268 : vector<1x8x8xf32> to vector<8x8xf32>
    %cst_903 = arith.constant dense<0.000000e+00> : vector<8x8xf32>
    %1270 = tpu.matmul %1245, %1269, %cst_903 {dimension_numbers = #tpu.dot_dimension_numbers<[1], [0], [0], [1], [0, 0, 1, 1], [], []>} : vector<8x8xf32>, vector<8x8xf32>, vector<8x8xf32> -> vector<8x8xf32>
    %c2_904 = arith.constant 2 : index
    %c0_905 = arith.constant 0 : index
    %c0_906 = arith.constant 0 : index
    %1271 = vector.load %arg20[%c2_904, %c0_905, %c0_906] : memref<3x8x8xf32, #tpu.memory_space<vmem>>, vector<1x8x8xf32>
    %1272 = vector.shape_cast %1271 : vector<1x8x8xf32> to vector<8x8xf32>
    %cst_907 = arith.constant dense<0.000000e+00> : vector<8x8xf32>
    %1273 = tpu.matmul %1238, %1272, %cst_907 {dimension_numbers = #tpu.dot_dimension_numbers<[1], [0], [0], [1], [0, 0, 1, 1], [], []>} : vector<8x8xf32>, vector<8x8xf32>, vector<8x8xf32> -> vector<8x8xf32>
    %1274 = arith.addf %1270, %1273 : vector<8x8xf32>
    %c2_908 = arith.constant 2 : index
    %c0_909 = arith.constant 0 : index
    %c0_910 = arith.constant 0 : index
    %1275 = vector.load %arg21[%c2_908, %c0_909, %c0_910] : memref<3x1x8xf32, #tpu.memory_space<vmem>>, vector<1x1x8xf32>
    %1276 = vector.shape_cast %1275 : vector<1x1x8xf32> to vector<1x8xf32>
    %1277 = vector.broadcast %1276 : vector<1x8xf32> to vector<8x8xf32>
    %1278 = arith.addf %1274, %1277 : vector<8x8xf32>
    %c0_911 = arith.constant 0 : index
    %c0_912 = arith.constant 0 : index
    %c0_913 = arith.constant 0 : index
    %1279 = vector.load %arg22[%c0_911, %c0_912, %c0_913] : memref<3x8x8xf32, #tpu.memory_space<vmem>>, vector<1x8x8xf32>
    %1280 = vector.shape_cast %1279 : vector<1x8x8xf32> to vector<8x8xf32>
    %cst_914 = arith.constant dense<0.000000e+00> : vector<8x8xf32>
    %1281 = tpu.matmul %1097, %1280, %cst_914 {dimension_numbers = #tpu.dot_dimension_numbers<[1], [0], [0], [1], [0, 0, 1, 1], [], []>} : vector<8x8xf32>, vector<8x8xf32>, vector<8x8xf32> -> vector<8x8xf32>
    %1282 = arith.addf %1256, %1281 : vector<8x8xf32>
    %c0_915 = arith.constant 0 : index
    %c0_916 = arith.constant 0 : index
    %c0_917 = arith.constant 0 : index
    %1283 = vector.load %arg23[%c0_915, %c0_916, %c0_917] : memref<3x1x8xf32, #tpu.memory_space<vmem>>, vector<1x1x8xf32>
    %1284 = vector.shape_cast %1283 : vector<1x1x8xf32> to vector<1x8xf32>
    %1285 = vector.broadcast %1284 : vector<1x8xf32> to vector<8x8xf32>
    %1286 = arith.addf %1282, %1285 : vector<8x8xf32>
    %1287 = arith.negf %1286 : vector<8x8xf32>
    %1288 = math.exp %1287 : vector<8x8xf32>
    %cst_918 = arith.constant 1.000000e+00 : f32
    %1289 = vector.broadcast %cst_918 : f32 to vector<8x8xf32>
    %1290 = arith.addf %1289, %1288 : vector<8x8xf32>
    %1291 = arith.divf %1289, %1290 : vector<8x8xf32>
    %c1_919 = arith.constant 1 : index
    %c0_920 = arith.constant 0 : index
    %c0_921 = arith.constant 0 : index
    %1292 = vector.load %arg22[%c1_919, %c0_920, %c0_921] : memref<3x8x8xf32, #tpu.memory_space<vmem>>, vector<1x8x8xf32>
    %1293 = vector.shape_cast %1292 : vector<1x8x8xf32> to vector<8x8xf32>
    %cst_922 = arith.constant dense<0.000000e+00> : vector<8x8xf32>
    %1294 = tpu.matmul %1097, %1293, %cst_922 {dimension_numbers = #tpu.dot_dimension_numbers<[1], [0], [0], [1], [0, 0, 1, 1], [], []>} : vector<8x8xf32>, vector<8x8xf32>, vector<8x8xf32> -> vector<8x8xf32>
    %1295 = arith.addf %1267, %1294 : vector<8x8xf32>
    %c1_923 = arith.constant 1 : index
    %c0_924 = arith.constant 0 : index
    %c0_925 = arith.constant 0 : index
    %1296 = vector.load %arg23[%c1_923, %c0_924, %c0_925] : memref<3x1x8xf32, #tpu.memory_space<vmem>>, vector<1x1x8xf32>
    %1297 = vector.shape_cast %1296 : vector<1x1x8xf32> to vector<1x8xf32>
    %1298 = vector.broadcast %1297 : vector<1x8xf32> to vector<8x8xf32>
    %1299 = arith.addf %1295, %1298 : vector<8x8xf32>
    %1300 = arith.negf %1299 : vector<8x8xf32>
    %1301 = math.exp %1300 : vector<8x8xf32>
    %cst_926 = arith.constant 1.000000e+00 : f32
    %1302 = vector.broadcast %cst_926 : f32 to vector<8x8xf32>
    %1303 = arith.addf %1302, %1301 : vector<8x8xf32>
    %1304 = arith.divf %1302, %1303 : vector<8x8xf32>
    %c2_927 = arith.constant 2 : index
    %c0_928 = arith.constant 0 : index
    %c0_929 = arith.constant 0 : index
    %1305 = vector.load %arg22[%c2_927, %c0_928, %c0_929] : memref<3x8x8xf32, #tpu.memory_space<vmem>>, vector<1x8x8xf32>
    %1306 = vector.shape_cast %1305 : vector<1x8x8xf32> to vector<8x8xf32>
    %cst_930 = arith.constant dense<0.000000e+00> : vector<8x8xf32>
    %1307 = tpu.matmul %1097, %1306, %cst_930 {dimension_numbers = #tpu.dot_dimension_numbers<[1], [0], [0], [1], [0, 0, 1, 1], [], []>} : vector<8x8xf32>, vector<8x8xf32>, vector<8x8xf32> -> vector<8x8xf32>
    %1308 = arith.addf %1278, %1307 : vector<8x8xf32>
    %c2_931 = arith.constant 2 : index
    %c0_932 = arith.constant 0 : index
    %c0_933 = arith.constant 0 : index
    %1309 = vector.load %arg23[%c2_931, %c0_932, %c0_933] : memref<3x1x8xf32, #tpu.memory_space<vmem>>, vector<1x1x8xf32>
    %1310 = vector.shape_cast %1309 : vector<1x1x8xf32> to vector<1x8xf32>
    %1311 = vector.broadcast %1310 : vector<1x8xf32> to vector<8x8xf32>
    %1312 = arith.addf %1308, %1311 : vector<8x8xf32>
    %1313 = arith.negf %1312 : vector<8x8xf32>
    %1314 = math.exp %1313 : vector<8x8xf32>
    %cst_934 = arith.constant 1.000000e+00 : f32
    %1315 = vector.broadcast %cst_934 : f32 to vector<8x8xf32>
    %1316 = arith.addf %1315, %1314 : vector<8x8xf32>
    %1317 = arith.divf %1315, %1316 : vector<8x8xf32>
    %1318 = arith.mulf %1304, %1097 : vector<8x8xf32>
    %c0_935 = arith.constant 0 : index
    %c0_936 = arith.constant 0 : index
    %c0_937 = arith.constant 0 : index
    %1319 = vector.load %arg22[%c0_935, %c0_936, %c0_937] : memref<3x8x8xf32, #tpu.memory_space<vmem>>, vector<1x8x8xf32>
    %1320 = vector.shape_cast %1319 : vector<1x8x8xf32> to vector<8x8xf32>
    %cst_938 = arith.constant dense<0.000000e+00> : vector<8x8xf32>
    %1321 = tpu.matmul %1318, %1320, %cst_938 {dimension_numbers = #tpu.dot_dimension_numbers<[1], [0], [0], [1], [0, 0, 1, 1], [], []>} : vector<8x8xf32>, vector<8x8xf32>, vector<8x8xf32> -> vector<8x8xf32>
    %1322 = arith.addf %1256, %1321 : vector<8x8xf32>
    %c0_939 = arith.constant 0 : index
    %c0_940 = arith.constant 0 : index
    %c0_941 = arith.constant 0 : index
    %1323 = vector.load %arg23[%c0_939, %c0_940, %c0_941] : memref<3x1x8xf32, #tpu.memory_space<vmem>>, vector<1x1x8xf32>
    %1324 = vector.shape_cast %1323 : vector<1x1x8xf32> to vector<1x8xf32>
    %1325 = vector.broadcast %1324 : vector<1x8xf32> to vector<8x8xf32>
    %1326 = arith.addf %1322, %1325 : vector<8x8xf32>
    %1327 = arith.negf %1326 : vector<8x8xf32>
    %1328 = math.exp %1327 : vector<8x8xf32>
    %cst_942 = arith.constant 1.000000e+00 : f32
    %1329 = vector.broadcast %cst_942 : f32 to vector<8x8xf32>
    %1330 = arith.addf %1329, %1328 : vector<8x8xf32>
    %1331 = arith.divf %1329, %1330 : vector<8x8xf32>
    %1332 = arith.mulf %1304, %1099 : vector<8x8xf32>
    %1333 = arith.mulf %1291, %1331 : vector<8x8xf32>
    %1334 = arith.addf %1332, %1333 : vector<8x8xf32>
    %1335 = math.tanh %1334 : vector<8x8xf32>
    %1336 = arith.mulf %1317, %1335 : vector<8x8xf32>
    %cst_943 = arith.constant dense<0.000000e+00> : vector<2x8xf32>
    %1337 = tpu.matmul %1, %1334, %cst_943 {dimension_numbers = #tpu.dot_dimension_numbers<[1], [0], [0], [1], [0, 0, 1, 1], [], []>} : vector<2x8xf32>, vector<8x8xf32>, vector<2x8xf32> -> vector<2x8xf32>
    %1338 = vector.broadcast %1242 : vector<2x1xf32> to vector<2x8xf32>
    %1339 = arith.mulf %1338, %1337 : vector<2x8xf32>
    %c0_944 = arith.constant 0 : index
    %c0_945 = arith.constant 0 : index
    %c0_946 = arith.constant 0 : index
    %1340 = vector.load %arg24[%c0_944, %c0_945, %c0_946] : memref<3x8x8xf32, #tpu.memory_space<vmem>>, vector<1x8x8xf32>
    %1341 = vector.shape_cast %1340 : vector<1x8x8xf32> to vector<8x8xf32>
    %cst_947 = arith.constant dense<0.000000e+00> : vector<2x8xf32>
    %1342 = tpu.matmul %1339, %1341, %cst_947 {dimension_numbers = #tpu.dot_dimension_numbers<[1], [0], [0], [1], [0, 0, 1, 1], [], []>} : vector<2x8xf32>, vector<8x8xf32>, vector<2x8xf32> -> vector<2x8xf32>
    %c0_948 = arith.constant 0 : index
    %c0_949 = arith.constant 0 : index
    %c0_950 = arith.constant 0 : index
    %1343 = vector.load %arg25[%c0_948, %c0_949, %c0_950] : memref<3x4x8xf32, #tpu.memory_space<vmem>>, vector<1x4x8xf32>
    %1344 = vector.shape_cast %1343 : vector<1x4x8xf32> to vector<4x8xf32>
    %cst_951 = arith.constant dense<0.000000e+00> : vector<2x8xf32>
    %1345 = tpu.matmul %1213, %1344, %cst_951 {dimension_numbers = #tpu.dot_dimension_numbers<[1], [0], [0], [1], [0, 0, 1, 1], [], []>} : vector<2x4xf32>, vector<4x8xf32>, vector<2x8xf32> -> vector<2x8xf32>
    %1346 = arith.addf %1342, %1345 : vector<2x8xf32>
    %c0_952 = arith.constant 0 : index
    %c0_953 = arith.constant 0 : index
    %c0_954 = arith.constant 0 : index
    %1347 = vector.load %arg26[%c0_952, %c0_953, %c0_954] : memref<3x1x8xf32, #tpu.memory_space<vmem>>, vector<1x1x8xf32>
    %1348 = vector.shape_cast %1347 : vector<1x1x8xf32> to vector<1x8xf32>
    %1349 = vector.broadcast %1348 : vector<1x8xf32> to vector<2x8xf32>
    %1350 = arith.addf %1346, %1349 : vector<2x8xf32>
    %c1_955 = arith.constant 1 : index
    %c0_956 = arith.constant 0 : index
    %c0_957 = arith.constant 0 : index
    %1351 = vector.load %arg24[%c1_955, %c0_956, %c0_957] : memref<3x8x8xf32, #tpu.memory_space<vmem>>, vector<1x8x8xf32>
    %1352 = vector.shape_cast %1351 : vector<1x8x8xf32> to vector<8x8xf32>
    %cst_958 = arith.constant dense<0.000000e+00> : vector<2x8xf32>
    %1353 = tpu.matmul %1339, %1352, %cst_958 {dimension_numbers = #tpu.dot_dimension_numbers<[1], [0], [0], [1], [0, 0, 1, 1], [], []>} : vector<2x8xf32>, vector<8x8xf32>, vector<2x8xf32> -> vector<2x8xf32>
    %c1_959 = arith.constant 1 : index
    %c0_960 = arith.constant 0 : index
    %c0_961 = arith.constant 0 : index
    %1354 = vector.load %arg25[%c1_959, %c0_960, %c0_961] : memref<3x4x8xf32, #tpu.memory_space<vmem>>, vector<1x4x8xf32>
    %1355 = vector.shape_cast %1354 : vector<1x4x8xf32> to vector<4x8xf32>
    %cst_962 = arith.constant dense<0.000000e+00> : vector<2x8xf32>
    %1356 = tpu.matmul %1213, %1355, %cst_962 {dimension_numbers = #tpu.dot_dimension_numbers<[1], [0], [0], [1], [0, 0, 1, 1], [], []>} : vector<2x4xf32>, vector<4x8xf32>, vector<2x8xf32> -> vector<2x8xf32>
    %1357 = arith.addf %1353, %1356 : vector<2x8xf32>
    %c1_963 = arith.constant 1 : index
    %c0_964 = arith.constant 0 : index
    %c0_965 = arith.constant 0 : index
    %1358 = vector.load %arg26[%c1_963, %c0_964, %c0_965] : memref<3x1x8xf32, #tpu.memory_space<vmem>>, vector<1x1x8xf32>
    %1359 = vector.shape_cast %1358 : vector<1x1x8xf32> to vector<1x8xf32>
    %1360 = vector.broadcast %1359 : vector<1x8xf32> to vector<2x8xf32>
    %1361 = arith.addf %1357, %1360 : vector<2x8xf32>
    %c2_966 = arith.constant 2 : index
    %c0_967 = arith.constant 0 : index
    %c0_968 = arith.constant 0 : index
    %1362 = vector.load %arg24[%c2_966, %c0_967, %c0_968] : memref<3x8x8xf32, #tpu.memory_space<vmem>>, vector<1x8x8xf32>
    %1363 = vector.shape_cast %1362 : vector<1x8x8xf32> to vector<8x8xf32>
    %cst_969 = arith.constant dense<0.000000e+00> : vector<2x8xf32>
    %1364 = tpu.matmul %1339, %1363, %cst_969 {dimension_numbers = #tpu.dot_dimension_numbers<[1], [0], [0], [1], [0, 0, 1, 1], [], []>} : vector<2x8xf32>, vector<8x8xf32>, vector<2x8xf32> -> vector<2x8xf32>
    %c2_970 = arith.constant 2 : index
    %c0_971 = arith.constant 0 : index
    %c0_972 = arith.constant 0 : index
    %1365 = vector.load %arg25[%c2_970, %c0_971, %c0_972] : memref<3x4x8xf32, #tpu.memory_space<vmem>>, vector<1x4x8xf32>
    %1366 = vector.shape_cast %1365 : vector<1x4x8xf32> to vector<4x8xf32>
    %cst_973 = arith.constant dense<0.000000e+00> : vector<2x8xf32>
    %1367 = tpu.matmul %1213, %1366, %cst_973 {dimension_numbers = #tpu.dot_dimension_numbers<[1], [0], [0], [1], [0, 0, 1, 1], [], []>} : vector<2x4xf32>, vector<4x8xf32>, vector<2x8xf32> -> vector<2x8xf32>
    %1368 = arith.addf %1364, %1367 : vector<2x8xf32>
    %c2_974 = arith.constant 2 : index
    %c0_975 = arith.constant 0 : index
    %c0_976 = arith.constant 0 : index
    %1369 = vector.load %arg26[%c2_974, %c0_975, %c0_976] : memref<3x1x8xf32, #tpu.memory_space<vmem>>, vector<1x1x8xf32>
    %1370 = vector.shape_cast %1369 : vector<1x1x8xf32> to vector<1x8xf32>
    %1371 = vector.broadcast %1370 : vector<1x8xf32> to vector<2x8xf32>
    %1372 = arith.addf %1368, %1371 : vector<2x8xf32>
    %c0_977 = arith.constant 0 : index
    %c0_978 = arith.constant 0 : index
    %c0_979 = arith.constant 0 : index
    %1373 = vector.load %arg27[%c0_977, %c0_978, %c0_979] : memref<3x8x8xf32, #tpu.memory_space<vmem>>, vector<1x8x8xf32>
    %1374 = vector.shape_cast %1373 : vector<1x8x8xf32> to vector<8x8xf32>
    %cst_980 = arith.constant dense<0.000000e+00> : vector<2x8xf32>
    %1375 = tpu.matmul %1191, %1374, %cst_980 {dimension_numbers = #tpu.dot_dimension_numbers<[1], [0], [0], [1], [0, 0, 1, 1], [], []>} : vector<2x8xf32>, vector<8x8xf32>, vector<2x8xf32> -> vector<2x8xf32>
    %1376 = arith.addf %1350, %1375 : vector<2x8xf32>
    %c0_981 = arith.constant 0 : index
    %c0_982 = arith.constant 0 : index
    %c0_983 = arith.constant 0 : index
    %1377 = vector.load %arg28[%c0_981, %c0_982, %c0_983] : memref<3x1x8xf32, #tpu.memory_space<vmem>>, vector<1x1x8xf32>
    %1378 = vector.shape_cast %1377 : vector<1x1x8xf32> to vector<1x8xf32>
    %1379 = vector.broadcast %1378 : vector<1x8xf32> to vector<2x8xf32>
    %1380 = arith.addf %1376, %1379 : vector<2x8xf32>
    %1381 = arith.negf %1380 : vector<2x8xf32>
    %1382 = math.exp %1381 : vector<2x8xf32>
    %cst_984 = arith.constant 1.000000e+00 : f32
    %1383 = vector.broadcast %cst_984 : f32 to vector<2x8xf32>
    %1384 = arith.addf %1383, %1382 : vector<2x8xf32>
    %1385 = arith.divf %1383, %1384 : vector<2x8xf32>
    %c1_985 = arith.constant 1 : index
    %c0_986 = arith.constant 0 : index
    %c0_987 = arith.constant 0 : index
    %1386 = vector.load %arg27[%c1_985, %c0_986, %c0_987] : memref<3x8x8xf32, #tpu.memory_space<vmem>>, vector<1x8x8xf32>
    %1387 = vector.shape_cast %1386 : vector<1x8x8xf32> to vector<8x8xf32>
    %cst_988 = arith.constant dense<0.000000e+00> : vector<2x8xf32>
    %1388 = tpu.matmul %1191, %1387, %cst_988 {dimension_numbers = #tpu.dot_dimension_numbers<[1], [0], [0], [1], [0, 0, 1, 1], [], []>} : vector<2x8xf32>, vector<8x8xf32>, vector<2x8xf32> -> vector<2x8xf32>
    %1389 = arith.addf %1361, %1388 : vector<2x8xf32>
    %c1_989 = arith.constant 1 : index
    %c0_990 = arith.constant 0 : index
    %c0_991 = arith.constant 0 : index
    %1390 = vector.load %arg28[%c1_989, %c0_990, %c0_991] : memref<3x1x8xf32, #tpu.memory_space<vmem>>, vector<1x1x8xf32>
    %1391 = vector.shape_cast %1390 : vector<1x1x8xf32> to vector<1x8xf32>
    %1392 = vector.broadcast %1391 : vector<1x8xf32> to vector<2x8xf32>
    %1393 = arith.addf %1389, %1392 : vector<2x8xf32>
    %1394 = arith.negf %1393 : vector<2x8xf32>
    %1395 = math.exp %1394 : vector<2x8xf32>
    %cst_992 = arith.constant 1.000000e+00 : f32
    %1396 = vector.broadcast %cst_992 : f32 to vector<2x8xf32>
    %1397 = arith.addf %1396, %1395 : vector<2x8xf32>
    %1398 = arith.divf %1396, %1397 : vector<2x8xf32>
    %c2_993 = arith.constant 2 : index
    %c0_994 = arith.constant 0 : index
    %c0_995 = arith.constant 0 : index
    %1399 = vector.load %arg27[%c2_993, %c0_994, %c0_995] : memref<3x8x8xf32, #tpu.memory_space<vmem>>, vector<1x8x8xf32>
    %1400 = vector.shape_cast %1399 : vector<1x8x8xf32> to vector<8x8xf32>
    %cst_996 = arith.constant dense<0.000000e+00> : vector<2x8xf32>
    %1401 = tpu.matmul %1191, %1400, %cst_996 {dimension_numbers = #tpu.dot_dimension_numbers<[1], [0], [0], [1], [0, 0, 1, 1], [], []>} : vector<2x8xf32>, vector<8x8xf32>, vector<2x8xf32> -> vector<2x8xf32>
    %1402 = arith.addf %1372, %1401 : vector<2x8xf32>
    %c2_997 = arith.constant 2 : index
    %c0_998 = arith.constant 0 : index
    %c0_999 = arith.constant 0 : index
    %1403 = vector.load %arg28[%c2_997, %c0_998, %c0_999] : memref<3x1x8xf32, #tpu.memory_space<vmem>>, vector<1x1x8xf32>
    %1404 = vector.shape_cast %1403 : vector<1x1x8xf32> to vector<1x8xf32>
    %1405 = vector.broadcast %1404 : vector<1x8xf32> to vector<2x8xf32>
    %1406 = arith.addf %1402, %1405 : vector<2x8xf32>
    %1407 = arith.negf %1406 : vector<2x8xf32>
    %1408 = math.exp %1407 : vector<2x8xf32>
    %cst_1000 = arith.constant 1.000000e+00 : f32
    %1409 = vector.broadcast %cst_1000 : f32 to vector<2x8xf32>
    %1410 = arith.addf %1409, %1408 : vector<2x8xf32>
    %1411 = arith.divf %1409, %1410 : vector<2x8xf32>
    %1412 = arith.mulf %1398, %1191 : vector<2x8xf32>
    %c0_1001 = arith.constant 0 : index
    %c0_1002 = arith.constant 0 : index
    %c0_1003 = arith.constant 0 : index
    %1413 = vector.load %arg27[%c0_1001, %c0_1002, %c0_1003] : memref<3x8x8xf32, #tpu.memory_space<vmem>>, vector<1x8x8xf32>
    %1414 = vector.shape_cast %1413 : vector<1x8x8xf32> to vector<8x8xf32>
    %cst_1004 = arith.constant dense<0.000000e+00> : vector<2x8xf32>
    %1415 = tpu.matmul %1412, %1414, %cst_1004 {dimension_numbers = #tpu.dot_dimension_numbers<[1], [0], [0], [1], [0, 0, 1, 1], [], []>} : vector<2x8xf32>, vector<8x8xf32>, vector<2x8xf32> -> vector<2x8xf32>
    %1416 = arith.addf %1350, %1415 : vector<2x8xf32>
    %c0_1005 = arith.constant 0 : index
    %c0_1006 = arith.constant 0 : index
    %c0_1007 = arith.constant 0 : index
    %1417 = vector.load %arg28[%c0_1005, %c0_1006, %c0_1007] : memref<3x1x8xf32, #tpu.memory_space<vmem>>, vector<1x1x8xf32>
    %1418 = vector.shape_cast %1417 : vector<1x1x8xf32> to vector<1x8xf32>
    %1419 = vector.broadcast %1418 : vector<1x8xf32> to vector<2x8xf32>
    %1420 = arith.addf %1416, %1419 : vector<2x8xf32>
    %1421 = arith.negf %1420 : vector<2x8xf32>
    %1422 = math.exp %1421 : vector<2x8xf32>
    %cst_1008 = arith.constant 1.000000e+00 : f32
    %1423 = vector.broadcast %cst_1008 : f32 to vector<2x8xf32>
    %1424 = arith.addf %1423, %1422 : vector<2x8xf32>
    %1425 = arith.divf %1423, %1424 : vector<2x8xf32>
    %1426 = arith.mulf %1398, %1193 : vector<2x8xf32>
    %1427 = arith.mulf %1385, %1425 : vector<2x8xf32>
    %1428 = arith.addf %1426, %1427 : vector<2x8xf32>
    %1429 = math.tanh %1428 : vector<2x8xf32>
    %1430 = arith.mulf %1411, %1429 : vector<2x8xf32>
    %c5_1009 = arith.constant 5 : index
    %c0_1010 = arith.constant 0 : index
    %c0_1011 = arith.constant 0 : index
    %1431 = vector.load %arg7[%c5_1009, %c0_1010, %c0_1011] : memref<7x14x2xf32, #tpu.memory_space<vmem>>, vector<1x14x2xf32>
    %1432 = vector.shape_cast %1431 : vector<1x14x2xf32> to vector<14x2xf32>
    %cst_1012 = arith.constant dense<0.000000e+00> : vector<14x8xf32>
    %1433 = tpu.matmul %1432, %1428, %cst_1012 {dimension_numbers = #tpu.dot_dimension_numbers<[1], [0], [0], [1], [0, 0, 1, 1], [], []>} : vector<14x2xf32>, vector<2x8xf32>, vector<14x8xf32> -> vector<14x8xf32>
    %1434 = arith.addf %1197, %1433 : vector<14x8xf32>
    %c5_1013 = arith.constant 5 : index
    %c0_1014 = arith.constant 0 : index
    %c0_1015 = arith.constant 0 : index
    %1435 = vector.load %arg8[%c5_1013, %c0_1014, %c0_1015] : memref<7x1x7xf32, #tpu.memory_space<vmem>>, vector<1x1x7xf32>
    %1436 = vector.shape_cast %1435 : vector<1x1x7xf32> to vector<1x7xf32>
    %1437 = vector.broadcast %1242 : vector<2x1xf32> to vector<2x7xf32>
    %1438 = vector.broadcast %1436 : vector<1x7xf32> to vector<2x7xf32>
    %1439 = arith.mulf %1437, %1438 : vector<2x7xf32>
    %1440 = arith.addf %1203, %1439 : vector<2x7xf32>
    %c6_1016 = arith.constant 6 : index
    %c0_1017 = arith.constant 0 : index
    %c0_1018 = arith.constant 0 : index
    %1441 = vector.load %arg0[%c6_1016, %c0_1017, %c0_1018] : memref<8x8x1xf32, #tpu.memory_space<vmem>>, vector<1x8x1xf32>
    %1442 = vector.shape_cast %1441 : vector<1x8x1xf32> to vector<8x1xf32>
    %c6_1019 = arith.constant 6 : index
    %c0_1020 = arith.constant 0 : index
    %c0_1021 = arith.constant 0 : index
    %1443 = vector.load %arg1[%c6_1019, %c0_1020, %c0_1021] : memref<8x1x8xf32, #tpu.memory_space<vmem>>, vector<1x1x8xf32>
    %1444 = vector.shape_cast %1443 : vector<1x1x8xf32> to vector<1x8xf32>
    %c7 = arith.constant 7 : index
    %c0_1022 = arith.constant 0 : index
    %c0_1023 = arith.constant 0 : index
    %1445 = vector.load %arg0[%c7, %c0_1022, %c0_1023] : memref<8x8x1xf32, #tpu.memory_space<vmem>>, vector<1x8x1xf32>
    %1446 = vector.shape_cast %1445 : vector<1x8x1xf32> to vector<8x1xf32>
    %c7_1024 = arith.constant 7 : index
    %c0_1025 = arith.constant 0 : index
    %c0_1026 = arith.constant 0 : index
    %1447 = vector.load %arg1[%c7_1024, %c0_1025, %c0_1026] : memref<8x1x8xf32, #tpu.memory_space<vmem>>, vector<1x1x8xf32>
    %1448 = vector.shape_cast %1447 : vector<1x1x8xf32> to vector<1x8xf32>
    %c7_1027 = arith.constant 7 : index
    %c0_1028 = arith.constant 0 : index
    %c0_1029 = arith.constant 0 : index
    %1449 = vector.load %arg2[%c7_1027, %c0_1028, %c0_1029] : memref<8x2x4xf32, #tpu.memory_space<vmem>>, vector<1x2x4xf32>
    %1450 = vector.shape_cast %1449 : vector<1x2x4xf32> to vector<2x4xf32>
    %1451 = vector.broadcast %1442 : vector<8x1xf32> to vector<8x8xf32>
    %1452 = vector.broadcast %1448 : vector<1x8xf32> to vector<8x8xf32>
    %1453 = arith.mulf %1451, %1452 : vector<8x8xf32>
    %1454 = arith.mulf %1453, %0 : vector<8x8xf32>
    %1455 = vector.broadcast %1446 : vector<8x1xf32> to vector<8x8xf32>
    %1456 = vector.broadcast %1444 : vector<1x8xf32> to vector<8x8xf32>
    %1457 = arith.mulf %1455, %1456 : vector<8x8xf32>
    %1458 = arith.mulf %1457, %0 : vector<8x8xf32>
    %cst_1030 = arith.constant dense<0.000000e+00> : vector<8x8xf32>
    %1459 = tpu.matmul %1454, %1334, %cst_1030 {dimension_numbers = #tpu.dot_dimension_numbers<[1], [0], [0], [1], [0, 0, 1, 1], [], []>} : vector<8x8xf32>, vector<8x8xf32>, vector<8x8xf32> -> vector<8x8xf32>
    %cst_1031 = arith.constant dense<0.000000e+00> : vector<8x8xf32>
    %1460 = tpu.matmul %1459, %3, %cst_1031 {dimension_numbers = #tpu.dot_dimension_numbers<[1], [0], [0], [1], [0, 0, 1, 1], [], []>} : vector<8x8xf32>, vector<8x8xf32>, vector<8x8xf32> -> vector<8x8xf32>
    %1461 = vector.broadcast %4 : vector<1x8xf32> to vector<8x8xf32>
    %1462 = arith.addf %1460, %1461 : vector<8x8xf32>
    %1463 = math.tanh %1462 : vector<8x8xf32>
    %cst_1032 = arith.constant dense<0.000000e+00> : vector<8x8xf32>
    %1464 = tpu.matmul %1458, %1334, %cst_1032 {dimension_numbers = #tpu.dot_dimension_numbers<[1], [0], [0], [1], [0, 0, 1, 1], [], []>} : vector<8x8xf32>, vector<8x8xf32>, vector<8x8xf32> -> vector<8x8xf32>
    %cst_1033 = arith.constant dense<0.000000e+00> : vector<8x8xf32>
    %1465 = tpu.matmul %1464, %5, %cst_1033 {dimension_numbers = #tpu.dot_dimension_numbers<[1], [0], [0], [1], [0, 0, 1, 1], [], []>} : vector<8x8xf32>, vector<8x8xf32>, vector<8x8xf32> -> vector<8x8xf32>
    %1466 = vector.broadcast %6 : vector<1x8xf32> to vector<8x8xf32>
    %1467 = arith.addf %1465, %1466 : vector<8x8xf32>
    %1468 = math.tanh %1467 : vector<8x8xf32>
    %cst_1034 = arith.constant dense<0.000000e+00> : vector<8x8xf32>
    %1469 = tpu.matmul %1463, %7, %cst_1034 {dimension_numbers = #tpu.dot_dimension_numbers<[1], [0], [0], [1], [0, 0, 1, 1], [], []>} : vector<8x8xf32>, vector<8x8xf32>, vector<8x8xf32> -> vector<8x8xf32>
    %cst_1035 = arith.constant dense<0.000000e+00> : vector<8x8xf32>
    %1470 = tpu.matmul %1468, %8, %cst_1035 {dimension_numbers = #tpu.dot_dimension_numbers<[1], [0], [0], [1], [0, 0, 1, 1], [], []>} : vector<8x8xf32>, vector<8x8xf32>, vector<8x8xf32> -> vector<8x8xf32>
    %1471 = arith.addf %1469, %1470 : vector<8x8xf32>
    %cst_1036 = arith.constant dense<0.000000e+00> : vector<8x8xf32>
    %1472 = tpu.matmul %1463, %9, %cst_1036 {dimension_numbers = #tpu.dot_dimension_numbers<[1], [0], [0], [1], [0, 0, 1, 1], [], []>} : vector<8x8xf32>, vector<8x8xf32>, vector<8x8xf32> -> vector<8x8xf32>
    %cst_1037 = arith.constant dense<0.000000e+00> : vector<8x8xf32>
    %1473 = tpu.matmul %1468, %10, %cst_1037 {dimension_numbers = #tpu.dot_dimension_numbers<[1], [0], [0], [1], [0, 0, 1, 1], [], []>} : vector<8x8xf32>, vector<8x8xf32>, vector<8x8xf32> -> vector<8x8xf32>
    %1474 = arith.addf %1472, %1473 : vector<8x8xf32>
    %1475 = arith.maximumf %1471, %1474 : vector<8x8xf32>
    %cst_1038 = arith.constant dense<0.000000e+00> : vector<2x8xf32>
    %1476 = tpu.matmul %1, %1475, %cst_1038 {dimension_numbers = #tpu.dot_dimension_numbers<[1], [0], [0], [1], [0, 0, 1, 1], [], []>} : vector<2x8xf32>, vector<8x8xf32>, vector<2x8xf32> -> vector<2x8xf32>
    %cst_1039 = arith.constant dense<0.000000e+00> : vector<2x1xf32>
    %1477 = tpu.matmul %1476, %11, %cst_1039 {dimension_numbers = #tpu.dot_dimension_numbers<[1], [0], [0], [1], [0, 0, 1, 1], [], []>} : vector<2x8xf32>, vector<8x1xf32>, vector<2x1xf32> -> vector<2x1xf32>
    %cst_1040 = arith.constant dense<0.000000e+00> : vector<2x1xf32>
    %1478 = tpu.matmul %1428, %12, %cst_1040 {dimension_numbers = #tpu.dot_dimension_numbers<[1], [0], [0], [1], [0, 0, 1, 1], [], []>} : vector<2x8xf32>, vector<8x1xf32>, vector<2x1xf32> -> vector<2x1xf32>
    %1479 = arith.addf %1477, %1478 : vector<2x1xf32>
    %1480 = vector.broadcast %1479 : vector<2x1xf32> to vector<2x8xf32>
    %1481 = arith.mulf %1480, %1428 : vector<2x8xf32>
    %cst_1041 = arith.constant dense<0.000000e+00> : vector<8x8xf32>
    %1482 = tpu.matmul %2, %1481, %cst_1041 {dimension_numbers = #tpu.dot_dimension_numbers<[1], [0], [0], [1], [0, 0, 1, 1], [], []>} : vector<8x2xf32>, vector<2x8xf32>, vector<8x8xf32> -> vector<8x8xf32>
    %c0_1042 = arith.constant 0 : index
    %c0_1043 = arith.constant 0 : index
    %c0_1044 = arith.constant 0 : index
    %1483 = vector.load %arg19[%c0_1042, %c0_1043, %c0_1044] : memref<3x8x8xf32, #tpu.memory_space<vmem>>, vector<1x8x8xf32>
    %1484 = vector.shape_cast %1483 : vector<1x8x8xf32> to vector<8x8xf32>
    %cst_1045 = arith.constant dense<0.000000e+00> : vector<8x8xf32>
    %1485 = tpu.matmul %1482, %1484, %cst_1045 {dimension_numbers = #tpu.dot_dimension_numbers<[1], [0], [0], [1], [0, 0, 1, 1], [], []>} : vector<8x8xf32>, vector<8x8xf32>, vector<8x8xf32> -> vector<8x8xf32>
    %c0_1046 = arith.constant 0 : index
    %c0_1047 = arith.constant 0 : index
    %c0_1048 = arith.constant 0 : index
    %1486 = vector.load %arg20[%c0_1046, %c0_1047, %c0_1048] : memref<3x8x8xf32, #tpu.memory_space<vmem>>, vector<1x8x8xf32>
    %1487 = vector.shape_cast %1486 : vector<1x8x8xf32> to vector<8x8xf32>
    %cst_1049 = arith.constant dense<0.000000e+00> : vector<8x8xf32>
    %1488 = tpu.matmul %1475, %1487, %cst_1049 {dimension_numbers = #tpu.dot_dimension_numbers<[1], [0], [0], [1], [0, 0, 1, 1], [], []>} : vector<8x8xf32>, vector<8x8xf32>, vector<8x8xf32> -> vector<8x8xf32>
    %1489 = arith.addf %1485, %1488 : vector<8x8xf32>
    %c0_1050 = arith.constant 0 : index
    %c0_1051 = arith.constant 0 : index
    %c0_1052 = arith.constant 0 : index
    %1490 = vector.load %arg21[%c0_1050, %c0_1051, %c0_1052] : memref<3x1x8xf32, #tpu.memory_space<vmem>>, vector<1x1x8xf32>
    %1491 = vector.shape_cast %1490 : vector<1x1x8xf32> to vector<1x8xf32>
    %1492 = vector.broadcast %1491 : vector<1x8xf32> to vector<8x8xf32>
    %1493 = arith.addf %1489, %1492 : vector<8x8xf32>
    %c1_1053 = arith.constant 1 : index
    %c0_1054 = arith.constant 0 : index
    %c0_1055 = arith.constant 0 : index
    %1494 = vector.load %arg19[%c1_1053, %c0_1054, %c0_1055] : memref<3x8x8xf32, #tpu.memory_space<vmem>>, vector<1x8x8xf32>
    %1495 = vector.shape_cast %1494 : vector<1x8x8xf32> to vector<8x8xf32>
    %cst_1056 = arith.constant dense<0.000000e+00> : vector<8x8xf32>
    %1496 = tpu.matmul %1482, %1495, %cst_1056 {dimension_numbers = #tpu.dot_dimension_numbers<[1], [0], [0], [1], [0, 0, 1, 1], [], []>} : vector<8x8xf32>, vector<8x8xf32>, vector<8x8xf32> -> vector<8x8xf32>
    %c1_1057 = arith.constant 1 : index
    %c0_1058 = arith.constant 0 : index
    %c0_1059 = arith.constant 0 : index
    %1497 = vector.load %arg20[%c1_1057, %c0_1058, %c0_1059] : memref<3x8x8xf32, #tpu.memory_space<vmem>>, vector<1x8x8xf32>
    %1498 = vector.shape_cast %1497 : vector<1x8x8xf32> to vector<8x8xf32>
    %cst_1060 = arith.constant dense<0.000000e+00> : vector<8x8xf32>
    %1499 = tpu.matmul %1475, %1498, %cst_1060 {dimension_numbers = #tpu.dot_dimension_numbers<[1], [0], [0], [1], [0, 0, 1, 1], [], []>} : vector<8x8xf32>, vector<8x8xf32>, vector<8x8xf32> -> vector<8x8xf32>
    %1500 = arith.addf %1496, %1499 : vector<8x8xf32>
    %c1_1061 = arith.constant 1 : index
    %c0_1062 = arith.constant 0 : index
    %c0_1063 = arith.constant 0 : index
    %1501 = vector.load %arg21[%c1_1061, %c0_1062, %c0_1063] : memref<3x1x8xf32, #tpu.memory_space<vmem>>, vector<1x1x8xf32>
    %1502 = vector.shape_cast %1501 : vector<1x1x8xf32> to vector<1x8xf32>
    %1503 = vector.broadcast %1502 : vector<1x8xf32> to vector<8x8xf32>
    %1504 = arith.addf %1500, %1503 : vector<8x8xf32>
    %c0_1064 = arith.constant 0 : index
    %c0_1065 = arith.constant 0 : index
    %c0_1066 = arith.constant 0 : index
    %1505 = vector.load %arg22[%c0_1064, %c0_1065, %c0_1066] : memref<3x8x8xf32, #tpu.memory_space<vmem>>, vector<1x8x8xf32>
    %1506 = vector.shape_cast %1505 : vector<1x8x8xf32> to vector<8x8xf32>
    %cst_1067 = arith.constant dense<0.000000e+00> : vector<8x8xf32>
    %1507 = tpu.matmul %1334, %1506, %cst_1067 {dimension_numbers = #tpu.dot_dimension_numbers<[1], [0], [0], [1], [0, 0, 1, 1], [], []>} : vector<8x8xf32>, vector<8x8xf32>, vector<8x8xf32> -> vector<8x8xf32>
    %1508 = arith.addf %1493, %1507 : vector<8x8xf32>
    %c0_1068 = arith.constant 0 : index
    %c0_1069 = arith.constant 0 : index
    %c0_1070 = arith.constant 0 : index
    %1509 = vector.load %arg23[%c0_1068, %c0_1069, %c0_1070] : memref<3x1x8xf32, #tpu.memory_space<vmem>>, vector<1x1x8xf32>
    %1510 = vector.shape_cast %1509 : vector<1x1x8xf32> to vector<1x8xf32>
    %1511 = vector.broadcast %1510 : vector<1x8xf32> to vector<8x8xf32>
    %1512 = arith.addf %1508, %1511 : vector<8x8xf32>
    %1513 = arith.negf %1512 : vector<8x8xf32>
    %1514 = math.exp %1513 : vector<8x8xf32>
    %cst_1071 = arith.constant 1.000000e+00 : f32
    %1515 = vector.broadcast %cst_1071 : f32 to vector<8x8xf32>
    %1516 = arith.addf %1515, %1514 : vector<8x8xf32>
    %1517 = arith.divf %1515, %1516 : vector<8x8xf32>
    %c1_1072 = arith.constant 1 : index
    %c0_1073 = arith.constant 0 : index
    %c0_1074 = arith.constant 0 : index
    %1518 = vector.load %arg22[%c1_1072, %c0_1073, %c0_1074] : memref<3x8x8xf32, #tpu.memory_space<vmem>>, vector<1x8x8xf32>
    %1519 = vector.shape_cast %1518 : vector<1x8x8xf32> to vector<8x8xf32>
    %cst_1075 = arith.constant dense<0.000000e+00> : vector<8x8xf32>
    %1520 = tpu.matmul %1334, %1519, %cst_1075 {dimension_numbers = #tpu.dot_dimension_numbers<[1], [0], [0], [1], [0, 0, 1, 1], [], []>} : vector<8x8xf32>, vector<8x8xf32>, vector<8x8xf32> -> vector<8x8xf32>
    %1521 = arith.addf %1504, %1520 : vector<8x8xf32>
    %c1_1076 = arith.constant 1 : index
    %c0_1077 = arith.constant 0 : index
    %c0_1078 = arith.constant 0 : index
    %1522 = vector.load %arg23[%c1_1076, %c0_1077, %c0_1078] : memref<3x1x8xf32, #tpu.memory_space<vmem>>, vector<1x1x8xf32>
    %1523 = vector.shape_cast %1522 : vector<1x1x8xf32> to vector<1x8xf32>
    %1524 = vector.broadcast %1523 : vector<1x8xf32> to vector<8x8xf32>
    %1525 = arith.addf %1521, %1524 : vector<8x8xf32>
    %1526 = arith.negf %1525 : vector<8x8xf32>
    %1527 = math.exp %1526 : vector<8x8xf32>
    %cst_1079 = arith.constant 1.000000e+00 : f32
    %1528 = vector.broadcast %cst_1079 : f32 to vector<8x8xf32>
    %1529 = arith.addf %1528, %1527 : vector<8x8xf32>
    %1530 = arith.divf %1528, %1529 : vector<8x8xf32>
    %1531 = arith.mulf %1530, %1334 : vector<8x8xf32>
    %c0_1080 = arith.constant 0 : index
    %c0_1081 = arith.constant 0 : index
    %c0_1082 = arith.constant 0 : index
    %1532 = vector.load %arg22[%c0_1080, %c0_1081, %c0_1082] : memref<3x8x8xf32, #tpu.memory_space<vmem>>, vector<1x8x8xf32>
    %1533 = vector.shape_cast %1532 : vector<1x8x8xf32> to vector<8x8xf32>
    %cst_1083 = arith.constant dense<0.000000e+00> : vector<8x8xf32>
    %1534 = tpu.matmul %1531, %1533, %cst_1083 {dimension_numbers = #tpu.dot_dimension_numbers<[1], [0], [0], [1], [0, 0, 1, 1], [], []>} : vector<8x8xf32>, vector<8x8xf32>, vector<8x8xf32> -> vector<8x8xf32>
    %1535 = arith.addf %1493, %1534 : vector<8x8xf32>
    %c0_1084 = arith.constant 0 : index
    %c0_1085 = arith.constant 0 : index
    %c0_1086 = arith.constant 0 : index
    %1536 = vector.load %arg23[%c0_1084, %c0_1085, %c0_1086] : memref<3x1x8xf32, #tpu.memory_space<vmem>>, vector<1x1x8xf32>
    %1537 = vector.shape_cast %1536 : vector<1x1x8xf32> to vector<1x8xf32>
    %1538 = vector.broadcast %1537 : vector<1x8xf32> to vector<8x8xf32>
    %1539 = arith.addf %1535, %1538 : vector<8x8xf32>
    %1540 = arith.negf %1539 : vector<8x8xf32>
    %1541 = math.exp %1540 : vector<8x8xf32>
    %cst_1087 = arith.constant 1.000000e+00 : f32
    %1542 = vector.broadcast %cst_1087 : f32 to vector<8x8xf32>
    %1543 = arith.addf %1542, %1541 : vector<8x8xf32>
    %1544 = arith.divf %1542, %1543 : vector<8x8xf32>
    %1545 = arith.mulf %1530, %1336 : vector<8x8xf32>
    %1546 = arith.mulf %1517, %1544 : vector<8x8xf32>
    %1547 = arith.addf %1545, %1546 : vector<8x8xf32>
    %cst_1088 = arith.constant dense<0.000000e+00> : vector<2x8xf32>
    %1548 = tpu.matmul %1, %1547, %cst_1088 {dimension_numbers = #tpu.dot_dimension_numbers<[1], [0], [0], [1], [0, 0, 1, 1], [], []>} : vector<2x8xf32>, vector<8x8xf32>, vector<2x8xf32> -> vector<2x8xf32>
    %1549 = vector.broadcast %1479 : vector<2x1xf32> to vector<2x8xf32>
    %1550 = arith.mulf %1549, %1548 : vector<2x8xf32>
    %c0_1089 = arith.constant 0 : index
    %c0_1090 = arith.constant 0 : index
    %c0_1091 = arith.constant 0 : index
    %1551 = vector.load %arg24[%c0_1089, %c0_1090, %c0_1091] : memref<3x8x8xf32, #tpu.memory_space<vmem>>, vector<1x8x8xf32>
    %1552 = vector.shape_cast %1551 : vector<1x8x8xf32> to vector<8x8xf32>
    %cst_1092 = arith.constant dense<0.000000e+00> : vector<2x8xf32>
    %1553 = tpu.matmul %1550, %1552, %cst_1092 {dimension_numbers = #tpu.dot_dimension_numbers<[1], [0], [0], [1], [0, 0, 1, 1], [], []>} : vector<2x8xf32>, vector<8x8xf32>, vector<2x8xf32> -> vector<2x8xf32>
    %c0_1093 = arith.constant 0 : index
    %c0_1094 = arith.constant 0 : index
    %c0_1095 = arith.constant 0 : index
    %1554 = vector.load %arg25[%c0_1093, %c0_1094, %c0_1095] : memref<3x4x8xf32, #tpu.memory_space<vmem>>, vector<1x4x8xf32>
    %1555 = vector.shape_cast %1554 : vector<1x4x8xf32> to vector<4x8xf32>
    %cst_1096 = arith.constant dense<0.000000e+00> : vector<2x8xf32>
    %1556 = tpu.matmul %1450, %1555, %cst_1096 {dimension_numbers = #tpu.dot_dimension_numbers<[1], [0], [0], [1], [0, 0, 1, 1], [], []>} : vector<2x4xf32>, vector<4x8xf32>, vector<2x8xf32> -> vector<2x8xf32>
    %1557 = arith.addf %1553, %1556 : vector<2x8xf32>
    %c0_1097 = arith.constant 0 : index
    %c0_1098 = arith.constant 0 : index
    %c0_1099 = arith.constant 0 : index
    %1558 = vector.load %arg26[%c0_1097, %c0_1098, %c0_1099] : memref<3x1x8xf32, #tpu.memory_space<vmem>>, vector<1x1x8xf32>
    %1559 = vector.shape_cast %1558 : vector<1x1x8xf32> to vector<1x8xf32>
    %1560 = vector.broadcast %1559 : vector<1x8xf32> to vector<2x8xf32>
    %1561 = arith.addf %1557, %1560 : vector<2x8xf32>
    %c1_1100 = arith.constant 1 : index
    %c0_1101 = arith.constant 0 : index
    %c0_1102 = arith.constant 0 : index
    %1562 = vector.load %arg24[%c1_1100, %c0_1101, %c0_1102] : memref<3x8x8xf32, #tpu.memory_space<vmem>>, vector<1x8x8xf32>
    %1563 = vector.shape_cast %1562 : vector<1x8x8xf32> to vector<8x8xf32>
    %cst_1103 = arith.constant dense<0.000000e+00> : vector<2x8xf32>
    %1564 = tpu.matmul %1550, %1563, %cst_1103 {dimension_numbers = #tpu.dot_dimension_numbers<[1], [0], [0], [1], [0, 0, 1, 1], [], []>} : vector<2x8xf32>, vector<8x8xf32>, vector<2x8xf32> -> vector<2x8xf32>
    %c1_1104 = arith.constant 1 : index
    %c0_1105 = arith.constant 0 : index
    %c0_1106 = arith.constant 0 : index
    %1565 = vector.load %arg25[%c1_1104, %c0_1105, %c0_1106] : memref<3x4x8xf32, #tpu.memory_space<vmem>>, vector<1x4x8xf32>
    %1566 = vector.shape_cast %1565 : vector<1x4x8xf32> to vector<4x8xf32>
    %cst_1107 = arith.constant dense<0.000000e+00> : vector<2x8xf32>
    %1567 = tpu.matmul %1450, %1566, %cst_1107 {dimension_numbers = #tpu.dot_dimension_numbers<[1], [0], [0], [1], [0, 0, 1, 1], [], []>} : vector<2x4xf32>, vector<4x8xf32>, vector<2x8xf32> -> vector<2x8xf32>
    %1568 = arith.addf %1564, %1567 : vector<2x8xf32>
    %c1_1108 = arith.constant 1 : index
    %c0_1109 = arith.constant 0 : index
    %c0_1110 = arith.constant 0 : index
    %1569 = vector.load %arg26[%c1_1108, %c0_1109, %c0_1110] : memref<3x1x8xf32, #tpu.memory_space<vmem>>, vector<1x1x8xf32>
    %1570 = vector.shape_cast %1569 : vector<1x1x8xf32> to vector<1x8xf32>
    %1571 = vector.broadcast %1570 : vector<1x8xf32> to vector<2x8xf32>
    %1572 = arith.addf %1568, %1571 : vector<2x8xf32>
    %c0_1111 = arith.constant 0 : index
    %c0_1112 = arith.constant 0 : index
    %c0_1113 = arith.constant 0 : index
    %1573 = vector.load %arg27[%c0_1111, %c0_1112, %c0_1113] : memref<3x8x8xf32, #tpu.memory_space<vmem>>, vector<1x8x8xf32>
    %1574 = vector.shape_cast %1573 : vector<1x8x8xf32> to vector<8x8xf32>
    %cst_1114 = arith.constant dense<0.000000e+00> : vector<2x8xf32>
    %1575 = tpu.matmul %1428, %1574, %cst_1114 {dimension_numbers = #tpu.dot_dimension_numbers<[1], [0], [0], [1], [0, 0, 1, 1], [], []>} : vector<2x8xf32>, vector<8x8xf32>, vector<2x8xf32> -> vector<2x8xf32>
    %1576 = arith.addf %1561, %1575 : vector<2x8xf32>
    %c0_1115 = arith.constant 0 : index
    %c0_1116 = arith.constant 0 : index
    %c0_1117 = arith.constant 0 : index
    %1577 = vector.load %arg28[%c0_1115, %c0_1116, %c0_1117] : memref<3x1x8xf32, #tpu.memory_space<vmem>>, vector<1x1x8xf32>
    %1578 = vector.shape_cast %1577 : vector<1x1x8xf32> to vector<1x8xf32>
    %1579 = vector.broadcast %1578 : vector<1x8xf32> to vector<2x8xf32>
    %1580 = arith.addf %1576, %1579 : vector<2x8xf32>
    %1581 = arith.negf %1580 : vector<2x8xf32>
    %1582 = math.exp %1581 : vector<2x8xf32>
    %cst_1118 = arith.constant 1.000000e+00 : f32
    %1583 = vector.broadcast %cst_1118 : f32 to vector<2x8xf32>
    %1584 = arith.addf %1583, %1582 : vector<2x8xf32>
    %1585 = arith.divf %1583, %1584 : vector<2x8xf32>
    %c1_1119 = arith.constant 1 : index
    %c0_1120 = arith.constant 0 : index
    %c0_1121 = arith.constant 0 : index
    %1586 = vector.load %arg27[%c1_1119, %c0_1120, %c0_1121] : memref<3x8x8xf32, #tpu.memory_space<vmem>>, vector<1x8x8xf32>
    %1587 = vector.shape_cast %1586 : vector<1x8x8xf32> to vector<8x8xf32>
    %cst_1122 = arith.constant dense<0.000000e+00> : vector<2x8xf32>
    %1588 = tpu.matmul %1428, %1587, %cst_1122 {dimension_numbers = #tpu.dot_dimension_numbers<[1], [0], [0], [1], [0, 0, 1, 1], [], []>} : vector<2x8xf32>, vector<8x8xf32>, vector<2x8xf32> -> vector<2x8xf32>
    %1589 = arith.addf %1572, %1588 : vector<2x8xf32>
    %c1_1123 = arith.constant 1 : index
    %c0_1124 = arith.constant 0 : index
    %c0_1125 = arith.constant 0 : index
    %1590 = vector.load %arg28[%c1_1123, %c0_1124, %c0_1125] : memref<3x1x8xf32, #tpu.memory_space<vmem>>, vector<1x1x8xf32>
    %1591 = vector.shape_cast %1590 : vector<1x1x8xf32> to vector<1x8xf32>
    %1592 = vector.broadcast %1591 : vector<1x8xf32> to vector<2x8xf32>
    %1593 = arith.addf %1589, %1592 : vector<2x8xf32>
    %1594 = arith.negf %1593 : vector<2x8xf32>
    %1595 = math.exp %1594 : vector<2x8xf32>
    %cst_1126 = arith.constant 1.000000e+00 : f32
    %1596 = vector.broadcast %cst_1126 : f32 to vector<2x8xf32>
    %1597 = arith.addf %1596, %1595 : vector<2x8xf32>
    %1598 = arith.divf %1596, %1597 : vector<2x8xf32>
    %1599 = arith.mulf %1598, %1428 : vector<2x8xf32>
    %c0_1127 = arith.constant 0 : index
    %c0_1128 = arith.constant 0 : index
    %c0_1129 = arith.constant 0 : index
    %1600 = vector.load %arg27[%c0_1127, %c0_1128, %c0_1129] : memref<3x8x8xf32, #tpu.memory_space<vmem>>, vector<1x8x8xf32>
    %1601 = vector.shape_cast %1600 : vector<1x8x8xf32> to vector<8x8xf32>
    %cst_1130 = arith.constant dense<0.000000e+00> : vector<2x8xf32>
    %1602 = tpu.matmul %1599, %1601, %cst_1130 {dimension_numbers = #tpu.dot_dimension_numbers<[1], [0], [0], [1], [0, 0, 1, 1], [], []>} : vector<2x8xf32>, vector<8x8xf32>, vector<2x8xf32> -> vector<2x8xf32>
    %1603 = arith.addf %1561, %1602 : vector<2x8xf32>
    %c0_1131 = arith.constant 0 : index
    %c0_1132 = arith.constant 0 : index
    %c0_1133 = arith.constant 0 : index
    %1604 = vector.load %arg28[%c0_1131, %c0_1132, %c0_1133] : memref<3x1x8xf32, #tpu.memory_space<vmem>>, vector<1x1x8xf32>
    %1605 = vector.shape_cast %1604 : vector<1x1x8xf32> to vector<1x8xf32>
    %1606 = vector.broadcast %1605 : vector<1x8xf32> to vector<2x8xf32>
    %1607 = arith.addf %1603, %1606 : vector<2x8xf32>
    %1608 = arith.negf %1607 : vector<2x8xf32>
    %1609 = math.exp %1608 : vector<2x8xf32>
    %cst_1134 = arith.constant 1.000000e+00 : f32
    %1610 = vector.broadcast %cst_1134 : f32 to vector<2x8xf32>
    %1611 = arith.addf %1610, %1609 : vector<2x8xf32>
    %1612 = arith.divf %1610, %1611 : vector<2x8xf32>
    %1613 = arith.mulf %1598, %1430 : vector<2x8xf32>
    %1614 = arith.mulf %1585, %1612 : vector<2x8xf32>
    %1615 = arith.addf %1613, %1614 : vector<2x8xf32>
    %c6_1135 = arith.constant 6 : index
    %c0_1136 = arith.constant 0 : index
    %c0_1137 = arith.constant 0 : index
    %1616 = vector.load %arg7[%c6_1135, %c0_1136, %c0_1137] : memref<7x14x2xf32, #tpu.memory_space<vmem>>, vector<1x14x2xf32>
    %1617 = vector.shape_cast %1616 : vector<1x14x2xf32> to vector<14x2xf32>
    %cst_1138 = arith.constant dense<0.000000e+00> : vector<14x8xf32>
    %1618 = tpu.matmul %1617, %1615, %cst_1138 {dimension_numbers = #tpu.dot_dimension_numbers<[1], [0], [0], [1], [0, 0, 1, 1], [], []>} : vector<14x2xf32>, vector<2x8xf32>, vector<14x8xf32> -> vector<14x8xf32>
    %1619 = arith.addf %1434, %1618 : vector<14x8xf32>
    %c6_1139 = arith.constant 6 : index
    %c0_1140 = arith.constant 0 : index
    %c0_1141 = arith.constant 0 : index
    %1620 = vector.load %arg8[%c6_1139, %c0_1140, %c0_1141] : memref<7x1x7xf32, #tpu.memory_space<vmem>>, vector<1x1x7xf32>
    %1621 = vector.shape_cast %1620 : vector<1x1x7xf32> to vector<1x7xf32>
    %1622 = vector.broadcast %1479 : vector<2x1xf32> to vector<2x7xf32>
    %1623 = vector.broadcast %1621 : vector<1x7xf32> to vector<2x7xf32>
    %1624 = arith.mulf %1622, %1623 : vector<2x7xf32>
    %1625 = arith.addf %1440, %1624 : vector<2x7xf32>
    %c0_1142 = arith.constant 0 : index
    %c0_1143 = arith.constant 0 : index
    %1626 = vector.load %arg29[%c0_1142, %c0_1143] : memref<8x512xf32, #tpu.memory_space<vmem>>, vector<8x512xf32>
    %cst_1144 = arith.constant dense<0.000000e+00> : vector<14x512xf32>
    %1627 = tpu.matmul %1619, %1626, %cst_1144 {dimension_numbers = #tpu.dot_dimension_numbers<[1], [0], [0], [1], [0, 0, 1, 1], [], []>} : vector<14x8xf32>, vector<8x512xf32>, vector<14x512xf32> -> vector<14x512xf32>
    %c0_1145 = arith.constant 0 : index
    %c0_1146 = arith.constant 0 : index
    %1628 = vector.load %arg30[%c0_1145, %c0_1146] : memref<1x512xf32, #tpu.memory_space<vmem>>, vector<1x512xf32>
    %1629 = vector.broadcast %1628 : vector<1x512xf32> to vector<14x512xf32>
    %1630 = arith.addf %1627, %1629 : vector<14x512xf32>
    %cst_1147 = arith.constant 0.000000e+00 : f32
    %1631 = vector.broadcast %cst_1147 : f32 to vector<14x512xf32>
    %1632 = arith.maximumf %1630, %1631 : vector<14x512xf32>
    %c0_1148 = arith.constant 0 : index
    %c0_1149 = arith.constant 0 : index
    %1633 = vector.load %arg31[%c0_1148, %c0_1149] : memref<512x4xf32, #tpu.memory_space<vmem>>, vector<512x4xf32>
    %cst_1150 = arith.constant dense<0.000000e+00> : vector<14x4xf32>
    %1634 = tpu.matmul %1632, %1633, %cst_1150 {dimension_numbers = #tpu.dot_dimension_numbers<[1], [0], [0], [1], [0, 0, 1, 1], [], []>} : vector<14x512xf32>, vector<512x4xf32>, vector<14x4xf32> -> vector<14x4xf32>
    %c0_1151 = arith.constant 0 : index
    %c0_1152 = arith.constant 0 : index
    %1635 = vector.load %arg32[%c0_1151, %c0_1152] : memref<1x4xf32, #tpu.memory_space<vmem>>, vector<1x4xf32>
    %1636 = vector.broadcast %1635 : vector<1x4xf32> to vector<14x4xf32>
    %1637 = arith.addf %1634, %1636 : vector<14x4xf32>
    %cst_1153 = arith.constant 0.000000e+00 : f32
    %1638 = vector.broadcast %cst_1153 : f32 to vector<14x4xf32>
    %1639 = arith.maximumf %1637, %1638 : vector<14x4xf32>
    %c0_1154 = arith.constant 0 : index
    %c0_1155 = arith.constant 0 : index
    %1640 = vector.load %arg33[%c0_1154, %c0_1155] : memref<14x4xf32, #tpu.memory_space<vmem>>, vector<14x4xf32>
    tpu.vector_store %arg33[%c0_1154, %c0_1155], %1639 {strides = array<i32>} : memref<14x4xf32, #tpu.memory_space<vmem>>, vector<14x4xf32>,
    %cst_1156 = arith.constant dense<0xFF800000> : vector<2xf32>
    %1641 = vector.multi_reduction <maximumf>, %1625, %cst_1156 [1] : vector<2x7xf32> to vector<2xf32>
    %1642 = vector.shape_cast %1641 : vector<2xf32> to vector<2x1xf32>
    %1643 = vector.broadcast %1642 : vector<2x1xf32> to vector<2x7xf32>
    %1644 = arith.subf %1625, %1643 : vector<2x7xf32>
    %1645 = math.exp %1644 : vector<2x7xf32>
    %cst_1157 = arith.constant dense<0.000000e+00> : vector<2xf32>
    %1646 = vector.multi_reduction <add>, %1645, %cst_1157 [1] : vector<2x7xf32> to vector<2xf32>
    %1647 = vector.shape_cast %1646 : vector<2xf32> to vector<2x1xf32>
    %1648 = vector.broadcast %1647 : vector<2x1xf32> to vector<2x7xf32>
    %1649 = arith.divf %1645, %1648 : vector<2x7xf32>
    %c0_1158 = arith.constant 0 : index
    %c0_1159 = arith.constant 0 : index
    %1650 = vector.load %arg34[%c0_1158, %c0_1159] : memref<2x7xf32, #tpu.memory_space<vmem>>, vector<2x7xf32>
    tpu.vector_store %arg34[%c0_1158, %c0_1159], %1649 {strides = array<i32>} : memref<2x7xf32, #tpu.memory_space<vmem>>, vector<2x7xf32>,
    return
  }
}

</mosaic_0001>

<bundles_post_ra>
// kernel: evonet_tsc_forward.1
= control target key start
LH: loop header
LB: loop body
LE: loop exit
PB: predicated region body
PF: predicated region fallthrough
CT: control target
= control target key end

     0   :  { %s21038_s6 = smov 1   ;;  %s21039_s10 = smov 2   ;;  %s23397_s0 = inlined_call_operand.smem [shape: u32[35], index: -1, kind: input, shape index: {}] }
   0x1   :  { %s21084_s5 = sld [smem:[%s23397_s0]]   ;;  %s21040_s14 = smov 3  }
   0x2   :  { %s21089_s9 = sld [smem:[%s23397_s0 + %s21038_s6]]   ;;  %s21041_s18 = smov 4  }
   0x3   :  { %s21094_s13 = sld [smem:[%s23397_s0 + %s21039_s10]]   ;;  %s21042_s22 = smov 5  }
   0x4   :  { %s21099_s17 = sld [smem:[%s23397_s0 + %s21040_s14]]   ;;  %s21043_s26 = smov 6  }
   0x5   :  { %s21104_s21 = sld [smem:[%s23397_s0 + %s21041_s18]]   ;;  %s21044_s30 = smov 7  }
   0x6   :  { %s21109_s25 = sld [smem:[%s23397_s0 + %s21042_s22]]   ;;  %s21045_s4 = smov 8  }
   0x7   :  { %s21114_s29 = sld [smem:[%s23397_s0 + %s21043_s26]]   ;;  %s21046_s10 = smov 9  }
   0x8   :  { %s21119_s3 = sld [smem:[%s23397_s0 + %s21044_s30]]   ;;  %s21047_s15 = smov 10  }
   0x9   :  { %23420 = sst [smem:[#allocation5_spill]] %s21094_s13  ;;  %s21048_s20 = smov 11  }
   0xa   :  { %s21124_s8 = sld [smem:[%s23397_s0 + %s21045_s4]]   ;;  %s21049_s26 = smov 12  }
   0xb   :  { %s21129_s14 = sld [smem:[%s23397_s0 + %s21046_s10]]   ;;  %s21050_s1 = smov 13  }
   0xc   :  { %23421 = sst [smem:[#allocation6_spill]] %s21109_s25  ;;  %s21051_s7 = smov 14  }
   0xd   :  { %23422 = sst [smem:[#allocation7_spill]] %s21114_s29  ;;  %s21053_s22 = smov 16  }
   0xe   :  { %23423 = sst [smem:[#allocation8_spill]] %s21119_s3  ;;  %s21054_s28 = smov 17  }
   0xf   :  { %s21134_s19 = sld [smem:[%s23397_s0 + %s21047_s15]]   ;;  %s21052_s15 = smov 15  }
  0x10   :  { %23424 = sst [smem:[#allocation9_spill]] %s21124_s8 }
  0x11   :  { %s21139_s24 = sld [smem:[%s23397_s0 + %s21048_s20]]  }
  0x12   :  { %s21144_s30 = sld [smem:[%s23397_s0 + %s21049_s26]]  }
  0x13   :  { %s21149_s6 = sld [smem:[%s23397_s0 + %s21050_s1]]  }
  0x14   :  { %s21154_s12 = sld [smem:[%s23397_s0 + %s21051_s7]]   ;;  %s21055_s7 = smov 18  }
  0x15   :  { %s21159_s20 = sld [smem:[%s23397_s0 + %s21052_s15]]   ;;  %s21056_s15 = smov 19  }
  0x16   :  { %s21164_s27 = sld [smem:[%s23397_s0 + %s21053_s22]]   ;;  %s21057_s22 = smov 20  }
  0x17   :  { %s21169_s4 = sld [smem:[%s23397_s0 + %s21054_s28]]   ;;  %s21058_s28 = smov 21  }
  0x18   :  { %s21174_s8 = sld [smem:[%s23397_s0 + %s21055_s7]]   ;;  %s21059_s7 = smov 22  }
  0x19   :  { %s21179_s3 = sld [smem:[%s23397_s0 + %s21056_s15]]   ;;  %s21060_s15 = smov 23  }
  0x1a   :  { %s21184_s13 = sld [smem:[%s23397_s0 + %s21057_s22]]   ;;  %s21061_s22 = smov 24  }
  0x1b   :  { %s21189_s29 = sld [smem:[%s23397_s0 + %s21058_s28]]   ;;  %s21062_s28 = smov 25  }
  0x1c   :  { %s21194_s25 = sld [smem:[%s23397_s0 + %s21059_s7]]   ;;  %s21063_s7 = smov 26  }
  0x1f   :  { %23425 = sst [smem:[#allocation10_spill]] %s21179_s3 }
  0x20   :  { %23426 = sst [smem:[#allocation11_spill]] %s21184_s13 }
  0x21   :  { %23427 = sst [smem:[#allocation12_spill]] %s21189_s29 }
  0x22   :  { %23428 = sst [smem:[#allocation13_spill]] %s21194_s25 }
  0x23   :  { %s21199_s3 = sld [smem:[%s23397_s0 + %s21060_s15]]   ;;  %s21064_s15 = smov 27  }
  0x24   :  { %s21204_s13 = sld [smem:[%s23397_s0 + %s21061_s22]]   ;;  %s21065_s22 = smov 28  }
  0x25   :  { %s21209_s29 = sld [smem:[%s23397_s0 + %s21062_s28]]   ;;  %s21066_s28 = smov 29  }
  0x26   :  { %s21214_s25 = sld [smem:[%s23397_s0 + %s21063_s7]]   ;;  %s21067_s7 = smov 30  }
  0x29   :  { %23429 = sst [smem:[#allocation14_spill]] %s21199_s3 }
  0x2a   :  { %23430 = sst [smem:[#allocation15_spill]] %s21204_s13 }
  0x2b   :  { %23431 = sst [smem:[#allocation16_spill]] %s21209_s29 }
  0x2c   :  { %23432 = sst [smem:[#allocation17_spill]] %s21214_s25 }
  0x2d   :  { %s21219_s3 = sld [smem:[%s23397_s0 + %s21064_s15]]   ;;  %s21068_s15 = smov 31  }
  0x2e   :  { %s21224_s13 = sld [smem:[%s23397_s0 + %s21065_s22]]   ;;  %s21069_s22 = smov 32  }
  0x2f   :  { %s21229_s29 = sld [smem:[%s23397_s0 + %s21066_s28]]   ;;  %s21070_s28 = smov 33  }
  0x30   :  { %s21234_s25 = sld [smem:[%s23397_s0 + %s21067_s7]]   ;;  %s21071_s7 = smov 34  }
  0x33   :  { %23433 = sst [smem:[#allocation18_spill]] %s21219_s3 }
  0x34   :  { %23434 = sst [smem:[#allocation19_spill]] %s21224_s13 }
  0x35   :  { %23435 = sst [smem:[#allocation20_spill]] %s21229_s29 }
  0x36   :  { %23436 = sst [smem:[#allocation21_spill]] %s21234_s25 }
  0x37   :  { %s21239_s3 = sld [smem:[%s23397_s0 + %s21068_s15]]  }
  0x38   :  { %s21244_s13 = sld [smem:[%s23397_s0 + %s21069_s22]]  }
  0x39   :  { %s21249_s29 = sld [smem:[%s23397_s0 + %s21070_s28]]  }
  0x3a   :  { %s21254_s25 = sld [smem:[%s23397_s0 + %s21071_s7]]  }
  0x3b   :  { %v156_v0 = vld [vmem:[%s21084_s5] sm:$0xff]  ;;  %v21072_v1 = vmov 0  }
  0x3c   :  { %20621 = vset.pattern.permute.xlu0 %v21072_v1  ;;  %20622 = vset.pattern.permute.xlu1 %v21072_v1 }
  0x3d   :  { %75 = vsyncpa [#allocation3], 0  ;;  %166 = vperm.xlu0 %20621, %v156_v0   ;;  %v18342_v2 = vld [vmem:[%s21084_s5 + $0x8] sm:$0xff]  ;;  %v23414_v3 = vmov 0.0   ;;  %v21260_v4 = vld [vmem:[%s21099_s17] sm:$0xff]  ;;  %vm21074_vm0 = vmmov 0  }
  0x3e   :  { %19305 = vmatprep.subr.mxu1 %v23414_v3  ;;  %19315 = vmatprep.subr.mxu0 %v23414_v3  ;;  %v21272_v5 = vld [vmem:[%s21089_s9 + $0x1] ss:$0 sm:$0xff]  ;;  %v18346_v9 = vld [vmem:[%s21089_s9] ss:$0 sm:$0xff]  ;;  %vm190_vm1 = vcmask 64512   ;;  %s23437_s0 = sld [smem:[#allocation6_spill]] }
  0x3f   :  { %19307 = vmatprep.mubr.msk.f32.mxu1 %vm21074_vm0, %v23414_v3  ;;  %19306 = vmatpush3.msra.mxu1 %v21260_v4  ;;  %v21275_v7 = vld [vmem:[%s21104_s21] sm:$0xff]  ;;  %s23438_s17 = sld [smem:[#allocation7_spill]]  ;;  %v18423_v46 = vld [vmem:[%s21084_s5 + $0x10] sm:$0xff]  ;;  %s23439_s15 = sld [smem:[#allocation11_spill]]  ;;  %v18482_v47 = vld [vmem:[%s21084_s5 + $0x18] sm:$0xff]  ;;  %vm1013_vm2 = vcmask 1041408  }
  0x40   :  { %19316 = vmatpush3.msra.mxu0 %v21260_v4  ;;  %19317 = vmatprep.mubr.msk.f32.mxu0 %vm21074_vm0, %v23414_v3  ;;  %v21291_v14 = vld [vmem:[%s21129_s14] sm:$0xff]  ;;  %v18594_v49 = vld [vmem:[%s21084_s5 + $0x28] sm:$0xff]  ;;  %v18650_v50 = vld [vmem:[%s21084_s5 + $0x30] sm:$0xff]  ;;  %vm1009_vm3 = vcmask 15360   ;;  %s23442_s16 = sld [smem:[#allocation13_spill]]  ;;  %s23443_s18 = sld [smem:[#allocation12_spill]] }
  0x41   :  { %179 = vperm.xlu0 %20621, %v18342_v2   ;;  %19310 = vmatprep.subr.mxu1 %v23414_v3  ;;  %v21296_v15 = vld [vmem:[%s21139_s24] sm:$0xff]  ;;  %v18706_v51 = vld [vmem:[%s21084_s5 + $0x38] sm:$0xff]  ;;  %s23444_s22 = sld [smem:[#allocation14_spill]]  ;;  %s23445_s23 = sld [smem:[#allocation16_spill]]  ;;  %vm1977_vm4 = vcmask 1043456   ;;  %vm1973_vm5 = vcmask 31744  }
  0x42   :  { %19325 = vmatprep.subr.mxu0 %v23414_v3  ;;  %v21307_v20 = vld [vmem:[%s21154_s12] sm:$0xff]  ;;  %s23446_s26 = sld [smem:[#allocation5_spill]]  ;;  %s23447_s28 = sld [smem:[#allocation18_spill]]  ;;  %vm18277_vm6 = vcmask 50176  }
  0x43   :  { %v21310_v21 = vld [vmem:[%s21164_s27] sm:$0xff]  ;;  %s23448_s1 = sld [smem:[#allocation15_spill]]  ;;  %s23449_s2 = sld [smem:[#allocation17_spill]] }
  0x44   :  { %v21317_v24 = vld [vmem:[%s21144_s30] ss:$0 sm:$0xff]  ;;  %s23450_s7 = sld [smem:[#allocation19_spill]]  ;;  %s23451_s10 = sld [smem:[#allocation8_spill]] }
  0x45   :  { %v21321_v28 = vld [vmem:[%s21134_s19] ss:$0 sm:$0xff]  ;;  %v21394_v56 = vld [vmem:[%s23439_s15 + $0x8] sm:$0xff]  ;;  %v21402_v57 = vld [vmem:[%s23439_s15 + $0x10] sm:$0xff] }
  0x46   :  { %v21325_v30 = vld [vmem:[%s21149_s6] sm:$0xff]  ;;  %v21427_v60 = vld [vmem:[%s23442_s16 + $0x10] sm:$0xff] }
  0x47   :  { %v21328_v31 = vld [vmem:[%s21159_s20] sm:$0xff] }
  0x48   :  { %v21347_v34 = vld [vmem:[%s21174_s8] sm:$0xff] }
  0x49   :  { %v21350_v35 = vld [vmem:[%s21169_s4] sm:$0xff] }
  0x4a   :  { %v21360_v41 = vld [vmem:[%s23437_s0] sm:$0x3] }
  0x4b   :  { %v18538_v48 = vld [vmem:[%s21084_s5 + $0x20] sm:$0xff]  ;;  %s23441_s5 = sld [smem:[#allocation10_spill]] }
  0x4c   :  { %v21380_v54 = vld [vmem:[%s23438_s17] sm:$0xff] }
  0x4d   :  { %v21383_v55 = vld [vmem:[%s23439_s15] sm:$0xff] }
  0x4e   :  { %v21418_v59 = vld [vmem:[%s23442_s16] sm:$0xff] }
  0x51   :  { %v21413_v58 = vld [vmem:[%s23441_s5] sm:$0xff]  ;;  %v21436_v61 = vld [vmem:[%s23441_s5 + $0x8] sm:$0xff]  ;;  %v21444_v0 = vld [vmem:[%s23441_s5 + $0x10] sm:$0xff] }
  0xbc   :  { %v167_v6 = vpop.permute.xlu0 %166 }
  0xbd   :  { %v175_v8 = vmul.f32 %v21272_v5, %v167_v6  ;;  %v21452_v6 = vld [vmem:[%s23442_s16 + $0x8] sm:$0xff] }
  0xbf   :  { %v176_v10 = vmul.f32 %v175_v8, %v21275_v7 }
  0xc0   :  { %v21280_v11 = vpop.permute.xlu0 %179 }
  0xc1   :  { %v188_v12 = vmul.f32 %v18346_v9, %v21280_v11  ;;  %19308 = vmatmul.mubr.msk.f32.vlgmr.msra.gmra.mrb[0].mxu1 %vm190_vm1, %v176_v10 }
  0xc2   :  { %19312 = vmatprep.mubr.msk.f32.mxu1 %vm21074_vm0, %v23414_v3  ;;  %19311 = vmatpush3.msra.mxu1 %v21291_v14 }
  0xc3   :  { %v189_v13 = vmul.f32 %v188_v12, %v21275_v7  ;;  %19320 = vmatprep.subr.mxu1 %v23414_v3 }
  0xc5   :  { %19318 = vmatmul.mubr.msk.f32.vlgmr.msra.gmra.mrb[0].mxu0 %vm190_vm1, %v189_v13 }
  0xc6   :  { %19327 = vmatprep.mubr.msk.f32.mxu0 %vm21074_vm0, %v23414_v3  ;;  %19326 = vmatpush3.msra.mxu0 %v21307_v20 }
  0xc7   :  { %19330 = vmatprep.subr.mxu0 %v23414_v3 }
 0x194   :  { %v260_v16 = vpop.f32.mrb[0].mxu1 }
 0x195   :  { %v19309_v17 = vpop.f32.mrb[1].mxu1  ;;  %19313 = vmatmul.mubr.msk.f32.vlgmr.msra.gmra.mrb[2].mxu1 %vm190_vm1, %v260_v16 }
 0x196   :  { %19321 = vmatpush3.msra.mxu1 %v21296_v15  ;;  %19322 = vmatprep.mubr.msk.f32.mxu1 %vm21074_vm0, %v23414_v3 }
 0x197   :  { %19335 = vmatprep.subr.mxu1 %v23414_v3 }
 0x198   :  { %v413_v18 = vpop.f32.mrb[0].mxu0 }
 0x199   :  { %v19319_v19 = vpop.f32.mrb[1].mxu0  ;;  %19323 = vmatmul.mubr.msk.f32.vlgmr.msra.gmra.mrb[4].mxu1 %vm190_vm1, %v413_v18 }
 0x19a   :  { %19337 = vmatprep.mubr.msk.f32.mxu1 %vm21074_vm0, %v23414_v3  ;;  %19336 = vmatpush3.msra.mxu1 %v21310_v21 }
 0x19b   :  { %19340 = vmatprep.subr.mxu1 %v23414_v3 }
 0x268   :  { %v339_v22 = vpop.f32.mrb[2].mxu1 }
 0x269   :  { %v19314_v23 = vpop.f32.mrb[3].mxu1  ;;  %v340_v29 = vadd.f32 %v21321_v28, %v339_v22  ;;  %v21466_v22 = vld [vmem:[%s23443_s18] ss:$0 sm:$0xff] }
 0x26c   :  { %v492_v25 = vpop.f32.mrb[4].mxu1 }
 0x26d   :  { %v493_v26 = vadd.f32 %v21317_v24, %v492_v25  ;;  %v19324_v27 = vpop.f32.mrb[5].mxu1 }
 0x26f   :  { %20623 = vtanh.f32 %v493_v26 }
 0x270   :  { %20625 = vtanh.f32 %v340_v29 }
 0x279   :  { %v20624_v32 = vpop.eup %20623 }
 0x27a   :  { %19328 = vmatmul.mubr.msk.f32.vlgmr.msra.gmra.mrb[2].mxu0 %vm190_vm1, %v20624_v32  ;;  %19338 = vmatmul.mubr.msk.f32.vlgmr.msra.gmra.mrb[6].mxu1 %vm190_vm1, %v20624_v32  ;;  %v20626_v33 = vpop.eup %20625 }
 0x27b   :  { %19331 = vmatpush3.msra.mxu0 %v21325_v30  ;;  %19341 = vmatpush3.msra.mxu1 %v21328_v31 }
 0x27c   :  { %19332 = vmatprep.mubr.msk.f32.mxu0 %vm21074_vm0, %v23414_v3  ;;  %19342 = vmatprep.mubr.msk.f32.mxu1 %vm21074_vm0, %v23414_v3 }
 0x27d   :  { %19345 = vmatprep.subr.mxu0 %v23414_v3  ;;  %19350 = vmatprep.subr.mxu1 %v23414_v3 }
 0x282   :  { %19333 = vmatmul.mubr.msk.f32.vlgmr.msra.gmra.mrb[2].mxu0 %vm190_vm1, %v20626_v33  ;;  %19343 = vmatmul.mubr.msk.f32.vlgmr.msra.gmra.mrb[6].mxu1 %vm190_vm1, %v20626_v33 }
 0x283   :  { %19347 = vmatprep.mubr.msk.f32.mxu0 %vm21074_vm0, %v23414_v3  ;;  %19352 = vmatprep.mubr.msk.f32.mxu1 %vm21074_vm0, %v23414_v3 }
 0x284   :  { %19351 = vmatpush3.msra.mxu1 %v21347_v34 }
 0x285   :  { %19355 = vmatprep.subr.mxu1 %v23414_v3 }
 0x286   :  { %19353 = vmatmul.mubr.f32.vlgmr.msra.gmra.mrb[8].mxu1 %v23414_v3 }
 0x287   :  { %19356 = vmatpush3.msra.mxu1 %v21350_v35  ;;  %19357 = vmatprep.mubr.msk.f32.mxu1 %vm21074_vm0, %v23414_v3 }
 0x288   :  { %19370 = vmatprep.subr.mxu1 %v23414_v3 }
 0x355   :  { %v639_v36 = vpop.f32.mrb[2].mxu0  ;;  %v779_v37 = vpop.f32.mrb[6].mxu1 }
 0x356   :  { %v783_v38 = vmax.f32 %v639_v36, %v779_v37  ;;  %v19334_v39 = vpop.f32.mrb[3].mxu0  ;;  %v19344_v40 = vpop.f32.mrb[7].mxu1  ;;  %v21470_v37 = vld [vmem:[%s23443_s18 + $0x1] ss:$0 sm:$0xff] }
 0x358   :  { %19346 = vmatpush3.msra.mxu0 %v783_v38 }
 0x359   :  { %19348 = vmatmul.mubr.msk.f32.vlgmr.msra.gmra.mrb[4].mxu0 %vm190_vm1, %v21360_v41  ;;  %19360 = vmatprep.subr.mxu0 %v23414_v3 }
 0x35a   :  { %19362 = vmatprep.mubr.msk.f32.mxu0 %vm21074_vm0, %v23414_v3 }
 0x42c   :  { %v853_v42 = vpop.f32.mrb[4].mxu0 }
 0x42d   :  { %v19349_v43 = vpop.f32.mrb[5].mxu0  ;;  %19358 = vmatmul.mubr.msk.f32.vlgmr.msra.gmra.mrb[8].mxu1 %vm190_vm1, %v853_v42 }
 0x42e   :  { %19372 = vmatprep.mubr.msk.f32.mxu1 %vm21074_vm0, %v23414_v3  ;;  %19371 = vmatpush3.msra.mxu1 %v21413_v58 }
 0x42f   :  { %19380 = vmatprep.subr.mxu1 %v23414_v3 }
 0x500   :  { %v999_v44 = vpop.f32.mrb[8].mxu1 }
 0x501   :  { %1005 = vperm.xlu1 %20622, %v999_v44   ;;  %v19359_v45 = vpop.f32.mrb[9].mxu1 }
 0x502   :  { %v21478_v45 = vld [vmem:[%s23444_s22 + $0x1] ss:$0 sm:$0xff] }
 0x505   :  { %2819 = vperm.xlu1 %20622, %v18423_v46  }
 0x509   :  { %5470 = vperm.xlu1 %20622, %v18482_v47  }
 0x50d   :  { %8039 = vperm.xlu1 %20622, %v18538_v48  }
 0x511   :  { %10608 = vperm.xlu1 %20622, %v18594_v49  }
 0x515   :  { %13177 = vperm.xlu1 %20622, %v18650_v50  }
 0x519   :  { %15746 = vperm.xlu1 %20622, %v18706_v51  }
 0x580   :  { %v21376_v52 = vpop.permute.xlu1 %1005 }
 0x581   :  { %23440 = vst [vmem:[#allocation22_spill] sm:$0xff] %v21376_v52  ;;  %v1008_v53 = vmul.f32 0.0, %v21376_v52 }
 0x583   :  { %19361 = vmatpush3.msk.msra.mxu0 %vm1013_vm2, %v1008_v53 }
 0x584   :  { %19363 = vmatmul.mubr.msk.f32.vlgmr.msra.gmra.mrb[6].mxu0 %vm1009_vm3, %v21380_v54  ;;  %19365 = vmatprep.subr.mxu0 %v23414_v3 }
 0x585   :  { %19366 = vmatpush3.msra.mxu0 %v21383_v55  ;;  %19367 = vmatprep.mubr.msk.f32.mxu0 %vm21074_vm0, %v23414_v3 }
 0x586   :  { %19375 = vmatprep.subr.mxu0 %v23414_v3 }
 0x588   :  { %19368 = vmatmul.mubr.msk.f32.vlgmr.msra.gmra.mrb[8].mxu0 %vm190_vm1, %v783_v38 }
 0x589   :  { %19376 = vmatpush3.msra.mxu0 %v21394_v56  ;;  %19377 = vmatprep.mubr.msk.f32.mxu0 %vm21074_vm0, %v23414_v3 }
 0x58a   :  { %19385 = vmatprep.subr.mxu0 %v23414_v3 }
 0x58c   :  { %19378 = vmatmul.mubr.msk.f32.vlgmr.msra.gmra.mrb[10].mxu0 %vm190_vm1, %v783_v38 }
 0x58d   :  { %19386 = vmatpush3.msra.mxu0 %v21402_v57  ;;  %19387 = vmatprep.mubr.msk.f32.mxu0 %vm21074_vm0, %v23414_v3 }
 0x58e   :  { %19395 = vmatprep.subr.mxu0 %v23414_v3 }
 0x590   :  { %19388 = vmatmul.mubr.msk.f32.vlgmr.msra.gmra.mrb[12].mxu0 %vm190_vm1, %v783_v38  ;;  %v21473_v38 = vld [vmem:[%s23443_s18 + $0x2] ss:$0 sm:$0xff] }
 0x591   :  { %19397 = vmatprep.mubr.msk.f32.mxu0 %vm21074_vm0, %v23414_v3  ;;  %19396 = vmatpush3.msra.mxu0 %v21418_v59 }
 0x592   :  { %19405 = vmatprep.subr.mxu0 %v23414_v3 }
 0x594   :  { %19398 = vmatmul.mubr.msk.f32.vlgmr.msra.gmra.mrb[14].mxu0 %vm190_vm1, %v21260_v4 }
 0x595   :  { %19407 = vmatprep.mubr.msk.f32.mxu0 %vm21074_vm0, %v23414_v3  ;;  %19406 = vmatpush3.msra.mxu0 %v21427_v60 }
 0x596   :  { %19415 = vmatprep.subr.mxu0 %v23414_v3 }
 0x598   :  { %19408 = vmatmul.mubr.msk.f32.vlgmr.msra.gmra.mrb[16].mxu0 %vm190_vm1, %v21260_v4 }
 0x599   :  { %19417 = vmatprep.mubr.msk.f32.mxu0 %vm21074_vm0, %v23414_v3 }
 0x657   :  { %v1083_v62 = vpop.f32.mrb[6].mxu0 }
 0x658   :  { %v19364_v63 = vpop.f32.mrb[7].mxu0  ;;  %19373 = vmatmul.mubr.msk.f32.vlgmr.msra.gmra.mrb[10].mxu1 %vm190_vm1, %v1083_v62 }
 0x659   :  { %19381 = vmatpush3.msra.mxu1 %v21436_v61  ;;  %19382 = vmatprep.mubr.msk.f32.mxu1 %vm21074_vm0, %v23414_v3 }
 0x65a   :  { %19390 = vmatprep.subr.mxu1 %v23414_v3 }
 0x65b   :  { %v1158_v1 = vpop.f32.mrb[8].mxu0 }
 0x65c   :  { %v19369_v2 = vpop.f32.mrb[9].mxu0  ;;  %19383 = vmatmul.mubr.msk.f32.vlgmr.msra.gmra.mrb[12].mxu1 %vm190_vm1, %v1083_v62 }
 0x65d   :  { %19391 = vmatpush3.msra.mxu1 %v21444_v0  ;;  %19392 = vmatprep.mubr.msk.f32.mxu1 %vm21074_vm0, %v23414_v3  ;;  %v18344_v2 = vld [vmem:[%s23446_s26 + $0x2] sm:$0x3] }
 0x65e   :  { %19400 = vmatprep.subr.mxu1 %v23414_v3 }
 0x65f   :  { %v1313_v8 = vpop.f32.mrb[10].mxu0 }
 0x660   :  { %v19379_v9 = vpop.f32.mrb[11].mxu0  ;;  %19393 = vmatmul.mubr.msk.f32.vlgmr.msra.gmra.mrb[14].mxu1 %vm190_vm1, %v1083_v62 }
 0x661   :  { %19401 = vmatpush3.msra.mxu1 %v21452_v6  ;;  %19402 = vmatprep.mubr.msk.f32.mxu1 %vm21074_vm0, %v23414_v3  ;;  %v21516_v9 = vld [vmem:[%s23447_s28] sm:$0xff] }
 0x662   :  { %19410 = vmatprep.subr.mxu1 %v23414_v3 }
 0x663   :  { %v1466_v10 = vpop.f32.mrb[12].mxu0 }
 0x664   :  { %v19389_v12 = vpop.f32.mrb[13].mxu0  ;;  %19403 = vmatmul.mubr.msk.f32.vlgmr.msra.gmra.mrb[16].mxu1 %vm190_vm1, %v21260_v4 }
 0x665   :  { %19411 = vmatpush3.msra.mxu1 %v21418_v59  ;;  %19412 = vmatprep.mubr.msk.f32.mxu1 %vm21074_vm0, %v23414_v3  ;;  %v21532_v12 = vld [vmem:[%s23444_s22] ss:$0 sm:$0xff] }
 0x666   :  { %19420 = vmatprep.subr.mxu1 %v23414_v3 }
 0x667   :  { %v1619_v13 = vpop.f32.mrb[14].mxu0 }
 0x668   :  { %v19399_v16 = vpop.f32.mrb[15].mxu0 }
 0x66b   :  { %v1794_v17 = vpop.f32.mrb[16].mxu0 }
 0x66c   :  { %v19409_v18 = vpop.f32.mrb[17].mxu0 }
 0x72b   :  { %v1231_v19 = vpop.f32.mrb[10].mxu1 }
 0x72c   :  { %v1232_v23 = vadd.f32 %v1231_v19, %v1158_v1  ;;  %v19374_v25 = vpop.f32.mrb[11].mxu1  ;;  %v21488_v1 = vld [vmem:[%s23445_s23] sm:$0xf] }
 0x72e   :  { %v1242_v26 = vadd.f32 %v21466_v22, %v1232_v23 }
 0x72f   :  { %v1383_v27 = vpop.f32.mrb[12].mxu1 }
 0x730   :  { %v1384_v29 = vadd.f32 %v1383_v27, %v1313_v8  ;;  %v1623_v32 = vadd.f32 %v1619_v13, %v1242_v26  ;;  %v19384_v33 = vpop.f32.mrb[13].mxu1  ;;  %v21507_v8 = vld [vmem:[%s23445_s23 + $0x8] sm:$0xf] }
 0x732   :  { %v1395_v42 = vadd.f32 %v21470_v37, %v1384_v29  ;;  %v1631_v13 = vadd.f32 %v21532_v12, %v1623_v32 }
 0x733   :  { %v1536_v36 = vpop.f32.mrb[14].mxu1 }
 0x734   :  { %v1537_v39 = vadd.f32 %v1536_v36, %v1466_v10  ;;  %v19394_v40 = vpop.f32.mrb[15].mxu1  ;;  %v21524_v10 = vld [vmem:[%s23447_s28 + $0x10] sm:$0xff]  ;;  %v18378_v16 = vmul.f32 -1.442695, %v1631_v13 }
 0x736   :  { %v1548_v43 = vadd.f32 %v21473_v38, %v1537_v39  ;;  %v21537_v39 = vld [vmem:[%s21089_s9 + $0x2] ss:$0 sm:$0xff] }
 0x737   :  { %v1706_v44 = vpop.f32.mrb[16].mxu1  ;;  %v2815_v32 = vmul.f32 %v21537_v39, %v21280_v11 }
 0x738   :  { %v1710_v46 = vadd.f32 %v1706_v44, %v1395_v42  ;;  %v21480_v47 = vadd.f32 %v1794_v17, %v1548_v43  ;;  %v19404_v48 = vpop.f32.mrb[17].mxu1 }
 0x73a   :  { %v1719_v49 = vadd.f32 %v21478_v45, %v1710_v46  ;;  %v2816_v46 = vmul.f32 %v2815_v32, %v21275_v7 }
 0x73c   :  { %v18383_v50 = vmul.f32 -1.442695, %v1719_v49 }
 0x73e   :  { %20627 = vpow2.f32 %v18383_v50 }
 0x748   :  { %v20628_v51 = vpop.eup %20627 }
 0x749   :  { %v1723_v53 = vadd.f32 1.0, %v20628_v51 }
 0x74b   :  { %20629 = vrcp.f32 %v1723_v53 }
 0x74c   :  { %20631 = vpow2.f32 %v18378_v16  ;;  %v21568_v16 = vld [vmem:[%s23448_s1] sm:$0xff] }
 0x755   :  { %v20630_v62 = vpop.eup %20629 }
 0x756   :  { %v1814_v63 = vmul.f32 %v20630_v62, %v21260_v4  ;;  %v21498_v4 = vld [vmem:[%s23445_s23 + $0x4] sm:$0xf]  ;;  %v20632_v27 = vpop.eup %20631 }
 0x757   :  { %v1635_v29 = vadd.f32 1.0, %v20632_v27 }
 0x758   :  { %19413 = vmatmul.mubr.msk.f32.vlgmr.msra.gmra.mrb[18].mxu1 %vm190_vm1, %v1814_v63 }
 0x759   :  { %19422 = vmatprep.mubr.msk.f32.mxu1 %vm21074_vm0, %v23414_v3  ;;  %19421 = vmatpush3.msk.msra.mxu1 %vm1977_vm4, %v21488_v1 }
 0x75a   :  { %19430 = vmatprep.subr.mxu1 %v23414_v3 }
 0x75c   :  { %19423 = vmatmul.mubr.msk.f32.vlgmr.msra.gmra.mrb[20].mxu1 %vm1973_vm5, %v18344_v2 }
 0x75d   :  { %19432 = vmatprep.mubr.msk.f32.mxu1 %vm21074_vm0, %v23414_v3  ;;  %19431 = vmatpush3.msk.msra.mxu1 %vm1977_vm4, %v21498_v4 }
 0x75e   :  { %19440 = vmatprep.subr.mxu1 %v23414_v3 }
 0x760   :  { %19433 = vmatmul.mubr.msk.f32.vlgmr.msra.gmra.mrb[22].mxu1 %vm1973_vm5, %v18344_v2 }
 0x761   :  { %19442 = vmatprep.mubr.msk.f32.mxu1 %vm21074_vm0, %v23414_v3  ;;  %19441 = vmatpush3.msk.msra.mxu1 %vm1977_vm4, %v21507_v8 }
 0x762   :  { %19450 = vmatprep.subr.mxu1 %v23414_v3 }
 0x764   :  { %19443 = vmatmul.mubr.msk.f32.vlgmr.msra.gmra.mrb[24].mxu1 %vm1973_vm5, %v18344_v2 }
 0x765   :  { %19452 = vmatprep.mubr.msk.f32.mxu1 %vm21074_vm0, %v23414_v3  ;;  %19451 = vmatpush3.msra.mxu1 %v21516_v9 }
 0x766   :  { %19460 = vmatprep.subr.mxu1 %v23414_v3 }
 0x768   :  { %19453 = vmatmul.mubr.f32.vlgmr.msra.gmra.mrb[26].mxu1 %v23414_v3 }
 0x769   :  { %19462 = vmatprep.mubr.msk.f32.mxu1 %vm21074_vm0, %v23414_v3  ;;  %19461 = vmatpush3.msra.mxu1 %v21524_v10 }
 0x76a   :  { %19470 = vmatprep.subr.mxu1 %v23414_v3 }
 0x76c   :  { %19463 = vmatmul.mubr.f32.vlgmr.msra.gmra.mrb[28].mxu1 %v23414_v3 }
 0x76d   :  { %19472 = vmatprep.mubr.msk.f32.mxu1 %vm21074_vm0, %v23414_v3 }
 0x82b   :  { %v1884_v17 = vpop.f32.mrb[18].mxu1 }
 0x82c   :  { %v1888_v18 = vadd.f32 %v1884_v17, %v1242_v26  ;;  %v19414_v19 = vpop.f32.mrb[19].mxu1  ;;  %v21541_v26 = vpop.permute.xlu1 %2819 }
 0x82d   :  { %v2822_v48 = vmul.f32 %v21272_v5, %v21541_v26 }
 0x82e   :  { %v1889_v23 = vadd.f32 %v21532_v12, %v1888_v18 }
 0x82f   :  { %v2823_v11 = vmul.f32 %v2822_v48, %v21275_v7  ;;  %v2047_v5 = vpop.f32.mrb[20].mxu1 }
 0x830   :  { %v18390_v25 = vmul.f32 -1.442695, %v1889_v23  ;;  %v19424_v7 = vpop.f32.mrb[21].mxu1 }
 0x832   :  { %20633 = vpow2.f32 %v18390_v25  ;;  %v21574_v25 = vld [vmem:[%s23448_s1 + $0x8] sm:$0xff] }
 0x833   :  { %20635 = vrcp.f32 %v1635_v29  ;;  %v2205_v49 = vpop.f32.mrb[22].mxu1 }
 0x834   :  { %v19434_v50 = vpop.f32.mrb[23].mxu1 }
 0x837   :  { %v2361_v51 = vpop.f32.mrb[24].mxu1 }
 0x838   :  { %v19444_v53 = vpop.f32.mrb[25].mxu1 }
 0x83b   :  { %v2511_v62 = vpop.f32.mrb[26].mxu1 }
 0x83c   :  { %v20634_v33 = vpop.eup %20633 }
 0x83d   :  { %v1893_v36 = vadd.f32 1.0, %v20634_v33  ;;  %v20636_v40 = vpop.eup %20635  ;;  %v21582_v33 = vld [vmem:[%s23448_s1 + $0x10] sm:$0xff] }
 0x83f   :  { %20637 = vrcp.f32 %v1893_v36  ;;  %v21590_v36 = vld [vmem:[%s23447_s28 + $0x8] sm:$0xff] }
 0x849   :  { %v20638_v42 = vpop.eup %20637 }
 0x84a   :  { %v1896_v43 = vmul.f32 %v20638_v42, %v20636_v40  ;;  %v21603_v42 = vld [vmem:[%s23449_s2] ss:$0 sm:$0xff] }
 0x84c   :  { %v21543_v44 = vadd.f32 %v1896_v43, %v1814_v63  ;;  %v19454_v63 = vpop.f32.mrb[27].mxu1 }
 0x84d   :  { %v2686_v2 = vpop.f32.mrb[28].mxu1  ;;  %v21607_v63 = vld [vmem:[%s23449_s2 + $0x2] ss:$0 sm:$0xff] }
 0x84e   :  { %19416 = vmatpush3.msra.mxu0 %v21543_v44  ;;  %19471 = vmatpush3.msra.mxu1 %v21543_v44  ;;  %v19464_v13 = vpop.f32.mrb[29].mxu1 }
 0x84f   :  { %19418 = vmatmul.mubr.msk.f32.vlgmr.msra.gmra.mrb[18].mxu0 %vm190_vm1, %v21360_v41  ;;  %19473 = vmatmul.mubr.msk.f32.vlgmr.msra.gmra.mrb[30].mxu1 %vm190_vm1, %v2816_v46  ;;  %v21610_v13 = vld [vmem:[%s23449_s2 + $0x1] ss:$0 sm:$0xff] }
 0x850   :  { %19480 = vmatprep.subr.mxu1 %v23414_v3  ;;  %19482 = vmatprep.mubr.msk.f32.mxu1 %vm21074_vm0, %v23414_v3 }
 0x851   :  { %19481 = vmatpush3.msra.mxu1 %v21543_v44  ;;  %19425 = vmatprep.subr.mxu0 %v23414_v3 }
 0x852   :  { %19427 = vmatprep.mubr.msk.f32.mxu0 %vm21074_vm0, %v23414_v3  ;;  %19490 = vmatprep.subr.mxu1 %v23414_v3 }
 0x853   :  { %19483 = vmatmul.mubr.msk.f32.vlgmr.msra.gmra.mrb[32].mxu1 %vm190_vm1, %v2823_v11  ;;  %19426 = vmatpush3.msra.mxu0 %v21568_v16 }
 0x854   :  { %19491 = vmatpush3.msra.mxu1 %v21307_v20  ;;  %19492 = vmatprep.mubr.msk.f32.mxu1 %vm21074_vm0, %v23414_v3 }
 0x855   :  { %19495 = vmatprep.subr.mxu1 %v23414_v3  ;;  %19435 = vmatprep.subr.mxu0 %v23414_v3 }
 0x922   :  { %v1966_v20 = vpop.f32.mrb[18].mxu0  ;;  %v2893_v17 = vpop.f32.mrb[30].mxu1 }
 0x923   :  { %v1970_v18 = vmul.f32 %v1966_v20, %v21376_v52  ;;  %v19419_v19 = vpop.f32.mrb[19].mxu0  ;;  %v19474_v23 = vpop.f32.mrb[31].mxu1 }
 0x925   :  { %19428 = vmatmul.mubr.msk.f32.vlgmr.msra.gmra.mrb[20].mxu0 %vm190_vm1, %v1970_v18 }
 0x926   :  { %v3040_v27 = vpop.f32.mrb[32].mxu1  ;;  %19436 = vmatpush3.msra.mxu0 %v21574_v25  ;;  %19437 = vmatprep.mubr.msk.f32.mxu0 %vm21074_vm0, %v23414_v3 }
 0x927   :  { %v19484_v29 = vpop.f32.mrb[33].mxu1  ;;  %19445 = vmatprep.subr.mxu0 %v23414_v3 }
 0x929   :  { %19438 = vmatmul.mubr.msk.f32.vlgmr.msra.gmra.mrb[22].mxu0 %vm190_vm1, %v1970_v18 }
 0x92a   :  { %19446 = vmatpush3.msra.mxu0 %v21582_v33  ;;  %19447 = vmatprep.mubr.msk.f32.mxu0 %vm21074_vm0, %v23414_v3 }
 0x92b   :  { %19455 = vmatprep.subr.mxu0 %v23414_v3 }
 0x92d   :  { %19448 = vmatmul.mubr.msk.f32.vlgmr.msra.gmra.mrb[24].mxu0 %vm190_vm1, %v1970_v18 }
 0x92e   :  { %19456 = vmatpush3.msra.mxu0 %v21590_v36  ;;  %19457 = vmatprep.mubr.msk.f32.mxu0 %vm21074_vm0, %v23414_v3 }
 0x92f   :  { %19465 = vmatprep.subr.mxu0 %v23414_v3 }
 0x931   :  { %19458 = vmatmul.mubr.f32.vlgmr.msra.gmra.mrb[26].mxu0 %v23414_v3 }
 0x932   :  { %19466 = vmatpush3.msra.mxu0 %v21516_v9  ;;  %19467 = vmatprep.mubr.msk.f32.mxu0 %vm21074_vm0, %v23414_v3 }
 0x933   :  { %19475 = vmatprep.subr.mxu0 %v23414_v3 }
 0x9f8   :  { %v2120_v40 = vpop.f32.mrb[20].mxu0 }
 0x9f9   :  { %v2121_v32 = vadd.f32 %v2120_v40, %v2047_v5  ;;  %v19429_v43 = vpop.f32.mrb[21].mxu0  ;;  %v21615_v5 = vld [vmem:[%s23450_s7 + $0x1] ss:$0 sm:$0xff] }
 0x9fb   :  { %v2131_v46 = vadd.f32 %v21603_v42, %v2121_v32 }
 0x9fc   :  { %v2275_v48 = vpop.f32.mrb[22].mxu0 }
 0x9fd   :  { %v2276_v11 = vadd.f32 %v2275_v48, %v2205_v49  ;;  %v19439_v7 = vpop.f32.mrb[23].mxu0  ;;  %v2515_v50 = vadd.f32 %v2511_v62, %v2131_v46 }
 0x9ff   :  { %v2287_v23 = vadd.f32 %v21610_v13, %v2276_v11 }
 0xa00   :  { %v2431_v53 = vpop.f32.mrb[24].mxu0 }
 0xa01   :  { %v2432_v20 = vadd.f32 %v2431_v53, %v2361_v51  ;;  %v19449_v18 = vpop.f32.mrb[25].mxu0 }
 0xa03   :  { %v2443_v19 = vadd.f32 %v21607_v63, %v2432_v20 }
 0xa04   :  { %v2598_v29 = vpop.f32.mrb[26].mxu0 }
 0xa05   :  { %v21617_v40 = vadd.f32 %v2686_v2, %v2443_v19  ;;  %v2602_v32 = vadd.f32 %v2598_v29, %v2287_v23  ;;  %v19459_v49 = vpop.f32.mrb[27].mxu0 }
 0xa07   :  { %v2611_v62 = vadd.f32 %v21615_v5, %v2602_v32 }
 0xa09   :  { %v18415_v43 = vmul.f32 -1.442695, %v2611_v62 }
 0xa0b   :  { %20639 = vpow2.f32 %v18415_v43 }
 0xa15   :  { %v20640_v48 = vpop.eup %20639 }
 0xa16   :  { %v2615_v7 = vadd.f32 1.0, %v20640_v48 }
 0xa18   :  { %20641 = vrcp.f32 %v2615_v7 }
 0xa22   :  { %v20642_v51 = vpop.eup %20641 }
 0xa23   :  { %v2706_v53 = vmul.f32 0.0, %v20642_v51 }
 0xa25   :  { %19468 = vmatmul.mubr.msk.f32.vlgmr.msra.gmra.mrb[28].mxu0 %vm190_vm1, %v2706_v53 }
 0xa26   :  { %19476 = vmatpush3.msra.mxu0 %v21291_v14  ;;  %19477 = vmatprep.mubr.msk.f32.mxu0 %vm21074_vm0, %v23414_v3  ;;  %v21636_v14 = vld [vmem:[%s23450_s7] ss:$0 sm:$0xff] }
 0xa27   :  { %19485 = vmatprep.subr.mxu0 %v23414_v3  ;;  %v2523_v2 = vadd.f32 %v21636_v14, %v2515_v50 }
 0xa29   :  { %19478 = vmatmul.mubr.msk.f32.vlgmr.msra.gmra.mrb[30].mxu0 %vm190_vm1, %v2893_v17  ;;  %v18411_v17 = vmul.f32 -1.442695, %v2523_v2 }
 0xa2a   :  { %19486 = vmatpush3.msra.mxu0 %v21296_v15  ;;  %19487 = vmatprep.mubr.msk.f32.mxu0 %vm21074_vm0, %v23414_v3 }
 0xa2b   :  { %19500 = vmatprep.subr.mxu0 %v23414_v3  ;;  %20643 = vpow2.f32 %v18411_v17 }
 0xa2d   :  { %19488 = vmatmul.mubr.msk.f32.vlgmr.msra.gmra.mrb[32].mxu0 %vm190_vm1, %v3040_v27 }
 0xa2e   :  { %19501 = vmatpush3.msra.mxu0 %v21310_v21  ;;  %19502 = vmatprep.mubr.msk.f32.mxu0 %vm21074_vm0, %v23414_v3 }
 0xa2f   :  { %19505 = vmatprep.subr.mxu0 %v23414_v3 }
 0xa35   :  { %v20644_v49 = vpop.eup %20643 }
 0xa36   :  { %v2527_v62 = vadd.f32 1.0, %v20644_v49 }
 0xaf8   :  { %v2776_v15 = vpop.f32.mrb[28].mxu0 }
 0xaf9   :  { %v2780_v11 = vadd.f32 %v2776_v15, %v2131_v46  ;;  %v19469_v20 = vpop.f32.mrb[29].mxu0 }
 0xafb   :  { %v2781_v18 = vadd.f32 %v21636_v14, %v2780_v11 }
 0xafc   :  { %v2966_v19 = vpop.f32.mrb[30].mxu0 }
 0xafd   :  { %v18421_v27 = vmul.f32 -1.442695, %v2781_v18  ;;  %v19479_v23 = vpop.f32.mrb[31].mxu0  ;;  %v2967_v50 = vadd.f32 %v21321_v28, %v2966_v19 }
 0xaff   :  { %20645 = vpow2.f32 %v18421_v27 }
 0xb00   :  { %v3113_v21 = vpop.f32.mrb[32].mxu0 }
 0xb01   :  { %v3114_v29 = vadd.f32 %v21317_v24, %v3113_v21  ;;  %v19489_v32 = vpop.f32.mrb[33].mxu0 }
 0xb03   :  { %20647 = vtanh.f32 %v3114_v29 }
 0xb04   :  { %20649 = vrcp.f32 %v2527_v62  ;;  %v21737_v62 = vld [vmem:[%s23444_s22 + $0x2] ss:$0 sm:$0xff] }
 0xb05   :  { %20651 = vtanh.f32 %v2967_v50 }
 0xb09   :  { %v20646_v43 = vpop.eup %20645 }
 0xb0a   :  { %v2785_v48 = vadd.f32 1.0, %v20646_v43 }
 0xb0c   :  { %20653 = vrcp.f32 %v2785_v48 }
 0xb0d   :  { %v20648_v46 = vpop.eup %20647 }
 0xb0e   :  { %19493 = vmatmul.mubr.msk.f32.vlgmr.msra.gmra.mrb[34].mxu1 %vm190_vm1, %v20648_v46  ;;  %19503 = vmatmul.mubr.msk.f32.vlgmr.msra.gmra.mrb[34].mxu0 %vm190_vm1, %v20648_v46  ;;  %v20650_v24 = vpop.eup %20649 }
 0xb0f   :  { %19496 = vmatpush3.msra.mxu1 %v21325_v30  ;;  %19506 = vmatpush3.msra.mxu0 %v21328_v31  ;;  %v20652_v28 = vpop.eup %20651 }
 0xb10   :  { %19497 = vmatprep.mubr.msk.f32.mxu1 %vm21074_vm0, %v23414_v3  ;;  %19507 = vmatprep.mubr.msk.f32.mxu0 %vm21074_vm0, %v23414_v3 }
 0xb11   :  { %19515 = vmatprep.subr.mxu0 %v23414_v3  ;;  %19510 = vmatprep.subr.mxu1 %v23414_v3 }
 0xb16   :  { %v20654_v7 = vpop.eup %20653  ;;  %19498 = vmatmul.mubr.msk.f32.vlgmr.msra.gmra.mrb[34].mxu1 %vm190_vm1, %v20652_v28  ;;  %19508 = vmatmul.mubr.msk.f32.vlgmr.msra.gmra.mrb[34].mxu0 %vm190_vm1, %v20652_v28 }
 0xb17   :  { %v2788_v30 = vmul.f32 %v20654_v7, %v20650_v24  ;;  %19516 = vmatpush3.msra.mxu0 %v21347_v34  ;;  %19517 = vmatprep.mubr.msk.f32.mxu0 %vm21074_vm0, %v23414_v3  ;;  %v1807_v24 = vadd.f32 %v21737_v62, %v21480_v47 }
 0xb18   :  { %19512 = vmatprep.mubr.msk.f32.mxu1 %vm21074_vm0, %v23414_v3  ;;  %19520 = vmatprep.subr.mxu0 %v23414_v3 }
 0xb19   :  { %v21660_v31 = vadd.f32 %v2788_v30, %v2706_v53 }
 0xb1b   :  { %19518 = vmatmul.mubr.msk.f32.vlgmr.msra.gmra.mrb[36].mxu0 %vm190_vm1, %v21660_v31 }
 0xb1c   :  { %19521 = vmatpush3.msra.mxu0 %v21350_v35  ;;  %19522 = vmatprep.mubr.msk.f32.mxu0 %vm21074_vm0, %v23414_v3 }
 0xb1d   :  { %19535 = vmatprep.subr.mxu0 %v23414_v3 }
 0xbe9   :  { %v3260_v34 = vpop.f32.mrb[34].mxu1  ;;  %v3400_v51 = vpop.f32.mrb[34].mxu0 }
 0xbea   :  { %v3404_v2 = vmax.f32 %v3260_v34, %v3400_v51  ;;  %v19499_v17 = vpop.f32.mrb[35].mxu1  ;;  %v19509_v15 = vpop.f32.mrb[35].mxu0  ;;  %v18388_v34 = vmul.f32 -1.442695, %v1807_v24 }
 0xbec   :  { %19511 = vmatpush3.msra.mxu1 %v3404_v2  ;;  %20655 = vpow2.f32 %v18388_v34 }
 0xbed   :  { %19513 = vmatmul.mubr.msk.f32.vlgmr.msra.gmra.mrb[36].mxu1 %vm190_vm1, %v21360_v41  ;;  %19525 = vmatprep.subr.mxu1 %v23414_v3 }
 0xbee   :  { %19527 = vmatprep.mubr.msk.f32.mxu1 %vm21074_vm0, %v23414_v3 }
 0xcc0   :  { %v3471_v35 = vpop.f32.mrb[36].mxu1 }
 0xcc1   :  { %v19514_v53 = vpop.f32.mrb[37].mxu1  ;;  %19523 = vmatmul.mubr.msk.f32.vlgmr.msra.gmra.mrb[36].mxu0 %vm190_vm1, %v3471_v35 }
 0xcc2   :  { %19536 = vmatpush3.msra.mxu0 %v21413_v58  ;;  %19537 = vmatprep.mubr.msk.f32.mxu0 %vm21074_vm0, %v23414_v3 }
 0xcc3   :  { %19545 = vmatprep.subr.mxu0 %v23414_v3 }
 0xd94   :  { %v3617_v11 = vpop.f32.mrb[36].mxu0 }
 0xd95   :  { %3623 = vperm.xlu0 %20621, %v3617_v11   ;;  %v19524_v20 = vpop.f32.mrb[37].mxu0 }
 0xd96   :  { %v20656_v20 = vpop.eup %20655 }
 0xd97   :  { %v1811_v47 = vadd.f32 1.0, %v20656_v20 }
 0xe14   :  { %v21678_v18 = vpop.permute.xlu0 %3623 }
 0xe15   :  { %v3626_v19 = vmul.f32 %v21678_v18, %v21660_v31 }
 0xe17   :  { %19526 = vmatpush3.msk.msra.mxu1 %vm1013_vm2, %v3626_v19 }
 0xe18   :  { %19528 = vmatmul.mubr.msk.f32.vlgmr.msra.gmra.mrb[38].mxu1 %vm1009_vm3, %v21380_v54  ;;  %19530 = vmatprep.subr.mxu1 %v23414_v3 }
 0xe19   :  { %19531 = vmatpush3.msra.mxu1 %v21383_v55  ;;  %19532 = vmatprep.mubr.msk.f32.mxu1 %vm21074_vm0, %v23414_v3 }
 0xe1a   :  { %19540 = vmatprep.subr.mxu1 %v23414_v3 }
 0xe1c   :  { %19533 = vmatmul.mubr.msk.f32.vlgmr.msra.gmra.mrb[40].mxu1 %vm190_vm1, %v3404_v2 }
 0xe1d   :  { %19541 = vmatpush3.msra.mxu1 %v21394_v56  ;;  %19542 = vmatprep.mubr.msk.f32.mxu1 %vm21074_vm0, %v23414_v3 }
 0xe1e   :  { %19550 = vmatprep.subr.mxu1 %v23414_v3 }
 0xe20   :  { %19543 = vmatmul.mubr.msk.f32.vlgmr.msra.gmra.mrb[42].mxu1 %vm190_vm1, %v3404_v2 }
 0xe21   :  { %19551 = vmatpush3.msra.mxu1 %v21402_v57  ;;  %19552 = vmatprep.mubr.msk.f32.mxu1 %vm21074_vm0, %v23414_v3 }
 0xe22   :  { %19560 = vmatprep.subr.mxu1 %v23414_v3 }
 0xe24   :  { %19553 = vmatmul.mubr.msk.f32.vlgmr.msra.gmra.mrb[44].mxu1 %vm190_vm1, %v3404_v2 }
 0xe25   :  { %19561 = vmatpush3.msra.mxu1 %v21418_v59  ;;  %19562 = vmatprep.mubr.msk.f32.mxu1 %vm21074_vm0, %v23414_v3 }
 0xe26   :  { %19570 = vmatprep.subr.mxu1 %v23414_v3 }
 0xe28   :  { %19563 = vmatmul.mubr.msk.f32.vlgmr.msra.gmra.mrb[46].mxu1 %vm190_vm1, %v21543_v44 }
 0xe29   :  { %19571 = vmatpush3.msra.mxu1 %v21427_v60  ;;  %19572 = vmatprep.mubr.msk.f32.mxu1 %vm21074_vm0, %v23414_v3 }
 0xe2a   :  { %19580 = vmatprep.subr.mxu1 %v23414_v3 }
 0xe2c   :  { %19573 = vmatmul.mubr.msk.f32.vlgmr.msra.gmra.mrb[48].mxu1 %vm190_vm1, %v21543_v44 }
 0xe2d   :  { %19582 = vmatprep.mubr.msk.f32.mxu1 %vm21074_vm0, %v23414_v3 }
 0xeeb   :  { %v3696_v54 = vpop.f32.mrb[38].mxu1 }
 0xeec   :  { %v19529_v55 = vpop.f32.mrb[39].mxu1  ;;  %19538 = vmatmul.mubr.msk.f32.vlgmr.msra.gmra.mrb[38].mxu0 %vm190_vm1, %v3696_v54 }
 0xeed   :  { %19546 = vmatpush3.msra.mxu0 %v21436_v61  ;;  %19547 = vmatprep.mubr.msk.f32.mxu0 %vm21074_vm0, %v23414_v3 }
 0xeee   :  { %19555 = vmatprep.subr.mxu0 %v23414_v3 }
 0xeef   :  { %v3769_v56 = vpop.f32.mrb[40].mxu1 }
 0xef0   :  { %v19534_v57 = vpop.f32.mrb[41].mxu1  ;;  %19548 = vmatmul.mubr.msk.f32.vlgmr.msra.gmra.mrb[40].mxu0 %vm190_vm1, %v3696_v54 }
 0xef1   :  { %19556 = vmatpush3.msra.mxu0 %v21444_v0  ;;  %19557 = vmatprep.mubr.msk.f32.mxu0 %vm21074_vm0, %v23414_v3 }
 0xef2   :  { %19565 = vmatprep.subr.mxu0 %v23414_v3 }
 0xef3   :  { %v3913_v58 = vpop.f32.mrb[42].mxu1 }
 0xef4   :  { %v19544_v60 = vpop.f32.mrb[43].mxu1  ;;  %19558 = vmatmul.mubr.msk.f32.vlgmr.msra.gmra.mrb[42].mxu0 %vm190_vm1, %v3696_v54 }
 0xef5   :  { %19566 = vmatpush3.msra.mxu0 %v21452_v6  ;;  %19567 = vmatprep.mubr.msk.f32.mxu0 %vm21074_vm0, %v23414_v3 }
 0xef6   :  { %19575 = vmatprep.subr.mxu0 %v23414_v3 }
 0xef7   :  { %v4054_v61 = vpop.f32.mrb[44].mxu1 }
 0xef8   :  { %v19554_v27 = vpop.f32.mrb[45].mxu1  ;;  %19568 = vmatmul.mubr.msk.f32.vlgmr.msra.gmra.mrb[44].mxu0 %vm190_vm1, %v21543_v44 }
 0xef9   :  { %19576 = vmatpush3.msra.mxu0 %v21418_v59  ;;  %19577 = vmatprep.mubr.msk.f32.mxu0 %vm21074_vm0, %v23414_v3 }
 0xefa   :  { %19585 = vmatprep.subr.mxu0 %v23414_v3 }
 0xefb   :  { %v4198_v0 = vpop.f32.mrb[46].mxu1 }
 0xefc   :  { %v19564_v6 = vpop.f32.mrb[47].mxu1 }
 0xeff   :  { %v4354_v23 = vpop.f32.mrb[48].mxu1 }
 0xf00   :  { %v19574_v21 = vpop.f32.mrb[49].mxu1 }
 0xfbf   :  { %v3842_v29 = vpop.f32.mrb[38].mxu0 }
 0xfc0   :  { %v3843_v32 = vadd.f32 %v3842_v29, %v3769_v56  ;;  %v19539_v49 = vpop.f32.mrb[39].mxu0 }
 0xfc2   :  { %v3846_v50 = vadd.f32 %v21466_v22, %v3843_v32 }
 0xfc3   :  { %v3983_v43 = vpop.f32.mrb[40].mxu0 }
 0xfc4   :  { %v3984_v48 = vadd.f32 %v3983_v43, %v3913_v58  ;;  %v19549_v46 = vpop.f32.mrb[41].mxu0  ;;  %v4202_v59 = vadd.f32 %v4198_v0, %v3846_v50 }
 0xfc6   :  { %v3987_v2 = vadd.f32 %v21470_v37, %v3984_v48 }
 0xfc7   :  { %v4124_v28 = vpop.f32.mrb[42].mxu0 }
 0xfc8   :  { %v4125_v7 = vadd.f32 %v4124_v28, %v4054_v61  ;;  %v19559_v30 = vpop.f32.mrb[43].mxu0 }
 0xfca   :  { %v4128_v51 = vadd.f32 %v21473_v38, %v4125_v7 }
 0xfcb   :  { %v4276_v17 = vpop.f32.mrb[44].mxu0 }
 0xfcc   :  { %v21744_v15 = vadd.f32 %v4354_v23, %v4128_v51  ;;  %v4280_v35 = vadd.f32 %v4276_v17, %v3987_v2  ;;  %v19569_v22 = vpop.f32.mrb[45].mxu0 }
 0xfce   :  { %v4281_v53 = vadd.f32 %v21478_v45, %v4280_v35  ;;  %v18425_v45 = vld [vmem:[%s23446_s26 + $0x4] sm:$0x3] }
 0xfd0   :  { %v18449_v11 = vmul.f32 -1.442695, %v4281_v53 }
 0xfd2   :  { %20657 = vpow2.f32 %v18449_v11 }
 0xfd3   :  { %20659 = vtanh.f32 %v21543_v44 }
 0xfd4   :  { %20661 = vrcp.f32 %v1811_v47 }
 0xfdc   :  { %v20658_v19 = vpop.eup %20657 }
 0xfdd   :  { %v4285_v38 = vadd.f32 1.0, %v20658_v19  ;;  %v20660_v37 = vpop.eup %20659 }
 0xfde   :  { %v20662_v54 = vpop.eup %20661 }
 0xfdf   :  { %20663 = vrcp.f32 %v4285_v38  ;;  %v1899_v55 = vmul.f32 %v20662_v54, %v20660_v37 }
 0xfe9   :  { %v20664_v56 = vpop.eup %20663 }
 0xfea   :  { %v4448_v57 = vmul.f32 %v20664_v56, %v1899_v55  ;;  %v4366_v58 = vmul.f32 %v20664_v56, %v21543_v44 }
 0xfec   :  { %19578 = vmatmul.mubr.msk.f32.vlgmr.msra.gmra.mrb[46].mxu0 %vm190_vm1, %v4366_v58 }
 0xfed   :  { %19586 = vmatpush3.msk.msra.mxu0 %vm1977_vm4, %v21488_v1  ;;  %19587 = vmatprep.mubr.msk.f32.mxu0 %vm21074_vm0, %v23414_v3  ;;  %v4203_v1 = vadd.f32 %v21532_v12, %v4202_v59 }
 0xfee   :  { %19595 = vmatprep.subr.mxu0 %v23414_v3 }
 0xff0   :  { %19588 = vmatmul.mubr.msk.f32.vlgmr.msra.gmra.mrb[48].mxu0 %vm1973_vm5, %v18425_v45 }
 0xff1   :  { %19596 = vmatpush3.msk.msra.mxu0 %vm1977_vm4, %v21498_v4  ;;  %19597 = vmatprep.mubr.msk.f32.mxu0 %vm21074_vm0, %v23414_v3  ;;  %v18447_v4 = vmul.f32 -1.442695, %v4203_v1 }
 0xff2   :  { %19605 = vmatprep.subr.mxu0 %v23414_v3 }
 0xff3   :  { %20665 = vpow2.f32 %v18447_v4 }
 0xff4   :  { %19598 = vmatmul.mubr.msk.f32.vlgmr.msra.gmra.mrb[50].mxu0 %vm1973_vm5, %v18425_v45 }
 0xff5   :  { %19606 = vmatpush3.msk.msra.mxu0 %vm1977_vm4, %v21507_v8  ;;  %19607 = vmatprep.mubr.msk.f32.mxu0 %vm21074_vm0, %v23414_v3 }
 0xff6   :  { %19615 = vmatprep.subr.mxu0 %v23414_v3 }
 0xff8   :  { %19608 = vmatmul.mubr.msk.f32.vlgmr.msra.gmra.mrb[52].mxu0 %vm1973_vm5, %v18425_v45 }
 0xff9   :  { %19616 = vmatpush3.msra.mxu0 %v21516_v9  ;;  %19617 = vmatprep.mubr.msk.f32.mxu0 %vm21074_vm0, %v23414_v3 }
 0xffa   :  { %19625 = vmatprep.subr.mxu0 %v23414_v3 }
 0xffc   :  { %19618 = vmatmul.mubr.msk.f32.vlgmr.msra.gmra.mrb[54].mxu0 %vm190_vm1, %v21660_v31 }
 0xffd   :  { %19626 = vmatpush3.msra.mxu0 %v21524_v10  ;;  %19627 = vmatprep.mubr.msk.f32.mxu0 %vm21074_vm0, %v23414_v3  ;;  %v20666_v21 = vpop.eup %20665 }
 0xffe   :  { %v4207_v49 = vadd.f32 1.0, %v20666_v21 }
0x1000   :  { %19628 = vmatmul.mubr.msk.f32.vlgmr.msra.gmra.mrb[56].mxu0 %vm190_vm1, %v21660_v31 }
0x10bf   :  { %v4436_v8 = vpop.f32.mrb[46].mxu0 }
0x10c0   :  { %v4440_v44 = vadd.f32 %v4436_v8, %v3846_v50  ;;  %v19579_v60 = vpop.f32.mrb[47].mxu0  ;;  %v21827_v8 = vld [vmem:[%s21089_s9 + $0x3] ss:$0 sm:$0xff] }
0x10c2   :  { %v4441_v61 = vadd.f32 %v21532_v12, %v4440_v44 }
0x10c3   :  { %v4593_v27 = vpop.f32.mrb[48].mxu0 }
0x10c4   :  { %v18453_v0 = vmul.f32 -1.442695, %v4441_v61  ;;  %v19589_v6 = vpop.f32.mrb[49].mxu0 }
0x10c6   :  { %20667 = vpow2.f32 %v18453_v0  ;;  %v21837_v0 = vld [vmem:[%s21104_s21] sm:$0xff] }
0x10c7   :  { %v4737_v10 = vpop.f32.mrb[50].mxu0  ;;  %20669 = vrcp.f32 %v4207_v49 }
0x10c8   :  { %v19599_v23 = vpop.f32.mrb[51].mxu0 }
0x10cb   :  { %v4878_v29 = vpop.f32.mrb[52].mxu0 }
0x10cc   :  { %v19609_v32 = vpop.f32.mrb[53].mxu0 }
0x10cf   :  { %v5019_v43 = vpop.f32.mrb[54].mxu0 }
0x10d0   :  { %v20668_v48 = vpop.eup %20667  ;;  %v19619_v46 = vpop.f32.mrb[55].mxu0 }
0x10d1   :  { %v4445_v59 = vadd.f32 1.0, %v20668_v48  ;;  %v20670_v28 = vpop.eup %20669 }
0x10d3   :  { %20671 = vrcp.f32 %v4445_v59  ;;  %v5175_v50 = vpop.f32.mrb[56].mxu0 }
0x10d4   :  { %v19629_v24 = vpop.f32.mrb[57].mxu0 }
0x10dd   :  { %v20672_v12 = vpop.eup %20671 }
0x10de   :  { %v4449_v7 = vmul.f32 %v20672_v12, %v20670_v28 }
0x10e0   :  { %v21782_v30 = vadd.f32 %v4449_v7, %v4448_v57 }
0x10e2   :  { %19581 = vmatpush3.msra.mxu1 %v21782_v30 }
0x10e3   :  { %19583 = vmatmul.mubr.msk.f32.vlgmr.msra.gmra.mrb[50].mxu1 %vm190_vm1, %v21360_v41  ;;  %19590 = vmatprep.subr.mxu1 %v23414_v3 }
0x10e4   :  { %19591 = vmatpush3.msra.mxu1 %v21568_v16  ;;  %19592 = vmatprep.mubr.msk.f32.mxu1 %vm21074_vm0, %v23414_v3 }
0x10e5   :  { %19600 = vmatprep.subr.mxu1 %v23414_v3 }
0x11b6   :  { %v4519_v34 = vpop.f32.mrb[50].mxu1 }
0x11b7   :  { %v4523_v51 = vmul.f32 %v4519_v34, %v21678_v18  ;;  %v19584_v2 = vpop.f32.mrb[51].mxu1 }
0x11b9   :  { %19593 = vmatmul.mubr.msk.f32.vlgmr.msra.gmra.mrb[52].mxu1 %vm190_vm1, %v4523_v51 }
0x11ba   :  { %19601 = vmatpush3.msra.mxu1 %v21574_v25  ;;  %19602 = vmatprep.mubr.msk.f32.mxu1 %vm21074_vm0, %v23414_v3 }
0x11bb   :  { %19610 = vmatprep.subr.mxu1 %v23414_v3 }
0x11bd   :  { %19603 = vmatmul.mubr.msk.f32.vlgmr.msra.gmra.mrb[54].mxu1 %vm190_vm1, %v4523_v51 }
0x11be   :  { %19611 = vmatpush3.msra.mxu1 %v21582_v33  ;;  %19612 = vmatprep.mubr.msk.f32.mxu1 %vm21074_vm0, %v23414_v3  ;;  %v21815_v33 = vld [vmem:[%s23450_s7 + $0x2] ss:$0 sm:$0xff] }
0x11bf   :  { %19620 = vmatprep.subr.mxu1 %v23414_v3  ;;  %v2699_v11 = vadd.f32 %v21815_v33, %v21617_v40 }
0x11c1   :  { %19613 = vmatmul.mubr.msk.f32.vlgmr.msra.gmra.mrb[56].mxu1 %vm190_vm1, %v4523_v51  ;;  %v18419_v19 = vmul.f32 -1.442695, %v2699_v11 }
0x11c2   :  { %19621 = vmatpush3.msra.mxu1 %v21590_v36  ;;  %19622 = vmatprep.mubr.msk.f32.mxu1 %vm21074_vm0, %v23414_v3 }
0x11c3   :  { %19630 = vmatprep.subr.mxu1 %v23414_v3  ;;  %20673 = vpow2.f32 %v18419_v19 }
0x11c5   :  { %19623 = vmatmul.mubr.msk.f32.vlgmr.msra.gmra.mrb[58].mxu1 %vm190_vm1, %v21660_v31 }
0x11c6   :  { %19631 = vmatpush3.msra.mxu1 %v21516_v9  ;;  %19632 = vmatprep.mubr.msk.f32.mxu1 %vm21074_vm0, %v23414_v3 }
0x11c7   :  { %19645 = vmatprep.subr.mxu1 %v23414_v3 }
0x11cd   :  { %v20674_v40 = vpop.eup %20673 }
0x11ce   :  { %v2703_v45 = vadd.f32 1.0, %v20674_v40  ;;  %v21930_v40 = vld [vmem:[%s21174_s8] sm:$0xff] }
0x128c   :  { %v4666_v41 = vpop.f32.mrb[52].mxu1 }
0x128d   :  { %v4667_v16 = vadd.f32 %v4666_v41, %v4593_v27  ;;  %v19594_v25 = vpop.f32.mrb[53].mxu1  ;;  %v18473_v41 = vld [vmem:[%s23451_s10 + $0x18] sm:$0x3f] }
0x128e   :  { %v21876_v25 = vpop.permute.xlu1 %5470 }
0x128f   :  { %v4670_v36 = vadd.f32 %v21603_v42, %v4667_v16  ;;  %v2792_v16 = vld [vmem:[%s23451_s10] sm:$0xff] }
0x1290   :  { %v4807_v17 = vpop.f32.mrb[54].mxu1 }
0x1291   :  { %v4808_v35 = vadd.f32 %v4807_v17, %v4737_v10  ;;  %v19604_v22 = vpop.f32.mrb[55].mxu1  ;;  %v5023_v53 = vadd.f32 %v5019_v43, %v4670_v36  ;;  %v21843_v10 = vld [vmem:[%s21129_s14] sm:$0xff]  ;;  %v5473_v17 = vmul.f32 %v21537_v39, %v21876_v25 }
0x1293   :  { %v4811_v37 = vadd.f32 %v21610_v13, %v4808_v35  ;;  %v5024_v23 = vadd.f32 %v21636_v14, %v5023_v53  ;;  %v21889_v35 = vld [vmem:[%s21154_s12] sm:$0xff] }
0x1294   :  { %v4948_v9 = vpop.f32.mrb[56].mxu1 }
0x1295   :  { %v4949_v20 = vadd.f32 %v4948_v9, %v4878_v29  ;;  %v19614_v47 = vpop.f32.mrb[57].mxu1  ;;  %v18465_v21 = vmul.f32 -1.442695, %v5024_v23  ;;  %v21897_v9 = vld [vmem:[%s21164_s27] sm:$0xff] }
0x1296   :  { %v21904_v47 = vld [vmem:[%s21144_s30] ss:$0 sm:$0xff] }
0x1297   :  { %v4952_v38 = vadd.f32 %v21607_v63, %v4949_v20 }
0x1298   :  { %v5097_v54 = vpop.f32.mrb[58].mxu1 }
0x1299   :  { %v21822_v55 = vadd.f32 %v5175_v50, %v4952_v38  ;;  %v5101_v42 = vadd.f32 %v5097_v54, %v4811_v37  ;;  %v19624_v56 = vpop.f32.mrb[59].mxu1  ;;  %v21855_v50 = vld [vmem:[%s21139_s24] sm:$0xff] }
0x129a   :  { %v21908_v37 = vld [vmem:[%s21134_s19] ss:$0 sm:$0xff] }
0x129b   :  { %v5102_v57 = vadd.f32 %v21615_v5, %v5101_v42  ;;  %v5466_v5 = vmul.f32 %v21827_v8, %v21541_v26  ;;  %v18472_v26 = vld [vmem:[%s23451_s10 + $0x10] sm:$0xff]  ;;  %v21914_v56 = vld [vmem:[%s21149_s6] sm:$0xff] }
0x129c   :  { %19637 = vmatprep.mubr.msk.f32.mxu0 %vm1009_vm3, %v18472_v26 }
0x129d   :  { %v18467_v58 = vmul.f32 -1.442695, %v5102_v57  ;;  %v5467_v6 = vmul.f32 %v21837_v0, %v5466_v5  ;;  %v21918_v57 = vld [vmem:[%s21159_s20] sm:$0xff] }
0x129f   :  { %20675 = vpow2.f32 %v18467_v58 }
0x12a0   :  { %20677 = vtanh.f32 %v21660_v31 }
0x12a1   :  { %20679 = vrcp.f32 %v2703_v45  ;;  %v21941_v45 = vld [vmem:[%s21169_s4] sm:$0xff] }
0x12a9   :  { %v20676_v1 = vpop.eup %20675 }
0x12aa   :  { %v5106_v63 = vadd.f32 1.0, %v20676_v1  ;;  %v20678_v13 = vpop.eup %20677 }
0x12ab   :  { %v20680_v4 = vpop.eup %20679 }
0x12ac   :  { %20681 = vrcp.f32 %v5106_v63  ;;  %v2791_v44 = vmul.f32 %v20680_v4, %v20678_v13 }
0x12ad   :  { %20683 = vpow2.f32 %v18465_v21 }
0x12b6   :  { %v20682_v60 = vpop.eup %20681 }
0x12b7   :  { %v5269_v61 = vmul.f32 %v20682_v60, %v2791_v44  ;;  %v5187_v27 = vmul.f32 %v20682_v60, %v21660_v31  ;;  %v20684_v24 = vpop.eup %20683  ;;  %v21948_v60 = vld [vmem:[%s23437_s0] sm:$0x3] }
0x12b8   :  { %v5028_v28 = vadd.f32 1.0, %v20684_v24 }
0x12b9   :  { %19633 = vmatmul.mubr.msk.f32.vlgmr.msra.gmra.mrb[60].mxu1 %vm190_vm1, %v5187_v27  ;;  %v21957_v27 = vld [vmem:[%s23441_s5] sm:$0xff] }
0x12ba   :  { %19646 = vmatpush3.msra.mxu1 %v21782_v30  ;;  %19647 = vmatprep.mubr.msk.f32.mxu1 %vm21074_vm0, %v23414_v3 }
0x12bb   :  { %19650 = vmatprep.subr.mxu1 %v23414_v3 }
0x12bd   :  { %19648 = vmatmul.mubr.msk.f32.vlgmr.msra.gmra.mrb[62].mxu1 %vm190_vm1, %v5467_v6 }
0x12be   :  { %19651 = vmatpush3.msra.mxu1 %v21843_v10  ;;  %19652 = vmatprep.mubr.msk.f32.mxu1 %vm21074_vm0, %v23414_v3 }
0x12bf   :  { %19660 = vmatprep.subr.mxu1 %v23414_v3 }
0x138c   :  { %v5257_v29 = vpop.f32.mrb[60].mxu1 }
0x138d   :  { %v5261_v32 = vadd.f32 %v5257_v29, %v4670_v36  ;;  %v19634_v49 = vpop.f32.mrb[61].mxu1  ;;  %v2793_v36 = vld [vmem:[%s23451_s10 + $0x8] sm:$0x3f]  ;;  %v21969_v29 = vld [vmem:[%s23438_s17] sm:$0xff] }
0x138e   :  { %v21983_v49 = vld [vmem:[%s23439_s15 + $0x8] sm:$0xff] }
0x138f   :  { %v5262_v43 = vadd.f32 %v21636_v14, %v5261_v32  ;;  %v21975_v32 = vld [vmem:[%s23439_s15] sm:$0xff] }
0x1390   :  { %v5544_v48 = vpop.f32.mrb[62].mxu1 }
0x1391   :  { %v18471_v46 = vmul.f32 -1.442695, %v5262_v43  ;;  %v19649_v59 = vpop.f32.mrb[63].mxu1  ;;  %19653 = vmatmul.mubr.msk.f32.vlgmr.msra.gmra.mrb[64].mxu1 %vm190_vm1, %v5544_v48  ;;  %v21991_v43 = vld [vmem:[%s23439_s15 + $0x10] sm:$0xff]  ;;  %v21999_v48 = vld [vmem:[%s23442_s16] sm:$0xff] }
0x1392   :  { %19661 = vmatpush3.msra.mxu1 %v21855_v50  ;;  %19662 = vmatprep.mubr.msk.f32.mxu1 %vm21074_vm0, %v23414_v3 }
0x1393   :  { %20685 = vpow2.f32 %v18471_v46  ;;  %19675 = vmatprep.subr.mxu1 %v23414_v3  ;;  %v22008_v46 = vld [vmem:[%s23442_s16 + $0x10] sm:$0xff] }
0x1394   :  { %20687 = vrcp.f32 %v5028_v28  ;;  %v22020_v28 = vld [vmem:[%s23441_s5 + $0x8] sm:$0xff] }
0x139d   :  { %v20686_v14 = vpop.eup %20685 }
0x139e   :  { %v5266_v12 = vadd.f32 1.0, %v20686_v14  ;;  %v20688_v7 = vpop.eup %20687 }
0x13a0   :  { %20689 = vrcp.f32 %v5266_v12 }
0x13aa   :  { %v20690_v34 = vpop.eup %20689 }
0x13ab   :  { %v5270_v51 = vmul.f32 %v20690_v34, %v20688_v7  ;;  %v22028_v7 = vld [vmem:[%s23441_s5 + $0x10] sm:$0xff] }
0x13ad   :  { %v21861_v2 = vadd.f32 %v5270_v51, %v5269_v61 }
0x13af   :  { %19635 = vmatprep.subr.msk.mxu0 %vm1013_vm2, %v21861_v2 }
0x13b0   :  { %19636 = vmatpush3.msk.msra.mxu0 %vm1013_vm2, %v21861_v2 }
0x13b1   :  { %19638 = vmatmul.mubr.msk.f32.vlgmr.msra.gmra.mrb[58].mxu0 %vm1009_vm3, %v18473_v41  ;;  %19640 = vmatprep.subr.msk.mxu0 %vm1013_vm2, %v21660_v31  ;;  %v22036_v41 = vld [vmem:[%s23442_s16 + $0x8] sm:$0xff] }
0x13b2   :  { %19641 = vmatpush3.msk.msra.mxu0 %vm1013_vm2, %v21660_v31  ;;  %19642 = vmatprep.mubr.msk.f32.mxu0 %vm1009_vm3, %v2792_v16  ;;  %v5474_v31 = vmul.f32 %v21837_v0, %v5473_v17 }
0x13b3   :  { %19655 = vmatprep.subr.mxu0 %v23414_v3 }
0x13b9   :  { %19643 = vmatmul.mubr.msk.f32.vlgmr.msra.gmra.mrb[58].mxu0 %vm1009_vm3, %v2793_v36 }
0x13ba   :  { %19656 = vmatpush3.msra.mxu0 %v21782_v30  ;;  %19657 = vmatprep.mubr.msk.f32.mxu0 %vm21074_vm0, %v23414_v3 }
0x13bb   :  { %19665 = vmatprep.subr.mxu0 %v23414_v3 }
0x13bd   :  { %19658 = vmatmul.mubr.msk.f32.vlgmr.msra.gmra.mrb[60].mxu0 %vm190_vm1, %v5474_v31 }
0x13be   :  { %19666 = vmatpush3.msra.mxu0 %v21889_v35  ;;  %19667 = vmatprep.mubr.msk.f32.mxu0 %vm21074_vm0, %v23414_v3 }
0x13bf   :  { %19670 = vmatprep.subr.mxu0 %v23414_v3 }
0x1464   :  { %v5617_v39 = vpop.f32.mrb[64].mxu1 }
0x1465   :  { %v19654_v22 = vpop.f32.mrb[65].mxu1  ;;  %v5618_v54 = vadd.f32 %v21908_v37, %v5617_v39 }
0x1490   :  { %v5691_v53 = vpop.f32.mrb[60].mxu0 }
0x1491   :  { %v19659_v11 = vpop.f32.mrb[61].mxu0  ;;  %19663 = vmatmul.mubr.msk.f32.vlgmr.msra.gmra.mrb[66].mxu1 %vm190_vm1, %v5691_v53 }
0x1492   :  { %19676 = vmatpush3.msra.mxu1 %v21897_v9  ;;  %19677 = vmatprep.mubr.msk.f32.mxu1 %vm21074_vm0, %v23414_v3 }
0x1493   :  { %19680 = vmatprep.subr.mxu1 %v23414_v3 }
0x1564   :  { %v5764_v20 = vpop.f32.mrb[66].mxu1 }
0x1565   :  { %v5765_v19 = vadd.f32 %v21904_v47, %v5764_v20  ;;  %v19664_v38 = vpop.f32.mrb[67].mxu1 }
0x1567   :  { %20691 = vtanh.f32 %v5765_v19  ;;  %v22049_v19 = vld [vmem:[%s23443_s18] ss:$0 sm:$0xff] }
0x1568   :  { %20693 = vtanh.f32 %v5618_v54 }
0x1571   :  { %v20692_v42 = vpop.eup %20691 }
0x1572   :  { %19668 = vmatmul.mubr.msk.f32.vlgmr.msra.gmra.mrb[62].mxu0 %vm190_vm1, %v20692_v42  ;;  %19678 = vmatmul.mubr.msk.f32.vlgmr.msra.gmra.mrb[68].mxu1 %vm190_vm1, %v20692_v42  ;;  %v20694_v58 = vpop.eup %20693 }
0x1573   :  { %19671 = vmatpush3.msra.mxu0 %v21914_v56  ;;  %19681 = vmatpush3.msra.mxu1 %v21918_v57 }
0x1574   :  { %19672 = vmatprep.mubr.msk.f32.mxu0 %vm21074_vm0, %v23414_v3  ;;  %19682 = vmatprep.mubr.msk.f32.mxu1 %vm21074_vm0, %v23414_v3 }
0x1575   :  { %19690 = vmatprep.subr.mxu1 %v23414_v3  ;;  %19685 = vmatprep.subr.mxu0 %v23414_v3 }
0x157a   :  { %19673 = vmatmul.mubr.msk.f32.vlgmr.msra.gmra.mrb[62].mxu0 %vm190_vm1, %v20694_v58  ;;  %19683 = vmatmul.mubr.msk.f32.vlgmr.msra.gmra.mrb[68].mxu1 %vm190_vm1, %v20694_v58 }
0x157b   :  { %19691 = vmatpush3.msra.mxu1 %v21930_v40  ;;  %19692 = vmatprep.mubr.msk.f32.mxu1 %vm21074_vm0, %v23414_v3 }
0x157c   :  { %19687 = vmatprep.mubr.msk.f32.mxu0 %vm21074_vm0, %v23414_v3  ;;  %19695 = vmatprep.subr.mxu1 %v23414_v3 }
0x157e   :  { %19693 = vmatmul.mubr.msk.f32.vlgmr.msra.gmra.mrb[70].mxu1 %vm190_vm1, %v21861_v2 }
0x157f   :  { %19696 = vmatpush3.msra.mxu1 %v21941_v45  ;;  %19697 = vmatprep.mubr.msk.f32.mxu1 %vm21074_vm0, %v23414_v3 }
0x1580   :  { %19710 = vmatprep.subr.mxu1 %v23414_v3 }
0x164d   :  { %v5911_v1 = vpop.f32.mrb[62].mxu0  ;;  %v6051_v63 = vpop.f32.mrb[68].mxu1 }
0x164e   :  { %v6055_v13 = vmax.f32 %v5911_v1, %v6051_v63  ;;  %v19674_v4 = vpop.f32.mrb[63].mxu0  ;;  %v19684_v44 = vpop.f32.mrb[69].mxu1  ;;  %v4359_v63 = vadd.f32 %v21737_v62, %v21744_v15 }
0x1650   :  { %19686 = vmatpush3.msra.mxu0 %v6055_v13 }
0x1651   :  { %19688 = vmatmul.mubr.msk.f32.vlgmr.msra.gmra.mrb[64].mxu0 %vm190_vm1, %v21948_v60  ;;  %19700 = vmatprep.subr.mxu0 %v23414_v3 }
0x1652   :  { %19702 = vmatprep.mubr.msk.f32.mxu0 %vm21074_vm0, %v23414_v3 }
0x1724   :  { %v6122_v5 = vpop.f32.mrb[64].mxu0 }
0x1725   :  { %v19689_v61 = vpop.f32.mrb[65].mxu0  ;;  %19698 = vmatmul.mubr.msk.f32.vlgmr.msra.gmra.mrb[70].mxu1 %vm190_vm1, %v6122_v5  ;;  %v18451_v5 = vmul.f32 -1.442695, %v4359_v63  ;;  %v22103_v63 = vld [vmem:[%s23447_s28] sm:$0xff] }
0x1726   :  { %19711 = vmatpush3.msra.mxu1 %v21957_v27  ;;  %19712 = vmatprep.mubr.msk.f32.mxu1 %vm21074_vm0, %v23414_v3  ;;  %v22058_v61 = vld [vmem:[%s23443_s18 + $0x2] ss:$0 sm:$0xff] }
0x1727   :  { %19720 = vmatprep.subr.mxu1 %v23414_v3  ;;  %20695 = vpow2.f32 %v18451_v5 }
0x17f8   :  { %v6267_v6 = vpop.f32.mrb[70].mxu1 }
0x17f9   :  { %6273 = vperm.xlu0 %20621, %v6267_v6   ;;  %v19699_v26 = vpop.f32.mrb[71].mxu1 }
0x17fa   :  { %v22062_v26 = vld [vmem:[%s23443_s18 + $0x1] ss:$0 sm:$0xff] }
0x1878   :  { %v21963_v23 = vpop.permute.xlu0 %6273 }
0x1879   :  { %23452 = vst [vmem:[#allocation23_spill] sm:$0xff] %v21963_v23  ;;  %v6276_v21 = vmul.f32 %v21963_v23, %v21861_v2 }
0x187b   :  { %19701 = vmatpush3.msk.msra.mxu0 %vm1013_vm2, %v6276_v21 }
0x187c   :  { %19703 = vmatmul.mubr.msk.f32.vlgmr.msra.gmra.mrb[66].mxu0 %vm1009_vm3, %v21969_v29  ;;  %19705 = vmatprep.subr.mxu0 %v23414_v3 }
0x187d   :  { %19706 = vmatpush3.msra.mxu0 %v21975_v32  ;;  %19707 = vmatprep.mubr.msk.f32.mxu0 %vm21074_vm0, %v23414_v3 }
0x187e   :  { %19715 = vmatprep.subr.mxu0 %v23414_v3 }
0x1880   :  { %19708 = vmatmul.mubr.msk.f32.vlgmr.msra.gmra.mrb[68].mxu0 %vm190_vm1, %v6055_v13 }
0x1881   :  { %19716 = vmatpush3.msra.mxu0 %v21983_v49  ;;  %19717 = vmatprep.mubr.msk.f32.mxu0 %vm21074_vm0, %v23414_v3 }
0x1882   :  { %19725 = vmatprep.subr.mxu0 %v23414_v3 }
0x1884   :  { %19718 = vmatmul.mubr.msk.f32.vlgmr.msra.gmra.mrb[70].mxu0 %vm190_vm1, %v6055_v13 }
0x1885   :  { %19726 = vmatpush3.msra.mxu0 %v21991_v43  ;;  %19727 = vmatprep.mubr.msk.f32.mxu0 %vm21074_vm0, %v23414_v3 }
0x1886   :  { %19735 = vmatprep.subr.mxu0 %v23414_v3 }
0x1888   :  { %19728 = vmatmul.mubr.msk.f32.vlgmr.msra.gmra.mrb[72].mxu0 %vm190_vm1, %v6055_v13 }
0x1889   :  { %19736 = vmatpush3.msra.mxu0 %v21999_v48  ;;  %19737 = vmatprep.mubr.msk.f32.mxu0 %vm21074_vm0, %v23414_v3 }
0x188a   :  { %19745 = vmatprep.subr.mxu0 %v23414_v3 }
0x188c   :  { %19738 = vmatmul.mubr.msk.f32.vlgmr.msra.gmra.mrb[74].mxu0 %vm190_vm1, %v21782_v30 }
0x188d   :  { %19746 = vmatpush3.msra.mxu0 %v22008_v46  ;;  %19747 = vmatprep.mubr.msk.f32.mxu0 %vm21074_vm0, %v23414_v3 }
0x188e   :  { %19755 = vmatprep.subr.mxu0 %v23414_v3 }
0x1890   :  { %19748 = vmatmul.mubr.msk.f32.vlgmr.msra.gmra.mrb[76].mxu0 %vm190_vm1, %v21782_v30 }
0x1891   :  { %19757 = vmatprep.mubr.msk.f32.mxu0 %vm21074_vm0, %v23414_v3 }
0x194f   :  { %v6346_v59 = vpop.f32.mrb[66].mxu0 }
0x1950   :  { %v19704_v24 = vpop.f32.mrb[67].mxu0  ;;  %19713 = vmatmul.mubr.msk.f32.vlgmr.msra.gmra.mrb[72].mxu1 %vm190_vm1, %v6346_v59 }
0x1951   :  { %19721 = vmatpush3.msra.mxu1 %v22020_v28  ;;  %19722 = vmatprep.mubr.msk.f32.mxu1 %vm21074_vm0, %v23414_v3 }
0x1952   :  { %19730 = vmatprep.subr.mxu1 %v23414_v3 }
0x1953   :  { %v6419_v14 = vpop.f32.mrb[68].mxu0 }
0x1954   :  { %v19709_v12 = vpop.f32.mrb[69].mxu0  ;;  %19723 = vmatmul.mubr.msk.f32.vlgmr.msra.gmra.mrb[74].mxu1 %vm190_vm1, %v6346_v59 }
0x1955   :  { %19731 = vmatpush3.msra.mxu1 %v22028_v7  ;;  %19732 = vmatprep.mubr.msk.f32.mxu1 %vm21074_vm0, %v23414_v3 }
0x1956   :  { %19740 = vmatprep.subr.mxu1 %v23414_v3 }
0x1957   :  { %v6563_v34 = vpop.f32.mrb[70].mxu0 }
0x1958   :  { %v19719_v51 = vpop.f32.mrb[71].mxu0  ;;  %19733 = vmatmul.mubr.msk.f32.vlgmr.msra.gmra.mrb[76].mxu1 %vm190_vm1, %v6346_v59 }
0x1959   :  { %19741 = vmatpush3.msra.mxu1 %v22036_v41  ;;  %19742 = vmatprep.mubr.msk.f32.mxu1 %vm21074_vm0, %v23414_v3  ;;  %v20696_v51 = vpop.eup %20695 }
0x195a   :  { %19750 = vmatprep.subr.mxu1 %v23414_v3 }
0x195b   :  { %v6704_v16 = vpop.f32.mrb[72].mxu0 }
0x195c   :  { %v19729_v36 = vpop.f32.mrb[73].mxu0  ;;  %19743 = vmatmul.mubr.msk.f32.vlgmr.msra.gmra.mrb[78].mxu1 %vm190_vm1, %v21782_v30 }
0x195d   :  { %19751 = vmatpush3.msra.mxu1 %v21999_v48  ;;  %19752 = vmatprep.mubr.msk.f32.mxu1 %vm21074_vm0, %v23414_v3 }
0x195e   :  { %19760 = vmatprep.subr.mxu1 %v23414_v3 }
0x195f   :  { %v6848_v17 = vpop.f32.mrb[74].mxu0 }
0x1960   :  { %v19739_v31 = vpop.f32.mrb[75].mxu0 }
0x1963   :  { %v7004_v39 = vpop.f32.mrb[76].mxu0 }
0x1964   :  { %v19749_v22 = vpop.f32.mrb[77].mxu0 }
0x1a23   :  { %v6492_v53 = vpop.f32.mrb[72].mxu1 }
0x1a24   :  { %v6493_v11 = vadd.f32 %v6492_v53, %v6419_v14  ;;  %v19714_v20 = vpop.f32.mrb[73].mxu1 }
0x1a26   :  { %v22052_v38 = vadd.f32 %v22049_v19, %v6493_v11 }
0x1a27   :  { %v6633_v54 = vpop.f32.mrb[74].mxu1 }
0x1a28   :  { %v6634_v42 = vadd.f32 %v6633_v54, %v6563_v34  ;;  %v19724_v58 = vpop.f32.mrb[75].mxu1  ;;  %v6852_v1 = vadd.f32 %v6848_v17, %v22052_v38  ;;  %v22068_v34 = vld [vmem:[%s23444_s22 + $0x1] ss:$0 sm:$0xff] }
0x1a29   :  { %v22075_v54 = vld [vmem:[%s23445_s23] sm:$0xf]  ;;  %v22085_v58 = vld [vmem:[%s23445_s23 + $0x4] sm:$0xf] }
0x1a2a   :  { %v6637_v21 = vadd.f32 %v22062_v26, %v6634_v42  ;;  %v18484_v42 = vld [vmem:[%s23446_s26 + $0x6] sm:$0x3] }
0x1a2b   :  { %v6774_v13 = vpop.f32.mrb[76].mxu1 }
0x1a2c   :  { %v6775_v4 = vadd.f32 %v6774_v13, %v6704_v16  ;;  %v19734_v44 = vpop.f32.mrb[77].mxu1  ;;  %v4363_v16 = vadd.f32 1.0, %v20696_v51  ;;  %v22112_v13 = vld [vmem:[%s23447_s28 + $0x10] sm:$0xff] }
0x1a2e   :  { %v6778_v6 = vadd.f32 %v22058_v61, %v6775_v4  ;;  %v22123_v4 = vld [vmem:[%s23444_s22] ss:$0 sm:$0xff] }
0x1a2f   :  { %v6926_v59 = vpop.f32.mrb[78].mxu1  ;;  %v6853_v44 = vadd.f32 %v22123_v4, %v6852_v1 }
0x1a30   :  { %v22065_v24 = vadd.f32 %v7004_v39, %v6778_v6  ;;  %v6930_v14 = vadd.f32 %v6926_v59, %v6637_v21  ;;  %v19744_v12 = vpop.f32.mrb[79].mxu1 }
0x1a31   :  { %v18506_v5 = vmul.f32 -1.442695, %v6853_v44  ;;  %v22139_v44 = vld [vmem:[%s21089_s9 + $0x4] ss:$0 sm:$0xff] }
0x1a32   :  { %v6931_v62 = vadd.f32 %v22068_v34, %v6930_v14 }
0x1a34   :  { %v18508_v15 = vmul.f32 -1.442695, %v6931_v62 }
0x1a36   :  { %20697 = vpow2.f32 %v18508_v15 }
0x1a37   :  { %20699 = vtanh.f32 %v21782_v30 }
0x1a38   :  { %20701 = vrcp.f32 %v4363_v16 }
0x1a40   :  { %v20698_v36 = vpop.eup %20697 }
0x1a41   :  { %v6935_v17 = vadd.f32 1.0, %v20698_v36  ;;  %v20700_v31 = vpop.eup %20699 }
0x1a42   :  { %v20702_v39 = vpop.eup %20701 }
0x1a43   :  { %20703 = vrcp.f32 %v6935_v17  ;;  %v4452_v22 = vmul.f32 %v20702_v39, %v20700_v31 }
0x1a44   :  { %20705 = vpow2.f32 %v18506_v5 }
0x1a4d   :  { %v20704_v53 = vpop.eup %20703 }
0x1a4e   :  { %v7098_v11 = vmul.f32 %v20704_v53, %v4452_v22  ;;  %v7016_v20 = vmul.f32 %v20704_v53, %v21782_v30  ;;  %v22094_v30 = vld [vmem:[%s23445_s23 + $0x8] sm:$0xf]  ;;  %v20706_v36 = vpop.eup %20705 }
0x1a4f   :  { %v6857_v31 = vadd.f32 1.0, %v20706_v36 }
0x1a50   :  { %19753 = vmatmul.mubr.msk.f32.vlgmr.msra.gmra.mrb[80].mxu1 %vm190_vm1, %v7016_v20 }
0x1a51   :  { %19761 = vmatpush3.msk.msra.mxu1 %vm1977_vm4, %v22075_v54  ;;  %19762 = vmatprep.mubr.msk.f32.mxu1 %vm21074_vm0, %v23414_v3 }
0x1a52   :  { %19770 = vmatprep.subr.mxu1 %v23414_v3 }
0x1a54   :  { %19763 = vmatmul.mubr.msk.f32.vlgmr.msra.gmra.mrb[82].mxu1 %vm1973_vm5, %v18484_v42 }
0x1a55   :  { %19771 = vmatpush3.msk.msra.mxu1 %vm1977_vm4, %v22085_v58  ;;  %19772 = vmatprep.mubr.msk.f32.mxu1 %vm21074_vm0, %v23414_v3 }
0x1a56   :  { %19780 = vmatprep.subr.mxu1 %v23414_v3 }
0x1a58   :  { %19773 = vmatmul.mubr.msk.f32.vlgmr.msra.gmra.mrb[84].mxu1 %vm1973_vm5, %v18484_v42 }
0x1a59   :  { %19781 = vmatpush3.msk.msra.mxu1 %vm1977_vm4, %v22094_v30  ;;  %19782 = vmatprep.mubr.msk.f32.mxu1 %vm21074_vm0, %v23414_v3 }
0x1a5a   :  { %19790 = vmatprep.subr.mxu1 %v23414_v3 }
0x1a5c   :  { %19783 = vmatmul.mubr.msk.f32.vlgmr.msra.gmra.mrb[86].mxu1 %vm1973_vm5, %v18484_v42 }
0x1a5d   :  { %19791 = vmatpush3.msra.mxu1 %v22103_v63  ;;  %19792 = vmatprep.mubr.msk.f32.mxu1 %vm21074_vm0, %v23414_v3 }
0x1a5e   :  { %19800 = vmatprep.subr.mxu1 %v23414_v3 }
0x1a60   :  { %19793 = vmatmul.mubr.msk.f32.vlgmr.msra.gmra.mrb[88].mxu1 %vm190_vm1, %v21861_v2 }
0x1a61   :  { %19801 = vmatpush3.msra.mxu1 %v22112_v13  ;;  %19802 = vmatprep.mubr.msk.f32.mxu1 %vm21074_vm0, %v23414_v3 }
0x1a62   :  { %19815 = vmatprep.subr.mxu1 %v23414_v3 }
0x1a64   :  { %19803 = vmatmul.mubr.msk.f32.vlgmr.msra.gmra.mrb[90].mxu1 %vm190_vm1, %v21861_v2 }
0x1a65   :  { %19817 = vmatprep.mubr.msk.f32.mxu1 %vm21074_vm0, %v23414_v3 }
0x1b23   :  { %v7086_v6 = vpop.f32.mrb[80].mxu1 }
0x1b24   :  { %v7090_v21 = vadd.f32 %v7086_v6, %v22052_v38  ;;  %v19754_v59 = vpop.f32.mrb[81].mxu1 }
0x1b26   :  { %v7091_v14 = vadd.f32 %v22123_v4, %v7090_v21  ;;  %v8035_v21 = vmul.f32 %v22139_v44, %v21876_v25  ;;  %v22157_v25 = vld [vmem:[%s23448_s1] sm:$0xff] }
0x1b27   :  { %v22128_v12 = vpop.f32.mrb[82].mxu1 }
0x1b28   :  { %v18512_v62 = vmul.f32 -1.442695, %v7091_v14  ;;  %v19764_v15 = vpop.f32.mrb[83].mxu1 }
0x1b2a   :  { %20707 = vpow2.f32 %v18512_v62  ;;  %v8036_v62 = vmul.f32 %v21837_v0, %v8035_v21 }
0x1b2b   :  { %v22130_v51 = vpop.f32.mrb[84].mxu1  ;;  %20709 = vrcp.f32 %v6857_v31  ;;  %v22180_v31 = vld [vmem:[%s23448_s1 + $0x10] sm:$0xff] }
0x1b2c   :  { %v19774_v16 = vpop.f32.mrb[85].mxu1 }
0x1b2f   :  { %v22132_v17 = vpop.f32.mrb[86].mxu1 }
0x1b30   :  { %v19784_v1 = vpop.f32.mrb[87].mxu1 }
0x1b31   :  { %v22172_v1 = vld [vmem:[%s23448_s1 + $0x8] sm:$0xff] }
0x1b33   :  { %v22134_v39 = vpop.f32.mrb[88].mxu1 }
0x1b34   :  { %v20708_v38 = vpop.eup %20707  ;;  %v19794_v22 = vpop.f32.mrb[89].mxu1 }
0x1b35   :  { %v7095_v53 = vadd.f32 1.0, %v20708_v38  ;;  %v20710_v5 = vpop.eup %20709 }
0x1b37   :  { %20711 = vrcp.f32 %v7095_v53  ;;  %v22136_v20 = vpop.f32.mrb[90].mxu1 }
0x1b38   :  { %v19804_v42 = vpop.f32.mrb[91].mxu1 }
0x1b41   :  { %v20712_v6 = vpop.eup %20711 }
0x1b42   :  { %v7099_v59 = vmul.f32 %v20712_v6, %v20710_v5  ;;  %v22203_v6 = vld [vmem:[%s23449_s2] ss:$0 sm:$0xff] }
0x1b44   :  { %v22143_v14 = vadd.f32 %v7099_v59, %v7098_v11 }
0x1b46   :  { %19756 = vmatpush3.msra.mxu0 %v22143_v14  ;;  %19816 = vmatpush3.msra.mxu1 %v22143_v14 }
0x1b47   :  { %19758 = vmatmul.mubr.msk.f32.vlgmr.msra.gmra.mrb[78].mxu0 %vm190_vm1, %v21948_v60  ;;  %19818 = vmatmul.mubr.msk.f32.vlgmr.msra.gmra.mrb[92].mxu1 %vm190_vm1, %v8036_v62 }
0x1b48   :  { %19820 = vmatprep.subr.mxu1 %v23414_v3  ;;  %19822 = vmatprep.mubr.msk.f32.mxu1 %vm21074_vm0, %v23414_v3 }
0x1b49   :  { %19821 = vmatpush3.msra.mxu1 %v21843_v10  ;;  %19765 = vmatprep.subr.mxu0 %v23414_v3 }
0x1b4a   :  { %19766 = vmatpush3.msra.mxu0 %v22157_v25  ;;  %19767 = vmatprep.mubr.msk.f32.mxu0 %vm21074_vm0, %v23414_v3 }
0x1b4b   :  { %19775 = vmatprep.subr.mxu0 %v23414_v3  ;;  %19830 = vmatprep.subr.mxu1 %v23414_v3 }
0x1c1a   :  { %v7169_v11 = vpop.f32.mrb[78].mxu0  ;;  %v8113_v15 = vpop.f32.mrb[92].mxu1 }
0x1c1b   :  { %v7173_v16 = vmul.f32 %v7169_v11, %v21963_v23  ;;  %v19759_v10 = vpop.f32.mrb[79].mxu0  ;;  %v19819_v36 = vpop.f32.mrb[93].mxu1  ;;  %19823 = vmatmul.mubr.msk.f32.vlgmr.msra.gmra.mrb[94].mxu1 %vm190_vm1, %v8113_v15 }
0x1c1c   :  { %19831 = vmatpush3.msra.mxu1 %v21855_v50  ;;  %19832 = vmatprep.mubr.msk.f32.mxu1 %vm21074_vm0, %v23414_v3  ;;  %v22188_v50 = vld [vmem:[%s23447_s28 + $0x8] sm:$0xff] }
0x1c1d   :  { %19768 = vmatmul.mubr.msk.f32.vlgmr.msra.gmra.mrb[80].mxu0 %vm190_vm1, %v7173_v16  ;;  %19845 = vmatprep.subr.mxu1 %v23414_v3 }
0x1c1e   :  { %19776 = vmatpush3.msra.mxu0 %v22172_v1  ;;  %19777 = vmatprep.mubr.msk.f32.mxu0 %vm21074_vm0, %v23414_v3 }
0x1c1f   :  { %19785 = vmatprep.subr.mxu0 %v23414_v3 }
0x1c21   :  { %19778 = vmatmul.mubr.msk.f32.vlgmr.msra.gmra.mrb[82].mxu0 %vm190_vm1, %v7173_v16 }
0x1c22   :  { %19786 = vmatpush3.msra.mxu0 %v22180_v31  ;;  %19787 = vmatprep.mubr.msk.f32.mxu0 %vm21074_vm0, %v23414_v3 }
0x1c23   :  { %19795 = vmatprep.subr.mxu0 %v23414_v3 }
0x1c25   :  { %19788 = vmatmul.mubr.msk.f32.vlgmr.msra.gmra.mrb[84].mxu0 %vm190_vm1, %v7173_v16  ;;  %v5180_v16 = vadd.f32 %v21815_v33, %v21822_v55  ;;  %v22223_v33 = vld [vmem:[%s23450_s7 + $0x1] ss:$0 sm:$0xff] }
0x1c26   :  { %19796 = vmatpush3.msra.mxu0 %v22188_v50  ;;  %19797 = vmatprep.mubr.msk.f32.mxu0 %vm21074_vm0, %v23414_v3 }
0x1c27   :  { %19805 = vmatprep.subr.mxu0 %v23414_v3 }
0x1c29   :  { %19798 = vmatmul.mubr.msk.f32.vlgmr.msra.gmra.mrb[86].mxu0 %vm190_vm1, %v21861_v2 }
0x1c2a   :  { %19806 = vmatpush3.msra.mxu0 %v22103_v63  ;;  %19807 = vmatprep.mubr.msk.f32.mxu0 %vm21074_vm0, %v23414_v3 }
0x1cee   :  { %v22199_v38 = vpop.f32.mrb[94].mxu1 }
0x1cef   :  { %v19824_v22 = vpop.f32.mrb[95].mxu1 }
0x1cf0   :  { %v7316_v53 = vpop.f32.mrb[80].mxu0 }
0x1cf1   :  { %v7317_v42 = vadd.f32 %v7316_v53, %v22128_v12  ;;  %v19769_v5 = vpop.f32.mrb[81].mxu0  ;;  %v18469_v12 = vmul.f32 -1.442695, %v5180_v16  ;;  %v22212_v53 = vld [vmem:[%s23449_s2 + $0x2] ss:$0 sm:$0xff] }
0x1cf3   :  { %v7320_v21 = vadd.f32 %v22203_v6, %v7317_v42  ;;  %v22216_v42 = vld [vmem:[%s23449_s2 + $0x1] ss:$0 sm:$0xff]  ;;  %20713 = vpow2.f32 %v18469_v12 }
0x1cf4   :  { %v7457_v59 = vpop.f32.mrb[82].mxu0 }
0x1cf5   :  { %v7458_v62 = vadd.f32 %v7457_v59, %v22130_v51  ;;  %v19779_v11 = vpop.f32.mrb[83].mxu0  ;;  %v7673_v15 = vadd.f32 %v22134_v39, %v7320_v21 }
0x1cf7   :  { %v7461_v51 = vadd.f32 %v22216_v42, %v7458_v62 }
0x1cf8   :  { %v7598_v10 = vpop.f32.mrb[84].mxu0 }
0x1cf9   :  { %v7599_v36 = vadd.f32 %v7598_v10, %v22132_v17  ;;  %v19789_v22 = vpop.f32.mrb[85].mxu0 }
0x1cfb   :  { %v7602_v5 = vadd.f32 %v22212_v53, %v7599_v36 }
0x1cfc   :  { %v7747_v59 = vpop.f32.mrb[86].mxu0 }
0x1cfd   :  { %v22220_v11 = vadd.f32 %v22136_v20, %v7602_v5  ;;  %v7751_v39 = vadd.f32 %v7747_v59, %v7461_v51  ;;  %v19799_v3 = vpop.f32.mrb[87].mxu0  ;;  %v20714_v16 = vpop.eup %20713  ;;  %v18531_v59 = vld [vmem:[%s23451_s10 + $0x20] sm:$0xff] }
0x1cfe   :  { %v5184_v10 = vadd.f32 1.0, %v20714_v16 }
0x1cff   :  { %v7752_v55 = vadd.f32 %v22223_v33, %v7751_v39  ;;  %v22232_v39 = vld [vmem:[%s23450_s7] ss:$0 sm:$0xff] }
0x1d01   :  { %v18526_v17 = vmul.f32 -1.442695, %v7752_v55  ;;  %v7674_v55 = vadd.f32 %v22232_v39, %v7673_v15  ;;  %v22236_v15 = vpop.permute.xlu1 %8039 }
0x1d03   :  { %20715 = vpow2.f32 %v18526_v17  ;;  %v18524_v17 = vmul.f32 -1.442695, %v7674_v55 }
0x1d04   :  { %20717 = vtanh.f32 %v21861_v2 }
0x1d05   :  { %20719 = vrcp.f32 %v5184_v10 }
0x1d0d   :  { %v20716_v62 = vpop.eup %20715 }
0x1d0e   :  { %v7756_v36 = vadd.f32 1.0, %v20716_v62  ;;  %v20718_v20 = vpop.eup %20717 }
0x1d0f   :  { %v20720_v22 = vpop.eup %20719 }
0x1d10   :  { %20721 = vrcp.f32 %v7756_v36  ;;  %v5273_v3 = vmul.f32 %v20720_v22, %v20718_v20 }
0x1d11   :  { %20723 = vpow2.f32 %v18524_v17  ;;  %v8042_v17 = vmul.f32 %v21827_v8, %v22236_v15 }
0x1d1a   :  { %v20722_v12 = vpop.eup %20721 }
0x1d1b   :  { %v7919_v5 = vmul.f32 %v20722_v12, %v5273_v3  ;;  %v7837_v51 = vmul.f32 %v20722_v12, %v21861_v2  ;;  %v20724_v2 = vpop.eup %20723 }
0x1d1c   :  { %v7678_v22 = vadd.f32 1.0, %v20724_v2 }
0x1d1d   :  { %19808 = vmatmul.mubr.msk.f32.vlgmr.msra.gmra.mrb[88].mxu0 %vm190_vm1, %v7837_v51 }
0x1d1e   :  { %19812 = vmatprep.mubr.msk.f32.mxu0 %vm1009_vm3, %v18531_v59 }
0x1df0   :  { %v7907_v16 = vpop.f32.mrb[88].mxu0 }
0x1df1   :  { %v7911_v10 = vadd.f32 %v7907_v16, %v7320_v21  ;;  %v19809_v62 = vpop.f32.mrb[89].mxu0  ;;  %v18532_v21 = vld [vmem:[%s23451_s10 + $0x28] sm:$0x3f]  ;;  %v23453_v16 = vmov 0.0  }
0x1df2   :  { %v8187_v62 = vadd.f32 %v21908_v37, %v22199_v38 }
0x1df3   :  { %v7912_v36 = vadd.f32 %v22232_v39, %v7911_v10 }
0x1df5   :  { %v18530_v20 = vmul.f32 -1.442695, %v7912_v36 }
0x1df7   :  { %20725 = vpow2.f32 %v18530_v20 }
0x1df8   :  { %20727 = vrcp.f32 %v7678_v22 }
0x1e01   :  { %v20726_v3 = vpop.eup %20725 }
0x1e02   :  { %v7916_v12 = vadd.f32 1.0, %v20726_v3  ;;  %v20728_v51 = vpop.eup %20727 }
0x1e04   :  { %20729 = vrcp.f32 %v7916_v12 }
0x1e0e   :  { %v20730_v59 = vpop.eup %20729 }
0x1e0f   :  { %v7920_v23 = vmul.f32 %v20730_v59, %v20728_v51 }
0x1e11   :  { %v22238_v55 = vadd.f32 %v7920_v23, %v7919_v5  ;;  %v8043_v23 = vmul.f32 %v21837_v0, %v8042_v17 }
0x1e13   :  { %19810 = vmatprep.subr.msk.mxu0 %vm1013_vm2, %v22238_v55 }
0x1e14   :  { %19811 = vmatpush3.msk.msra.mxu0 %vm1013_vm2, %v22238_v55 }
0x1e15   :  { %19813 = vmatmul.mubr.msk.f32.vlgmr.msra.gmra.mrb[58].mxu0 %vm1009_vm3, %v18532_v21  ;;  %19825 = vmatprep.subr.mxu0 %v23453_v16 }
0x1e16   :  { %19826 = vmatpush3.msra.mxu0 %v22143_v14  ;;  %19827 = vmatprep.mubr.msk.f32.mxu0 %vm21074_vm0, %v23453_v16 }
0x1e17   :  { %19835 = vmatprep.subr.mxu0 %v23453_v16 }
0x1e19   :  { %19828 = vmatmul.mubr.msk.f32.vlgmr.msra.gmra.mrb[90].mxu0 %vm190_vm1, %v8043_v23 }
0x1e1a   :  { %19836 = vmatpush3.msra.mxu0 %v21889_v35  ;;  %19837 = vmatprep.mubr.msk.f32.mxu0 %vm21074_vm0, %v23453_v16 }
0x1e1b   :  { %19840 = vmatprep.subr.mxu0 %v23453_v16 }
0x1eec   :  { %v8260_v8 = vpop.f32.mrb[90].mxu0 }
0x1eed   :  { %v19829_v5 = vpop.f32.mrb[91].mxu0  ;;  %19833 = vmatmul.mubr.msk.f32.vlgmr.msra.gmra.mrb[96].mxu1 %vm190_vm1, %v8260_v8 }
0x1eee   :  { %19846 = vmatpush3.msra.mxu1 %v21897_v9  ;;  %19847 = vmatprep.mubr.msk.f32.mxu1 %vm21074_vm0, %v23453_v16 }
0x1eef   :  { %19850 = vmatprep.subr.mxu1 %v23453_v16 }
0x1fc0   :  { %v8333_v0 = vpop.f32.mrb[96].mxu1 }
0x1fc1   :  { %v8334_v10 = vadd.f32 %v21904_v47, %v8333_v0  ;;  %v19834_v35 = vpop.f32.mrb[97].mxu1 }
0x1fc3   :  { %20731 = vtanh.f32 %v8334_v10 }
0x1fc4   :  { %20733 = vtanh.f32 %v8187_v62  ;;  %v22361_v62 = vld [vmem:[%s23444_s22 + $0x2] ss:$0 sm:$0xff] }
0x1fcd   :  { %v20732_v36 = vpop.eup %20731 }
0x1fce   :  { %19838 = vmatmul.mubr.msk.f32.vlgmr.msra.gmra.mrb[92].mxu0 %vm190_vm1, %v20732_v36  ;;  %19848 = vmatmul.mubr.msk.f32.vlgmr.msra.gmra.mrb[98].mxu1 %vm190_vm1, %v20732_v36  ;;  %v20734_v9 = vpop.eup %20733 }
0x1fcf   :  { %19841 = vmatpush3.msra.mxu0 %v21914_v56  ;;  %19851 = vmatpush3.msra.mxu1 %v21918_v57 }
0x1fd0   :  { %19842 = vmatprep.mubr.msk.f32.mxu0 %vm21074_vm0, %v23453_v16  ;;  %19852 = vmatprep.mubr.msk.f32.mxu1 %vm21074_vm0, %v23453_v16 }
0x1fd1   :  { %19860 = vmatprep.subr.mxu1 %v23453_v16  ;;  %19855 = vmatprep.subr.mxu0 %v23453_v16 }
0x1fd6   :  { %19843 = vmatmul.mubr.msk.f32.vlgmr.msra.gmra.mrb[92].mxu0 %vm190_vm1, %v20734_v9  ;;  %19853 = vmatmul.mubr.msk.f32.vlgmr.msra.gmra.mrb[98].mxu1 %vm190_vm1, %v20734_v9 }
0x1fd7   :  { %19861 = vmatpush3.msra.mxu1 %v21930_v40  ;;  %19862 = vmatprep.mubr.msk.f32.mxu1 %vm21074_vm0, %v23453_v16 }
0x1fd8   :  { %19857 = vmatprep.mubr.msk.f32.mxu0 %vm21074_vm0, %v23453_v16  ;;  %19865 = vmatprep.subr.mxu1 %v23453_v16 }
0x1fda   :  { %19863 = vmatmul.mubr.msk.f32.vlgmr.msra.gmra.mrb[100].mxu1 %vm190_vm1, %v22238_v55 }
0x1fdb   :  { %19866 = vmatpush3.msra.mxu1 %v21941_v45  ;;  %19867 = vmatprep.mubr.msk.f32.mxu1 %vm21074_vm0, %v23453_v16 }
0x1fdc   :  { %19880 = vmatprep.subr.mxu1 %v23453_v16 }
0x20a9   :  { %v8480_v47 = vpop.f32.mrb[92].mxu0  ;;  %v8620_v37 = vpop.f32.mrb[98].mxu1 }
0x20aa   :  { %v8624_v56 = vmax.f32 %v8480_v47, %v8620_v37  ;;  %v19844_v57 = vpop.f32.mrb[93].mxu0  ;;  %v19854_v40 = vpop.f32.mrb[99].mxu1 }
0x20ac   :  { %19856 = vmatpush3.msra.mxu0 %v8624_v56 }
0x20ad   :  { %19858 = vmatmul.mubr.msk.f32.vlgmr.msra.gmra.mrb[94].mxu0 %vm190_vm1, %v21948_v60  ;;  %19870 = vmatprep.subr.mxu0 %v23453_v16 }
0x20ae   :  { %19872 = vmatprep.mubr.msk.f32.mxu0 %vm21074_vm0, %v23453_v16 }
0x2180   :  { %v8691_v45 = vpop.f32.mrb[94].mxu0 }
0x2181   :  { %v19859_v38 = vpop.f32.mrb[95].mxu0  ;;  %19868 = vmatmul.mubr.msk.f32.vlgmr.msra.gmra.mrb[100].mxu1 %vm190_vm1, %v8691_v45 }
0x2182   :  { %19881 = vmatpush3.msra.mxu1 %v21957_v27  ;;  %19882 = vmatprep.mubr.msk.f32.mxu1 %vm21074_vm0, %v23453_v16 }
0x2183   :  { %19890 = vmatprep.subr.mxu1 %v23453_v16 }
0x2254   :  { %v8836_v20 = vpop.f32.mrb[100].mxu1 }
0x2255   :  { %8842 = vperm.xlu0 %20621, %v8836_v20   ;;  %v19869_v2 = vpop.f32.mrb[101].mxu1 }
0x22d4   :  { %v22301_v22 = vpop.permute.xlu0 %8842 }
0x22d5   :  { %23454 = vst [vmem:[#allocation24_spill] sm:$0xff] %v22301_v22  ;;  %v8845_v3 = vmul.f32 %v22301_v22, %v22238_v55 }
0x22d7   :  { %19871 = vmatpush3.msk.msra.mxu0 %vm1013_vm2, %v8845_v3 }
0x22d8   :  { %19873 = vmatmul.mubr.msk.f32.vlgmr.msra.gmra.mrb[96].mxu0 %vm1009_vm3, %v21969_v29  ;;  %19875 = vmatprep.subr.mxu0 %v23453_v16 }
0x22d9   :  { %19876 = vmatpush3.msra.mxu0 %v21975_v32  ;;  %19877 = vmatprep.mubr.msk.f32.mxu0 %vm21074_vm0, %v23453_v16 }
0x22da   :  { %19885 = vmatprep.subr.mxu0 %v23453_v16 }
0x22dc   :  { %19878 = vmatmul.mubr.msk.f32.vlgmr.msra.gmra.mrb[98].mxu0 %vm190_vm1, %v8624_v56 }
0x22dd   :  { %19886 = vmatpush3.msra.mxu0 %v21983_v49  ;;  %19887 = vmatprep.mubr.msk.f32.mxu0 %vm21074_vm0, %v23453_v16 }
0x22de   :  { %19895 = vmatprep.subr.mxu0 %v23453_v16 }
0x22e0   :  { %19888 = vmatmul.mubr.msk.f32.vlgmr.msra.gmra.mrb[100].mxu0 %vm190_vm1, %v8624_v56 }
0x22e1   :  { %19896 = vmatpush3.msra.mxu0 %v21991_v43  ;;  %19897 = vmatprep.mubr.msk.f32.mxu0 %vm21074_vm0, %v23453_v16 }
0x22e2   :  { %19905 = vmatprep.subr.mxu0 %v23453_v16 }
0x22e4   :  { %19898 = vmatmul.mubr.msk.f32.vlgmr.msra.gmra.mrb[102].mxu0 %vm190_vm1, %v8624_v56 }
0x22e5   :  { %19906 = vmatpush3.msra.mxu0 %v21999_v48  ;;  %19907 = vmatprep.mubr.msk.f32.mxu0 %vm21074_vm0, %v23453_v16 }
0x22e6   :  { %19915 = vmatprep.subr.mxu0 %v23453_v16 }
0x22e8   :  { %19908 = vmatmul.mubr.msk.f32.vlgmr.msra.gmra.mrb[104].mxu0 %vm190_vm1, %v22143_v14 }
0x22e9   :  { %19916 = vmatpush3.msra.mxu0 %v22008_v46  ;;  %19917 = vmatprep.mubr.msk.f32.mxu0 %vm21074_vm0, %v23453_v16 }
0x22ea   :  { %19925 = vmatprep.subr.mxu0 %v23453_v16 }
0x22ec   :  { %19918 = vmatmul.mubr.msk.f32.vlgmr.msra.gmra.mrb[106].mxu0 %vm190_vm1, %v22143_v14 }
0x22ed   :  { %19927 = vmatprep.mubr.msk.f32.mxu0 %vm21074_vm0, %v23453_v16 }
0x23ab   :  { %v8915_v27 = vpop.f32.mrb[96].mxu0 }
0x23ac   :  { %v19874_v29 = vpop.f32.mrb[97].mxu0  ;;  %19883 = vmatmul.mubr.msk.f32.vlgmr.msra.gmra.mrb[102].mxu1 %vm190_vm1, %v8915_v27 }
0x23ad   :  { %19891 = vmatpush3.msra.mxu1 %v22020_v28  ;;  %19892 = vmatprep.mubr.msk.f32.mxu1 %vm21074_vm0, %v23453_v16 }
0x23ae   :  { %19900 = vmatprep.subr.mxu1 %v23453_v16 }
0x23af   :  { %v8988_v32 = vpop.f32.mrb[98].mxu0 }
0x23b0   :  { %v19879_v49 = vpop.f32.mrb[99].mxu0  ;;  %19893 = vmatmul.mubr.msk.f32.vlgmr.msra.gmra.mrb[104].mxu1 %vm190_vm1, %v8915_v27 }
0x23b1   :  { %19901 = vmatpush3.msra.mxu1 %v22028_v7  ;;  %19902 = vmatprep.mubr.msk.f32.mxu1 %vm21074_vm0, %v23453_v16 }
0x23b2   :  { %19910 = vmatprep.subr.mxu1 %v23453_v16 }
0x23b3   :  { %v9132_v43 = vpop.f32.mrb[100].mxu0 }
0x23b4   :  { %v19889_v46 = vpop.f32.mrb[101].mxu0  ;;  %19903 = vmatmul.mubr.msk.f32.vlgmr.msra.gmra.mrb[106].mxu1 %vm190_vm1, %v8915_v27 }
0x23b5   :  { %19911 = vmatpush3.msra.mxu1 %v22036_v41  ;;  %19912 = vmatprep.mubr.msk.f32.mxu1 %vm21074_vm0, %v23453_v16 }
0x23b6   :  { %19920 = vmatprep.subr.mxu1 %v23453_v16 }
0x23b7   :  { %v9273_v28 = vpop.f32.mrb[102].mxu0 }
0x23b8   :  { %v19899_v12 = vpop.f32.mrb[103].mxu0  ;;  %19913 = vmatmul.mubr.msk.f32.vlgmr.msra.gmra.mrb[108].mxu1 %vm190_vm1, %v22143_v14 }
0x23b9   :  { %19921 = vmatpush3.msra.mxu1 %v21999_v48  ;;  %19922 = vmatprep.mubr.msk.f32.mxu1 %vm21074_vm0, %v23453_v16  ;;  %v7009_v48 = vadd.f32 %v22361_v62, %v22065_v24 }
0x23ba   :  { %19930 = vmatprep.subr.mxu1 %v23453_v16 }
0x23bb   :  { %v9417_v7 = vpop.f32.mrb[104].mxu0  ;;  %v18510_v37 = vmul.f32 -1.442695, %v7009_v48 }
0x23bc   :  { %v19909_v41 = vpop.f32.mrb[105].mxu0 }
0x23bd   :  { %20735 = vpow2.f32 %v18510_v37 }
0x23bf   :  { %v9573_v51 = vpop.f32.mrb[106].mxu0 }
0x23c0   :  { %v19919_v59 = vpop.f32.mrb[107].mxu0 }
0x23c7   :  { %v20736_v3 = vpop.eup %20735 }
0x23c8   :  { %v7013_v24 = vadd.f32 1.0, %v20736_v3 }
0x247f   :  { %v9061_v21 = vpop.f32.mrb[102].mxu1 }
0x2480   :  { %v9062_v17 = vadd.f32 %v9061_v21, %v8988_v32  ;;  %v19884_v23 = vpop.f32.mrb[103].mxu1 }
0x2482   :  { %v9065_v8 = vadd.f32 %v22049_v19, %v9062_v17 }
0x2483   :  { %v9202_v5 = vpop.f32.mrb[104].mxu1 }
0x2484   :  { %v9203_v0 = vadd.f32 %v9202_v5, %v9132_v43  ;;  %v19894_v10 = vpop.f32.mrb[105].mxu1  ;;  %v9421_v35 = vadd.f32 %v9417_v7, %v9065_v8 }
0x2486   :  { %v9206_v57 = vadd.f32 %v22062_v26, %v9203_v0 }
0x2487   :  { %v9343_v36 = vpop.f32.mrb[106].mxu1 }
0x2488   :  { %v9344_v9 = vadd.f32 %v9343_v36, %v9273_v28  ;;  %v19904_v47 = vpop.f32.mrb[107].mxu1  ;;  %v22419_v36 = vld [vmem:[%s21089_s9 + $0x5] ss:$0 sm:$0xff] }
0x2489   :  { %v10604_v37 = vmul.f32 %v22419_v36, %v22236_v15  ;;  %v22438_v15 = vld [vmem:[%s21129_s14] sm:$0xff] }
0x248a   :  { %v9347_v56 = vadd.f32 %v22058_v61, %v9344_v9 }
0x248b   :  { %v9495_v40 = vpop.f32.mrb[108].mxu1 }
0x248c   :  { %v22367_v45 = vadd.f32 %v9573_v51, %v9347_v56  ;;  %v9499_v19 = vadd.f32 %v9495_v40, %v9206_v57  ;;  %v19914_v38 = vpop.f32.mrb[109].mxu1  ;;  %v22426_v40 = vld [vmem:[%s21104_s21] sm:$0xff] }
0x248e   :  { %v9500_v20 = vadd.f32 %v22068_v34, %v9499_v19  ;;  %v18540_v34 = vld [vmem:[%s23446_s26 + $0x8] sm:$0x3]  ;;  %v10605_v19 = vmul.f32 %v22426_v40, %v10604_v37 }
0x2490   :  { %v18564_v2 = vmul.f32 -1.442695, %v9500_v20 }
0x2492   :  { %20737 = vpow2.f32 %v18564_v2 }
0x2493   :  { %20739 = vtanh.f32 %v22143_v14 }
0x2494   :  { %20741 = vrcp.f32 %v7013_v24  ;;  %v22450_v24 = vld [vmem:[%s21139_s24] sm:$0xff] }
0x249c   :  { %v20738_v27 = vpop.eup %20737 }
0x249d   :  { %v9504_v61 = vadd.f32 1.0, %v20738_v27  ;;  %v20740_v26 = vpop.eup %20739 }
0x249e   :  { %v20742_v29 = vpop.eup %20741 }
0x249f   :  { %20743 = vrcp.f32 %v9504_v61  ;;  %v7102_v32 = vmul.f32 %v20742_v29, %v20740_v26 }
0x24a9   :  { %v20744_v49 = vpop.eup %20743 }
0x24aa   :  { %v9667_v43 = vmul.f32 %v20744_v49, %v7102_v32  ;;  %v9585_v46 = vmul.f32 %v20744_v49, %v22143_v14 }
0x24ac   :  { %19923 = vmatmul.mubr.msk.f32.vlgmr.msra.gmra.mrb[110].mxu1 %vm190_vm1, %v9585_v46 }
0x24ad   :  { %19931 = vmatpush3.msk.msra.mxu1 %vm1977_vm4, %v22075_v54  ;;  %19932 = vmatprep.mubr.msk.f32.mxu1 %vm21074_vm0, %v23453_v16  ;;  %v9422_v54 = vadd.f32 %v22123_v4, %v9421_v35 }
0x24ae   :  { %19940 = vmatprep.subr.mxu1 %v23453_v16 }
0x24b0   :  { %19933 = vmatmul.mubr.msk.f32.vlgmr.msra.gmra.mrb[112].mxu1 %vm1973_vm5, %v18540_v34 }
0x24b1   :  { %19941 = vmatpush3.msk.msra.mxu1 %vm1977_vm4, %v22085_v58  ;;  %19942 = vmatprep.mubr.msk.f32.mxu1 %vm21074_vm0, %v23453_v16  ;;  %v18562_v58 = vmul.f32 -1.442695, %v9422_v54 }
0x24b2   :  { %19950 = vmatprep.subr.mxu1 %v23453_v16 }
0x24b3   :  { %20745 = vpow2.f32 %v18562_v58 }
0x24b4   :  { %19943 = vmatmul.mubr.msk.f32.vlgmr.msra.gmra.mrb[114].mxu1 %vm1973_vm5, %v18540_v34 }
0x24b5   :  { %19951 = vmatpush3.msk.msra.mxu1 %vm1977_vm4, %v22094_v30  ;;  %19952 = vmatprep.mubr.msk.f32.mxu1 %vm21074_vm0, %v23453_v16 }
0x24b6   :  { %19960 = vmatprep.subr.mxu1 %v23453_v16 }
0x24b8   :  { %19953 = vmatmul.mubr.msk.f32.vlgmr.msra.gmra.mrb[116].mxu1 %vm1973_vm5, %v18540_v34 }
0x24b9   :  { %19961 = vmatpush3.msra.mxu1 %v22103_v63  ;;  %19962 = vmatprep.mubr.msk.f32.mxu1 %vm21074_vm0, %v23453_v16 }
0x24ba   :  { %19970 = vmatprep.subr.mxu1 %v23453_v16 }
0x24bc   :  { %19963 = vmatmul.mubr.msk.f32.vlgmr.msra.gmra.mrb[118].mxu1 %vm190_vm1, %v22238_v55 }
0x24bd   :  { %19971 = vmatpush3.msra.mxu1 %v22112_v13  ;;  %19972 = vmatprep.mubr.msk.f32.mxu1 %vm21074_vm0, %v23453_v16  ;;  %v20746_v21 = vpop.eup %20745 }
0x24be   :  { %19985 = vmatprep.subr.mxu1 %v23453_v16  ;;  %v9426_v5 = vadd.f32 1.0, %v20746_v21 }
0x24c0   :  { %19973 = vmatmul.mubr.msk.f32.vlgmr.msra.gmra.mrb[120].mxu1 %vm190_vm1, %v22238_v55 }
0x24c1   :  { %19987 = vmatprep.mubr.msk.f32.mxu1 %vm21074_vm0, %v23453_v16 }
0x257f   :  { %v9655_v30 = vpop.f32.mrb[110].mxu1 }
0x2580   :  { %v9659_v14 = vadd.f32 %v9655_v30, %v9065_v8  ;;  %v19924_v28 = vpop.f32.mrb[111].mxu1 }
0x2582   :  { %v9660_v13 = vadd.f32 %v22123_v4, %v9659_v14 }
0x2583   :  { %v22408_v12 = vpop.f32.mrb[112].mxu1 }
0x2584   :  { %v18568_v7 = vmul.f32 -1.442695, %v9660_v13  ;;  %v19934_v41 = vpop.f32.mrb[113].mxu1 }
0x2586   :  { %20747 = vpow2.f32 %v18568_v7 }
0x2587   :  { %v22410_v51 = vpop.f32.mrb[114].mxu1  ;;  %20749 = vrcp.f32 %v9426_v5 }
0x2588   :  { %v19944_v59 = vpop.f32.mrb[115].mxu1 }
0x258b   :  { %v22412_v17 = vpop.f32.mrb[116].mxu1 }
0x258c   :  { %v19954_v23 = vpop.f32.mrb[117].mxu1 }
0x258f   :  { %v22414_v8 = vpop.f32.mrb[118].mxu1 }
0x2590   :  { %v20748_v0 = vpop.eup %20747  ;;  %v19964_v10 = vpop.f32.mrb[119].mxu1 }
0x2591   :  { %v9664_v4 = vadd.f32 1.0, %v20748_v0  ;;  %v20750_v9 = vpop.eup %20749 }
0x2593   :  { %20751 = vrcp.f32 %v9664_v4  ;;  %v22416_v35 = vpop.f32.mrb[120].mxu1 }
0x2594   :  { %v19974_v48 = vpop.f32.mrb[121].mxu1 }
0x259d   :  { %v20752_v47 = vpop.eup %20751 }
0x259e   :  { %v9668_v56 = vmul.f32 %v20752_v47, %v20750_v9 }
0x25a0   :  { %v22423_v57 = vadd.f32 %v9668_v56, %v9667_v43  ;;  %v22483_v43 = vld [vmem:[%s23450_s7 + $0x2] ss:$0 sm:$0xff] }
0x25a2   :  { %19926 = vmatpush3.msra.mxu0 %v22423_v57  ;;  %19986 = vmatpush3.msra.mxu1 %v22423_v57 }
0x25a3   :  { %19928 = vmatmul.mubr.msk.f32.vlgmr.msra.gmra.mrb[108].mxu0 %vm190_vm1, %v21948_v60  ;;  %19988 = vmatmul.mubr.msk.f32.vlgmr.msra.gmra.mrb[122].mxu1 %vm190_vm1, %v10605_v19 }
0x25a4   :  { %19990 = vmatprep.subr.mxu1 %v23453_v16  ;;  %19992 = vmatprep.mubr.msk.f32.mxu1 %vm21074_vm0, %v23453_v16 }
0x25a5   :  { %19991 = vmatpush3.msra.mxu1 %v22438_v15  ;;  %19935 = vmatprep.subr.mxu0 %v23453_v16 }
0x25a6   :  { %19936 = vmatpush3.msra.mxu0 %v22157_v25  ;;  %19937 = vmatprep.mubr.msk.f32.mxu0 %vm21074_vm0, %v23453_v16 }
0x25a7   :  { %19945 = vmatprep.subr.mxu0 %v23453_v16  ;;  %20000 = vmatprep.subr.mxu1 %v23453_v16 }
0x2676   :  { %v9738_v60 = vpop.f32.mrb[108].mxu0  ;;  %v10682_v38 = vpop.f32.mrb[122].mxu1 }
0x2677   :  { %v9742_v20 = vmul.f32 %v9738_v60, %v22301_v22  ;;  %v19929_v2 = vpop.f32.mrb[109].mxu0  ;;  %v19989_v3 = vpop.f32.mrb[123].mxu1  ;;  %19993 = vmatmul.mubr.msk.f32.vlgmr.msra.gmra.mrb[124].mxu1 %vm190_vm1, %v10682_v38 }
0x2678   :  { %20001 = vmatpush3.msra.mxu1 %v22450_v24  ;;  %20002 = vmatprep.mubr.msk.f32.mxu1 %vm21074_vm0, %v23453_v16  ;;  %v22501_v2 = vpop.permute.xlu1 %10608 }
0x2679   :  { %19938 = vmatmul.mubr.msk.f32.vlgmr.msra.gmra.mrb[110].mxu0 %vm190_vm1, %v9742_v20  ;;  %20015 = vmatprep.subr.mxu1 %v23453_v16 }
0x267a   :  { %19946 = vmatpush3.msra.mxu0 %v22172_v1  ;;  %19947 = vmatprep.mubr.msk.f32.mxu0 %vm21074_vm0, %v23453_v16 }
0x267b   :  { %19955 = vmatprep.subr.mxu0 %v23453_v16 }
0x267d   :  { %19948 = vmatmul.mubr.msk.f32.vlgmr.msra.gmra.mrb[112].mxu0 %vm190_vm1, %v9742_v20 }
0x267e   :  { %19956 = vmatpush3.msra.mxu0 %v22180_v31  ;;  %19957 = vmatprep.mubr.msk.f32.mxu0 %vm21074_vm0, %v23453_v16 }
0x267f   :  { %19965 = vmatprep.subr.mxu0 %v23453_v16 }
0x2681   :  { %19958 = vmatmul.mubr.msk.f32.vlgmr.msra.gmra.mrb[114].mxu0 %vm190_vm1, %v9742_v20 }
0x2682   :  { %19966 = vmatpush3.msra.mxu0 %v22188_v50  ;;  %19967 = vmatprep.mubr.msk.f32.mxu0 %vm21074_vm0, %v23453_v16 }
0x2683   :  { %19975 = vmatprep.subr.mxu0 %v23453_v16 }
0x2685   :  { %19968 = vmatmul.mubr.msk.f32.vlgmr.msra.gmra.mrb[116].mxu0 %vm190_vm1, %v22238_v55 }
0x2686   :  { %19976 = vmatpush3.msra.mxu0 %v22103_v63  ;;  %19977 = vmatprep.mubr.msk.f32.mxu0 %vm21074_vm0, %v23453_v16  ;;  %v7830_v63 = vadd.f32 %v22483_v43, %v22220_v11 }
0x2688   :  { %v18528_v58 = vmul.f32 -1.442695, %v7830_v63  ;;  %v22540_v63 = vld [vmem:[%s21134_s19] ss:$0 sm:$0xff] }
0x268a   :  { %20753 = vpow2.f32 %v18528_v58  ;;  %v22551_v58 = vld [vmem:[%s21159_s20] sm:$0xff] }
0x2694   :  { %v20754_v11 = vpop.eup %20753 }
0x274a   :  { %v22476_v25 = vpop.f32.mrb[124].mxu1 }
0x274b   :  { %v19994_v1 = vpop.f32.mrb[125].mxu1 }
0x274c   :  { %v9885_v31 = vpop.f32.mrb[110].mxu0  ;;  %v18588_v1 = vld [vmem:[%s23451_s10 + $0x38] sm:$0x3f] }
0x274d   :  { %v9886_v50 = vadd.f32 %v9885_v31, %v22408_v12  ;;  %v19939_v27 = vpop.f32.mrb[111].mxu0 }
0x274f   :  { %v9889_v61 = vadd.f32 %v22203_v6, %v9886_v50 }
0x2750   :  { %v10026_v26 = vpop.f32.mrb[112].mxu0 }
0x2751   :  { %v10027_v29 = vadd.f32 %v10026_v26, %v22410_v51  ;;  %v19949_v32 = vpop.f32.mrb[113].mxu0  ;;  %v10242_v49 = vadd.f32 %v22414_v8, %v9889_v61  ;;  %v7834_v51 = vadd.f32 1.0, %v20754_v11  ;;  %v22581_v11 = vld [vmem:[%s23437_s0] sm:$0x3] }
0x2753   :  { %v10030_v6 = vadd.f32 %v22216_v42, %v10027_v29  ;;  %v10243_v0 = vadd.f32 %v22232_v39, %v10242_v49  ;;  %v22536_v29 = vld [vmem:[%s21144_s30] ss:$0 sm:$0xff] }
0x2754   :  { %v10167_v46 = vpop.f32.mrb[114].mxu0 }
0x2755   :  { %v10168_v34 = vadd.f32 %v10167_v46, %v22412_v17  ;;  %v19959_v54 = vpop.f32.mrb[115].mxu0  ;;  %v18580_v10 = vmul.f32 -1.442695, %v10243_v0  ;;  %v10756_v46 = vadd.f32 %v22540_v63, %v22476_v25  ;;  %v22624_v0 = vld [vmem:[%s23439_s15 + $0x10] sm:$0xff] }
0x2756   :  { %v22547_v54 = vld [vmem:[%s21149_s6] sm:$0xff] }
0x2757   :  { %v10171_v30 = vadd.f32 %v22212_v53, %v10168_v34 }
0x2758   :  { %v10316_v14 = vpop.f32.mrb[116].mxu0 }
0x2759   :  { %v22491_v28 = vadd.f32 %v22416_v35, %v10171_v30  ;;  %v10320_v13 = vadd.f32 %v10316_v14, %v10030_v6  ;;  %v19969_v12 = vpop.f32.mrb[117].mxu0  ;;  %v22563_v30 = vld [vmem:[%s21174_s8] sm:$0xff] }
0x275a   :  { %v22574_v6 = vld [vmem:[%s21169_s4] sm:$0xff] }
0x275b   :  { %v10321_v7 = vadd.f32 %v22223_v33, %v10320_v13  ;;  %v18587_v33 = vld [vmem:[%s23451_s10 + $0x30] sm:$0xff] }
0x275d   :  { %v18582_v41 = vmul.f32 -1.442695, %v10321_v7 }
0x275f   :  { %20755 = vpow2.f32 %v18582_v41 }
0x2760   :  { %20757 = vtanh.f32 %v22238_v55 }
0x2761   :  { %20759 = vrcp.f32 %v7834_v51 }
0x2769   :  { %v20756_v59 = vpop.eup %20755 }
0x276a   :  { %v10325_v53 = vadd.f32 1.0, %v20756_v59  ;;  %v20758_v42 = vpop.eup %20757 }
0x276b   :  { %v20760_v21 = vpop.eup %20759 }
0x276c   :  { %20761 = vrcp.f32 %v10325_v53  ;;  %v7923_v17 = vmul.f32 %v20760_v21, %v20758_v42  ;;  %v22590_v53 = vld [vmem:[%s23441_s5] sm:$0xff] }
0x276d   :  { %20763 = vpow2.f32 %v18580_v10  ;;  %v22632_v10 = vld [vmem:[%s23442_s16] sm:$0xff] }
0x2776   :  { %v20762_v23 = vpop.eup %20761 }
0x2777   :  { %v10488_v5 = vmul.f32 %v20762_v23, %v7923_v17  ;;  %v10406_v8 = vmul.f32 %v20762_v23, %v22238_v55  ;;  %v20764_v37 = vpop.eup %20763 }
0x2778   :  { %v10247_v56 = vadd.f32 1.0, %v20764_v37 }
0x2779   :  { %19978 = vmatmul.mubr.msk.f32.vlgmr.msra.gmra.mrb[118].mxu0 %vm190_vm1, %v10406_v8  ;;  %v22608_v8 = vld [vmem:[%s23439_s15] sm:$0xff] }
0x277a   :  { %19982 = vmatprep.mubr.msk.f32.mxu0 %vm1009_vm3, %v18587_v33  ;;  %v22616_v33 = vld [vmem:[%s23439_s15 + $0x8] sm:$0xff] }
0x284c   :  { %v10476_v4 = vpop.f32.mrb[118].mxu0 }
0x284d   :  { %v10480_v35 = vadd.f32 %v10476_v4, %v9889_v61  ;;  %v19979_v48 = vpop.f32.mrb[119].mxu0  ;;  %v22529_v61 = vld [vmem:[%s21164_s27] sm:$0xff]  ;;  %v22641_v4 = vld [vmem:[%s23442_s16 + $0x10] sm:$0xff] }
0x284f   :  { %v10481_v9 = vadd.f32 %v22232_v39, %v10480_v35  ;;  %v10611_v39 = vmul.f32 %v22139_v44, %v22501_v2  ;;  %v22521_v44 = vld [vmem:[%s21154_s12] sm:$0xff] }
0x2851   :  { %v18586_v47 = vmul.f32 -1.442695, %v10481_v9  ;;  %v10612_v31 = vmul.f32 %v22426_v40, %v10611_v39  ;;  %v22653_v9 = vld [vmem:[%s23441_s5 + $0x8] sm:$0xff] }
0x2853   :  { %20765 = vpow2.f32 %v18586_v47 }
0x2854   :  { %20767 = vrcp.f32 %v10247_v56  ;;  %v22661_v56 = vld [vmem:[%s23441_s5 + $0x10] sm:$0xff] }
0x285d   :  { %v20766_v55 = vpop.eup %20765 }
0x285e   :  { %v10485_v19 = vadd.f32 1.0, %v20766_v55  ;;  %v20768_v60 = vpop.eup %20767 }
0x2860   :  { %20769 = vrcp.f32 %v10485_v19 }
0x286a   :  { %v20770_v38 = vpop.eup %20769 }
0x286b   :  { %v10489_v20 = vmul.f32 %v20770_v38, %v20768_v60  ;;  %v22669_v60 = vld [vmem:[%s23442_s16 + $0x8] sm:$0xff] }
0x286d   :  { %v22503_v3 = vadd.f32 %v10489_v20, %v10488_v5  ;;  %v22602_v5 = vld [vmem:[%s23438_s17] sm:$0xff] }
0x286f   :  { %19980 = vmatprep.subr.msk.mxu0 %vm1013_vm2, %v22503_v3 }
0x2870   :  { %19981 = vmatpush3.msk.msra.mxu0 %vm1013_vm2, %v22503_v3 }
0x2871   :  { %19983 = vmatmul.mubr.msk.f32.vlgmr.msra.gmra.mrb[58].mxu0 %vm1009_vm3, %v18588_v1  ;;  %19995 = vmatprep.subr.mxu0 %v23453_v16 }
0x2872   :  { %19996 = vmatpush3.msra.mxu0 %v22423_v57  ;;  %19997 = vmatprep.mubr.msk.f32.mxu0 %vm21074_vm0, %v23453_v16 }
0x2873   :  { %20005 = vmatprep.subr.mxu0 %v23453_v16 }
0x2875   :  { %19998 = vmatmul.mubr.msk.f32.vlgmr.msra.gmra.mrb[120].mxu0 %vm190_vm1, %v10612_v31 }
0x2876   :  { %20006 = vmatpush3.msra.mxu0 %v22521_v44  ;;  %20007 = vmatprep.mubr.msk.f32.mxu0 %vm21074_vm0, %v23453_v16 }
0x2877   :  { %20010 = vmatprep.subr.mxu0 %v23453_v16 }
0x2948   :  { %v10829_v50 = vpop.f32.mrb[120].mxu0 }
0x2949   :  { %v19999_v27 = vpop.f32.mrb[121].mxu0  ;;  %20003 = vmatmul.mubr.msk.f32.vlgmr.msra.gmra.mrb[126].mxu1 %vm190_vm1, %v10829_v50 }
0x294a   :  { %20016 = vmatpush3.msra.mxu1 %v22529_v61  ;;  %20017 = vmatprep.mubr.msk.f32.mxu1 %vm21074_vm0, %v23453_v16 }
0x294b   :  { %20020 = vmatprep.subr.mxu1 %v23453_v16 }
0x2a1c   :  { %v10902_v26 = vpop.f32.mrb[126].mxu1 }
0x2a1d   :  { %v10903_v32 = vadd.f32 %v22536_v29, %v10902_v26  ;;  %v20004_v49 = vpop.f32.mrb[127].mxu1 }
0x2a1e   :  { %v22682_v49 = vld [vmem:[%s23443_s18] ss:$0 sm:$0xff] }
0x2a1f   :  { %20771 = vtanh.f32 %v10903_v32 }
0x2a20   :  { %20773 = vtanh.f32 %v10756_v46 }
0x2a29   :  { %v20772_v34 = vpop.eup %20771 }
0x2a2a   :  { %20008 = vmatmul.mubr.msk.f32.vlgmr.msra.gmra.mrb[122].mxu0 %vm190_vm1, %v20772_v34  ;;  %20018 = vmatmul.mubr.msk.f32.vlgmr.msra.gmra.mrb[128].mxu1 %vm190_vm1, %v20772_v34  ;;  %v20774_v25 = vpop.eup %20773 }
0x2a2b   :  { %20011 = vmatpush3.msra.mxu0 %v22547_v54  ;;  %20021 = vmatpush3.msra.mxu1 %v22551_v58 }
0x2a2c   :  { %20012 = vmatprep.mubr.msk.f32.mxu0 %vm21074_vm0, %v23453_v16  ;;  %20022 = vmatprep.mubr.msk.f32.mxu1 %vm21074_vm0, %v23453_v16 }
0x2a2d   :  { %20030 = vmatprep.subr.mxu1 %v23453_v16  ;;  %20025 = vmatprep.subr.mxu0 %v23453_v16 }
0x2a32   :  { %20013 = vmatmul.mubr.msk.f32.vlgmr.msra.gmra.mrb[122].mxu0 %vm190_vm1, %v20774_v25  ;;  %20023 = vmatmul.mubr.msk.f32.vlgmr.msra.gmra.mrb[128].mxu1 %vm190_vm1, %v20774_v25 }
0x2a33   :  { %20031 = vmatpush3.msra.mxu1 %v22563_v30  ;;  %20032 = vmatprep.mubr.msk.f32.mxu1 %vm21074_vm0, %v23453_v16 }
0x2a34   :  { %20027 = vmatprep.mubr.msk.f32.mxu0 %vm21074_vm0, %v23453_v16  ;;  %20035 = vmatprep.subr.mxu1 %v23453_v16 }
0x2a36   :  { %20033 = vmatmul.mubr.msk.f32.vlgmr.msra.gmra.mrb[130].mxu1 %vm190_vm1, %v22503_v3 }
0x2a37   :  { %20036 = vmatpush3.msra.mxu1 %v22574_v6  ;;  %20037 = vmatprep.mubr.msk.f32.mxu1 %vm21074_vm0, %v23453_v16 }
0x2a38   :  { %20050 = vmatprep.subr.mxu1 %v23453_v16 }
0x2b05   :  { %v11049_v14 = vpop.f32.mrb[122].mxu0  ;;  %v11189_v13 = vpop.f32.mrb[128].mxu1 }
0x2b06   :  { %v11193_v12 = vmax.f32 %v11049_v14, %v11189_v13  ;;  %v20014_v7 = vpop.f32.mrb[123].mxu0  ;;  %v20024_v41 = vpop.f32.mrb[129].mxu1 }
0x2b08   :  { %20026 = vmatpush3.msra.mxu0 %v11193_v12 }
0x2b09   :  { %20028 = vmatmul.mubr.msk.f32.vlgmr.msra.gmra.mrb[124].mxu0 %vm190_vm1, %v22581_v11  ;;  %20040 = vmatprep.subr.mxu0 %v23453_v16 }
0x2b0a   :  { %20042 = vmatprep.mubr.msk.f32.mxu0 %vm21074_vm0, %v23453_v16 }
0x2bdc   :  { %v11260_v51 = vpop.f32.mrb[124].mxu0 }
0x2bdd   :  { %v20029_v59 = vpop.f32.mrb[125].mxu0  ;;  %20038 = vmatmul.mubr.msk.f32.vlgmr.msra.gmra.mrb[130].mxu1 %vm190_vm1, %v11260_v51 }
0x2bde   :  { %20051 = vmatpush3.msra.mxu1 %v22590_v53  ;;  %20052 = vmatprep.mubr.msk.f32.mxu1 %vm21074_vm0, %v23453_v16 }
0x2bdf   :  { %20060 = vmatprep.subr.mxu1 %v23453_v16 }
0x2cb0   :  { %v11405_v42 = vpop.f32.mrb[130].mxu1 }
0x2cb1   :  { %11411 = vperm.xlu0 %20621, %v11405_v42   ;;  %v20039_v21 = vpop.f32.mrb[131].mxu1  ;;  %v22691_v42 = vld [vmem:[%s23443_s18 + $0x2] ss:$0 sm:$0xff] }
0x2d30   :  { %v22596_v17 = vpop.permute.xlu0 %11411 }
0x2d31   :  { %23455 = vst [vmem:[#allocation25_spill] sm:$0xff] %v22596_v17  ;;  %v11414_v23 = vmul.f32 %v22596_v17, %v22503_v3 }
0x2d33   :  { %20041 = vmatpush3.msk.msra.mxu0 %vm1013_vm2, %v11414_v23  ;;  %v22695_v23 = vld [vmem:[%s23443_s18 + $0x1] ss:$0 sm:$0xff] }
0x2d34   :  { %20043 = vmatmul.mubr.msk.f32.vlgmr.msra.gmra.mrb[126].mxu0 %vm1009_vm3, %v22602_v5  ;;  %20045 = vmatprep.subr.mxu0 %v23453_v16 }
0x2d35   :  { %20046 = vmatpush3.msra.mxu0 %v22608_v8  ;;  %20047 = vmatprep.mubr.msk.f32.mxu0 %vm21074_vm0, %v23453_v16 }
0x2d36   :  { %20055 = vmatprep.subr.mxu0 %v23453_v16 }
0x2d38   :  { %20048 = vmatmul.mubr.msk.f32.vlgmr.msra.gmra.mrb[128].mxu0 %vm190_vm1, %v11193_v12 }
0x2d39   :  { %20056 = vmatpush3.msra.mxu0 %v22616_v33  ;;  %20057 = vmatprep.mubr.msk.f32.mxu0 %vm21074_vm0, %v23453_v16 }
0x2d3a   :  { %20065 = vmatprep.subr.mxu0 %v23453_v16 }
0x2d3c   :  { %20058 = vmatmul.mubr.msk.f32.vlgmr.msra.gmra.mrb[130].mxu0 %vm190_vm1, %v11193_v12 }
0x2d3d   :  { %20066 = vmatpush3.msra.mxu0 %v22624_v0  ;;  %20067 = vmatprep.mubr.msk.f32.mxu0 %vm21074_vm0, %v23453_v16 }
0x2d3e   :  { %20075 = vmatprep.subr.mxu0 %v23453_v16 }
0x2d40   :  { %20068 = vmatmul.mubr.msk.f32.vlgmr.msra.gmra.mrb[132].mxu0 %vm190_vm1, %v11193_v12  ;;  %v9578_v12 = vadd.f32 %v22361_v62, %v22367_v45 }
0x2d41   :  { %20076 = vmatpush3.msra.mxu0 %v22632_v10  ;;  %20077 = vmatprep.mubr.msk.f32.mxu0 %vm21074_vm0, %v23453_v16 }
0x2d42   :  { %20085 = vmatprep.subr.mxu0 %v23453_v16  ;;  %v18566_v59 = vmul.f32 -1.442695, %v9578_v12  ;;  %v22718_v12 = vld [vmem:[%s23445_s23 + $0x4] sm:$0xf] }
0x2d44   :  { %20078 = vmatmul.mubr.msk.f32.vlgmr.msra.gmra.mrb[134].mxu0 %vm190_vm1, %v22423_v57  ;;  %20775 = vpow2.f32 %v18566_v59 }
0x2d45   :  { %20086 = vmatpush3.msra.mxu0 %v22641_v4  ;;  %20087 = vmatprep.mubr.msk.f32.mxu0 %vm21074_vm0, %v23453_v16 }
0x2d46   :  { %20095 = vmatprep.subr.mxu0 %v23453_v16 }
0x2d48   :  { %20088 = vmatmul.mubr.msk.f32.vlgmr.msra.gmra.mrb[136].mxu0 %vm190_vm1, %v22423_v57 }
0x2d49   :  { %20097 = vmatprep.mubr.msk.f32.mxu0 %vm21074_vm0, %v23453_v16 }
0x2e07   :  { %v11484_v35 = vpop.f32.mrb[126].mxu0 }
0x2e08   :  { %v20044_v48 = vpop.f32.mrb[127].mxu0  ;;  %20053 = vmatmul.mubr.msk.f32.vlgmr.msra.gmra.mrb[132].mxu1 %vm190_vm1, %v11484_v35 }
0x2e09   :  { %20061 = vmatpush3.msra.mxu1 %v22653_v9  ;;  %20062 = vmatprep.mubr.msk.f32.mxu1 %vm21074_vm0, %v23453_v16 }
0x2e0a   :  { %20070 = vmatprep.subr.mxu1 %v23453_v16 }
0x2e0b   :  { %v11557_v47 = vpop.f32.mrb[128].mxu0 }
0x2e0c   :  { %v20049_v37 = vpop.f32.mrb[129].mxu0  ;;  %20063 = vmatmul.mubr.msk.f32.vlgmr.msra.gmra.mrb[134].mxu1 %vm190_vm1, %v11484_v35 }
0x2e0d   :  { %20071 = vmatpush3.msra.mxu1 %v22661_v56  ;;  %20072 = vmatprep.mubr.msk.f32.mxu1 %vm21074_vm0, %v23453_v16 }
0x2e0e   :  { %20080 = vmatprep.subr.mxu1 %v23453_v16 }
0x2e0f   :  { %v11701_v55 = vpop.f32.mrb[130].mxu0 }
0x2e10   :  { %v20059_v19 = vpop.f32.mrb[131].mxu0  ;;  %20073 = vmatmul.mubr.msk.f32.vlgmr.msra.gmra.mrb[136].mxu1 %vm190_vm1, %v11484_v35 }
0x2e11   :  { %20081 = vmatpush3.msra.mxu1 %v22669_v60  ;;  %20082 = vmatprep.mubr.msk.f32.mxu1 %vm21074_vm0, %v23453_v16  ;;  %v22701_v19 = vld [vmem:[%s23444_s22 + $0x1] ss:$0 sm:$0xff] }
0x2e12   :  { %20090 = vmatprep.subr.mxu1 %v23453_v16 }
0x2e13   :  { %v11842_v38 = vpop.f32.mrb[132].mxu0 }
0x2e14   :  { %v20069_v20 = vpop.f32.mrb[133].mxu0  ;;  %20083 = vmatmul.mubr.msk.f32.vlgmr.msra.gmra.mrb[138].mxu1 %vm190_vm1, %v22423_v57 }
0x2e15   :  { %20091 = vmatpush3.msra.mxu1 %v22632_v10  ;;  %20092 = vmatprep.mubr.msk.f32.mxu1 %vm21074_vm0, %v23453_v16 }
0x2e16   :  { %20100 = vmatprep.subr.mxu1 %v23453_v16 }
0x2e17   :  { %v11986_v1 = vpop.f32.mrb[134].mxu0 }
0x2e18   :  { %v20079_v39 = vpop.f32.mrb[135].mxu0 }
0x2e1b   :  { %v12142_v31 = vpop.f32.mrb[136].mxu0 }
0x2e1c   :  { %v20089_v50 = vpop.f32.mrb[137].mxu0 }
0x2edb   :  { %v11630_v27 = vpop.f32.mrb[132].mxu1 }
0x2edc   :  { %v11631_v26 = vadd.f32 %v11630_v27, %v11557_v47  ;;  %v20054_v32 = vpop.f32.mrb[133].mxu1 }
0x2ede   :  { %v22685_v46 = vadd.f32 %v22682_v49, %v11631_v26 }
0x2edf   :  { %v11771_v34 = vpop.f32.mrb[134].mxu1 }
0x2ee0   :  { %v11772_v25 = vadd.f32 %v11771_v34, %v11701_v55  ;;  %v20064_v14 = vpop.f32.mrb[135].mxu1  ;;  %v11990_v13 = vadd.f32 %v11986_v1, %v22685_v46 }
0x2ee1   :  { %v18596_v14 = vld [vmem:[%s23446_s26 + $0xa] sm:$0x3] }
0x2ee2   :  { %v11775_v35 = vadd.f32 %v22695_v23, %v11772_v25  ;;  %v22708_v25 = vld [vmem:[%s23445_s23] sm:$0xf] }
0x2ee3   :  { %v11912_v7 = vpop.f32.mrb[136].mxu1 }
0x2ee4   :  { %v11913_v41 = vadd.f32 %v11912_v7, %v11842_v38  ;;  %v20074_v51 = vpop.f32.mrb[137].mxu1  ;;  %v20776_v38 = vpop.eup %20775  ;;  %v22736_v7 = vld [vmem:[%s23447_s28] sm:$0xff] }
0x2ee5   :  { %v9582_v20 = vadd.f32 1.0, %v20776_v38  ;;  %v22756_v51 = vld [vmem:[%s23444_s22] ss:$0 sm:$0xff] }
0x2ee6   :  { %v11916_v21 = vadd.f32 %v22691_v42, %v11913_v41  ;;  %v22745_v41 = vld [vmem:[%s23447_s28 + $0x10] sm:$0xff]  ;;  %v11991_v59 = vadd.f32 %v22756_v51, %v11990_v13 }
0x2ee7   :  { %v12064_v48 = vpop.f32.mrb[138].mxu1 }
0x2ee8   :  { %v22698_v47 = vadd.f32 %v12142_v31, %v11916_v21  ;;  %v12068_v37 = vadd.f32 %v12064_v48, %v11775_v35  ;;  %v20084_v55 = vpop.f32.mrb[139].mxu1  ;;  %v18618_v21 = vmul.f32 -1.442695, %v11991_v59 }
0x2eea   :  { %v12069_v62 = vadd.f32 %v22701_v19, %v12068_v37 }
0x2eec   :  { %v18620_v45 = vmul.f32 -1.442695, %v12069_v62 }
0x2eee   :  { %20777 = vpow2.f32 %v18620_v45 }
0x2eef   :  { %20779 = vtanh.f32 %v22423_v57 }
0x2ef0   :  { %20781 = vrcp.f32 %v9582_v20 }
0x2ef8   :  { %v20778_v1 = vpop.eup %20777 }
0x2ef9   :  { %v12073_v39 = vadd.f32 1.0, %v20778_v1  ;;  %v20780_v31 = vpop.eup %20779 }
0x2efa   :  { %v20782_v50 = vpop.eup %20781 }
0x2efb   :  { %20783 = vrcp.f32 %v12073_v39  ;;  %v9671_v27 = vmul.f32 %v20782_v50, %v20780_v31 }
0x2efc   :  { %20785 = vpow2.f32 %v18618_v21  ;;  %v22772_v21 = vld [vmem:[%s21089_s9 + $0x6] ss:$0 sm:$0xff] }
0x2f05   :  { %v20784_v26 = vpop.eup %20783 }
0x2f06   :  { %v12236_v32 = vmul.f32 %v20784_v26, %v9671_v27  ;;  %v12154_v34 = vmul.f32 %v20784_v26, %v22423_v57  ;;  %v22727_v57 = vld [vmem:[%s23445_s23 + $0x8] sm:$0xf]  ;;  %v20786_v39 = vpop.eup %20785 }
0x2f07   :  { %v11995_v50 = vadd.f32 1.0, %v20786_v39 }
0x2f08   :  { %20093 = vmatmul.mubr.msk.f32.vlgmr.msra.gmra.mrb[140].mxu1 %vm190_vm1, %v12154_v34 }
0x2f09   :  { %20101 = vmatpush3.msk.msra.mxu1 %vm1977_vm4, %v22708_v25  ;;  %20102 = vmatprep.mubr.msk.f32.mxu1 %vm21074_vm0, %v23453_v16 }
0x2f0a   :  { %20110 = vmatprep.subr.mxu1 %v23453_v16 }
0x2f0c   :  { %20103 = vmatmul.mubr.msk.f32.vlgmr.msra.gmra.mrb[142].mxu1 %vm1973_vm5, %v18596_v14 }
0x2f0d   :  { %20111 = vmatpush3.msk.msra.mxu1 %vm1977_vm4, %v22718_v12  ;;  %20112 = vmatprep.mubr.msk.f32.mxu1 %vm21074_vm0, %v23453_v16 }
0x2f0e   :  { %20120 = vmatprep.subr.mxu1 %v23453_v16 }
0x2f10   :  { %20113 = vmatmul.mubr.msk.f32.vlgmr.msra.gmra.mrb[144].mxu1 %vm1973_vm5, %v18596_v14 }
0x2f11   :  { %20121 = vmatpush3.msk.msra.mxu1 %vm1977_vm4, %v22727_v57  ;;  %20122 = vmatprep.mubr.msk.f32.mxu1 %vm21074_vm0, %v23453_v16 }
0x2f12   :  { %20130 = vmatprep.subr.mxu1 %v23453_v16 }
0x2f14   :  { %20123 = vmatmul.mubr.msk.f32.vlgmr.msra.gmra.mrb[146].mxu1 %vm1973_vm5, %v18596_v14 }
0x2f15   :  { %20131 = vmatpush3.msra.mxu1 %v22736_v7  ;;  %20132 = vmatprep.mubr.msk.f32.mxu1 %vm21074_vm0, %v23453_v16 }
0x2f16   :  { %20140 = vmatprep.subr.mxu1 %v23453_v16 }
0x2f18   :  { %20133 = vmatmul.mubr.msk.f32.vlgmr.msra.gmra.mrb[148].mxu1 %vm190_vm1, %v22503_v3 }
0x2f19   :  { %20141 = vmatpush3.msra.mxu1 %v22745_v41  ;;  %20142 = vmatprep.mubr.msk.f32.mxu1 %vm21074_vm0, %v23453_v16 }
0x2f1a   :  { %20155 = vmatprep.subr.mxu1 %v23453_v16 }
0x2f1c   :  { %20143 = vmatmul.mubr.msk.f32.vlgmr.msra.gmra.mrb[150].mxu1 %vm190_vm1, %v22503_v3 }
0x2f1d   :  { %20157 = vmatprep.mubr.msk.f32.mxu1 %vm21074_vm0, %v23453_v16 }
0x2fdb   :  { %v12224_v35 = vpop.f32.mrb[140].mxu1 }
0x2fdc   :  { %v12228_v48 = vadd.f32 %v12224_v35, %v22685_v46  ;;  %v20094_v37 = vpop.f32.mrb[141].mxu1 }
0x2fdd   :  { %v13173_v37 = vmul.f32 %v22772_v21, %v22501_v2  ;;  %v22790_v2 = vld [vmem:[%s23448_s1] sm:$0xff] }
0x2fde   :  { %v12229_v55 = vadd.f32 %v22756_v51, %v12228_v48 }
0x2fdf   :  { %v22761_v62 = vpop.f32.mrb[142].mxu1 }
0x2fe0   :  { %v18624_v45 = vmul.f32 -1.442695, %v12229_v55  ;;  %v20104_v38 = vpop.f32.mrb[143].mxu1 }
0x2fe1   :  { %v13174_v38 = vmul.f32 %v22426_v40, %v13173_v37  ;;  %v22836_v37 = vld [vmem:[%s23449_s2] ss:$0 sm:$0xff] }
0x2fe2   :  { %20787 = vpow2.f32 %v18624_v45 }
0x2fe3   :  { %v22763_v20 = vpop.f32.mrb[144].mxu1  ;;  %20789 = vrcp.f32 %v11995_v50  ;;  %v22805_v50 = vld [vmem:[%s23448_s1 + $0x8] sm:$0xff] }
0x2fe4   :  { %v20114_v1 = vpop.f32.mrb[145].mxu1 }
0x2fe7   :  { %v22765_v31 = vpop.f32.mrb[146].mxu1 }
0x2fe8   :  { %v20124_v13 = vpop.f32.mrb[147].mxu1 }
0x2feb   :  { %v22767_v27 = vpop.f32.mrb[148].mxu1 }
0x2fec   :  { %v20788_v46 = vpop.eup %20787  ;;  %v20134_v26 = vpop.f32.mrb[149].mxu1 }
0x2fed   :  { %v12233_v34 = vadd.f32 1.0, %v20788_v46  ;;  %v20790_v35 = vpop.eup %20789  ;;  %v22813_v46 = vld [vmem:[%s23448_s1 + $0x10] sm:$0xff] }
0x2fef   :  { %20791 = vrcp.f32 %v12233_v34  ;;  %v22769_v14 = vpop.f32.mrb[150].mxu1 }
0x2ff0   :  { %v20144_v59 = vpop.f32.mrb[151].mxu1 }
0x2ff9   :  { %v20792_v48 = vpop.eup %20791 }
0x2ffa   :  { %v12237_v55 = vmul.f32 %v20792_v48, %v20790_v35 }
0x2ffc   :  { %v22776_v45 = vadd.f32 %v12237_v55, %v12236_v32 }
0x2ffe   :  { %20096 = vmatpush3.msra.mxu0 %v22776_v45  ;;  %20156 = vmatpush3.msra.mxu1 %v22776_v45 }
0x2fff   :  { %20098 = vmatmul.mubr.msk.f32.vlgmr.msra.gmra.mrb[138].mxu0 %vm190_vm1, %v22581_v11  ;;  %20158 = vmatmul.mubr.msk.f32.vlgmr.msra.gmra.mrb[152].mxu1 %vm190_vm1, %v13174_v38 }
0x3000   :  { %20160 = vmatprep.subr.mxu1 %v23453_v16  ;;  %20162 = vmatprep.mubr.msk.f32.mxu1 %vm21074_vm0, %v23453_v16 }
0x3001   :  { %20161 = vmatpush3.msra.mxu1 %v22438_v15  ;;  %20105 = vmatprep.subr.mxu0 %v23453_v16 }
0x3002   :  { %20106 = vmatpush3.msra.mxu0 %v22790_v2  ;;  %20107 = vmatprep.mubr.msk.f32.mxu0 %vm21074_vm0, %v23453_v16 }
0x3003   :  { %20115 = vmatprep.subr.mxu0 %v23453_v16  ;;  %20170 = vmatprep.subr.mxu1 %v23453_v16 }
0x30d2   :  { %v12307_v32 = vpop.f32.mrb[138].mxu0  ;;  %v13251_v1 = vpop.f32.mrb[152].mxu1 }
0x30d3   :  { %v12311_v39 = vmul.f32 %v12307_v32, %v22596_v17  ;;  %v20099_v15 = vpop.f32.mrb[139].mxu0  ;;  %v20159_v13 = vpop.f32.mrb[153].mxu1  ;;  %20163 = vmatmul.mubr.msk.f32.vlgmr.msra.gmra.mrb[154].mxu1 %vm190_vm1, %v13251_v1 }
0x30d4   :  { %20171 = vmatpush3.msra.mxu1 %v22450_v24  ;;  %20172 = vmatprep.mubr.msk.f32.mxu1 %vm21074_vm0, %v23453_v16  ;;  %v22821_v24 = vld [vmem:[%s23447_s28 + $0x8] sm:$0xff]  ;;  %v10399_v15 = vadd.f32 %v22483_v43, %v22491_v28  ;;  %v22856_v43 = vld [vmem:[%s23450_s7 + $0x1] ss:$0 sm:$0xff] }
0x30d5   :  { %20108 = vmatmul.mubr.msk.f32.vlgmr.msra.gmra.mrb[140].mxu0 %vm190_vm1, %v12311_v39  ;;  %20185 = vmatprep.subr.mxu1 %v23453_v16 }
0x30d6   :  { %20116 = vmatpush3.msra.mxu0 %v22805_v50  ;;  %20117 = vmatprep.mubr.msk.f32.mxu0 %vm21074_vm0, %v23453_v16 }
0x30d7   :  { %20125 = vmatprep.subr.mxu0 %v23453_v16 }
0x30d9   :  { %20118 = vmatmul.mubr.msk.f32.vlgmr.msra.gmra.mrb[142].mxu0 %vm190_vm1, %v12311_v39 }
0x30da   :  { %20126 = vmatpush3.msra.mxu0 %v22813_v46  ;;  %20127 = vmatprep.mubr.msk.f32.mxu0 %vm21074_vm0, %v23453_v16 }
0x30db   :  { %20135 = vmatprep.subr.mxu0 %v23453_v16 }
0x30dd   :  { %20128 = vmatmul.mubr.msk.f32.vlgmr.msra.gmra.mrb[144].mxu0 %vm190_vm1, %v12311_v39 }
0x30de   :  { %20136 = vmatpush3.msra.mxu0 %v22821_v24  ;;  %20137 = vmatprep.mubr.msk.f32.mxu0 %vm21074_vm0, %v23453_v16 }
0x30df   :  { %20145 = vmatprep.subr.mxu0 %v23453_v16 }
0x30e1   :  { %20138 = vmatmul.mubr.msk.f32.vlgmr.msra.gmra.mrb[146].mxu0 %vm190_vm1, %v22503_v3 }
0x30e2   :  { %20146 = vmatpush3.msra.mxu0 %v22736_v7  ;;  %20147 = vmatprep.mubr.msk.f32.mxu0 %vm21074_vm0, %v23453_v16 }
0x31a6   :  { %v22832_v26 = vpop.f32.mrb[154].mxu1 }
0x31a7   :  { %v20164_v34 = vpop.f32.mrb[155].mxu1 }
0x31a8   :  { %v12454_v59 = vpop.f32.mrb[140].mxu0 }
0x31a9   :  { %v12455_v35 = vadd.f32 %v12454_v59, %v22761_v62  ;;  %v20109_v48 = vpop.f32.mrb[141].mxu0  ;;  %v18584_v62 = vmul.f32 -1.442695, %v10399_v15  ;;  %v22845_v59 = vld [vmem:[%s23449_s2 + $0x2] ss:$0 sm:$0xff] }
0x31ab   :  { %v12458_v55 = vadd.f32 %v22836_v37, %v12455_v35  ;;  %v22849_v35 = vld [vmem:[%s23449_s2 + $0x1] ss:$0 sm:$0xff]  ;;  %20793 = vpow2.f32 %v18584_v62 }
0x31ac   :  { %v12595_v38 = vpop.f32.mrb[142].mxu0 }
0x31ad   :  { %v12596_v32 = vadd.f32 %v12595_v38, %v22763_v20  ;;  %v20119_v1 = vpop.f32.mrb[143].mxu0  ;;  %v12811_v39 = vadd.f32 %v22767_v27, %v12458_v55 }
0x31af   :  { %v12599_v20 = vadd.f32 %v22849_v35, %v12596_v32 }
0x31b0   :  { %v12736_v13 = vpop.f32.mrb[144].mxu0 }
0x31b1   :  { %v12737_v34 = vadd.f32 %v12736_v13, %v22765_v31  ;;  %v20129_v17 = vpop.f32.mrb[145].mxu0 }
0x31b3   :  { %v12740_v48 = vadd.f32 %v22845_v59, %v12737_v34 }
0x31b4   :  { %v12885_v38 = vpop.f32.mrb[146].mxu0 }
0x31b5   :  { %v22853_v1 = vadd.f32 %v22769_v14, %v12740_v48  ;;  %v12889_v27 = vadd.f32 %v12885_v38, %v12599_v20  ;;  %v20139_v22 = vpop.f32.mrb[147].mxu0  ;;  %v20794_v31 = vpop.eup %20793  ;;  %v18643_v38 = vld [vmem:[%s23451_s10 + $0x40] sm:$0xff] }
0x31b6   :  { %v10403_v15 = vadd.f32 1.0, %v20794_v31 }
0x31b7   :  { %v12890_v28 = vadd.f32 %v22856_v43, %v12889_v27  ;;  %v22865_v27 = vld [vmem:[%s23450_s7] ss:$0 sm:$0xff] }
0x31b9   :  { %v18638_v17 = vmul.f32 -1.442695, %v12890_v28  ;;  %v12812_v28 = vadd.f32 %v22865_v27, %v12811_v39  ;;  %v22869_v39 = vpop.permute.xlu1 %13177 }
0x31bb   :  { %20795 = vpow2.f32 %v18638_v17  ;;  %v18636_v17 = vmul.f32 -1.442695, %v12812_v28 }
0x31bc   :  { %20797 = vtanh.f32 %v22503_v3 }
0x31bd   :  { %20799 = vrcp.f32 %v10403_v15 }
0x31c5   :  { %v20796_v32 = vpop.eup %20795 }
0x31c6   :  { %v12894_v13 = vadd.f32 1.0, %v20796_v32  ;;  %v20798_v14 = vpop.eup %20797 }
0x31c7   :  { %v20800_v34 = vpop.eup %20799 }
0x31c8   :  { %20801 = vrcp.f32 %v12894_v13  ;;  %v10492_v22 = vmul.f32 %v20800_v34, %v20798_v14 }
0x31c9   :  { %20803 = vpow2.f32 %v18636_v17  ;;  %v13180_v17 = vmul.f32 %v22419_v36, %v22869_v39 }
0x31d2   :  { %v20802_v62 = vpop.eup %20801 }
0x31d3   :  { %v13057_v48 = vmul.f32 %v20802_v62, %v10492_v22  ;;  %v12975_v20 = vmul.f32 %v20802_v62, %v22503_v3  ;;  %v20804_v3 = vpop.eup %20803 }
0x31d4   :  { %v12816_v34 = vadd.f32 1.0, %v20804_v3 }
0x31d5   :  { %20148 = vmatmul.mubr.msk.f32.vlgmr.msra.gmra.mrb[148].mxu0 %vm190_vm1, %v12975_v20 }
0x31d6   :  { %20152 = vmatprep.mubr.msk.f32.mxu0 %vm1009_vm3, %v18643_v38 }
0x32a8   :  { %v13045_v31 = vpop.f32.mrb[148].mxu0 }
0x32a9   :  { %v13049_v15 = vadd.f32 %v13045_v31, %v12458_v55  ;;  %v20149_v32 = vpop.f32.mrb[149].mxu0  ;;  %v18644_v55 = vld [vmem:[%s23451_s10 + $0x48] sm:$0x3f] }
0x32ab   :  { %v13050_v13 = vadd.f32 %v22865_v27, %v13049_v15  ;;  %v13325_v15 = vadd.f32 %v22540_v63, %v22832_v26 }
0x32ad   :  { %v18642_v14 = vmul.f32 -1.442695, %v13050_v13 }
0x32af   :  { %20805 = vpow2.f32 %v18642_v14 }
0x32b0   :  { %20807 = vrcp.f32 %v12816_v34 }
0x32b9   :  { %v20806_v22 = vpop.eup %20805 }
0x32ba   :  { %v13054_v62 = vadd.f32 1.0, %v20806_v22  ;;  %v20808_v20 = vpop.eup %20807 }
0x32bc   :  { %20809 = vrcp.f32 %v13054_v62 }
0x32c6   :  { %v20810_v38 = vpop.eup %20809 }
0x32c7   :  { %v13058_v52 = vmul.f32 %v20810_v38, %v20808_v20 }
0x32c9   :  { %v22871_v28 = vadd.f32 %v13058_v52, %v13057_v48  ;;  %v13181_v52 = vmul.f32 %v22426_v40, %v13180_v17 }
0x32cb   :  { %20150 = vmatprep.subr.msk.mxu0 %vm1013_vm2, %v22871_v28 }
0x32cc   :  { %20151 = vmatpush3.msk.msra.mxu0 %vm1013_vm2, %v22871_v28 }
0x32cd   :  { %20153 = vmatmul.mubr.msk.f32.vlgmr.msra.gmra.mrb[58].mxu0 %vm1009_vm3, %v18644_v55  ;;  %20165 = vmatprep.subr.mxu0 %v23453_v16 }
0x32ce   :  { %20166 = vmatpush3.msra.mxu0 %v22776_v45  ;;  %20167 = vmatprep.mubr.msk.f32.mxu0 %vm21074_vm0, %v23453_v16 }
0x32cf   :  { %20175 = vmatprep.subr.mxu0 %v23453_v16 }
0x32d1   :  { %20168 = vmatmul.mubr.msk.f32.vlgmr.msra.gmra.mrb[150].mxu0 %vm190_vm1, %v13181_v52 }
0x32d2   :  { %20176 = vmatpush3.msra.mxu0 %v22521_v44  ;;  %20177 = vmatprep.mubr.msk.f32.mxu0 %vm21074_vm0, %v23453_v16 }
0x32d3   :  { %20180 = vmatprep.subr.mxu0 %v23453_v16 }
0x33a4   :  { %v13398_v36 = vpop.f32.mrb[150].mxu0 }
0x33a5   :  { %v20169_v48 = vpop.f32.mrb[151].mxu0  ;;  %20173 = vmatmul.mubr.msk.f32.vlgmr.msra.gmra.mrb[156].mxu1 %vm190_vm1, %v13398_v36 }
0x33a6   :  { %20186 = vmatpush3.msra.mxu1 %v22529_v61  ;;  %20187 = vmatprep.mubr.msk.f32.mxu1 %vm21074_vm0, %v23453_v16 }
0x33a7   :  { %20190 = vmatprep.subr.mxu1 %v23453_v16 }
0x3478   :  { %v13471_v40 = vpop.f32.mrb[156].mxu1 }
0x3479   :  { %v13472_v31 = vadd.f32 %v22536_v29, %v13471_v40  ;;  %v20174_v44 = vpop.f32.mrb[157].mxu1 }
0x347a   :  { %v22994_v44 = vld [vmem:[%s23444_s22 + $0x2] ss:$0 sm:$0xff] }
0x347b   :  { %20811 = vtanh.f32 %v13472_v31 }
0x347c   :  { %20813 = vtanh.f32 %v13325_v15 }
0x3485   :  { %v20812_v32 = vpop.eup %20811 }
0x3486   :  { %20178 = vmatmul.mubr.msk.f32.vlgmr.msra.gmra.mrb[152].mxu0 %vm190_vm1, %v20812_v32  ;;  %20188 = vmatmul.mubr.msk.f32.vlgmr.msra.gmra.mrb[158].mxu1 %vm190_vm1, %v20812_v32  ;;  %v20814_v61 = vpop.eup %20813 }
0x3487   :  { %20181 = vmatpush3.msra.mxu0 %v22547_v54  ;;  %20191 = vmatpush3.msra.mxu1 %v22551_v58 }
0x3488   :  { %20182 = vmatprep.mubr.msk.f32.mxu0 %vm21074_vm0, %v23453_v16  ;;  %20192 = vmatprep.mubr.msk.f32.mxu1 %vm21074_vm0, %v23453_v16 }
0x3489   :  { %20200 = vmatprep.subr.mxu1 %v23453_v16  ;;  %20195 = vmatprep.subr.mxu0 %v23453_v16 }
0x348e   :  { %20183 = vmatmul.mubr.msk.f32.vlgmr.msra.gmra.mrb[152].mxu0 %vm190_vm1, %v20814_v61  ;;  %20193 = vmatmul.mubr.msk.f32.vlgmr.msra.gmra.mrb[158].mxu1 %vm190_vm1, %v20814_v61 }
0x348f   :  { %20201 = vmatpush3.msra.mxu1 %v22563_v30  ;;  %20202 = vmatprep.mubr.msk.f32.mxu1 %vm21074_vm0, %v23453_v16 }
0x3490   :  { %20197 = vmatprep.mubr.msk.f32.mxu0 %vm21074_vm0, %v23453_v16  ;;  %20205 = vmatprep.subr.mxu1 %v23453_v16 }
0x3492   :  { %20203 = vmatmul.mubr.msk.f32.vlgmr.msra.gmra.mrb[160].mxu1 %vm190_vm1, %v22871_v28 }
0x3493   :  { %20206 = vmatpush3.msra.mxu1 %v22574_v6  ;;  %20207 = vmatprep.mubr.msk.f32.mxu1 %vm21074_vm0, %v23453_v16 }
0x3494   :  { %20220 = vmatprep.subr.mxu1 %v23453_v16 }
0x3561   :  { %v13618_v29 = vpop.f32.mrb[152].mxu0  ;;  %v13758_v63 = vpop.f32.mrb[158].mxu1 }
0x3562   :  { %v13762_v54 = vmax.f32 %v13618_v29, %v13758_v63  ;;  %v20184_v58 = vpop.f32.mrb[153].mxu0  ;;  %v20194_v30 = vpop.f32.mrb[159].mxu1 }
0x3564   :  { %20196 = vmatpush3.msra.mxu0 %v13762_v54 }
0x3565   :  { %20198 = vmatmul.mubr.msk.f32.vlgmr.msra.gmra.mrb[154].mxu0 %vm190_vm1, %v22581_v11  ;;  %20210 = vmatprep.subr.mxu0 %v23453_v16 }
0x3566   :  { %20212 = vmatprep.mubr.msk.f32.mxu0 %vm21074_vm0, %v23453_v16 }
0x3638   :  { %v13829_v6 = vpop.f32.mrb[154].mxu0 }
0x3639   :  { %v20199_v26 = vpop.f32.mrb[155].mxu0  ;;  %20208 = vmatmul.mubr.msk.f32.vlgmr.msra.gmra.mrb[160].mxu1 %vm190_vm1, %v13829_v6 }
0x363a   :  { %20221 = vmatpush3.msra.mxu1 %v22590_v53  ;;  %20222 = vmatprep.mubr.msk.f32.mxu1 %vm21074_vm0, %v23453_v16 }
0x363b   :  { %20230 = vmatprep.subr.mxu1 %v23453_v16 }
0x370c   :  { %v13974_v13 = vpop.f32.mrb[160].mxu1 }
0x370d   :  { %13980 = vperm.xlu0 %20621, %v13974_v13   ;;  %v20209_v14 = vpop.f32.mrb[161].mxu1 }
0x378c   :  { %v22934_v3 = vpop.permute.xlu0 %13980 }
0x378d   :  { %v13983_v34 = vmul.f32 %v22934_v3, %v22871_v28 }
0x378f   :  { %20211 = vmatpush3.msk.msra.mxu0 %vm1013_vm2, %v13983_v34 }
0x3790   :  { %20213 = vmatmul.mubr.msk.f32.vlgmr.msra.gmra.mrb[156].mxu0 %vm1009_vm3, %v22602_v5  ;;  %20215 = vmatprep.subr.mxu0 %v23453_v16 }
0x3791   :  { %20216 = vmatpush3.msra.mxu0 %v22608_v8  ;;  %20217 = vmatprep.mubr.msk.f32.mxu0 %vm21074_vm0, %v23453_v16 }
0x3792   :  { %20225 = vmatprep.subr.mxu0 %v23453_v16 }
0x3794   :  { %20218 = vmatmul.mubr.msk.f32.vlgmr.msra.gmra.mrb[158].mxu0 %vm190_vm1, %v13762_v54 }
0x3795   :  { %20226 = vmatpush3.msra.mxu0 %v22616_v33  ;;  %20227 = vmatprep.mubr.msk.f32.mxu0 %vm21074_vm0, %v23453_v16 }
0x3796   :  { %20235 = vmatprep.subr.mxu0 %v23453_v16 }
0x3798   :  { %20228 = vmatmul.mubr.msk.f32.vlgmr.msra.gmra.mrb[160].mxu0 %vm190_vm1, %v13762_v54 }
0x3799   :  { %20236 = vmatpush3.msra.mxu0 %v22624_v0  ;;  %20237 = vmatprep.mubr.msk.f32.mxu0 %vm21074_vm0, %v23453_v16 }
0x379a   :  { %20245 = vmatprep.subr.mxu0 %v23453_v16 }
0x379c   :  { %20238 = vmatmul.mubr.msk.f32.vlgmr.msra.gmra.mrb[162].mxu0 %vm190_vm1, %v13762_v54 }
0x379d   :  { %20246 = vmatpush3.msra.mxu0 %v22632_v10  ;;  %20247 = vmatprep.mubr.msk.f32.mxu0 %vm21074_vm0, %v23453_v16 }
0x379e   :  { %20255 = vmatprep.subr.mxu0 %v23453_v16 }
0x37a0   :  { %20248 = vmatmul.mubr.msk.f32.vlgmr.msra.gmra.mrb[164].mxu0 %vm190_vm1, %v22776_v45 }
0x37a1   :  { %20256 = vmatpush3.msra.mxu0 %v22641_v4  ;;  %20257 = vmatprep.mubr.msk.f32.mxu0 %vm21074_vm0, %v23453_v16 }
0x37a2   :  { %20265 = vmatprep.subr.mxu0 %v23453_v16 }
0x37a4   :  { %20258 = vmatmul.mubr.msk.f32.vlgmr.msra.gmra.mrb[166].mxu0 %vm190_vm1, %v22776_v45 }
0x37a5   :  { %20267 = vmatprep.mubr.msk.f32.mxu0 %vm21074_vm0, %v23453_v16 }
0x3863   :  { %v14053_v53 = vpop.f32.mrb[156].mxu0 }
0x3864   :  { %v20214_v5 = vpop.f32.mrb[157].mxu0  ;;  %20223 = vmatmul.mubr.msk.f32.vlgmr.msra.gmra.mrb[162].mxu1 %vm190_vm1, %v14053_v53 }
0x3865   :  { %20231 = vmatpush3.msra.mxu1 %v22653_v9  ;;  %20232 = vmatprep.mubr.msk.f32.mxu1 %vm21074_vm0, %v23453_v16 }
0x3866   :  { %20240 = vmatprep.subr.mxu1 %v23453_v16 }
0x3867   :  { %v14126_v8 = vpop.f32.mrb[158].mxu0 }
0x3868   :  { %v20219_v33 = vpop.f32.mrb[159].mxu0  ;;  %20233 = vmatmul.mubr.msk.f32.vlgmr.msra.gmra.mrb[164].mxu1 %vm190_vm1, %v14053_v53 }
0x3869   :  { %20241 = vmatpush3.msra.mxu1 %v22661_v56  ;;  %20242 = vmatprep.mubr.msk.f32.mxu1 %vm21074_vm0, %v23453_v16 }
0x386a   :  { %20250 = vmatprep.subr.mxu1 %v23453_v16 }
0x386b   :  { %v14270_v0 = vpop.f32.mrb[160].mxu0 }
0x386c   :  { %v20229_v4 = vpop.f32.mrb[161].mxu0  ;;  %20243 = vmatmul.mubr.msk.f32.vlgmr.msra.gmra.mrb[166].mxu1 %vm190_vm1, %v14053_v53 }
0x386d   :  { %20251 = vmatpush3.msra.mxu1 %v22669_v60  ;;  %20252 = vmatprep.mubr.msk.f32.mxu1 %vm21074_vm0, %v23453_v16 }
0x386e   :  { %20260 = vmatprep.subr.mxu1 %v23453_v16 }
0x386f   :  { %v14411_v9 = vpop.f32.mrb[162].mxu0 }
0x3870   :  { %v20239_v22 = vpop.f32.mrb[163].mxu0  ;;  %20253 = vmatmul.mubr.msk.f32.vlgmr.msra.gmra.mrb[168].mxu1 %vm190_vm1, %v22776_v45 }
0x3871   :  { %20261 = vmatpush3.msra.mxu1 %v22632_v10  ;;  %20262 = vmatprep.mubr.msk.f32.mxu1 %vm21074_vm0, %v23453_v16  ;;  %v12147_v10 = vadd.f32 %v22994_v44, %v22698_v47 }
0x3872   :  { %20270 = vmatprep.subr.mxu1 %v23453_v16 }
0x3873   :  { %v14555_v56 = vpop.f32.mrb[164].mxu0  ;;  %v18622_v29 = vmul.f32 -1.442695, %v12147_v10  ;;  %v18709_v10 = vld [vmem:[%s21089_s9 + $0x7] ss:$0 sm:$0xff]  ;;  %s23456_s9 = sld [smem:[#allocation9_spill]] }
0x3874   :  { %v20249_v60 = vpop.f32.mrb[165].mxu0 }
0x3875   :  { %20815 = vpow2.f32 %v18622_v29 }
0x3877   :  { %v14711_v62 = vpop.f32.mrb[166].mxu0 }
0x3878   :  { %v20259_v20 = vpop.f32.mrb[167].mxu0 }
0x387f   :  { %v20816_v14 = vpop.eup %20815 }
0x3880   :  { %v12151_v47 = vadd.f32 1.0, %v20816_v14  ;;  %v20982_v14 = vld [vmem:[%s21139_s24] sm:$0xff] }
0x3937   :  { %v14199_v38 = vpop.f32.mrb[162].mxu1 }
0x3938   :  { %v14200_v55 = vadd.f32 %v14199_v38, %v14126_v8  ;;  %v20224_v17 = vpop.f32.mrb[163].mxu1 }
0x393a   :  { %v14203_v52 = vadd.f32 %v22682_v49, %v14200_v55 }
0x393b   :  { %v14340_v36 = vpop.f32.mrb[164].mxu1 }
0x393c   :  { %v14341_v48 = vadd.f32 %v14340_v36, %v14270_v0  ;;  %v20234_v40 = vpop.f32.mrb[165].mxu1  ;;  %v14559_v31 = vadd.f32 %v14555_v56, %v14203_v52 }
0x393e   :  { %v14344_v54 = vadd.f32 %v22695_v23, %v14341_v48 }
0x393f   :  { %v14481_v15 = vpop.f32.mrb[166].mxu1 }
0x3940   :  { %v14482_v32 = vadd.f32 %v14481_v15, %v14411_v9  ;;  %v20244_v61 = vpop.f32.mrb[167].mxu1 }
0x3941   :  { %v15742_v61 = vmul.f32 %v18709_v10, %v22869_v39  ;;  %v20981_v39 = vld [vmem:[%s21129_s14] sm:$0xff] }
0x3942   :  { %v14485_v63 = vadd.f32 %v22691_v42, %v14482_v32 }
0x3943   :  { %v14633_v58 = vpop.f32.mrb[168].mxu1 }
0x3944   :  { %v23000_v30 = vadd.f32 %v14711_v62, %v14485_v63  ;;  %v14637_v49 = vadd.f32 %v14633_v58, %v14344_v54  ;;  %v20254_v6 = vpop.f32.mrb[169].mxu1  ;;  %v23056_v54 = vld [vmem:[%s21104_s21] sm:$0xff]  ;;  %s23461_s21 = sld [smem:[#allocation20_spill]] }
0x3945   :  { %v15743_v58 = vmul.f32 %v23056_v54, %v15742_v61 }
0x3946   :  { %v14638_v26 = vadd.f32 %v22701_v19, %v14637_v49  ;;  %v18652_v19 = vld [vmem:[%s23446_s26 + $0xc] sm:$0x3] }
0x3948   :  { %v18676_v13 = vmul.f32 -1.442695, %v14638_v26 }
0x394a   :  { %20817 = vpow2.f32 %v18676_v13 }
0x394b   :  { %20819 = vtanh.f32 %v22776_v45 }
0x394c   :  { %20821 = vrcp.f32 %v12151_v47 }
0x3954   :  { %v20818_v34 = vpop.eup %20817 }
0x3955   :  { %v14642_v42 = vadd.f32 1.0, %v20818_v34  ;;  %v20820_v23 = vpop.eup %20819 }
0x3956   :  { %v20822_v53 = vpop.eup %20821 }
0x3957   :  { %20823 = vrcp.f32 %v14642_v42  ;;  %v12240_v5 = vmul.f32 %v20822_v53, %v20820_v23 }
0x3961   :  { %v20824_v8 = vpop.eup %20823 }
0x3962   :  { %v14805_v33 = vmul.f32 %v20824_v8, %v12240_v5  ;;  %v14723_v0 = vmul.f32 %v20824_v8, %v22776_v45  ;;  %v23107_v8 = vld [vmem:[%s23450_s7 + $0x2] ss:$0 sm:$0xff] }
0x3964   :  { %20263 = vmatmul.mubr.msk.f32.vlgmr.msra.gmra.mrb[170].mxu1 %vm190_vm1, %v14723_v0 }
0x3965   :  { %20271 = vmatpush3.msk.msra.mxu1 %vm1977_vm4, %v22708_v25  ;;  %20272 = vmatprep.mubr.msk.f32.mxu1 %vm21074_vm0, %v23453_v16  ;;  %v14560_v25 = vadd.f32 %v22756_v51, %v14559_v31 }
0x3966   :  { %20280 = vmatprep.subr.mxu1 %v23453_v16 }
0x3968   :  { %20273 = vmatmul.mubr.msk.f32.vlgmr.msra.gmra.mrb[172].mxu1 %vm1973_vm5, %v18652_v19 }
0x3969   :  { %20281 = vmatpush3.msk.msra.mxu1 %vm1977_vm4, %v22718_v12  ;;  %20282 = vmatprep.mubr.msk.f32.mxu1 %vm21074_vm0, %v23453_v16  ;;  %v18674_v12 = vmul.f32 -1.442695, %v14560_v25 }
0x396a   :  { %20290 = vmatprep.subr.mxu1 %v23453_v16 }
0x396b   :  { %20825 = vpow2.f32 %v18674_v12 }
0x396c   :  { %20283 = vmatmul.mubr.msk.f32.vlgmr.msra.gmra.mrb[174].mxu1 %vm1973_vm5, %v18652_v19 }
0x396d   :  { %20291 = vmatpush3.msk.msra.mxu1 %vm1977_vm4, %v22727_v57  ;;  %20292 = vmatprep.mubr.msk.f32.mxu1 %vm21074_vm0, %v23453_v16 }
0x396e   :  { %20300 = vmatprep.subr.mxu1 %v23453_v16 }
0x3970   :  { %20293 = vmatmul.mubr.msk.f32.vlgmr.msra.gmra.mrb[176].mxu1 %vm1973_vm5, %v18652_v19 }
0x3971   :  { %20301 = vmatpush3.msra.mxu1 %v22736_v7  ;;  %20302 = vmatprep.mubr.msk.f32.mxu1 %vm21074_vm0, %v23453_v16 }
0x3972   :  { %20310 = vmatprep.subr.mxu1 %v23453_v16 }
0x3974   :  { %20303 = vmatmul.mubr.msk.f32.vlgmr.msra.gmra.mrb[178].mxu1 %vm190_vm1, %v22871_v28 }
0x3975   :  { %20311 = vmatpush3.msra.mxu1 %v22745_v41  ;;  %20312 = vmatprep.mubr.msk.f32.mxu1 %vm21074_vm0, %v23453_v16  ;;  %v20826_v20 = vpop.eup %20825 }
0x3976   :  { %20325 = vmatprep.subr.mxu1 %v23453_v16  ;;  %v14564_v17 = vadd.f32 1.0, %v20826_v20 }
0x3978   :  { %20313 = vmatmul.mubr.msk.f32.vlgmr.msra.gmra.mrb[180].mxu1 %vm190_vm1, %v22871_v28 }
0x3979   :  { %20327 = vmatprep.mubr.msk.f32.mxu1 %vm21074_vm0, %v23453_v16 }
0x3a37   :  { %v14793_v57 = vpop.f32.mrb[170].mxu1 }
0x3a38   :  { %v14797_v45 = vadd.f32 %v14793_v57, %v14203_v52  ;;  %v20264_v4 = vpop.f32.mrb[171].mxu1 }
0x3a3a   :  { %v14798_v41 = vadd.f32 %v22756_v51, %v14797_v45 }
0x3a3b   :  { %v23041_v9 = vpop.f32.mrb[172].mxu1 }
0x3a3c   :  { %v18680_v22 = vmul.f32 -1.442695, %v14798_v41  ;;  %v20274_v56 = vpop.f32.mrb[173].mxu1 }
0x3a3e   :  { %20827 = vpow2.f32 %v18680_v22 }
0x3a3f   :  { %v23043_v60 = vpop.f32.mrb[174].mxu1  ;;  %20829 = vrcp.f32 %v14564_v17 }
0x3a40   :  { %v20284_v62 = vpop.f32.mrb[175].mxu1 }
0x3a43   :  { %v23045_v38 = vpop.f32.mrb[176].mxu1 }
0x3a44   :  { %v20294_v55 = vpop.f32.mrb[177].mxu1 }
0x3a47   :  { %v23047_v52 = vpop.f32.mrb[178].mxu1 }
0x3a48   :  { %v20828_v36 = vpop.eup %20827  ;;  %v20304_v48 = vpop.f32.mrb[179].mxu1 }
0x3a49   :  { %v14802_v51 = vadd.f32 1.0, %v20828_v36  ;;  %v20830_v15 = vpop.eup %20829 }
0x3a4b   :  { %20831 = vrcp.f32 %v14802_v51  ;;  %v23049_v40 = vpop.f32.mrb[180].mxu1 }
0x3a4c   :  { %v20314_v31 = vpop.f32.mrb[181].mxu1 }
0x3a55   :  { %v20832_v32 = vpop.eup %20831 }
0x3a56   :  { %v14806_v29 = vmul.f32 %v20832_v32, %v20830_v15 }
0x3a58   :  { %v23053_v63 = vadd.f32 %v14806_v29, %v14805_v33 }
0x3a5a   :  { %20266 = vmatpush3.msra.mxu0 %v23053_v63  ;;  %20326 = vmatpush3.msra.mxu1 %v23053_v63 }
0x3a5b   :  { %20268 = vmatmul.mubr.msk.f32.vlgmr.msra.gmra.mrb[168].mxu0 %vm190_vm1, %v22581_v11  ;;  %20328 = vmatmul.mubr.msk.f32.vlgmr.msra.gmra.mrb[182].mxu1 %vm190_vm1, %v15743_v58 }
0x3a5c   :  { %20330 = vmatprep.subr.mxu1 %v23453_v16  ;;  %20332 = vmatprep.mubr.msk.f32.mxu1 %vm21074_vm0, %v23453_v16 }
0x3a5d   :  { %20331 = vmatpush3.msra.mxu1 %v20981_v39  ;;  %20275 = vmatprep.subr.mxu0 %v23453_v16 }
0x3a5e   :  { %20276 = vmatpush3.msra.mxu0 %v22790_v2  ;;  %20277 = vmatprep.mubr.msk.f32.mxu0 %vm21074_vm0, %v23453_v16 }
0x3a5f   :  { %20285 = vmatprep.subr.mxu0 %v23453_v16  ;;  %20340 = vmatprep.subr.mxu1 %v23453_v16 }
0x3b2e   :  { %v14876_v11 = vpop.f32.mrb[168].mxu0  ;;  %v15820_v49 = vpop.f32.mrb[182].mxu1 }
0x3b2f   :  { %v14880_v6 = vmul.f32 %v14876_v11, %v22934_v3  ;;  %v20269_v26 = vpop.f32.mrb[169].mxu0  ;;  %v20329_v13 = vpop.f32.mrb[183].mxu1  ;;  %20333 = vmatmul.mubr.msk.f32.vlgmr.msra.gmra.mrb[184].mxu1 %vm190_vm1, %v15820_v49 }
0x3b30   :  { %20341 = vmatpush3.msra.mxu1 %v20982_v14  ;;  %20342 = vmatprep.mubr.msk.f32.mxu1 %vm21074_vm0, %v23453_v16  ;;  %v15747_v11 = vpop.permute.xlu1 %15746 }
0x3b31   :  { %20278 = vmatmul.mubr.msk.f32.vlgmr.msra.gmra.mrb[170].mxu0 %vm190_vm1, %v14880_v6  ;;  %20355 = vmatprep.subr.mxu1 %v23453_v16  ;;  %v15749_v26 = vmul.f32 %v22772_v21, %v15747_v11  ;;  %v20984_v21 = vld [vmem:[%s21154_s12] sm:$0xff] }
0x3b32   :  { %20286 = vmatpush3.msra.mxu0 %v22805_v50  ;;  %20287 = vmatprep.mubr.msk.f32.mxu0 %vm21074_vm0, %v23453_v16 }
0x3b33   :  { %20295 = vmatprep.subr.mxu0 %v23453_v16 }
0x3b35   :  { %20288 = vmatmul.mubr.msk.f32.vlgmr.msra.gmra.mrb[172].mxu0 %vm190_vm1, %v14880_v6 }
0x3b36   :  { %20296 = vmatpush3.msra.mxu0 %v22813_v46  ;;  %20297 = vmatprep.mubr.msk.f32.mxu0 %vm21074_vm0, %v23453_v16 }
0x3b37   :  { %20305 = vmatprep.subr.mxu0 %v23453_v16 }
0x3b39   :  { %20298 = vmatmul.mubr.msk.f32.vlgmr.msra.gmra.mrb[174].mxu0 %vm190_vm1, %v14880_v6  ;;  %v18700_v6 = vld [vmem:[%s23451_s10 + $0x58] sm:$0x3f] }
0x3b3a   :  { %20306 = vmatpush3.msra.mxu0 %v22821_v24  ;;  %20307 = vmatprep.mubr.msk.f32.mxu0 %vm21074_vm0, %v23453_v16 }
0x3b3b   :  { %20315 = vmatprep.subr.mxu0 %v23453_v16 }
0x3b3d   :  { %20308 = vmatmul.mubr.msk.f32.vlgmr.msra.gmra.mrb[176].mxu0 %vm190_vm1, %v22871_v28 }
0x3b3e   :  { %20316 = vmatpush3.msra.mxu0 %v22736_v7  ;;  %20317 = vmatprep.mubr.msk.f32.mxu0 %vm21074_vm0, %v23453_v16  ;;  %v12968_v7 = vadd.f32 %v23107_v8, %v22853_v1 }
0x3b40   :  { %v18640_v25 = vmul.f32 -1.442695, %v12968_v7  ;;  %v20990_v7 = vld [vmem:[%s21174_s8] sm:$0xff]  ;;  %s23462_s8 = sld [smem:[#allocation21_spill]] }
0x3b42   :  { %20833 = vpow2.f32 %v18640_v25 }
0x3b4c   :  { %v20834_v1 = vpop.eup %20833 }
0x3b4d   :  { %v12972_v56 = vadd.f32 1.0, %v20834_v1 }
0x3c02   :  { %v23100_v2 = vpop.f32.mrb[184].mxu1 }
0x3c03   :  { %v20334_v50 = vpop.f32.mrb[185].mxu1 }
0x3c04   :  { %v15023_v46 = vpop.f32.mrb[170].mxu0  ;;  %v20985_v50 = vld [vmem:[%s21164_s27] sm:$0xff] }
0x3c05   :  { %v15024_v24 = vadd.f32 %v15023_v46, %v23041_v9  ;;  %v20279_v47 = vpop.f32.mrb[171].mxu0  ;;  %v20986_v46 = vld [vmem:[%s21144_s30] ss:$0 sm:$0xff] }
0x3c07   :  { %v15027_v34 = vadd.f32 %v22836_v37, %v15024_v24 }
0x3c08   :  { %v15164_v42 = vpop.f32.mrb[172].mxu0 }
0x3c09   :  { %v15165_v23 = vadd.f32 %v15164_v42, %v23043_v60  ;;  %v20289_v53 = vpop.f32.mrb[173].mxu0  ;;  %v15380_v5 = vadd.f32 %v23047_v52, %v15027_v34 }
0x3c0a   :  { %v20988_v53 = vld [vmem:[%s21149_s6] sm:$0xff] }
0x3c0b   :  { %v15168_v37 = vadd.f32 %v22849_v35, %v15165_v23  ;;  %v15381_v52 = vadd.f32 %v22865_v27, %v15380_v5  ;;  %v20989_v5 = vld [vmem:[%s21159_s20] sm:$0xff] }
0x3c0c   :  { %v15305_v33 = vpop.f32.mrb[174].mxu0 }
0x3c0d   :  { %v15306_v0 = vadd.f32 %v15305_v33, %v23045_v38  ;;  %v20299_v19 = vpop.f32.mrb[175].mxu0  ;;  %v18692_v36 = vmul.f32 -1.442695, %v15381_v52  ;;  %v20991_v33 = vld [vmem:[%s21169_s4] sm:$0xff] }
0x3c0f   :  { %v15309_v12 = vadd.f32 %v22845_v59, %v15306_v0 }
0x3c10   :  { %v15454_v57 = vpop.f32.mrb[176].mxu0 }
0x3c11   :  { %v23115_v45 = vadd.f32 %v23049_v40, %v15309_v12  ;;  %v15458_v4 = vadd.f32 %v15454_v57, %v15168_v37  ;;  %v20309_v41 = vpop.f32.mrb[177].mxu0  ;;  %v23178_v57 = vld [vmem:[%s23437_s0] sm:$0x3] }
0x3c13   :  { %v15459_v9 = vadd.f32 %v22856_v43, %v15458_v4  ;;  %v18699_v43 = vld [vmem:[%s23451_s10 + $0x50] sm:$0xff] }
0x3c15   :  { %v18694_v22 = vmul.f32 -1.442695, %v15459_v9  ;;  %v20993_v9 = vld [vmem:[%s23441_s5] sm:$0xff] }
0x3c17   :  { %20835 = vpow2.f32 %v18694_v22 }
0x3c18   :  { %20837 = vtanh.f32 %v22871_v28 }
0x3c19   :  { %20839 = vrcp.f32 %v12972_v56  ;;  %v18481_v56 = vld [vmem:[%s23456_s9 + $0x1] ss:$0 sm:$0xff] }
0x3c21   :  { %v20836_v60 = vpop.eup %20835 }
0x3c22   :  { %v15463_v59 = vadd.f32 1.0, %v20836_v60  ;;  %v20838_v35 = vpop.eup %20837  ;;  %v18422_v60 = vld [vmem:[%s23456_s9] ss:$0 sm:$0xff] }
0x3c23   :  { %v20840_v62 = vpop.eup %20839 }
0x3c24   :  { %20841 = vrcp.f32 %v15463_v59  ;;  %v13061_v20 = vmul.f32 %v20840_v62, %v20838_v35  ;;  %v18537_v59 = vld [vmem:[%s23456_s9 + $0x2] ss:$0 sm:$0xff]  ;;  %v5452_v35 = vmul.f32 %v18481_v56, %v21678_v18  ;;  %v18593_v62 = vld [vmem:[%s23456_s9 + $0x3] ss:$0 sm:$0xff] }
0x3c25   :  { %20843 = vpow2.f32 %v18692_v36  ;;  %v23459_v36 = vld [vmem:[#allocation24_spill] sm:$0xff] }
0x3c2e   :  { %v20842_v38 = vpop.eup %20841 }
0x3c2f   :  { %v15626_v55 = vmul.f32 %v20842_v38, %v13061_v20  ;;  %v15544_v17 = vmul.f32 %v20842_v38, %v22871_v28  ;;  %v20844_v15 = vpop.eup %20843  ;;  %v23457_v20 = vld [vmem:[#allocation22_spill] sm:$0xff] }
0x3c30   :  { %v15385_v32 = vadd.f32 1.0, %v20844_v15  ;;  %v2801_v38 = vmul.f32 %v18422_v60, %v23457_v20 }
0x3c31   :  { %20318 = vmatmul.mubr.msk.f32.vlgmr.msra.gmra.mrb[178].mxu0 %vm190_vm1, %v15544_v17 }
0x3c32   :  { %20322 = vmatprep.mubr.msk.f32.mxu0 %vm1009_vm3, %v18699_v43  ;;  %v18649_v43 = vld [vmem:[%s23456_s9 + $0x4] ss:$0 sm:$0xff]  ;;  %v5453_v52 = vadd.f32 %v5452_v35, %v2801_v38 }
0x3d04   :  { %v15614_v48 = vpop.f32.mrb[178].mxu0 }
0x3d05   :  { %v15618_v51 = vadd.f32 %v15614_v48, %v15027_v34  ;;  %v20319_v40 = vpop.f32.mrb[179].mxu0  ;;  %v20987_v34 = vld [vmem:[%s21134_s19] ss:$0 sm:$0xff]  ;;  %v10590_v48 = vmul.f32 %v18593_v62, %v23459_v36  ;;  %v21001_v62 = vld [vmem:[%s23443_s18 + $0x1] ss:$0 sm:$0xff] }
0x3d06   :  { %v15894_v42 = vadd.f32 %v20987_v34, %v23100_v2  ;;  %v20998_v34 = vld [vmem:[%s23441_s5 + $0x8] sm:$0xff] }
0x3d07   :  { %v15619_v31 = vadd.f32 %v22865_v27, %v15618_v51  ;;  %v15750_v27 = vmul.f32 %v23056_v54, %v15749_v26  ;;  %v18705_v51 = vld [vmem:[%s23456_s9 + $0x5] ss:$0 sm:$0xff] }
0x3d08   :  { %v20995_v26 = vld [vmem:[%s23439_s15] sm:$0xff] }
0x3d09   :  { %v18698_v10 = vmul.f32 -1.442695, %v15619_v31  ;;  %v23460_v31 = vld [vmem:[#allocation25_spill] sm:$0xff] }
0x3d0b   :  { %20845 = vpow2.f32 %v18698_v10  ;;  %v13159_v10 = vmul.f32 %v18649_v43, %v23460_v31  ;;  %v21002_v43 = vld [vmem:[%s23444_s22 + $0x1] ss:$0 sm:$0xff] }
0x3d0c   :  { %20847 = vrcp.f32 %v15385_v32  ;;  %v15728_v32 = vmul.f32 %v18705_v51, %v22934_v3 }
0x3d15   :  { %v20846_v28 = vpop.eup %20845 }
0x3d16   :  { %v15623_v61 = vadd.f32 1.0, %v20846_v28  ;;  %v20848_v29 = vpop.eup %20847  ;;  %v18752_v28 = vld [vmem:[%s23456_s9 + $0x6] ss:$0 sm:$0xff] }
0x3d18   :  { %20849 = vrcp.f32 %v15623_v61 }
0x3d22   :  { %v20850_v58 = vpop.eup %20849 }
0x3d23   :  { %v15627_v39 = vmul.f32 %v20850_v58, %v20848_v29 }
0x3d25   :  { %v23125_v49 = vadd.f32 %v15627_v39, %v15626_v55  ;;  %v23458_v55 = vld [vmem:[#allocation23_spill] sm:$0xff] }
0x3d26   :  { %v8021_v17 = vmul.f32 %v18537_v59, %v23458_v55 }
0x3d27   :  { %20320 = vmatprep.subr.msk.mxu0 %vm1013_vm2, %v23125_v49 }
0x3d28   :  { %20321 = vmatpush3.msk.msra.mxu0 %vm1013_vm2, %v23125_v49  ;;  %v8022_v40 = vadd.f32 %v8021_v17, %v5453_v52 }
0x3d29   :  { %20323 = vmatmul.mubr.msk.f32.vlgmr.msra.gmra.mrb[58].mxu0 %vm1009_vm3, %v18700_v6  ;;  %20335 = vmatprep.subr.mxu0 %v23453_v16  ;;  %v20994_v6 = vld [vmem:[%s23438_s17] sm:$0xff] }
0x3d2a   :  { %20336 = vmatpush3.msra.mxu0 %v23053_v63  ;;  %20337 = vmatprep.mubr.msk.f32.mxu0 %vm21074_vm0, %v23453_v16  ;;  %v10591_v15 = vadd.f32 %v10590_v48, %v8022_v40 }
0x3d2b   :  { %20345 = vmatprep.subr.mxu0 %v23453_v16 }
0x3d2c   :  { %v13160_v18 = vadd.f32 %v13159_v10, %v10591_v15 }
0x3d2d   :  { %20338 = vmatmul.mubr.msk.f32.vlgmr.msra.gmra.mrb[180].mxu0 %vm190_vm1, %v15750_v27  ;;  %v20996_v27 = vld [vmem:[%s23439_s15 + $0x8] sm:$0xff] }
0x3d2e   :  { %20346 = vmatpush3.msra.mxu0 %v20984_v21  ;;  %20347 = vmatprep.mubr.msk.f32.mxu0 %vm21074_vm0, %v23453_v16  ;;  %v15729_v39 = vadd.f32 %v15728_v32, %v13160_v18  ;;  %v20997_v21 = vld [vmem:[%s23442_s16] sm:$0xff] }
0x3d2f   :  { %20350 = vmatprep.subr.mxu0 %v23453_v16  ;;  %v21003_v18 = vld [vmem:[%s23445_s23] sm:$0xf] }
0x3e00   :  { %v15967_v13 = vpop.f32.mrb[180].mxu0 }
0x3e01   :  { %v20339_v14 = vpop.f32.mrb[181].mxu0  ;;  %20343 = vmatmul.mubr.msk.f32.vlgmr.msra.gmra.mrb[186].mxu1 %vm190_vm1, %v15967_v13 }
0x3e02   :  { %20356 = vmatpush3.msra.mxu1 %v20985_v50  ;;  %20357 = vmatprep.mubr.msk.f32.mxu1 %vm21074_vm0, %v23453_v16 }
0x3e03   :  { %20360 = vmatprep.subr.mxu1 %v23453_v16 }
0x3ed4   :  { %v16040_v54 = vpop.f32.mrb[186].mxu1 }
0x3ed5   :  { %v16041_v24 = vadd.f32 %v20986_v46, %v16040_v54  ;;  %v20344_v47 = vpop.f32.mrb[187].mxu1 }
0x3ed7   :  { %20851 = vtanh.f32 %v16041_v24 }
0x3ed8   :  { %20853 = vtanh.f32 %v15894_v42 }
0x3ee1   :  { %v20852_v23 = vpop.eup %20851 }
0x3ee2   :  { %20348 = vmatmul.mubr.msk.f32.vlgmr.msra.gmra.mrb[182].mxu0 %vm190_vm1, %v20852_v23  ;;  %20358 = vmatmul.mubr.msk.f32.vlgmr.msra.gmra.mrb[188].mxu1 %vm190_vm1, %v20852_v23  ;;  %v20854_v2 = vpop.eup %20853 }
0x3ee3   :  { %20351 = vmatpush3.msra.mxu0 %v20988_v53  ;;  %20361 = vmatpush3.msra.mxu1 %v20989_v5  ;;  %v20999_v53 = vld [vmem:[%s23442_s16 + $0x8] sm:$0xff] }
0x3ee4   :  { %20352 = vmatprep.mubr.msk.f32.mxu0 %vm21074_vm0, %v23453_v16  ;;  %20362 = vmatprep.mubr.msk.f32.mxu1 %vm21074_vm0, %v23453_v16 }
0x3ee5   :  { %20370 = vmatprep.subr.mxu1 %v23453_v16  ;;  %20365 = vmatprep.subr.mxu0 %v23453_v16 }
0x3eea   :  { %20353 = vmatmul.mubr.msk.f32.vlgmr.msra.gmra.mrb[182].mxu0 %vm190_vm1, %v20854_v2  ;;  %20363 = vmatmul.mubr.msk.f32.vlgmr.msra.gmra.mrb[188].mxu1 %vm190_vm1, %v20854_v2 }
0x3eeb   :  { %20371 = vmatpush3.msra.mxu1 %v20990_v7  ;;  %20372 = vmatprep.mubr.msk.f32.mxu1 %vm21074_vm0, %v23453_v16 }
0x3eec   :  { %20367 = vmatprep.mubr.msk.f32.mxu0 %vm21074_vm0, %v23453_v16  ;;  %20375 = vmatprep.subr.mxu1 %v23453_v16 }
0x3eee   :  { %20373 = vmatmul.mubr.msk.f32.vlgmr.msra.gmra.mrb[190].mxu1 %vm190_vm1, %v23125_v49 }
0x3eef   :  { %20376 = vmatpush3.msra.mxu1 %v20991_v33  ;;  %20377 = vmatprep.mubr.msk.f32.mxu1 %vm21074_vm0, %v23453_v16 }
0x3ef0   :  { %20390 = vmatprep.subr.mxu1 %v23453_v16 }
0x3fbd   :  { %v16187_v0 = vpop.f32.mrb[182].mxu0  ;;  %v16327_v19 = vpop.f32.mrb[188].mxu1 }
0x3fbe   :  { %v16331_v25 = vmax.f32 %v16187_v0, %v16327_v19  ;;  %v20354_v12 = vpop.f32.mrb[183].mxu0  ;;  %v20364_v37 = vpop.f32.mrb[189].mxu1 }
0x3fbf   :  { %v14716_v37 = vadd.f32 %v22994_v44, %v23000_v30 }
0x3fc0   :  { %20366 = vmatpush3.msra.mxu0 %v16331_v25 }
0x3fc1   :  { %20368 = vmatmul.mubr.msk.f32.vlgmr.msra.gmra.mrb[184].mxu0 %vm190_vm1, %v23178_v57  ;;  %20380 = vmatprep.subr.mxu0 %v23453_v16  ;;  %v18678_v56 = vmul.f32 -1.442695, %v14716_v37  ;;  %v21008_v37 = vld [vmem:[%s23448_s1 + $0x8] sm:$0xff] }
0x3fc2   :  { %20382 = vmatprep.mubr.msk.f32.mxu0 %vm21074_vm0, %v23453_v16 }
0x4094   :  { %v16398_v4 = vpop.f32.mrb[184].mxu0 }
0x4095   :  { %v20369_v41 = vpop.f32.mrb[185].mxu0  ;;  %20378 = vmatmul.mubr.msk.f32.vlgmr.msra.gmra.mrb[190].mxu1 %vm190_vm1, %v16398_v4 }
0x4096   :  { %20391 = vmatpush3.msra.mxu1 %v20993_v9  ;;  %20392 = vmatprep.mubr.msk.f32.mxu1 %vm21074_vm0, %v23453_v16  ;;  %v21000_v9 = vld [vmem:[%s23443_s18] ss:$0 sm:$0xff] }
0x4097   :  { %20400 = vmatprep.subr.mxu1 %v23453_v16 }
0x4168   :  { %v16543_v22 = vpop.f32.mrb[190].mxu1 }
0x4169   :  { %16549 = vperm.xlu0 %20621, %v16543_v22   ;;  %v20379_v1 = vpop.f32.mrb[191].mxu1 }
0x41e8   :  { %v23203_v61 = vpop.permute.xlu0 %16549 }
0x41e9   :  { %v16552_v29 = vmul.f32 %v23203_v61, %v23125_v49  ;;  %v17855_v58 = vmul.f32 %v18752_v28, %v23203_v61 }
0x41eb   :  { %20381 = vmatpush3.msk.msra.mxu0 %vm1013_vm2, %v16552_v29  ;;  %v17856_v11 = vadd.f32 %v17855_v58, %v15729_v39  ;;  %v18708_v29 = vld [vmem:[%s23446_s26 + $0xe] sm:$0x3]  ;;  %v21004_v58 = vld [vmem:[%s23445_s23 + $0x4] sm:$0xf]  ;;  %v21006_v39 = vld [vmem:[%s23444_s22] ss:$0 sm:$0xff] }
0x41ec   :  { %20383 = vmatmul.mubr.msk.f32.vlgmr.msra.gmra.mrb[186].mxu0 %vm1009_vm3, %v20994_v6  ;;  %20385 = vmatprep.subr.mxu0 %v23453_v16 }
0x41ed   :  { %v18278_v3 = vsel %vm18277_vm6, %v17856_v11, -inf  ;;  %20386 = vmatpush3.msra.mxu0 %v20995_v26  ;;  %20387 = vmatprep.mubr.msk.f32.mxu0 %vm21074_vm0, %v23453_v16 }
0x41ee   :  { %18279 = vmax.xlane.f32.xlu1 %v18278_v3  ;;  %20395 = vmatprep.subr.mxu0 %v23453_v16 }
0x41f0   :  { %20388 = vmatmul.mubr.msk.f32.vlgmr.msra.gmra.mrb[188].mxu0 %vm190_vm1, %v16331_v25 }
0x41f1   :  { %20396 = vmatpush3.msra.mxu0 %v20996_v27  ;;  %20397 = vmatprep.mubr.msk.f32.mxu0 %vm21074_vm0, %v23453_v16 }
0x41f2   :  { %20405 = vmatprep.subr.mxu0 %v23453_v16 }
0x41f4   :  { %20398 = vmatmul.mubr.msk.f32.vlgmr.msra.gmra.mrb[190].mxu0 %vm190_vm1, %v16331_v25 }
0x41f5   :  { %20406 = vmatpush3.msra.mxu0 %v20997_v21  ;;  %20407 = vmatprep.mubr.msk.f32.mxu0 %vm21074_vm0, %v23453_v16 }
0x41f6   :  { %20415 = vmatprep.subr.mxu0 %v23453_v16 }
0x41f8   :  { %20408 = vmatmul.mubr.msk.f32.vlgmr.msra.gmra.mrb[192].mxu0 %vm190_vm1, %v23053_v63 }
0x41f9   :  { %20416 = vmatpush3.msra.mxu0 %v20997_v21  ;;  %20417 = vmatprep.mubr.msk.f32.mxu0 %vm21074_vm0, %v23453_v16 }
0x41fa   :  { %20425 = vmatprep.subr.mxu0 %v23453_v16 }
0x427b   :  { %v18280_v13 = vpop.xlane.xlu1 %18279 }
0x427c   :  { %v18281_v14 = vsub.f32 %v17856_v11, %v18280_v13 }
0x427e   :  { %v18282_v50 = vmul.f32 1.442695, %v18281_v14 }
0x4280   :  { %20855 = vpow2.f32 %v18282_v50 }
0x428a   :  { %v20856_v54 = vpop.eup %20855 }
0x428b   :  { %v18284_v46 = vsel %vm18277_vm6, %v20856_v54, 0.0 }
0x428c   :  { %18285 = vadd.xlane.f32.xlu0 %v18284_v46 }
0x42bf   :  { %v16622_v24 = vpop.f32.mrb[186].mxu0 }
0x42c0   :  { %v20384_v47 = vpop.f32.mrb[187].mxu0  ;;  %20393 = vmatmul.mubr.msk.f32.vlgmr.msra.gmra.mrb[192].mxu1 %vm190_vm1, %v16622_v24 }
0x42c1   :  { %20401 = vmatpush3.msra.mxu1 %v20998_v34  ;;  %20402 = vmatprep.mubr.msk.f32.mxu1 %vm21074_vm0, %v23453_v16 }
0x42c2   :  { %20410 = vmatprep.subr.mxu1 %v23453_v16 }
0x42c3   :  { %v16695_v42 = vpop.f32.mrb[188].mxu0 }
0x42c4   :  { %v20389_v23 = vpop.f32.mrb[189].mxu0  ;;  %20403 = vmatmul.mubr.msk.f32.vlgmr.msra.gmra.mrb[194].mxu1 %vm190_vm1, %v16622_v24 }
0x42c5   :  { %20411 = vmatpush3.msra.mxu1 %v20999_v53  ;;  %20412 = vmatprep.mubr.msk.f32.mxu1 %vm21074_vm0, %v23453_v16 }
0x42c6   :  { %20420 = vmatprep.subr.mxu1 %v23453_v16 }
0x42c7   :  { %v16839_v5 = vpop.f32.mrb[190].mxu0 }
0x42c8   :  { %v20399_v2 = vpop.f32.mrb[191].mxu0  ;;  %20413 = vmatmul.mubr.msk.f32.vlgmr.msra.gmra.mrb[196].mxu1 %vm190_vm1, %v23053_v63 }
0x42c9   :  { %20422 = vmatprep.mubr.msk.f32.mxu1 %vm21074_vm0, %v23453_v16 }
0x42cb   :  { %v16983_v7 = vpop.f32.mrb[192].mxu0 }
0x42cc   :  { %v20409_v33 = vpop.f32.mrb[193].mxu0 }
0x4319   :  { %v18286_v0 = vpop.xlane.xlu0 %18285 }
0x431a   :  { %20857 = vrcp.f32 %v18286_v0  ;;  %v21007_v0 = vld [vmem:[%s23448_s1] sm:$0xff] }
0x431b   :  { %20859 = vpow2.f32 %v18678_v56 }
0x4324   :  { %v20858_v19 = vpop.eup %20857 }
0x4325   :  { %v18288_v25 = vmul.f32 %v20858_v19, %v20856_v54  ;;  %v20860_v44 = vpop.eup %20859 }
0x4326   :  { %v14720_v30 = vadd.f32 1.0, %v20860_v44 }
0x4327   :  { %18289 = vst.msk [vmem:[#allocation2] sm:$0x3] %vm18277_vm6, %v18288_v25 }
0x4393   :  { %v16768_v12 = vpop.f32.mrb[192].mxu1 }
0x4394   :  { %v16769_v4 = vadd.f32 %v16768_v12, %v16695_v42  ;;  %v20394_v41 = vpop.f32.mrb[193].mxu1 }
0x4396   :  { %v16772_v22 = vadd.f32 %v21000_v9, %v16769_v4  ;;  %v15537_v4 = vadd.f32 %v23107_v8, %v23115_v45 }
0x4397   :  { %v16909_v1 = vpop.f32.mrb[194].mxu1 }
0x4398   :  { %v16910_v60 = vadd.f32 %v16909_v1, %v16839_v5  ;;  %v20404_v59 = vpop.f32.mrb[195].mxu1  ;;  %v16987_v35 = vadd.f32 %v16983_v7, %v16772_v22 }
0x439a   :  { %v16913_v20 = vadd.f32 %v21001_v62, %v16910_v60  ;;  %v16988_v11 = vadd.f32 %v21006_v39, %v16987_v35  ;;  %v18696_v60 = vmul.f32 -1.442695, %v15537_v4  ;;  %v18102_v4 = vld [vmem:[%s21239_s3 + $0x198] sm:$0xff] }
0x439b   :  { %v17061_v38 = vpop.f32.mrb[196].mxu1 }
0x439c   :  { %v17065_v55 = vadd.f32 %v17061_v38, %v16913_v20  ;;  %v20414_v17 = vpop.f32.mrb[197].mxu1  ;;  %v18728_v6 = vmul.f32 -1.442695, %v16988_v11  ;;  %v21011_v20 = vld [vmem:[%s23449_s2 + $0x1] ss:$0 sm:$0xff] }
0x439e   :  { %v17066_v52 = vadd.f32 %v21002_v43, %v17065_v55 }
0x43a0   :  { %v18730_v36 = vmul.f32 -1.442695, %v17066_v52  ;;  %v21012_v52 = vld [vmem:[%s23450_s7 + $0x1] ss:$0 sm:$0xff] }
0x43a2   :  { %20861 = vpow2.f32 %v18730_v36 }
0x43a3   :  { %20863 = vtanh.f32 %v23053_v63 }
0x43a4   :  { %20865 = vrcp.f32 %v14720_v30 }
0x43ac   :  { %v20862_v48 = vpop.eup %20861 }
0x43ad   :  { %v17070_v51 = vadd.f32 1.0, %v20862_v48  ;;  %v20864_v40 = vpop.eup %20863 }
0x43ae   :  { %v20866_v31 = vpop.eup %20865 }
0x43af   :  { %20867 = vrcp.f32 %v17070_v51  ;;  %v14809_v10 = vmul.f32 %v20866_v31, %v20864_v40 }
0x43b0   :  { %20869 = vpow2.f32 %v18728_v6 }
0x43b9   :  { %v20868_v15 = vpop.eup %20867 }
0x43ba   :  { %v17073_v32 = vmul.f32 %v20868_v15, %v23053_v63  ;;  %v17155_v28 = vmul.f32 %v20868_v15, %v14809_v10  ;;  %v21005_v63 = vld [vmem:[%s23447_s28] sm:$0xff]  ;;  %v20870_v24 = vpop.eup %20869 }
0x43bb   :  { %v16992_v42 = vadd.f32 1.0, %v20870_v24  ;;  %v17858_v24 = vld [vmem:[%s23461_s21 + $0x8] sm:$0xff] }
0x43bc   :  { %20418 = vmatmul.mubr.msk.f32.vlgmr.msra.gmra.mrb[194].mxu0 %vm190_vm1, %v17073_v32 }
0x43bd   :  { %20426 = vmatpush3.msk.msra.mxu0 %vm1977_vm4, %v21003_v18  ;;  %20427 = vmatprep.mubr.msk.f32.mxu0 %vm21074_vm0, %v23453_v16  ;;  %v21013_v18 = vld [vmem:[%s23450_s7] ss:$0 sm:$0xff] }
0x43be   :  { %20435 = vmatprep.subr.mxu0 %v23453_v16 }
0x43c0   :  { %20428 = vmatmul.mubr.msk.f32.vlgmr.msra.gmra.mrb[196].mxu0 %vm1973_vm5, %v18708_v29 }
0x43c1   :  { %20436 = vmatpush3.msk.msra.mxu0 %vm1977_vm4, %v21004_v58  ;;  %20437 = vmatprep.mubr.msk.f32.mxu0 %vm21074_vm0, %v23453_v16 }
0x43c2   :  { %20445 = vmatprep.subr.mxu0 %v23453_v16 }
0x43c4   :  { %20438 = vmatmul.mubr.msk.f32.vlgmr.msra.gmra.mrb[198].mxu0 %vm1973_vm5, %v18708_v29 }
0x43c5   :  { %20446 = vmatpush3.msra.mxu0 %v21005_v63  ;;  %20447 = vmatprep.mubr.msk.f32.mxu0 %vm21074_vm0, %v23453_v16 }
0x43c6   :  { %20455 = vmatprep.subr.mxu0 %v23453_v16 }
0x43c8   :  { %20448 = vmatmul.mubr.msk.f32.vlgmr.msra.gmra.mrb[200].mxu0 %vm190_vm1, %v23125_v49 }
0x43c9   :  { %20456 = vmatpush3.msra.mxu0 %v21005_v63  ;;  %20457 = vmatprep.mubr.msk.f32.mxu0 %vm21074_vm0, %v23453_v16 }
0x448f   :  { %v17143_v3 = vpop.f32.mrb[194].mxu0 }
0x4490   :  { %v17147_v26 = vadd.f32 %v17143_v3, %v16772_v22  ;;  %v20419_v27 = vpop.f32.mrb[195].mxu0  ;;  %v21010_v22 = vld [vmem:[%s23449_s2] ss:$0 sm:$0xff] }
0x4492   :  { %v17148_v21 = vadd.f32 %v21006_v39, %v17147_v26 }
0x4493   :  { %v17298_v13 = vpop.f32.mrb[196].mxu0 }
0x4494   :  { %v18732_v14 = vmul.f32 -1.442695, %v17148_v21  ;;  %v20429_v50 = vpop.f32.mrb[197].mxu0 }
0x4496   :  { %20871 = vpow2.f32 %v18732_v14 }
0x4497   :  { %v17442_v54 = vpop.f32.mrb[198].mxu0  ;;  %20873 = vrcp.f32 %v16992_v42  ;;  %v17859_v42 = vld [vmem:[%s23461_s21 + $0x10] sm:$0xff] }
0x4498   :  { %v20439_v46 = vpop.f32.mrb[199].mxu0 }
0x4499   :  { %v18747_v46 = vld [vmem:[%s23451_s10 + $0x68] sm:$0x3f] }
0x449b   :  { %v17583_v47 = vpop.f32.mrb[200].mxu0 }
0x449c   :  { %v20449_v34 = vpop.f32.mrb[201].mxu0 }
0x449d   :  { %v17857_v34 = vld [vmem:[%s23461_s21] sm:$0xff] }
0x44a0   :  { %v20872_v23 = vpop.eup %20871 }
0x44a1   :  { %v17152_v53 = vadd.f32 1.0, %v20872_v23  ;;  %v20874_v5 = vpop.eup %20873  ;;  %v18067_v23 = vld [vmem:[%s21239_s3 + $0x80] sm:$0xff] }
0x44a3   :  { %20875 = vrcp.f32 %v17152_v53  ;;  %v18068_v53 = vld [vmem:[%s21239_s3 + $0x88] sm:$0xff] }
0x44a4   :  { %20877 = vpow2.f32 %v18696_v60 }
0x44ad   :  { %v20876_v2 = vpop.eup %20875 }
0x44ae   :  { %v17156_v7 = vmul.f32 %v20876_v2, %v20874_v5  ;;  %v20878_v8 = vpop.eup %20877  ;;  %v18099_v5 = vld [vmem:[%s21239_s3 + $0x180] sm:$0xff]  ;;  %v20465_v2 = vpack.c.bf16 %v18068_v53, %v18067_v23 }
0x44af   :  { %v15541_v45 = vadd.f32 1.0, %v20878_v8  ;;  %v18056_v8 = vld [vmem:[%s21239_s3 + $0x28] sm:$0xff] }
0x44b0   :  { %v17157_v33 = vadd.f32 %v17156_v7, %v17155_v28  ;;  %v18746_v28 = vld [vmem:[%s23451_s10 + $0x60] sm:$0xff]  ;;  %v18100_v7 = vld [vmem:[%s21239_s3 + $0x188] sm:$0xff] }
0x44b2   :  { %20421 = vmatpush3.msra.mxu1 %v17157_v33  ;;  %v20497_v33 = vpack.c.bf16 %v18100_v7, %v18099_v5  ;;  %v18061_v5 = vld [vmem:[%s21239_s3 + $0x50] sm:$0xff] }
0x44b3   :  { %20423 = vmatmul.mubr.msk.f32.vlgmr.msra.gmra.mrb[198].mxu1 %vm190_vm1, %v23178_v57  ;;  %20430 = vmatprep.subr.mxu1 %v23453_v16  ;;  %v21009_v57 = vld [vmem:[%s23447_s28 + $0x8] sm:$0xff] }
0x44b4   :  { %20431 = vmatpush3.msra.mxu1 %v21007_v0  ;;  %20432 = vmatprep.mubr.msk.f32.mxu1 %vm21074_vm0, %v23453_v16  ;;  %v18051_v0 = vld [vmem:[%s21239_s3] sm:$0xff] }
0x44b5   :  { %20440 = vmatprep.subr.mxu1 %v23453_v16 }
0x4586   :  { %v17224_v19 = vpop.f32.mrb[198].mxu1 }
0x4587   :  { %v17228_v25 = vmul.f32 %v17224_v19, %v23203_v61  ;;  %v20424_v12 = vpop.f32.mrb[199].mxu1  ;;  %v18052_v19 = vld [vmem:[%s21239_s3 + $0x8] sm:$0xff] }
0x4588   :  { %v18084_v12 = vld [vmem:[%s21239_s3 + $0x108] sm:$0xff] }
0x4589   :  { %20433 = vmatmul.mubr.msk.f32.vlgmr.msra.gmra.mrb[200].mxu1 %vm190_vm1, %v17228_v25 }
0x458a   :  { %20441 = vmatpush3.msra.mxu1 %v21008_v37  ;;  %20442 = vmatprep.mubr.msk.f32.mxu1 %vm21074_vm0, %v23453_v16  ;;  %v18069_v37 = vld [vmem:[%s21239_s3 + $0x90] sm:$0xff] }
0x458b   :  { %20450 = vmatprep.subr.mxu1 %v23453_v16 }
0x458d   :  { %20443 = vmatmul.mubr.msk.f32.vlgmr.msra.gmra.mrb[202].mxu1 %vm190_vm1, %v17228_v25  ;;  %v18083_v25 = vld [vmem:[%s21239_s3 + $0x100] sm:$0xff] }
0x458e   :  { %20451 = vmatpush3.msra.mxu1 %v21009_v57  ;;  %20452 = vmatprep.mubr.msk.f32.mxu1 %vm21074_vm0, %v23453_v16  ;;  %v18070_v57 = vld [vmem:[%s21239_s3 + $0x98] sm:$0xff] }
0x458f   :  { %17889 = vmatprep.subr.mxu1 %v17858_v24  ;;  %v18077_v24 = vld [vmem:[%s21239_s3 + $0xd0] sm:$0xff] }
0x4591   :  { %20453 = vmatmul.mubr.msk.f32.vlgmr.msra.gmra.mrb[204].mxu1 %vm190_vm1, %v23125_v49 }
0x4592   :  { %17953 = vmatprep.mubr.f32.mxu1 %v23453_v16  ;;  %17890 = vmatpush1.msra.mxu1 %v17857_v34  ;;  %v18109_v34 = vld [vmem:[%s21239_s3 + $0x1d0] sm:$0xff] }
0x4593   :  { %20466 = vmatprep.subr.bf16.mxu1 %v20465_v2  ;;  %v18062_v2 = vld [vmem:[%s21239_s3 + $0x58] sm:$0xff] }
0x465c   :  { %v17371_v61 = vpop.f32.mrb[200].mxu1 }
0x465d   :  { %v17372_v41 = vadd.f32 %v17371_v61, %v17298_v13  ;;  %v20434_v9 = vpop.f32.mrb[201].mxu1  ;;  %v18101_v61 = vld [vmem:[%s21239_s3 + $0x190] sm:$0xff] }
0x465e   :  { %v20467_v9 = vpack.c.bf16 %v18052_v19, %v18051_v0  ;;  %v18093_v0 = vld [vmem:[%s21239_s3 + $0x150] sm:$0xff]  ;;  %v18094_v19 = vld [vmem:[%s21239_s3 + $0x158] sm:$0xff] }
0x465f   :  { %v17375_v1 = vadd.f32 %v21010_v22, %v17372_v41  ;;  %v20499_v22 = vpack.c.bf16 %v18084_v12, %v18083_v25  ;;  %v18079_v25 = vld [vmem:[%s21239_s3 + $0xe0] sm:$0xff]  ;;  %v18080_v12 = vld [vmem:[%s21239_s3 + $0xe8] sm:$0xff] }
0x4660   :  { %v17512_v56 = vpop.f32.mrb[202].mxu1 }
0x4661   :  { %v17513_v59 = vadd.f32 %v17512_v56, %v17442_v54  ;;  %v20444_v35 = vpop.f32.mrb[203].mxu1  ;;  %v17587_v62 = vadd.f32 %v17583_v47, %v17375_v1  ;;  %v17860_v47 = vld [vmem:[%s23461_s21 + $0x18] sm:$0xff] }
0x4662   :  { %v18054_v56 = vld [vmem:[%s21239_s3 + $0x18] sm:$0xff]  ;;  %v20501_v35 = vpack.c.bf16 %v18102_v4, %v18101_v61  ;;  %v20487_v61 = vpack.c.bf16 %v18062_v2, %v18061_v5  ;;  %v20519_v4 = vpack.c.bf16 %v18094_v19, %v18093_v0 }
0x4663   :  { %v17516_v38 = vadd.f32 %v21011_v20, %v17513_v59  ;;  %v17588_v29 = vadd.f32 %v21013_v18, %v17587_v62  ;;  %v20469_v59 = vpack.c.bf16 %v18070_v57, %v18069_v37  ;;  %v18085_v62 = vld [vmem:[%s21239_s3 + $0x110] sm:$0xff]  ;;  %v18086_v20 = vld [vmem:[%s21239_s3 + $0x118] sm:$0xff]  ;;  %v18111_v37 = vld [vmem:[%s21239_s3 + $0x1e0] sm:$0xff] }
0x4664   :  { %v17661_v55 = vpop.f32.mrb[204].mxu1  ;;  %v18112_v57 = vld [vmem:[%s21239_s3 + $0x1e8] sm:$0xff] }
0x4665   :  { %v17665_v17 = vadd.f32 %v17661_v55, %v17516_v38  ;;  %v20454_v43 = vpop.f32.mrb[205].mxu1  ;;  %v18741_v58 = vmul.f32 -1.442695, %v17588_v29  ;;  %v18071_v38 = vld [vmem:[%s21239_s3 + $0xa0] sm:$0xff]  ;;  %v18072_v55 = vld [vmem:[%s21239_s3 + $0xa8] sm:$0xff] }
0x4666   :  { %v18104_v43 = vld [vmem:[%s21239_s3 + $0x1a8] sm:$0xff] }
0x4667   :  { %v17666_v36 = vadd.f32 %v21012_v52, %v17665_v17  ;;  %v18103_v17 = vld [vmem:[%s21239_s3 + $0x1a0] sm:$0xff] }
0x4669   :  { %v18743_v44 = vmul.f32 -1.442695, %v17666_v36  ;;  %v20503_v36 = vpack.c.bf16 %v18086_v20, %v18085_v62  ;;  %v18081_v62 = vld [vmem:[%s21239_s3 + $0xf0] sm:$0xff]  ;;  %v18082_v20 = vld [vmem:[%s21239_s3 + $0xf8] sm:$0xff] }
0x466b   :  { %20879 = vpow2.f32 %v18743_v44  ;;  %v18055_v44 = vld [vmem:[%s21239_s3 + $0x20] sm:$0xff] }
0x466c   :  { %20881 = vtanh.f32 %v23125_v49 }
0x466d   :  { %20883 = vrcp.f32 %v15541_v45  ;;  %v20473_v45 = vpack.c.bf16 %v18072_v55, %v18071_v38  ;;  %v18113_v38 = vld [vmem:[%s21239_s3 + $0x1f0] sm:$0xff]  ;;  %v20493_v55 = vpack.c.bf16 %v18082_v20, %v18081_v62 }
0x4675   :  { %v20880_v30 = vpop.eup %20879 }
0x4676   :  { %v17670_v48 = vadd.f32 1.0, %v20880_v30  ;;  %v20882_v51 = vpop.eup %20881  ;;  %v20505_v30 = vpack.c.bf16 %v18104_v43, %v18103_v17  ;;  %v18114_v17 = vld [vmem:[%s21239_s3 + $0x1f8] sm:$0xff]  ;;  %v18065_v43 = vld [vmem:[%s21239_s3 + $0x70] sm:$0xff] }
0x4677   :  { %v20884_v40 = vpop.eup %20883 }
0x4678   :  { %20885 = vrcp.f32 %v17670_v48  ;;  %v15630_v31 = vmul.f32 %v20884_v40, %v20882_v51  ;;  %v18087_v48 = vld [vmem:[%s21239_s3 + $0x120] sm:$0xff]  ;;  %v18088_v51 = vld [vmem:[%s21239_s3 + $0x128] sm:$0xff]  ;;  %v18073_v40 = vld [vmem:[%s21239_s3 + $0xb0] sm:$0xff] }
0x4679   :  { %20887 = vpow2.f32 %v18741_v58 }
0x4682   :  { %v20886_v10 = vpop.eup %20885 }
0x4683   :  { %v17673_v15 = vmul.f32 %v20886_v10, %v23125_v49  ;;  %v17755_v32 = vmul.f32 %v20886_v10, %v15630_v31  ;;  %v20888_v26 = vpop.eup %20887  ;;  %v18105_v31 = vld [vmem:[%s21239_s3 + $0x1b0] sm:$0xff]  ;;  %v18106_v10 = vld [vmem:[%s21239_s3 + $0x1b8] sm:$0xff] }
0x4684   :  { %v17592_v49 = vadd.f32 1.0, %v20888_v26  ;;  %v20509_v58 = vpack.c.bf16 %v18106_v10, %v18105_v31  ;;  %v18108_v26 = vld [vmem:[%s21239_s3 + $0x1c8] sm:$0xff]  ;;  %v17861_v31 = vld [vmem:[%s23462_s8] sm:$0xf] }
0x4685   :  { %20458 = vmatmul.mubr.msk.f32.vlgmr.msra.gmra.mrb[202].mxu0 %vm190_vm1, %v17673_v15  ;;  %v20475_v15 = vpack.c.bf16 %v18056_v8, %v18055_v44  ;;  %v18097_v8 = vld [vmem:[%s21239_s3 + $0x170] sm:$0xff] }
0x4686   :  { %20462 = vmatprep.mubr.msk.f32.mxu0 %vm1009_vm3, %v18746_v28  ;;  %v18057_v28 = vld [vmem:[%s21239_s3 + $0x30] sm:$0xff] }
0x4758   :  { %v17743_v63 = vpop.f32.mrb[202].mxu0 }
0x4759   :  { %v17747_v39 = vadd.f32 %v17743_v63, %v17375_v1  ;;  %v20459_v11 = vpop.f32.mrb[203].mxu0  ;;  %v18053_v1 = vld [vmem:[%s21239_s3 + $0x10] sm:$0xff] }
0x475a   :  { %v20471_v52 = vpack.c.bf16 %v18054_v56, %v18053_v1  ;;  %v18089_v63 = vld [vmem:[%s21239_s3 + $0x130] sm:$0xff]  ;;  %v18075_v11 = vld [vmem:[%s21239_s3 + $0xc0] sm:$0xff]  ;;  %v18064_v1 = vld [vmem:[%s21239_s3 + $0x68] sm:$0xff] }
0x475b   :  { %v17748_v6 = vadd.f32 %v21013_v18, %v17747_v39  ;;  %v18058_v18 = vld [vmem:[%s21239_s3 + $0x38] sm:$0xff]  ;;  %v18095_v56 = vld [vmem:[%s21239_s3 + $0x160] sm:$0xff] }
0x475c   :  { %v18090_v39 = vld [vmem:[%s21239_s3 + $0x138] sm:$0xff] }
0x475d   :  { %v18745_v3 = vmul.f32 -1.442695, %v17748_v6  ;;  %v18076_v6 = vld [vmem:[%s21239_s3 + $0xc8] sm:$0xff] }
0x475f   :  { %20889 = vpow2.f32 %v18745_v3  ;;  %v18107_v3 = vld [vmem:[%s21239_s3 + $0x1c0] sm:$0xff] }
0x4760   :  { %20891 = vrcp.f32 %v17592_v49  ;;  %v20479_v49 = vpack.c.bf16 %v18058_v18, %v18057_v28 }
0x4769   :  { %v20890_v27 = vpop.eup %20889 }
0x476a   :  { %v17752_v21 = vadd.f32 1.0, %v20890_v27  ;;  %v20892_v13 = vpop.eup %20891  ;;  %v20511_v27 = vpack.c.bf16 %v18090_v39, %v18089_v63 }
0x476c   :  { %20893 = vrcp.f32 %v17752_v21  ;;  %v18059_v21 = vld [vmem:[%s21239_s3 + $0x40] sm:$0xff] }
0x4776   :  { %v20894_v14 = vpop.eup %20893 }
0x4777   :  { %v17756_v50 = vmul.f32 %v20894_v14, %v20892_v13  ;;  %v18060_v13 = vld [vmem:[%s21239_s3 + $0x48] sm:$0xff]  ;;  %v20481_v14 = vpack.c.bf16 %v18076_v6, %v18075_v11 }
0x4778   :  { %v20483_v23 = vpack.c.bf16 %v18060_v13, %v18059_v21 }
0x4779   :  { %v17757_v54 = vadd.f32 %v17756_v50, %v17755_v32  ;;  %v20507_v32 = vpack.c.bf16 %v18088_v51, %v18087_v48  ;;  %v20513_v50 = vpack.c.bf16 %v18108_v26, %v18107_v3  ;;  %v17863_v48 = vlaneseq }
0x477b   :  { %20460 = vmatprep.subr.msk.mxu0 %vm1013_vm2, %v17757_v54  ;;  %v17864_v51 = vshrl.u32 %v17863_v48, 7 }
0x477c   :  { %20461 = vmatpush3.msk.msra.mxu0 %vm1013_vm2, %v17757_v54  ;;  %v18091_v54 = vld [vmem:[%s21239_s3 + $0x140] sm:$0xff] }
0x477d   :  { %20463 = vmatmul.mubr.msk.f32.vlgmr.msra.gmra.mrb[58].mxu0 %vm1009_vm3, %v18747_v46  ;;  %17966 = vmatprep.subr.mxu0 %v17860_v47  ;;  %v18092_v46 = vld [vmem:[%s21239_s3 + $0x148] sm:$0xff]  ;;  %v18078_v47 = vld [vmem:[%s21239_s3 + $0xd8] sm:$0xff]  ;;  %v17869_v10 = vsub.s32 1, %v17864_v51 }
0x477e   :  { %18030 = vmatprep.mubr.f32.mxu0 %v23453_v16  ;;  %17967 = vmatpush1.msra.mxu0 %v17859_v42  ;;  %v18110_v42 = vld [vmem:[%s21239_s3 + $0x1d8] sm:$0xff]  ;;  %v20515_v53 = vpack.c.bf16 %v18092_v46, %v18091_v54  ;;  %v20485_v7 = vpack.c.bf16 %v18078_v47, %v18077_v24 }
0x477f   :  { %20498 = vmatprep.subr.bf16.mxu0 %v20497_v33  ;;  %v20517_v33 = vpack.c.bf16 %v18110_v42, %v18109_v34  ;;  %v17870_v18 = vrot.slane %v17861_v31, %v17869_v10 }
0x4850   :  { %v20464_v41 = vpop.f32.mrb[58].mxu0 }
0x4851   :  { %v17836_v60 = vpop.f32.mrb[59].mxu0 }
0x4852   :  { %18753 = vmatmul.mubr.msk.f32.vlgmr.msra.gmra.mrb[206].mxu1 %vm190_vm1, %v17836_v60  ;;  %18755 = vmatmul.mubr.msk.f32.vlgmr.msra.gmra.mrb[204].mxu0 %vm190_vm1, %v17836_v60 }
0x4853   :  { %17959 = vmatprep.mubr.f32.mxu1 %v23453_v16  ;;  %18036 = vmatprep.mubr.f32.mxu0 %v23453_v16  ;;  %v18074_v16 = vld [vmem:[%s21239_s3 + $0xb8] sm:$0xff] }
0x4854   :  { %20468 = vmatpush3.bf16.msra.mxu1 %v20467_v9  ;;  %20500 = vmatpush3.bf16.msra.mxu0 %v20499_v22  ;;  %v20477_v29 = vpack.c.bf16 %v18074_v16, %v18073_v40  ;;  %v20521_v9 = vpack.c.bf16 %v18112_v57, %v18111_v37  ;;  %v18063_v22 = vld [vmem:[%s21239_s3 + $0x60] sm:$0xff]  ;;  %v17865_v40 = vsub.s32 0, %v17864_v51  ;;  %v17873_v16 = vsub.s32 2, %v17864_v51 }
0x4855   :  { %20470 = vmatprep.subr.bf16.mxu1 %v20469_v59  ;;  %20502 = vmatprep.subr.bf16.mxu0 %v20501_v35  ;;  %v20491_v60 = vpack.c.bf16 %v18064_v1, %v18063_v22  ;;  %v18096_v59 = vld [vmem:[%s21239_s3 + $0x168] sm:$0xff] }
0x4856   :  { %18754 = vmatmul.mubr.msk.f32.gmra.mrb[208].mxu1 %vm190_vm1, %v20464_v41  ;;  %18756 = vmatmul.mubr.msk.f32.gmra.mrb[206].mxu0 %vm190_vm1, %v20464_v41  ;;  %v20489_v41 = vpack.c.bf16 %v18080_v12, %v18079_v25  ;;  %v20523_v35 = vpack.c.bf16 %v18096_v59, %v18095_v56  ;;  %v17874_v28 = vrot.slane %v17861_v31, %v17873_v16 }
0x4858   :  { %20472 = vmatpush3.bf16.msra.mxu1 %v20471_v52  ;;  %20504 = vmatpush3.bf16.msra.mxu0 %v20503_v36  ;;  %v18066_v52 = vld [vmem:[%s21239_s3 + $0x78] sm:$0xff]  ;;  %v20525_v36 = vpack.c.bf16 %v18114_v17, %v18113_v38 }
0x4859   :  { %20474 = vmatprep.subr.bf16.mxu1 %v20473_v45  ;;  %20506 = vmatprep.subr.bf16.mxu0 %v20505_v30  ;;  %v20495_v44 = vpack.c.bf16 %v18066_v52, %v18065_v43  ;;  %v18098_v45 = vld [vmem:[%s21239_s3 + $0x178] sm:$0xff]  ;;  %s21075_s3 = smov [#allocation2]  }
0x485a   :  { %v20527_v30 = vpack.c.bf16 %v18098_v45, %v18097_v8  ;;  %s18298_s14 = sshll.u32 %s21075_s3, 4  ;;  %s18299_s14 = int_to_ptr.vmem [resolvable:$true] %s18298_s14 }
0x485b   :  { %s21014_s19 = scalar_lea.vmem %s18299_s14, 32  ;;  %p21019_p1 = scmp.lt.s32.totalorder %s18299_s14, %s18299_s14 }
0x485c   :  { %20476 = vmatpush3.bf16.msra.mxu1 %v20475_v15  ;;  %20508 = vmatpush3.bf16.msra.mxu0 %v20507_v32  ;;  %v17877_v15 = vsub.s32 3, %v17864_v51  ;;  %v17866_v32 = vrot.slane %v17861_v31, %v17865_v40  ;;  %p21015_p0 = scmp.ne.s32.totalorder %s18299_s14, %s21014_s19  ;;  %p21020_p2 = scmp.lt.s32.totalorder %s21014_s19, %s21014_s19 }
0x485d   :  { %20478 = vmatprep.subr.bf16.mxu1 %v20477_v29  ;;  %20510 = vmatprep.subr.bf16.mxu0 %v20509_v58 }
0x485e   :  { %v17878_v29 = vrot.slane %v17861_v31, %v17877_v15  ;;  %p21021_p3 = por %p21020_p2, %p21019_p1 }
0x4860   :  { %20480 = vmatpush3.bf16.msra.mxu1 %v20479_v49  ;;  %20512 = vmatpush3.bf16.msra.mxu0 %v20511_v27  ;;  %p21022_p4 = pnand %p21021_p3, %p21015_p0 }
0x4861   :  { %20482 = vmatprep.subr.bf16.mxu1 %v20481_v14  ;;  %20514 = vmatprep.subr.bf16.mxu0 %v20513_v50 }
0x4864   :  { %20484 = vmatpush3.bf16.msra.mxu1 %v20483_v23  ;;  %20516 = vmatpush3.bf16.msra.mxu0 %v20515_v53 }
0x4865   :  { %20486 = vmatprep.subr.bf16.mxu1 %v20485_v7  ;;  %20518 = vmatprep.subr.bf16.mxu0 %v20517_v33 }
0x4868   :  { %20488 = vmatpush3.bf16.msra.mxu1 %v20487_v61  ;;  %20520 = vmatpush3.bf16.msra.mxu0 %v20519_v4 }
0x4869   :  { %20490 = vmatprep.subr.bf16.mxu1 %v20489_v41  ;;  %20522 = vmatprep.subr.bf16.mxu0 %v20521_v9 }
0x486c   :  { %20492 = vmatpush3.bf16.msra.mxu1 %v20491_v60  ;;  %20524 = vmatpush3.bf16.msra.mxu0 %v20523_v35 }
0x486d   :  { %20494 = vmatprep.subr.bf16.mxu1 %v20493_v55  ;;  %20526 = vmatprep.subr.bf16.mxu0 %v20525_v36 }
0x4870   :  { %20496 = vmatpush3.bf16.msra.mxu1 %v20495_v44  ;;  %20528 = vmatpush3.bf16.msra.mxu0 %v20527_v30 }
0x4925   :  { %v17955_v58 = vpop.f32.mrb[206].mxu1  ;;  %v18032_v63 = vpop.f32.mrb[204].mxu0 }
0x4926   :  { %v17956_v39 = vadd.f32 %v17955_v58, %v17866_v32  ;;  %v18033_v11 = vadd.f32 %v18032_v63, %v17874_v28  ;;  %v17957_v6 = vpop.f32.mrb[207].mxu1  ;;  %v18034_v3 = vpop.f32.mrb[205].mxu0 }
0x4927   :  { %v17958_v26 = vadd.f32 %v17957_v6, %v17870_v18  ;;  %v18035_v49 = vadd.f32 %v18034_v3, %v17878_v29 }
0x4928   :  { %v18043_v50 = vmax.f32 %v17956_v39, 0.0  ;;  %v18045_v54 = vmax.f32 %v18033_v11, 0.0 }
0x4929   :  { %v18044_v27 = vmax.f32 %v17958_v26, 0.0  ;;  %v18046_v21 = vmax.f32 %v18035_v49, 0.0  ;;  %v17961_v13 = vpop.f32.mrb[208].mxu1  ;;  %v18038_v14 = vpop.f32.mrb[206].mxu0 }
0x492a   :  { %v17962_v46 = vadd.f32 %v17961_v13, %v17866_v32  ;;  %v18039_v24 = vadd.f32 %v18038_v14, %v17874_v28  ;;  %v17963_v47 = vpop.f32.mrb[209].mxu1  ;;  %v18040_v34 = vpop.f32.mrb[207].mxu0 }
0x492b   :  { %v17964_v42 = vadd.f32 %v17963_v47, %v17870_v18  ;;  %v18041_v23 = vadd.f32 %v18040_v34, %v17878_v29  ;;  %18186 = vmatprep.mubr.f32.mxu1 %v18044_v27  ;;  %18261 = vmatprep.mubr.f32.mxu0 %v18046_v21 }
0x492c   :  { %18187 = vmatmul.mubr.f32.vlgmr.msra.gmra.mrb[210].mxu1 %v18043_v50  ;;  %18262 = vmatmul.mubr.f32.vlgmr.msra.gmra.mrb[208].mxu0 %v18045_v54  ;;  %v18047_v2 = vmax.f32 %v17962_v46, 0.0  ;;  %v18049_v7 = vmax.f32 %v18039_v24, 0.0 }
0x492d   :  { %v18048_v53 = vmax.f32 %v17964_v42, 0.0  ;;  %v18050_v5 = vmax.f32 %v18041_v23, 0.0 }
0x492f   :  { %18191 = vmatprep.mubr.f32.mxu1 %v18048_v53  ;;  %18266 = vmatprep.mubr.f32.mxu0 %v18050_v5 }
0x4930   :  { %18192 = vmatmul.mubr.f32.gmra.mrb[212].mxu1 %v18047_v2  ;;  %18267 = vmatmul.mubr.f32.gmra.mrb[210].mxu0 %v18049_v7 }
0x4931   :  { %21025 = shalt.err (!%p21022_p4)
}
0x4932   :  { %s21026_s24 = scalar_lea.hbm %s21254_s25, 32 }
0x4933   :  { %p21027_p5 = scmp.ne.s32.totalorder %s21254_s25, %s21026_s24  ;;  %p21030_p6 = scmp.lt.u32.totalorder %s21026_s24, %s21254_s25 }
0x4935   :  { %p21032_p7 = pnand %p21030_p6, %p21027_p5 }
0x4937   :  { %21035 = shalt.err (!%p21032_p7)
}
0x4938   :  { %18301 = dma.vmem_to_hbm [thread:$0]  %s18299_s14, 32, %s21254_s25, [#allocation3]   ;;  %v18757_v19 = vld [vmem:[%s21244_s13] ss:$0 sm:$0xff]  ;;  %vm18275_vm7 = vcmask 29696  }
0x49ff   :  { %v19261_v33 = vpop.f32.mrb[210].mxu1  ;;  %v19299_v0 = vpop.f32.mrb[208].mxu0 }
0x4a00   :  { %v19262_v25 = vpop.f32.mrb[211].mxu1  ;;  %v19300_v12 = vpop.f32.mrb[209].mxu0 }
0x4a01   :  { %v19263_v37 = vadd.f32 %v19262_v25, %v19261_v33  ;;  %v19301_v57 = vadd.f32 %v19300_v12, %v19299_v0 }
0x4a03   :  { %v18189_v61 = vadd.f32 %v19263_v37, %v18757_v19  ;;  %v19264_v4 = vpop.f32.mrb[212].mxu1  ;;  %v19302_v41 = vpop.f32.mrb[210].mxu0 }
0x4a04   :  { %v19265_v9 = vpop.f32.mrb[213].mxu1  ;;  %v19303_v22 = vpop.f32.mrb[211].mxu0 }
0x4a05   :  { %v18264_v1 = vadd.f32 %v19301_v57, %v18189_v61  ;;  %v19266_v56 = vadd.f32 %v19265_v9, %v19264_v4  ;;  %v19304_v60 = vadd.f32 %v19303_v22, %v19302_v41 }
0x4a07   :  { %v18272_v59 = vmax.f32 %v18264_v1, 0.0  ;;  %v18194_v35 = vadd.f32 %v19266_v56, %v18757_v19 }
0x4a09   :  { %18274 = vst.msk [vmem:[%s21249_s29] sm:$0xff] %vm1973_vm5, %v18272_v59  ;;  %v18269_v62 = vadd.f32 %v19304_v60, %v18194_v35 }
0x4a0b   :  { %v18273_v20 = vmax.f32 %v18269_v62, 0.0 }
0x4a0d   :  { %18276 = vst.msk [vmem:[%s21249_s29 + $0x8] sm:$0x3f] %vm18275_vm7, %v18273_v20 }
0x4a0e   :  { %21036 = dma.done.wait [#allocation3], 32  }
0x4a0f   :  { %21037 = vsyncadd [#allocation3], 4294967264 }
0x4a10   :  { %18307 = vsyncpa [#allocation3], 1 }

</bundles_post_ra>
